<compile_context>
chip_gen: v7x
topology: tpu7x:2x2x1
jax: 0.10.0
libtpu: 0.0.40
codegen_flags: <defaults>
</compile_context>

<pallas_src>
import jax
import jax.numpy as jnp
from jax import lax
from jax.experimental import pallas as pl
from jax.experimental.pallas import tpu as pltpu


_PAD = 18                      # max dilation; one shared spatial pad
_DILATIONS = (6, 12, 18)
_BN_EPS = 1e-5


# ----------------------------------------------------------------------------
# Fused ASPP kernel
# ----------------------------------------------------------------------------
def _aspp_fused_kernel(x_ref, w1_ref, w3_ref, wo_ref, sc_ref, bs_ref,
                       so_ref, ib_ref, o_ref):
    # x_ref : (Hp, Wp, Cin)      bf16   padded input image of this batch
    # w1_ref: (Cin, 256)         bf16   1x1-branch weights
    # w3_ref: (3, 9, Cin, 256)   bf16   3 dilated branches, 9 taps each
    # wo_ref: (4, 256, CP)       bf16   projection slabs of conv_1x1_3
    # sc_ref/bs_ref: (4, 256)    f32    folded BN scale / bias per branch
    # so_ref: (1, CP)            f32    folded output BN scale
    # ib_ref: (1, CP)            f32    per-batch bias (img branch + out bias)
    # o_ref : (TH, W, CP)        f32
    th, w, cp = o_ref.shape
    cin = x_ref.shape[-1]
    m = th * w
    row0 = pl.multiple_of(pl.program_id(1) * th, th) + _PAD

    def tap(dy, dx):
        # (TH, W, Cin) slab of the resident padded image, flattened so the
        # MXU sees one big M = TH*W matmul instead of TH row-sized slivers.
        slab = x_ref[pl.ds(row0 + dy, th), pl.ds(_PAD + dx, w), :]
        return slab.reshape(m, cin)

    # ---- branch 0: 1x1 conv + BN + ReLU, projected --------------------------
    b0 = jnp.dot(tap(0, 0), w1_ref[...], preferred_element_type=jnp.float32)
    b0 = jnp.maximum(b0 * sc_ref[0:1, :] + bs_ref[0:1, :], 0.0)
    acc = jnp.dot(b0.astype(jnp.bfloat16), wo_ref[0],
                  preferred_element_type=jnp.float32)              # (M, CP)

    # ---- branches 1..3: dilated 3x3 conv + BN + ReLU, projected -------------
    for bi, d in enumerate(_DILATIONS):
        bsum = None
        for ky in range(3):
            for kx in range(3):
                part = jnp.dot(tap(d * (ky - 1), d * (kx - 1)),
                               w3_ref[bi, 3 * ky + kx],
                               preferred_element_type=jnp.float32)
                bsum = part if bsum is None else bsum + part
        act = jnp.maximum(
            bsum * sc_ref[bi + 1:bi + 2, :] + bs_ref[bi + 1:bi + 2, :], 0.0)
        acc = acc + jnp.dot(act.astype(jnp.bfloat16), wo_ref[bi + 1],
                            preferred_element_type=jnp.float32)

    # ---- final affine (folded BN of conv_1x1_3) + img branch + ReLU ---------
    out = jnp.maximum(acc * so_ref[...] + ib_ref[...], 0.0)
    o_ref[...] = out.reshape(th, w, cp).astype(o_ref.dtype)


# ----------------------------------------------------------------------------
# Parameter construction (deterministic, synthetic)
# ----------------------------------------------------------------------------
def _fold_bn(gamma, beta, mean, var, conv_bias):
    scale = gamma / jnp.sqrt(var + _BN_EPS)
    bias = beta - mean * scale + conv_bias * scale
    return (scale.reshape(1, -1).astype(jnp.float32),
            bias.reshape(1, -1).astype(jnp.float32))


def init_aspp_params(key, inplanes, outplanes):
    keys = iter(jax.random.split(key, 64))

    def conv_w(shape):
        return 0.1 * jax.random.normal(next(keys), shape, jnp.float32)

    def conv_b(n):
        return 0.05 * jax.random.normal(next(keys), (n,), jnp.float32)

    def bn(n):
        gamma = 1.0 + 0.1 * jax.random.normal(next(keys), (n,), jnp.float32)
        beta = 0.1 * jax.random.normal(next(keys), (n,), jnp.float32)
        mean = 0.1 * jax.random.normal(next(keys), (n,), jnp.float32)
        var = 0.5 + jax.random.uniform(next(keys), (n,), jnp.float32)
        return gamma, beta, mean, var

    params = {}
    # 1x1 branch
    w = conv_w((inplanes, 256)); b = conv_b(256)
    params["conv_1x1_1"] = (w, *_fold_bn(*bn(256), b))
    # three dilated 3x3 branches (weights stored as (9, Cin, Cout) == HWIO flat)
    for name in ("conv_3x3_1", "conv_3x3_2", "conv_3x3_3"):
        w9 = conv_w((9, inplanes, 256)); b = conv_b(256)
        params[name] = (w9, *_fold_bn(*bn(256), b))
    # image-level (global pool) branch
    w = conv_w((inplanes, 256)); b = conv_b(256)
    params["conv_1x1_2"] = (w, *_fold_bn(*bn(256), b))
    # output projection
    w = conv_w((256 * 5, outplanes)); b = conv_b(outplanes)
    params["conv_1x1_3"] = (w, *_fold_bn(*bn(outplanes), b))
    return params


# ----------------------------------------------------------------------------
# ASPP forward
# ----------------------------------------------------------------------------
def aspp_forward(x_nchw, params, *, row_tile=8):
    x = jnp.transpose(x_nchw, (0, 2, 3, 1)).astype(jnp.float32)   # NHWC
    n, h, w, cin = x.shape
    outplanes = params["conv_1x1_3"][0].shape[1]
    cp = 128 * pl.cdiv(outplanes, 128)           # lane-dense padded out chans

    # ---- pack / fold weights ------------------------------------------------
    w1, s1, b1 = params["conv_1x1_1"]
    branches = [params[k] for k in ("conv_3x3_1", "conv_3x3_2", "conv_3x3_3")]
    w3 = jnp.stack([bw for (bw, _, _) in branches])               # (3,9,Cin,256)
    sc = jnp.concatenate([s1] + [s for (_, s, _) in branches], axis=0)  # (4,256)
    bs = jnp.concatenate([b1] + [b for (_, _, b) in branches], axis=0)  # (4,256)
    wi, si, bi = params["conv_1x1_2"]
    wo, so, bo = params["conv_1x1_3"]                             # (1280,out)
    wo_p = jnp.pad(wo, ((0, 0), (0, cp - outplanes))).reshape(5, 256, cp)
    so_p = jnp.pad(so, ((0, 0), (0, cp - outplanes)))             # (1, cp)
    bo_p = jnp.pad(bo, ((0, 0), (0, cp - outplanes)))             # (1, cp)

    # ---- image-level branch (tiny, plain JAX; bilinear of 1x1 == broadcast) -
    pooled = jnp.mean(x, axis=(1, 2))                             # (N, Cin)
    img = jnp.maximum(pooled @ wi * si + bi, 0.0)                 # (N, 256)
    # fold its projection + output-BN bias into a per-batch bias vector
    ib = ((img @ wo_p[4]) * so_p + bo_p).reshape(n, 1, cp)        # (N,1,cp)

    # ---- fused spatial kernel ----------------------------------------------
    xp = jnp.pad(x, ((0, 0), (_PAD, _PAD), (_PAD, _PAD), (0, 0)))
    xp = xp.astype(jnp.bfloat16)
    hp, wp = h + 2 * _PAD, w + 2 * _PAD

    th = min(row_tile, h)
    while h % th:
        th -= 1                                  # largest divisor of H <= tile

    out = pl.pallas_call(
        _aspp_fused_kernel,
        out_shape=jax.ShapeDtypeStruct((n, h, w, cp), jnp.float32),
        grid_spec=pltpu.PrefetchScalarGridSpec(
            num_scalar_prefetch=0,
            grid=(n, h // th),
            in_specs=[
                # padded image: resident once per batch (index const over rows)
                pl.BlockSpec((None, hp, wp, cin), lambda b, r: (b, 0, 0, 0)),
                pl.BlockSpec((cin, 256), lambda b, r: (0, 0)),
                pl.BlockSpec((3, 9, cin, 256), lambda b, r: (0, 0, 0, 0)),
                pl.BlockSpec((4, 256, cp), lambda b, r: (0, 0, 0)),
                pl.BlockSpec((4, 256), lambda b, r: (0, 0)),
                pl.BlockSpec((4, 256), lambda b, r: (0, 0)),
                pl.BlockSpec((1, cp), lambda b, r: (0, 0)),
                pl.BlockSpec((None, 1, cp), lambda b, r: (b, 0, 0)),
            ],
            out_specs=pl.BlockSpec((None, th, w, cp),
                                   lambda b, r: (b, r, 0, 0)),
        ),
        compiler_params=pltpu.CompilerParams(
            dimension_semantics=("parallel", "parallel"),
            vmem_limit_bytes=32 * 1024 * 1024),
    )(xp,
      w1.astype(jnp.bfloat16),
      w3.astype(jnp.bfloat16),
      wo_p[:4].astype(jnp.bfloat16),
      sc, bs, so_p, ib)

    out = out[..., :outplanes]
    return jnp.transpose(out, (0, 3, 1, 2))      # back to NCHW


# ----------------------------------------------------------------------------
# Pure-JAX reference (same folded params) for a sanity check
# ----------------------------------------------------------------------------
def aspp_reference(x_nchw, params):
    x = jnp.transpose(x_nchw, (0, 2, 3, 1)).astype(jnp.float32)
    n, h, w, cin = x.shape

    def affine_relu(y, s, b):
        return jnp.maximum(y * s.reshape(1, 1, 1, -1) + b.reshape(1, 1, 1, -1),
                           0.0)

    def conv1x1(xx, cw, s, b):
        y = lax.conv_general_dilated(
            xx, cw.reshape(1, 1, *cw.shape), (1, 1), "VALID",
            dimension_numbers=("NHWC", "HWIO", "NHWC"))
        return affine_relu(y, s, b)

    def conv3x3(xx, w9, s, b, d):
        cw = w9.reshape(3, 3, w9.shape[1], w9.shape[2])
        y = lax.conv_general_dilated(
            xx, cw, (1, 1), [(d, d), (d, d)], rhs_dilation=(d, d),
            dimension_numbers=("NHWC", "HWIO", "NHWC"))
        return affine_relu(y, s, b)

    o0 = conv1x1(x, *params["conv_1x1_1"])
    o1 = conv3x3(x, *params["conv_3x3_1"], 6)
    o2 = conv3x3(x, *params["conv_3x3_2"], 12)
    o3 = conv3x3(x, *params["conv_3x3_3"], 18)

    wi, si, bi = params["conv_1x1_2"]
    pooled = jnp.mean(x, axis=(1, 2))
    img = jnp.maximum(pooled @ wi * si + bi, 0.0)
    img = jnp.broadcast_to(img[:, None, None, :], (n, h, w, 256))

    cat = jnp.concatenate([o0, o1, o2, o3, img], axis=-1)
    wo, so, bo = params["conv_1x1_3"]
    y = cat.reshape(n * h * w, -1) @ wo
    y = jnp.maximum(y * so + bo, 0.0).reshape(n, h, w, -1)
    return jnp.transpose(y, (0, 3, 1, 2))


# ----------------------------------------------------------------------------
if __name__ == "__main__":
    key = jax.random.PRNGKey(0)
    k_x, k_p = jax.random.split(key)

    N, inplanes, H, W = 2, 4, 16, 16
    outplanes = 8

    x = jax.random.normal(k_x, (N, inplanes, H, W), jnp.float32)  # NCHW input
    params = init_aspp_params(k_p, inplanes, outplanes)

    fwd = jax.jit(aspp_forward)
    out = jax.block_until_ready(fwd(x, params))
    assert out.shape == (N, outplanes, H, W), out.shape

    ref = jax.block_until_ready(aspp_reference(x, params))
    assert jnp.allclose(out, ref, rtol=5e-2, atol=5e-2), (
        float(jnp.max(jnp.abs(out - ref))))

    print("KERNEL_OK")
</pallas_src>

<mosaic_0001>
module attributes {stable_mosaic.version = 11 : i64} {
  func.func @_aspp_fused_kernel(%arg0: i32, %arg1: i32, %arg2: memref<1x52x52x4xbf16, #tpu.memory_space<vmem>>, %arg3: memref<4x256xbf16, #tpu.memory_space<vmem>>, %arg4: memref<3x9x4x256xbf16, #tpu.memory_space<vmem>>, %arg5: memref<4x256x128xbf16, #tpu.memory_space<vmem>>, %arg6: memref<4x256xf32, #tpu.memory_space<vmem>>, %arg7: memref<4x256xf32, #tpu.memory_space<vmem>>, %arg8: memref<1x128xf32, #tpu.memory_space<vmem>>, %arg9: memref<1x1x128xf32, #tpu.memory_space<vmem>>, %arg10: memref<1x8x16x128xf32, #tpu.memory_space<vmem>>) attributes {dimension_semantics = [#tpu.dimension_semantics<parallel>, #tpu.dimension_semantics<parallel>], iteration_bounds = array<i64: 2, 2>, scalar_prefetch = 0 : i64, scratch_operands = 0 : i64, tpu.core_type = #tpu.core_type<tc>, window_params = [{transform_indices = @transform_0, window_bounds = array<i64: 1, 52, 52, 4>}, {pipeline_mode = #tpu.pipeline_mode<synchronous>, transform_indices = @transform_1, window_bounds = array<i64: 4, 256>}, {pipeline_mode = #tpu.pipeline_mode<synchronous>, transform_indices = @transform_2, window_bounds = array<i64: 3, 9, 4, 256>}, {pipeline_mode = #tpu.pipeline_mode<synchronous>, transform_indices = @transform_3, window_bounds = array<i64: 4, 256, 128>}, {pipeline_mode = #tpu.pipeline_mode<synchronous>, transform_indices = @transform_4, window_bounds = array<i64: 4, 256>}, {pipeline_mode = #tpu.pipeline_mode<synchronous>, transform_indices = @transform_5, window_bounds = array<i64: 4, 256>}, {pipeline_mode = #tpu.pipeline_mode<synchronous>, transform_indices = @transform_6, window_bounds = array<i64: 1, 128>}, {transform_indices = @transform_7, window_bounds = array<i64: 1, 1, 128>}, {transform_indices = @transform_8, window_bounds = array<i64: 1, 8, 16, 128>}]} {
    %c8_i32 = arith.constant 8 : i32
    %0 = arith.muli %arg1, %c8_i32 : i32
    %1 = tpu.assume_multiple %0, 8 : i32
    %c18_i32 = arith.constant 18 : i32
    %2 = arith.addi %1, %c18_i32 : i32
    %c0_i32 = arith.constant 0 : i32
    %3 = arith.addi %2, %c0_i32 : i32
    %c0 = arith.constant 0 : index
    %4 = arith.index_cast %3 : i32 to index
    %c18 = arith.constant 18 : index
    %c0_0 = arith.constant 0 : index
    %5 = vector.load %arg2[%c0, %4, %c18, %c0_0] : memref<1x52x52x4xbf16, #tpu.memory_space<vmem>>, vector<1x8x16x4xbf16>
    %6 = vector.shape_cast %5 : vector<1x8x16x4xbf16> to vector<8x16x4xbf16>
    %7 = vector.shape_cast %6 : vector<8x16x4xbf16> to vector<128x4xbf16>
    %c0_1 = arith.constant 0 : index
    %c0_2 = arith.constant 0 : index
    %8 = vector.load %arg3[%c0_1, %c0_2] : memref<4x256xbf16, #tpu.memory_space<vmem>>, vector<4x256xbf16>
    %cst = arith.constant dense<0.000000e+00> : vector<128x256xf32>
    %9 = tpu.matmul %7, %8, %cst {dimension_numbers = #tpu.dot_dimension_numbers<[1], [0], [0], [1], [0, 0, 1, 1], [], []>} : vector<128x4xbf16>, vector<4x256xbf16>, vector<128x256xf32> -> vector<128x256xf32>
    %c0_3 = arith.constant 0 : index
    %c0_4 = arith.constant 0 : index
    %10 = vector.load %arg6[%c0_3, %c0_4] : memref<4x256xf32, #tpu.memory_space<vmem>>, vector<1x256xf32>
    %11 = vector.broadcast %10 : vector<1x256xf32> to vector<128x256xf32>
    %12 = arith.mulf %9, %11 : vector<128x256xf32>
    %c0_5 = arith.constant 0 : index
    %c0_6 = arith.constant 0 : index
    %13 = vector.load %arg7[%c0_5, %c0_6] : memref<4x256xf32, #tpu.memory_space<vmem>>, vector<1x256xf32>
    %14 = vector.broadcast %13 : vector<1x256xf32> to vector<128x256xf32>
    %15 = arith.addf %12, %14 : vector<128x256xf32>
    %cst_7 = arith.constant 0.000000e+00 : f32
    %16 = vector.broadcast %cst_7 : f32 to vector<128x256xf32>
    %17 = arith.maximumf %15, %16 : vector<128x256xf32>
    %18 = arith.truncf %17 : vector<128x256xf32> to vector<128x256xbf16>
    %c0_8 = arith.constant 0 : index
    %c0_9 = arith.constant 0 : index
    %c0_10 = arith.constant 0 : index
    %19 = vector.load %arg5[%c0_8, %c0_9, %c0_10] : memref<4x256x128xbf16, #tpu.memory_space<vmem>>, vector<1x256x128xbf16>
    %20 = vector.shape_cast %19 : vector<1x256x128xbf16> to vector<256x128xbf16>
    %cst_11 = arith.constant dense<0.000000e+00> : vector<128x128xf32>
    %21 = tpu.matmul %18, %20, %cst_11 {dimension_numbers = #tpu.dot_dimension_numbers<[1], [0], [0], [1], [0, 0, 1, 1], [], []>} : vector<128x256xbf16>, vector<256x128xbf16>, vector<128x128xf32> -> vector<128x128xf32>
    %c-6_i32 = arith.constant -6 : i32
    %22 = arith.addi %2, %c-6_i32 : i32
    %c0_12 = arith.constant 0 : index
    %23 = arith.index_cast %22 : i32 to index
    %c12 = arith.constant 12 : index
    %c0_13 = arith.constant 0 : index
    %24 = vector.load %arg2[%c0_12, %23, %c12, %c0_13] : memref<1x52x52x4xbf16, #tpu.memory_space<vmem>>, vector<1x8x16x4xbf16>
    %25 = vector.shape_cast %24 : vector<1x8x16x4xbf16> to vector<8x16x4xbf16>
    %26 = vector.shape_cast %25 : vector<8x16x4xbf16> to vector<128x4xbf16>
    %c0_14 = arith.constant 0 : index
    %c0_15 = arith.constant 0 : index
    %c0_16 = arith.constant 0 : index
    %c0_17 = arith.constant 0 : index
    %27 = vector.load %arg4[%c0_14, %c0_15, %c0_16, %c0_17] : memref<3x9x4x256xbf16, #tpu.memory_space<vmem>>, vector<1x1x4x256xbf16>
    %28 = vector.shape_cast %27 : vector<1x1x4x256xbf16> to vector<4x256xbf16>
    %cst_18 = arith.constant dense<0.000000e+00> : vector<128x256xf32>
    %29 = tpu.matmul %26, %28, %cst_18 {dimension_numbers = #tpu.dot_dimension_numbers<[1], [0], [0], [1], [0, 0, 1, 1], [], []>} : vector<128x4xbf16>, vector<4x256xbf16>, vector<128x256xf32> -> vector<128x256xf32>
    %c-6_i32_19 = arith.constant -6 : i32
    %30 = arith.addi %2, %c-6_i32_19 : i32
    %c0_20 = arith.constant 0 : index
    %31 = arith.index_cast %30 : i32 to index
    %c18_21 = arith.constant 18 : index
    %c0_22 = arith.constant 0 : index
    %32 = vector.load %arg2[%c0_20, %31, %c18_21, %c0_22] : memref<1x52x52x4xbf16, #tpu.memory_space<vmem>>, vector<1x8x16x4xbf16>
    %33 = vector.shape_cast %32 : vector<1x8x16x4xbf16> to vector<8x16x4xbf16>
    %34 = vector.shape_cast %33 : vector<8x16x4xbf16> to vector<128x4xbf16>
    %c0_23 = arith.constant 0 : index
    %c1 = arith.constant 1 : index
    %c0_24 = arith.constant 0 : index
    %c0_25 = arith.constant 0 : index
    %35 = vector.load %arg4[%c0_23, %c1, %c0_24, %c0_25] : memref<3x9x4x256xbf16, #tpu.memory_space<vmem>>, vector<1x1x4x256xbf16>
    %36 = vector.shape_cast %35 : vector<1x1x4x256xbf16> to vector<4x256xbf16>
    %cst_26 = arith.constant dense<0.000000e+00> : vector<128x256xf32>
    %37 = tpu.matmul %34, %36, %cst_26 {dimension_numbers = #tpu.dot_dimension_numbers<[1], [0], [0], [1], [0, 0, 1, 1], [], []>} : vector<128x4xbf16>, vector<4x256xbf16>, vector<128x256xf32> -> vector<128x256xf32>
    %38 = arith.addf %29, %37 : vector<128x256xf32>
    %c-6_i32_27 = arith.constant -6 : i32
    %39 = arith.addi %2, %c-6_i32_27 : i32
    %c0_28 = arith.constant 0 : index
    %40 = arith.index_cast %39 : i32 to index
    %c24 = arith.constant 24 : index
    %c0_29 = arith.constant 0 : index
    %41 = vector.load %arg2[%c0_28, %40, %c24, %c0_29] : memref<1x52x52x4xbf16, #tpu.memory_space<vmem>>, vector<1x8x16x4xbf16>
    %42 = vector.shape_cast %41 : vector<1x8x16x4xbf16> to vector<8x16x4xbf16>
    %43 = vector.shape_cast %42 : vector<8x16x4xbf16> to vector<128x4xbf16>
    %c0_30 = arith.constant 0 : index
    %c2 = arith.constant 2 : index
    %c0_31 = arith.constant 0 : index
    %c0_32 = arith.constant 0 : index
    %44 = vector.load %arg4[%c0_30, %c2, %c0_31, %c0_32] : memref<3x9x4x256xbf16, #tpu.memory_space<vmem>>, vector<1x1x4x256xbf16>
    %45 = vector.shape_cast %44 : vector<1x1x4x256xbf16> to vector<4x256xbf16>
    %cst_33 = arith.constant dense<0.000000e+00> : vector<128x256xf32>
    %46 = tpu.matmul %43, %45, %cst_33 {dimension_numbers = #tpu.dot_dimension_numbers<[1], [0], [0], [1], [0, 0, 1, 1], [], []>} : vector<128x4xbf16>, vector<4x256xbf16>, vector<128x256xf32> -> vector<128x256xf32>
    %47 = arith.addf %38, %46 : vector<128x256xf32>
    %c0_i32_34 = arith.constant 0 : i32
    %48 = arith.addi %2, %c0_i32_34 : i32
    %c0_35 = arith.constant 0 : index
    %49 = arith.index_cast %48 : i32 to index
    %c12_36 = arith.constant 12 : index
    %c0_37 = arith.constant 0 : index
    %50 = vector.load %arg2[%c0_35, %49, %c12_36, %c0_37] : memref<1x52x52x4xbf16, #tpu.memory_space<vmem>>, vector<1x8x16x4xbf16>
    %51 = vector.shape_cast %50 : vector<1x8x16x4xbf16> to vector<8x16x4xbf16>
    %52 = vector.shape_cast %51 : vector<8x16x4xbf16> to vector<128x4xbf16>
    %c0_38 = arith.constant 0 : index
    %c3 = arith.constant 3 : index
    %c0_39 = arith.constant 0 : index
    %c0_40 = arith.constant 0 : index
    %53 = vector.load %arg4[%c0_38, %c3, %c0_39, %c0_40] : memref<3x9x4x256xbf16, #tpu.memory_space<vmem>>, vector<1x1x4x256xbf16>
    %54 = vector.shape_cast %53 : vector<1x1x4x256xbf16> to vector<4x256xbf16>
    %cst_41 = arith.constant dense<0.000000e+00> : vector<128x256xf32>
    %55 = tpu.matmul %52, %54, %cst_41 {dimension_numbers = #tpu.dot_dimension_numbers<[1], [0], [0], [1], [0, 0, 1, 1], [], []>} : vector<128x4xbf16>, vector<4x256xbf16>, vector<128x256xf32> -> vector<128x256xf32>
    %56 = arith.addf %47, %55 : vector<128x256xf32>
    %c0_i32_42 = arith.constant 0 : i32
    %57 = arith.addi %2, %c0_i32_42 : i32
    %c0_43 = arith.constant 0 : index
    %58 = arith.index_cast %57 : i32 to index
    %c18_44 = arith.constant 18 : index
    %c0_45 = arith.constant 0 : index
    %59 = vector.load %arg2[%c0_43, %58, %c18_44, %c0_45] : memref<1x52x52x4xbf16, #tpu.memory_space<vmem>>, vector<1x8x16x4xbf16>
    %60 = vector.shape_cast %59 : vector<1x8x16x4xbf16> to vector<8x16x4xbf16>
    %61 = vector.shape_cast %60 : vector<8x16x4xbf16> to vector<128x4xbf16>
    %c0_46 = arith.constant 0 : index
    %c4 = arith.constant 4 : index
    %c0_47 = arith.constant 0 : index
    %c0_48 = arith.constant 0 : index
    %62 = vector.load %arg4[%c0_46, %c4, %c0_47, %c0_48] : memref<3x9x4x256xbf16, #tpu.memory_space<vmem>>, vector<1x1x4x256xbf16>
    %63 = vector.shape_cast %62 : vector<1x1x4x256xbf16> to vector<4x256xbf16>
    %cst_49 = arith.constant dense<0.000000e+00> : vector<128x256xf32>
    %64 = tpu.matmul %61, %63, %cst_49 {dimension_numbers = #tpu.dot_dimension_numbers<[1], [0], [0], [1], [0, 0, 1, 1], [], []>} : vector<128x4xbf16>, vector<4x256xbf16>, vector<128x256xf32> -> vector<128x256xf32>
    %65 = arith.addf %56, %64 : vector<128x256xf32>
    %c0_i32_50 = arith.constant 0 : i32
    %66 = arith.addi %2, %c0_i32_50 : i32
    %c0_51 = arith.constant 0 : index
    %67 = arith.index_cast %66 : i32 to index
    %c24_52 = arith.constant 24 : index
    %c0_53 = arith.constant 0 : index
    %68 = vector.load %arg2[%c0_51, %67, %c24_52, %c0_53] : memref<1x52x52x4xbf16, #tpu.memory_space<vmem>>, vector<1x8x16x4xbf16>
    %69 = vector.shape_cast %68 : vector<1x8x16x4xbf16> to vector<8x16x4xbf16>
    %70 = vector.shape_cast %69 : vector<8x16x4xbf16> to vector<128x4xbf16>
    %c0_54 = arith.constant 0 : index
    %c5 = arith.constant 5 : index
    %c0_55 = arith.constant 0 : index
    %c0_56 = arith.constant 0 : index
    %71 = vector.load %arg4[%c0_54, %c5, %c0_55, %c0_56] : memref<3x9x4x256xbf16, #tpu.memory_space<vmem>>, vector<1x1x4x256xbf16>
    %72 = vector.shape_cast %71 : vector<1x1x4x256xbf16> to vector<4x256xbf16>
    %cst_57 = arith.constant dense<0.000000e+00> : vector<128x256xf32>
    %73 = tpu.matmul %70, %72, %cst_57 {dimension_numbers = #tpu.dot_dimension_numbers<[1], [0], [0], [1], [0, 0, 1, 1], [], []>} : vector<128x4xbf16>, vector<4x256xbf16>, vector<128x256xf32> -> vector<128x256xf32>
    %74 = arith.addf %65, %73 : vector<128x256xf32>
    %c6_i32 = arith.constant 6 : i32
    %75 = arith.addi %2, %c6_i32 : i32
    %c0_58 = arith.constant 0 : index
    %76 = arith.index_cast %75 : i32 to index
    %c12_59 = arith.constant 12 : index
    %c0_60 = arith.constant 0 : index
    %77 = vector.load %arg2[%c0_58, %76, %c12_59, %c0_60] : memref<1x52x52x4xbf16, #tpu.memory_space<vmem>>, vector<1x8x16x4xbf16>
    %78 = vector.shape_cast %77 : vector<1x8x16x4xbf16> to vector<8x16x4xbf16>
    %79 = vector.shape_cast %78 : vector<8x16x4xbf16> to vector<128x4xbf16>
    %c0_61 = arith.constant 0 : index
    %c6 = arith.constant 6 : index
    %c0_62 = arith.constant 0 : index
    %c0_63 = arith.constant 0 : index
    %80 = vector.load %arg4[%c0_61, %c6, %c0_62, %c0_63] : memref<3x9x4x256xbf16, #tpu.memory_space<vmem>>, vector<1x1x4x256xbf16>
    %81 = vector.shape_cast %80 : vector<1x1x4x256xbf16> to vector<4x256xbf16>
    %cst_64 = arith.constant dense<0.000000e+00> : vector<128x256xf32>
    %82 = tpu.matmul %79, %81, %cst_64 {dimension_numbers = #tpu.dot_dimension_numbers<[1], [0], [0], [1], [0, 0, 1, 1], [], []>} : vector<128x4xbf16>, vector<4x256xbf16>, vector<128x256xf32> -> vector<128x256xf32>
    %83 = arith.addf %74, %82 : vector<128x256xf32>
    %c6_i32_65 = arith.constant 6 : i32
    %84 = arith.addi %2, %c6_i32_65 : i32
    %c0_66 = arith.constant 0 : index
    %85 = arith.index_cast %84 : i32 to index
    %c18_67 = arith.constant 18 : index
    %c0_68 = arith.constant 0 : index
    %86 = vector.load %arg2[%c0_66, %85, %c18_67, %c0_68] : memref<1x52x52x4xbf16, #tpu.memory_space<vmem>>, vector<1x8x16x4xbf16>
    %87 = vector.shape_cast %86 : vector<1x8x16x4xbf16> to vector<8x16x4xbf16>
    %88 = vector.shape_cast %87 : vector<8x16x4xbf16> to vector<128x4xbf16>
    %c0_69 = arith.constant 0 : index
    %c7 = arith.constant 7 : index
    %c0_70 = arith.constant 0 : index
    %c0_71 = arith.constant 0 : index
    %89 = vector.load %arg4[%c0_69, %c7, %c0_70, %c0_71] : memref<3x9x4x256xbf16, #tpu.memory_space<vmem>>, vector<1x1x4x256xbf16>
    %90 = vector.shape_cast %89 : vector<1x1x4x256xbf16> to vector<4x256xbf16>
    %cst_72 = arith.constant dense<0.000000e+00> : vector<128x256xf32>
    %91 = tpu.matmul %88, %90, %cst_72 {dimension_numbers = #tpu.dot_dimension_numbers<[1], [0], [0], [1], [0, 0, 1, 1], [], []>} : vector<128x4xbf16>, vector<4x256xbf16>, vector<128x256xf32> -> vector<128x256xf32>
    %92 = arith.addf %83, %91 : vector<128x256xf32>
    %c6_i32_73 = arith.constant 6 : i32
    %93 = arith.addi %2, %c6_i32_73 : i32
    %c0_74 = arith.constant 0 : index
    %94 = arith.index_cast %93 : i32 to index
    %c24_75 = arith.constant 24 : index
    %c0_76 = arith.constant 0 : index
    %95 = vector.load %arg2[%c0_74, %94, %c24_75, %c0_76] : memref<1x52x52x4xbf16, #tpu.memory_space<vmem>>, vector<1x8x16x4xbf16>
    %96 = vector.shape_cast %95 : vector<1x8x16x4xbf16> to vector<8x16x4xbf16>
    %97 = vector.shape_cast %96 : vector<8x16x4xbf16> to vector<128x4xbf16>
    %c0_77 = arith.constant 0 : index
    %c8 = arith.constant 8 : index
    %c0_78 = arith.constant 0 : index
    %c0_79 = arith.constant 0 : index
    %98 = vector.load %arg4[%c0_77, %c8, %c0_78, %c0_79] : memref<3x9x4x256xbf16, #tpu.memory_space<vmem>>, vector<1x1x4x256xbf16>
    %99 = vector.shape_cast %98 : vector<1x1x4x256xbf16> to vector<4x256xbf16>
    %cst_80 = arith.constant dense<0.000000e+00> : vector<128x256xf32>
    %100 = tpu.matmul %97, %99, %cst_80 {dimension_numbers = #tpu.dot_dimension_numbers<[1], [0], [0], [1], [0, 0, 1, 1], [], []>} : vector<128x4xbf16>, vector<4x256xbf16>, vector<128x256xf32> -> vector<128x256xf32>
    %101 = arith.addf %92, %100 : vector<128x256xf32>
    %c1_81 = arith.constant 1 : index
    %c0_82 = arith.constant 0 : index
    %102 = vector.load %arg6[%c1_81, %c0_82] : memref<4x256xf32, #tpu.memory_space<vmem>>, vector<1x256xf32>
    %103 = vector.broadcast %102 : vector<1x256xf32> to vector<128x256xf32>
    %104 = arith.mulf %101, %103 : vector<128x256xf32>
    %c1_83 = arith.constant 1 : index
    %c0_84 = arith.constant 0 : index
    %105 = vector.load %arg7[%c1_83, %c0_84] : memref<4x256xf32, #tpu.memory_space<vmem>>, vector<1x256xf32>
    %106 = vector.broadcast %105 : vector<1x256xf32> to vector<128x256xf32>
    %107 = arith.addf %104, %106 : vector<128x256xf32>
    %cst_85 = arith.constant 0.000000e+00 : f32
    %108 = vector.broadcast %cst_85 : f32 to vector<128x256xf32>
    %109 = arith.maximumf %107, %108 : vector<128x256xf32>
    %110 = arith.truncf %109 : vector<128x256xf32> to vector<128x256xbf16>
    %c1_86 = arith.constant 1 : index
    %c0_87 = arith.constant 0 : index
    %c0_88 = arith.constant 0 : index
    %111 = vector.load %arg5[%c1_86, %c0_87, %c0_88] : memref<4x256x128xbf16, #tpu.memory_space<vmem>>, vector<1x256x128xbf16>
    %112 = vector.shape_cast %111 : vector<1x256x128xbf16> to vector<256x128xbf16>
    %cst_89 = arith.constant dense<0.000000e+00> : vector<128x128xf32>
    %113 = tpu.matmul %110, %112, %cst_89 {dimension_numbers = #tpu.dot_dimension_numbers<[1], [0], [0], [1], [0, 0, 1, 1], [], []>} : vector<128x256xbf16>, vector<256x128xbf16>, vector<128x128xf32> -> vector<128x128xf32>
    %114 = arith.addf %21, %113 : vector<128x128xf32>
    %c-12_i32 = arith.constant -12 : i32
    %115 = arith.addi %2, %c-12_i32 : i32
    %c0_90 = arith.constant 0 : index
    %116 = arith.index_cast %115 : i32 to index
    %c6_91 = arith.constant 6 : index
    %c0_92 = arith.constant 0 : index
    %117 = vector.load %arg2[%c0_90, %116, %c6_91, %c0_92] : memref<1x52x52x4xbf16, #tpu.memory_space<vmem>>, vector<1x8x16x4xbf16>
    %118 = vector.shape_cast %117 : vector<1x8x16x4xbf16> to vector<8x16x4xbf16>
    %119 = vector.shape_cast %118 : vector<8x16x4xbf16> to vector<128x4xbf16>
    %c1_93 = arith.constant 1 : index
    %c0_94 = arith.constant 0 : index
    %c0_95 = arith.constant 0 : index
    %c0_96 = arith.constant 0 : index
    %120 = vector.load %arg4[%c1_93, %c0_94, %c0_95, %c0_96] : memref<3x9x4x256xbf16, #tpu.memory_space<vmem>>, vector<1x1x4x256xbf16>
    %121 = vector.shape_cast %120 : vector<1x1x4x256xbf16> to vector<4x256xbf16>
    %cst_97 = arith.constant dense<0.000000e+00> : vector<128x256xf32>
    %122 = tpu.matmul %119, %121, %cst_97 {dimension_numbers = #tpu.dot_dimension_numbers<[1], [0], [0], [1], [0, 0, 1, 1], [], []>} : vector<128x4xbf16>, vector<4x256xbf16>, vector<128x256xf32> -> vector<128x256xf32>
    %c-12_i32_98 = arith.constant -12 : i32
    %123 = arith.addi %2, %c-12_i32_98 : i32
    %c0_99 = arith.constant 0 : index
    %124 = arith.index_cast %123 : i32 to index
    %c18_100 = arith.constant 18 : index
    %c0_101 = arith.constant 0 : index
    %125 = vector.load %arg2[%c0_99, %124, %c18_100, %c0_101] : memref<1x52x52x4xbf16, #tpu.memory_space<vmem>>, vector<1x8x16x4xbf16>
    %126 = vector.shape_cast %125 : vector<1x8x16x4xbf16> to vector<8x16x4xbf16>
    %127 = vector.shape_cast %126 : vector<8x16x4xbf16> to vector<128x4xbf16>
    %c1_102 = arith.constant 1 : index
    %c1_103 = arith.constant 1 : index
    %c0_104 = arith.constant 0 : index
    %c0_105 = arith.constant 0 : index
    %128 = vector.load %arg4[%c1_102, %c1_103, %c0_104, %c0_105] : memref<3x9x4x256xbf16, #tpu.memory_space<vmem>>, vector<1x1x4x256xbf16>
    %129 = vector.shape_cast %128 : vector<1x1x4x256xbf16> to vector<4x256xbf16>
    %cst_106 = arith.constant dense<0.000000e+00> : vector<128x256xf32>
    %130 = tpu.matmul %127, %129, %cst_106 {dimension_numbers = #tpu.dot_dimension_numbers<[1], [0], [0], [1], [0, 0, 1, 1], [], []>} : vector<128x4xbf16>, vector<4x256xbf16>, vector<128x256xf32> -> vector<128x256xf32>
    %131 = arith.addf %122, %130 : vector<128x256xf32>
    %c-12_i32_107 = arith.constant -12 : i32
    %132 = arith.addi %2, %c-12_i32_107 : i32
    %c0_108 = arith.constant 0 : index
    %133 = arith.index_cast %132 : i32 to index
    %c30 = arith.constant 30 : index
    %c0_109 = arith.constant 0 : index
    %134 = vector.load %arg2[%c0_108, %133, %c30, %c0_109] : memref<1x52x52x4xbf16, #tpu.memory_space<vmem>>, vector<1x8x16x4xbf16>
    %135 = vector.shape_cast %134 : vector<1x8x16x4xbf16> to vector<8x16x4xbf16>
    %136 = vector.shape_cast %135 : vector<8x16x4xbf16> to vector<128x4xbf16>
    %c1_110 = arith.constant 1 : index
    %c2_111 = arith.constant 2 : index
    %c0_112 = arith.constant 0 : index
    %c0_113 = arith.constant 0 : index
    %137 = vector.load %arg4[%c1_110, %c2_111, %c0_112, %c0_113] : memref<3x9x4x256xbf16, #tpu.memory_space<vmem>>, vector<1x1x4x256xbf16>
    %138 = vector.shape_cast %137 : vector<1x1x4x256xbf16> to vector<4x256xbf16>
    %cst_114 = arith.constant dense<0.000000e+00> : vector<128x256xf32>
    %139 = tpu.matmul %136, %138, %cst_114 {dimension_numbers = #tpu.dot_dimension_numbers<[1], [0], [0], [1], [0, 0, 1, 1], [], []>} : vector<128x4xbf16>, vector<4x256xbf16>, vector<128x256xf32> -> vector<128x256xf32>
    %140 = arith.addf %131, %139 : vector<128x256xf32>
    %c0_i32_115 = arith.constant 0 : i32
    %141 = arith.addi %2, %c0_i32_115 : i32
    %c0_116 = arith.constant 0 : index
    %142 = arith.index_cast %141 : i32 to index
    %c6_117 = arith.constant 6 : index
    %c0_118 = arith.constant 0 : index
    %143 = vector.load %arg2[%c0_116, %142, %c6_117, %c0_118] : memref<1x52x52x4xbf16, #tpu.memory_space<vmem>>, vector<1x8x16x4xbf16>
    %144 = vector.shape_cast %143 : vector<1x8x16x4xbf16> to vector<8x16x4xbf16>
    %145 = vector.shape_cast %144 : vector<8x16x4xbf16> to vector<128x4xbf16>
    %c1_119 = arith.constant 1 : index
    %c3_120 = arith.constant 3 : index
    %c0_121 = arith.constant 0 : index
    %c0_122 = arith.constant 0 : index
    %146 = vector.load %arg4[%c1_119, %c3_120, %c0_121, %c0_122] : memref<3x9x4x256xbf16, #tpu.memory_space<vmem>>, vector<1x1x4x256xbf16>
    %147 = vector.shape_cast %146 : vector<1x1x4x256xbf16> to vector<4x256xbf16>
    %cst_123 = arith.constant dense<0.000000e+00> : vector<128x256xf32>
    %148 = tpu.matmul %145, %147, %cst_123 {dimension_numbers = #tpu.dot_dimension_numbers<[1], [0], [0], [1], [0, 0, 1, 1], [], []>} : vector<128x4xbf16>, vector<4x256xbf16>, vector<128x256xf32> -> vector<128x256xf32>
    %149 = arith.addf %140, %148 : vector<128x256xf32>
    %c0_i32_124 = arith.constant 0 : i32
    %150 = arith.addi %2, %c0_i32_124 : i32
    %c0_125 = arith.constant 0 : index
    %151 = arith.index_cast %150 : i32 to index
    %c18_126 = arith.constant 18 : index
    %c0_127 = arith.constant 0 : index
    %152 = vector.load %arg2[%c0_125, %151, %c18_126, %c0_127] : memref<1x52x52x4xbf16, #tpu.memory_space<vmem>>, vector<1x8x16x4xbf16>
    %153 = vector.shape_cast %152 : vector<1x8x16x4xbf16> to vector<8x16x4xbf16>
    %154 = vector.shape_cast %153 : vector<8x16x4xbf16> to vector<128x4xbf16>
    %c1_128 = arith.constant 1 : index
    %c4_129 = arith.constant 4 : index
    %c0_130 = arith.constant 0 : index
    %c0_131 = arith.constant 0 : index
    %155 = vector.load %arg4[%c1_128, %c4_129, %c0_130, %c0_131] : memref<3x9x4x256xbf16, #tpu.memory_space<vmem>>, vector<1x1x4x256xbf16>
    %156 = vector.shape_cast %155 : vector<1x1x4x256xbf16> to vector<4x256xbf16>
    %cst_132 = arith.constant dense<0.000000e+00> : vector<128x256xf32>
    %157 = tpu.matmul %154, %156, %cst_132 {dimension_numbers = #tpu.dot_dimension_numbers<[1], [0], [0], [1], [0, 0, 1, 1], [], []>} : vector<128x4xbf16>, vector<4x256xbf16>, vector<128x256xf32> -> vector<128x256xf32>
    %158 = arith.addf %149, %157 : vector<128x256xf32>
    %c0_i32_133 = arith.constant 0 : i32
    %159 = arith.addi %2, %c0_i32_133 : i32
    %c0_134 = arith.constant 0 : index
    %160 = arith.index_cast %159 : i32 to index
    %c30_135 = arith.constant 30 : index
    %c0_136 = arith.constant 0 : index
    %161 = vector.load %arg2[%c0_134, %160, %c30_135, %c0_136] : memref<1x52x52x4xbf16, #tpu.memory_space<vmem>>, vector<1x8x16x4xbf16>
    %162 = vector.shape_cast %161 : vector<1x8x16x4xbf16> to vector<8x16x4xbf16>
    %163 = vector.shape_cast %162 : vector<8x16x4xbf16> to vector<128x4xbf16>
    %c1_137 = arith.constant 1 : index
    %c5_138 = arith.constant 5 : index
    %c0_139 = arith.constant 0 : index
    %c0_140 = arith.constant 0 : index
    %164 = vector.load %arg4[%c1_137, %c5_138, %c0_139, %c0_140] : memref<3x9x4x256xbf16, #tpu.memory_space<vmem>>, vector<1x1x4x256xbf16>
    %165 = vector.shape_cast %164 : vector<1x1x4x256xbf16> to vector<4x256xbf16>
    %cst_141 = arith.constant dense<0.000000e+00> : vector<128x256xf32>
    %166 = tpu.matmul %163, %165, %cst_141 {dimension_numbers = #tpu.dot_dimension_numbers<[1], [0], [0], [1], [0, 0, 1, 1], [], []>} : vector<128x4xbf16>, vector<4x256xbf16>, vector<128x256xf32> -> vector<128x256xf32>
    %167 = arith.addf %158, %166 : vector<128x256xf32>
    %c12_i32 = arith.constant 12 : i32
    %168 = arith.addi %2, %c12_i32 : i32
    %c0_142 = arith.constant 0 : index
    %169 = arith.index_cast %168 : i32 to index
    %c6_143 = arith.constant 6 : index
    %c0_144 = arith.constant 0 : index
    %170 = vector.load %arg2[%c0_142, %169, %c6_143, %c0_144] : memref<1x52x52x4xbf16, #tpu.memory_space<vmem>>, vector<1x8x16x4xbf16>
    %171 = vector.shape_cast %170 : vector<1x8x16x4xbf16> to vector<8x16x4xbf16>
    %172 = vector.shape_cast %171 : vector<8x16x4xbf16> to vector<128x4xbf16>
    %c1_145 = arith.constant 1 : index
    %c6_146 = arith.constant 6 : index
    %c0_147 = arith.constant 0 : index
    %c0_148 = arith.constant 0 : index
    %173 = vector.load %arg4[%c1_145, %c6_146, %c0_147, %c0_148] : memref<3x9x4x256xbf16, #tpu.memory_space<vmem>>, vector<1x1x4x256xbf16>
    %174 = vector.shape_cast %173 : vector<1x1x4x256xbf16> to vector<4x256xbf16>
    %cst_149 = arith.constant dense<0.000000e+00> : vector<128x256xf32>
    %175 = tpu.matmul %172, %174, %cst_149 {dimension_numbers = #tpu.dot_dimension_numbers<[1], [0], [0], [1], [0, 0, 1, 1], [], []>} : vector<128x4xbf16>, vector<4x256xbf16>, vector<128x256xf32> -> vector<128x256xf32>
    %176 = arith.addf %167, %175 : vector<128x256xf32>
    %c12_i32_150 = arith.constant 12 : i32
    %177 = arith.addi %2, %c12_i32_150 : i32
    %c0_151 = arith.constant 0 : index
    %178 = arith.index_cast %177 : i32 to index
    %c18_152 = arith.constant 18 : index
    %c0_153 = arith.constant 0 : index
    %179 = vector.load %arg2[%c0_151, %178, %c18_152, %c0_153] : memref<1x52x52x4xbf16, #tpu.memory_space<vmem>>, vector<1x8x16x4xbf16>
    %180 = vector.shape_cast %179 : vector<1x8x16x4xbf16> to vector<8x16x4xbf16>
    %181 = vector.shape_cast %180 : vector<8x16x4xbf16> to vector<128x4xbf16>
    %c1_154 = arith.constant 1 : index
    %c7_155 = arith.constant 7 : index
    %c0_156 = arith.constant 0 : index
    %c0_157 = arith.constant 0 : index
    %182 = vector.load %arg4[%c1_154, %c7_155, %c0_156, %c0_157] : memref<3x9x4x256xbf16, #tpu.memory_space<vmem>>, vector<1x1x4x256xbf16>
    %183 = vector.shape_cast %182 : vector<1x1x4x256xbf16> to vector<4x256xbf16>
    %cst_158 = arith.constant dense<0.000000e+00> : vector<128x256xf32>
    %184 = tpu.matmul %181, %183, %cst_158 {dimension_numbers = #tpu.dot_dimension_numbers<[1], [0], [0], [1], [0, 0, 1, 1], [], []>} : vector<128x4xbf16>, vector<4x256xbf16>, vector<128x256xf32> -> vector<128x256xf32>
    %185 = arith.addf %176, %184 : vector<128x256xf32>
    %c12_i32_159 = arith.constant 12 : i32
    %186 = arith.addi %2, %c12_i32_159 : i32
    %c0_160 = arith.constant 0 : index
    %187 = arith.index_cast %186 : i32 to index
    %c30_161 = arith.constant 30 : index
    %c0_162 = arith.constant 0 : index
    %188 = vector.load %arg2[%c0_160, %187, %c30_161, %c0_162] : memref<1x52x52x4xbf16, #tpu.memory_space<vmem>>, vector<1x8x16x4xbf16>
    %189 = vector.shape_cast %188 : vector<1x8x16x4xbf16> to vector<8x16x4xbf16>
    %190 = vector.shape_cast %189 : vector<8x16x4xbf16> to vector<128x4xbf16>
    %c1_163 = arith.constant 1 : index
    %c8_164 = arith.constant 8 : index
    %c0_165 = arith.constant 0 : index
    %c0_166 = arith.constant 0 : index
    %191 = vector.load %arg4[%c1_163, %c8_164, %c0_165, %c0_166] : memref<3x9x4x256xbf16, #tpu.memory_space<vmem>>, vector<1x1x4x256xbf16>
    %192 = vector.shape_cast %191 : vector<1x1x4x256xbf16> to vector<4x256xbf16>
    %cst_167 = arith.constant dense<0.000000e+00> : vector<128x256xf32>
    %193 = tpu.matmul %190, %192, %cst_167 {dimension_numbers = #tpu.dot_dimension_numbers<[1], [0], [0], [1], [0, 0, 1, 1], [], []>} : vector<128x4xbf16>, vector<4x256xbf16>, vector<128x256xf32> -> vector<128x256xf32>
    %194 = arith.addf %185, %193 : vector<128x256xf32>
    %c2_168 = arith.constant 2 : index
    %c0_169 = arith.constant 0 : index
    %195 = vector.load %arg6[%c2_168, %c0_169] : memref<4x256xf32, #tpu.memory_space<vmem>>, vector<1x256xf32>
    %196 = vector.broadcast %195 : vector<1x256xf32> to vector<128x256xf32>
    %197 = arith.mulf %194, %196 : vector<128x256xf32>
    %c2_170 = arith.constant 2 : index
    %c0_171 = arith.constant 0 : index
    %198 = vector.load %arg7[%c2_170, %c0_171] : memref<4x256xf32, #tpu.memory_space<vmem>>, vector<1x256xf32>
    %199 = vector.broadcast %198 : vector<1x256xf32> to vector<128x256xf32>
    %200 = arith.addf %197, %199 : vector<128x256xf32>
    %cst_172 = arith.constant 0.000000e+00 : f32
    %201 = vector.broadcast %cst_172 : f32 to vector<128x256xf32>
    %202 = arith.maximumf %200, %201 : vector<128x256xf32>
    %203 = arith.truncf %202 : vector<128x256xf32> to vector<128x256xbf16>
    %c2_173 = arith.constant 2 : index
    %c0_174 = arith.constant 0 : index
    %c0_175 = arith.constant 0 : index
    %204 = vector.load %arg5[%c2_173, %c0_174, %c0_175] : memref<4x256x128xbf16, #tpu.memory_space<vmem>>, vector<1x256x128xbf16>
    %205 = vector.shape_cast %204 : vector<1x256x128xbf16> to vector<256x128xbf16>
    %cst_176 = arith.constant dense<0.000000e+00> : vector<128x128xf32>
    %206 = tpu.matmul %203, %205, %cst_176 {dimension_numbers = #tpu.dot_dimension_numbers<[1], [0], [0], [1], [0, 0, 1, 1], [], []>} : vector<128x256xbf16>, vector<256x128xbf16>, vector<128x128xf32> -> vector<128x128xf32>
    %207 = arith.addf %114, %206 : vector<128x128xf32>
    %c-18_i32 = arith.constant -18 : i32
    %208 = arith.addi %2, %c-18_i32 : i32
    %c0_177 = arith.constant 0 : index
    %209 = arith.index_cast %208 : i32 to index
    %c0_178 = arith.constant 0 : index
    %c0_179 = arith.constant 0 : index
    %210 = vector.load %arg2[%c0_177, %209, %c0_178, %c0_179] : memref<1x52x52x4xbf16, #tpu.memory_space<vmem>>, vector<1x8x16x4xbf16>
    %211 = vector.shape_cast %210 : vector<1x8x16x4xbf16> to vector<8x16x4xbf16>
    %212 = vector.shape_cast %211 : vector<8x16x4xbf16> to vector<128x4xbf16>
    %c2_180 = arith.constant 2 : index
    %c0_181 = arith.constant 0 : index
    %c0_182 = arith.constant 0 : index
    %c0_183 = arith.constant 0 : index
    %213 = vector.load %arg4[%c2_180, %c0_181, %c0_182, %c0_183] : memref<3x9x4x256xbf16, #tpu.memory_space<vmem>>, vector<1x1x4x256xbf16>
    %214 = vector.shape_cast %213 : vector<1x1x4x256xbf16> to vector<4x256xbf16>
    %cst_184 = arith.constant dense<0.000000e+00> : vector<128x256xf32>
    %215 = tpu.matmul %212, %214, %cst_184 {dimension_numbers = #tpu.dot_dimension_numbers<[1], [0], [0], [1], [0, 0, 1, 1], [], []>} : vector<128x4xbf16>, vector<4x256xbf16>, vector<128x256xf32> -> vector<128x256xf32>
    %c-18_i32_185 = arith.constant -18 : i32
    %216 = arith.addi %2, %c-18_i32_185 : i32
    %c0_186 = arith.constant 0 : index
    %217 = arith.index_cast %216 : i32 to index
    %c18_187 = arith.constant 18 : index
    %c0_188 = arith.constant 0 : index
    %218 = vector.load %arg2[%c0_186, %217, %c18_187, %c0_188] : memref<1x52x52x4xbf16, #tpu.memory_space<vmem>>, vector<1x8x16x4xbf16>
    %219 = vector.shape_cast %218 : vector<1x8x16x4xbf16> to vector<8x16x4xbf16>
    %220 = vector.shape_cast %219 : vector<8x16x4xbf16> to vector<128x4xbf16>
    %c2_189 = arith.constant 2 : index
    %c1_190 = arith.constant 1 : index
    %c0_191 = arith.constant 0 : index
    %c0_192 = arith.constant 0 : index
    %221 = vector.load %arg4[%c2_189, %c1_190, %c0_191, %c0_192] : memref<3x9x4x256xbf16, #tpu.memory_space<vmem>>, vector<1x1x4x256xbf16>
    %222 = vector.shape_cast %221 : vector<1x1x4x256xbf16> to vector<4x256xbf16>
    %cst_193 = arith.constant dense<0.000000e+00> : vector<128x256xf32>
    %223 = tpu.matmul %220, %222, %cst_193 {dimension_numbers = #tpu.dot_dimension_numbers<[1], [0], [0], [1], [0, 0, 1, 1], [], []>} : vector<128x4xbf16>, vector<4x256xbf16>, vector<128x256xf32> -> vector<128x256xf32>
    %224 = arith.addf %215, %223 : vector<128x256xf32>
    %c-18_i32_194 = arith.constant -18 : i32
    %225 = arith.addi %2, %c-18_i32_194 : i32
    %c0_195 = arith.constant 0 : index
    %226 = arith.index_cast %225 : i32 to index
    %c36 = arith.constant 36 : index
    %c0_196 = arith.constant 0 : index
    %227 = vector.load %arg2[%c0_195, %226, %c36, %c0_196] : memref<1x52x52x4xbf16, #tpu.memory_space<vmem>>, vector<1x8x16x4xbf16>
    %228 = vector.shape_cast %227 : vector<1x8x16x4xbf16> to vector<8x16x4xbf16>
    %229 = vector.shape_cast %228 : vector<8x16x4xbf16> to vector<128x4xbf16>
    %c2_197 = arith.constant 2 : index
    %c2_198 = arith.constant 2 : index
    %c0_199 = arith.constant 0 : index
    %c0_200 = arith.constant 0 : index
    %230 = vector.load %arg4[%c2_197, %c2_198, %c0_199, %c0_200] : memref<3x9x4x256xbf16, #tpu.memory_space<vmem>>, vector<1x1x4x256xbf16>
    %231 = vector.shape_cast %230 : vector<1x1x4x256xbf16> to vector<4x256xbf16>
    %cst_201 = arith.constant dense<0.000000e+00> : vector<128x256xf32>
    %232 = tpu.matmul %229, %231, %cst_201 {dimension_numbers = #tpu.dot_dimension_numbers<[1], [0], [0], [1], [0, 0, 1, 1], [], []>} : vector<128x4xbf16>, vector<4x256xbf16>, vector<128x256xf32> -> vector<128x256xf32>
    %233 = arith.addf %224, %232 : vector<128x256xf32>
    %c0_i32_202 = arith.constant 0 : i32
    %234 = arith.addi %2, %c0_i32_202 : i32
    %c0_203 = arith.constant 0 : index
    %235 = arith.index_cast %234 : i32 to index
    %c0_204 = arith.constant 0 : index
    %c0_205 = arith.constant 0 : index
    %236 = vector.load %arg2[%c0_203, %235, %c0_204, %c0_205] : memref<1x52x52x4xbf16, #tpu.memory_space<vmem>>, vector<1x8x16x4xbf16>
    %237 = vector.shape_cast %236 : vector<1x8x16x4xbf16> to vector<8x16x4xbf16>
    %238 = vector.shape_cast %237 : vector<8x16x4xbf16> to vector<128x4xbf16>
    %c2_206 = arith.constant 2 : index
    %c3_207 = arith.constant 3 : index
    %c0_208 = arith.constant 0 : index
    %c0_209 = arith.constant 0 : index
    %239 = vector.load %arg4[%c2_206, %c3_207, %c0_208, %c0_209] : memref<3x9x4x256xbf16, #tpu.memory_space<vmem>>, vector<1x1x4x256xbf16>
    %240 = vector.shape_cast %239 : vector<1x1x4x256xbf16> to vector<4x256xbf16>
    %cst_210 = arith.constant dense<0.000000e+00> : vector<128x256xf32>
    %241 = tpu.matmul %238, %240, %cst_210 {dimension_numbers = #tpu.dot_dimension_numbers<[1], [0], [0], [1], [0, 0, 1, 1], [], []>} : vector<128x4xbf16>, vector<4x256xbf16>, vector<128x256xf32> -> vector<128x256xf32>
    %242 = arith.addf %233, %241 : vector<128x256xf32>
    %c0_i32_211 = arith.constant 0 : i32
    %243 = arith.addi %2, %c0_i32_211 : i32
    %c0_212 = arith.constant 0 : index
    %244 = arith.index_cast %243 : i32 to index
    %c18_213 = arith.constant 18 : index
    %c0_214 = arith.constant 0 : index
    %245 = vector.load %arg2[%c0_212, %244, %c18_213, %c0_214] : memref<1x52x52x4xbf16, #tpu.memory_space<vmem>>, vector<1x8x16x4xbf16>
    %246 = vector.shape_cast %245 : vector<1x8x16x4xbf16> to vector<8x16x4xbf16>
    %247 = vector.shape_cast %246 : vector<8x16x4xbf16> to vector<128x4xbf16>
    %c2_215 = arith.constant 2 : index
    %c4_216 = arith.constant 4 : index
    %c0_217 = arith.constant 0 : index
    %c0_218 = arith.constant 0 : index
    %248 = vector.load %arg4[%c2_215, %c4_216, %c0_217, %c0_218] : memref<3x9x4x256xbf16, #tpu.memory_space<vmem>>, vector<1x1x4x256xbf16>
    %249 = vector.shape_cast %248 : vector<1x1x4x256xbf16> to vector<4x256xbf16>
    %cst_219 = arith.constant dense<0.000000e+00> : vector<128x256xf32>
    %250 = tpu.matmul %247, %249, %cst_219 {dimension_numbers = #tpu.dot_dimension_numbers<[1], [0], [0], [1], [0, 0, 1, 1], [], []>} : vector<128x4xbf16>, vector<4x256xbf16>, vector<128x256xf32> -> vector<128x256xf32>
    %251 = arith.addf %242, %250 : vector<128x256xf32>
    %c0_i32_220 = arith.constant 0 : i32
    %252 = arith.addi %2, %c0_i32_220 : i32
    %c0_221 = arith.constant 0 : index
    %253 = arith.index_cast %252 : i32 to index
    %c36_222 = arith.constant 36 : index
    %c0_223 = arith.constant 0 : index
    %254 = vector.load %arg2[%c0_221, %253, %c36_222, %c0_223] : memref<1x52x52x4xbf16, #tpu.memory_space<vmem>>, vector<1x8x16x4xbf16>
    %255 = vector.shape_cast %254 : vector<1x8x16x4xbf16> to vector<8x16x4xbf16>
    %256 = vector.shape_cast %255 : vector<8x16x4xbf16> to vector<128x4xbf16>
    %c2_224 = arith.constant 2 : index
    %c5_225 = arith.constant 5 : index
    %c0_226 = arith.constant 0 : index
    %c0_227 = arith.constant 0 : index
    %257 = vector.load %arg4[%c2_224, %c5_225, %c0_226, %c0_227] : memref<3x9x4x256xbf16, #tpu.memory_space<vmem>>, vector<1x1x4x256xbf16>
    %258 = vector.shape_cast %257 : vector<1x1x4x256xbf16> to vector<4x256xbf16>
    %cst_228 = arith.constant dense<0.000000e+00> : vector<128x256xf32>
    %259 = tpu.matmul %256, %258, %cst_228 {dimension_numbers = #tpu.dot_dimension_numbers<[1], [0], [0], [1], [0, 0, 1, 1], [], []>} : vector<128x4xbf16>, vector<4x256xbf16>, vector<128x256xf32> -> vector<128x256xf32>
    %260 = arith.addf %251, %259 : vector<128x256xf32>
    %c18_i32_229 = arith.constant 18 : i32
    %261 = arith.addi %2, %c18_i32_229 : i32
    %c0_230 = arith.constant 0 : index
    %262 = arith.index_cast %261 : i32 to index
    %c0_231 = arith.constant 0 : index
    %c0_232 = arith.constant 0 : index
    %263 = vector.load %arg2[%c0_230, %262, %c0_231, %c0_232] : memref<1x52x52x4xbf16, #tpu.memory_space<vmem>>, vector<1x8x16x4xbf16>
    %264 = vector.shape_cast %263 : vector<1x8x16x4xbf16> to vector<8x16x4xbf16>
    %265 = vector.shape_cast %264 : vector<8x16x4xbf16> to vector<128x4xbf16>
    %c2_233 = arith.constant 2 : index
    %c6_234 = arith.constant 6 : index
    %c0_235 = arith.constant 0 : index
    %c0_236 = arith.constant 0 : index
    %266 = vector.load %arg4[%c2_233, %c6_234, %c0_235, %c0_236] : memref<3x9x4x256xbf16, #tpu.memory_space<vmem>>, vector<1x1x4x256xbf16>
    %267 = vector.shape_cast %266 : vector<1x1x4x256xbf16> to vector<4x256xbf16>
    %cst_237 = arith.constant dense<0.000000e+00> : vector<128x256xf32>
    %268 = tpu.matmul %265, %267, %cst_237 {dimension_numbers = #tpu.dot_dimension_numbers<[1], [0], [0], [1], [0, 0, 1, 1], [], []>} : vector<128x4xbf16>, vector<4x256xbf16>, vector<128x256xf32> -> vector<128x256xf32>
    %269 = arith.addf %260, %268 : vector<128x256xf32>
    %c18_i32_238 = arith.constant 18 : i32
    %270 = arith.addi %2, %c18_i32_238 : i32
    %c0_239 = arith.constant 0 : index
    %271 = arith.index_cast %270 : i32 to index
    %c18_240 = arith.constant 18 : index
    %c0_241 = arith.constant 0 : index
    %272 = vector.load %arg2[%c0_239, %271, %c18_240, %c0_241] : memref<1x52x52x4xbf16, #tpu.memory_space<vmem>>, vector<1x8x16x4xbf16>
    %273 = vector.shape_cast %272 : vector<1x8x16x4xbf16> to vector<8x16x4xbf16>
    %274 = vector.shape_cast %273 : vector<8x16x4xbf16> to vector<128x4xbf16>
    %c2_242 = arith.constant 2 : index
    %c7_243 = arith.constant 7 : index
    %c0_244 = arith.constant 0 : index
    %c0_245 = arith.constant 0 : index
    %275 = vector.load %arg4[%c2_242, %c7_243, %c0_244, %c0_245] : memref<3x9x4x256xbf16, #tpu.memory_space<vmem>>, vector<1x1x4x256xbf16>
    %276 = vector.shape_cast %275 : vector<1x1x4x256xbf16> to vector<4x256xbf16>
    %cst_246 = arith.constant dense<0.000000e+00> : vector<128x256xf32>
    %277 = tpu.matmul %274, %276, %cst_246 {dimension_numbers = #tpu.dot_dimension_numbers<[1], [0], [0], [1], [0, 0, 1, 1], [], []>} : vector<128x4xbf16>, vector<4x256xbf16>, vector<128x256xf32> -> vector<128x256xf32>
    %278 = arith.addf %269, %277 : vector<128x256xf32>
    %c18_i32_247 = arith.constant 18 : i32
    %279 = arith.addi %2, %c18_i32_247 : i32
    %c0_248 = arith.constant 0 : index
    %280 = arith.index_cast %279 : i32 to index
    %c36_249 = arith.constant 36 : index
    %c0_250 = arith.constant 0 : index
    %281 = vector.load %arg2[%c0_248, %280, %c36_249, %c0_250] : memref<1x52x52x4xbf16, #tpu.memory_space<vmem>>, vector<1x8x16x4xbf16>
    %282 = vector.shape_cast %281 : vector<1x8x16x4xbf16> to vector<8x16x4xbf16>
    %283 = vector.shape_cast %282 : vector<8x16x4xbf16> to vector<128x4xbf16>
    %c2_251 = arith.constant 2 : index
    %c8_252 = arith.constant 8 : index
    %c0_253 = arith.constant 0 : index
    %c0_254 = arith.constant 0 : index
    %284 = vector.load %arg4[%c2_251, %c8_252, %c0_253, %c0_254] : memref<3x9x4x256xbf16, #tpu.memory_space<vmem>>, vector<1x1x4x256xbf16>
    %285 = vector.shape_cast %284 : vector<1x1x4x256xbf16> to vector<4x256xbf16>
    %cst_255 = arith.constant dense<0.000000e+00> : vector<128x256xf32>
    %286 = tpu.matmul %283, %285, %cst_255 {dimension_numbers = #tpu.dot_dimension_numbers<[1], [0], [0], [1], [0, 0, 1, 1], [], []>} : vector<128x4xbf16>, vector<4x256xbf16>, vector<128x256xf32> -> vector<128x256xf32>
    %287 = arith.addf %278, %286 : vector<128x256xf32>
    %c3_256 = arith.constant 3 : index
    %c0_257 = arith.constant 0 : index
    %288 = vector.load %arg6[%c3_256, %c0_257] : memref<4x256xf32, #tpu.memory_space<vmem>>, vector<1x256xf32>
    %289 = vector.broadcast %288 : vector<1x256xf32> to vector<128x256xf32>
    %290 = arith.mulf %287, %289 : vector<128x256xf32>
    %c3_258 = arith.constant 3 : index
    %c0_259 = arith.constant 0 : index
    %291 = vector.load %arg7[%c3_258, %c0_259] : memref<4x256xf32, #tpu.memory_space<vmem>>, vector<1x256xf32>
    %292 = vector.broadcast %291 : vector<1x256xf32> to vector<128x256xf32>
    %293 = arith.addf %290, %292 : vector<128x256xf32>
    %cst_260 = arith.constant 0.000000e+00 : f32
    %294 = vector.broadcast %cst_260 : f32 to vector<128x256xf32>
    %295 = arith.maximumf %293, %294 : vector<128x256xf32>
    %296 = arith.truncf %295 : vector<128x256xf32> to vector<128x256xbf16>
    %c3_261 = arith.constant 3 : index
    %c0_262 = arith.constant 0 : index
    %c0_263 = arith.constant 0 : index
    %297 = vector.load %arg5[%c3_261, %c0_262, %c0_263] : memref<4x256x128xbf16, #tpu.memory_space<vmem>>, vector<1x256x128xbf16>
    %298 = vector.shape_cast %297 : vector<1x256x128xbf16> to vector<256x128xbf16>
    %cst_264 = arith.constant dense<0.000000e+00> : vector<128x128xf32>
    %299 = tpu.matmul %296, %298, %cst_264 {dimension_numbers = #tpu.dot_dimension_numbers<[1], [0], [0], [1], [0, 0, 1, 1], [], []>} : vector<128x256xbf16>, vector<256x128xbf16>, vector<128x128xf32> -> vector<128x128xf32>
    %300 = arith.addf %207, %299 : vector<128x128xf32>
    %c0_265 = arith.constant 0 : index
    %c0_266 = arith.constant 0 : index
    %301 = vector.load %arg8[%c0_265, %c0_266] : memref<1x128xf32, #tpu.memory_space<vmem>>, vector<1x128xf32>
    %302 = vector.broadcast %301 : vector<1x128xf32> to vector<128x128xf32>
    %303 = arith.mulf %300, %302 : vector<128x128xf32>
    %c0_267 = arith.constant 0 : index
    %c0_268 = arith.constant 0 : index
    %c0_269 = arith.constant 0 : index
    %304 = vector.load %arg9[%c0_267, %c0_268, %c0_269] : memref<1x1x128xf32, #tpu.memory_space<vmem>>, vector<1x1x128xf32>
    %305 = vector.shape_cast %304 : vector<1x1x128xf32> to vector<1x128xf32>
    %306 = vector.broadcast %305 : vector<1x128xf32> to vector<128x128xf32>
    %307 = arith.addf %303, %306 : vector<128x128xf32>
    %cst_270 = arith.constant 0.000000e+00 : f32
    %308 = vector.broadcast %cst_270 : f32 to vector<128x128xf32>
    %309 = arith.maximumf %307, %308 : vector<128x128xf32>
    %310 = vector.shape_cast %309 : vector<128x128xf32> to vector<8x16x128xf32>
    %c0_271 = arith.constant 0 : index
    %c0_272 = arith.constant 0 : index
    %c0_273 = arith.constant 0 : index
    %c0_274 = arith.constant 0 : index
    %311 = vector.load %arg10[%c0_271, %c0_272, %c0_273, %c0_274] : memref<1x8x16x128xf32, #tpu.memory_space<vmem>>, vector<1x8x16x128xf32>
    %312 = vector.shape_cast %311 : vector<1x8x16x128xf32> to vector<8x16x128xf32>
    %313 = vector.shape_cast %310 : vector<8x16x128xf32> to vector<1x8x16x128xf32>
    tpu.vector_store %arg10[%c0_271, %c0_272, %c0_273, %c0_274], %313 {strides = array<i32>} : memref<1x8x16x128xf32, #tpu.memory_space<vmem>>, vector<1x8x16x128xf32>,
    return
  }
  func.func @transform_0(%arg0: i32, %arg1: i32) -> (i32, i32, i32, i32) {
    %c0_i32 = arith.constant 0 : i32
    %c0_i32_0 = arith.constant 0 : i32
    %c0_i32_1 = arith.constant 0 : i32
    %c0_i32_2 = arith.constant 0 : i32
    return %arg0, %c0_i32, %c0_i32_0, %c0_i32_1 : i32, i32, i32, i32
  }
  func.func @transform_1(%arg0: i32, %arg1: i32) -> (i32, i32) {
    %c0_i32 = arith.constant 0 : i32
    %c0_i32_0 = arith.constant 0 : i32
    %c0_i32_1 = arith.constant 0 : i32
    return %c0_i32, %c0_i32_0 : i32, i32
  }
  func.func @transform_2(%arg0: i32, %arg1: i32) -> (i32, i32, i32, i32) {
    %c0_i32 = arith.constant 0 : i32
    %c0_i32_0 = arith.constant 0 : i32
    %c0_i32_1 = arith.constant 0 : i32
    %c0_i32_2 = arith.constant 0 : i32
    %c0_i32_3 = arith.constant 0 : i32
    return %c0_i32, %c0_i32_0, %c0_i32_1, %c0_i32_2 : i32, i32, i32, i32
  }
  func.func @transform_3(%arg0: i32, %arg1: i32) -> (i32, i32, i32) {
    %c0_i32 = arith.constant 0 : i32
    %c0_i32_0 = arith.constant 0 : i32
    %c0_i32_1 = arith.constant 0 : i32
    %c0_i32_2 = arith.constant 0 : i32
    return %c0_i32, %c0_i32_0, %c0_i32_1 : i32, i32, i32
  }
  func.func @transform_4(%arg0: i32, %arg1: i32) -> (i32, i32) {
    %c0_i32 = arith.constant 0 : i32
    %c0_i32_0 = arith.constant 0 : i32
    %c0_i32_1 = arith.constant 0 : i32
    return %c0_i32, %c0_i32_0 : i32, i32
  }
  func.func @transform_5(%arg0: i32, %arg1: i32) -> (i32, i32) {
    %c0_i32 = arith.constant 0 : i32
    %c0_i32_0 = arith.constant 0 : i32
    %c0_i32_1 = arith.constant 0 : i32
    return %c0_i32, %c0_i32_0 : i32, i32
  }
  func.func @transform_6(%arg0: i32, %arg1: i32) -> (i32, i32) {
    %c0_i32 = arith.constant 0 : i32
    %c0_i32_0 = arith.constant 0 : i32
    %c0_i32_1 = arith.constant 0 : i32
    return %c0_i32, %c0_i32_0 : i32, i32
  }
  func.func @transform_7(%arg0: i32, %arg1: i32) -> (i32, i32, i32) {
    %c0_i32 = arith.constant 0 : i32
    %c0_i32_0 = arith.constant 0 : i32
    %c0_i32_1 = arith.constant 0 : i32
    return %arg0, %c0_i32, %c0_i32_0 : i32, i32, i32
  }
  func.func @transform_8(%arg0: i32, %arg1: i32) -> (i32, i32, i32, i32) {
    %c0_i32 = arith.constant 0 : i32
    %c0_i32_0 = arith.constant 0 : i32
    %c0_i32_1 = arith.constant 0 : i32
    return %arg0, %arg1, %c0_i32, %c0_i32_0 : i32, i32, i32, i32
  }
}

</mosaic_0001>

<bundles_post_ra>
// kernel: aspp_forward.1
= control target key start
LH: loop header
LB: loop body
LE: loop exit
PB: predicated region body
PF: predicated region fallthrough
CT: control target
= control target key end

     0   :  { %s12357_s27 = smov 0   ;;  %s12359_s28 = smov 0   ;;  %s15119_s0 = inlined_call_operand.vmem [shape: bf16[2,52,52,4], index: 0, kind: input, shape index: {}]   ;;  %s15120_s1 = inlined_call_operand.vmem [shape: bf16[4,256], index: 1, kind: input, shape index: {}]   ;;  %s15121_s2 = inlined_call_operand.vmem [shape: bf16[3,9,4,256], index: 2, kind: input, shape index: {}]   ;;  %s15122_s3 = inlined_call_operand.vmem [shape: bf16[4,256,128], index: 3, kind: input, shape index: {}]   ;;  %s15123_s4 = inlined_call_operand.vmem [shape: f32[4,256], index: 4, kind: input, shape index: {}]   ;;  %s15124_s5 = inlined_call_operand.vmem [shape: f32[4,256], index: 5, kind: input, shape index: {}]   ;;  %s15125_s6 = inlined_call_operand.vmem [shape: f32[1,128], index: 6, kind: input, shape index: {}]   ;;  %s15126_s7 = inlined_call_operand.vmem [shape: f32[2,1,128], index: 7, kind: input, shape index: {}]   ;;  %s15127_s8 = inlined_call_operand.vmem [shape: f32[2,16,16,128], index: 8, kind: output, shape index: {}]  }
   0x1   :  { %s12361_s29 = smov 0   ;;  %s12363_s30 = smov 0  }
   0x2   :  { %s12365_s9 = smov 0  }
   0x3 LB: > { %s27_s10 = sadd.s32 1, %s12301_s29  ;;  %s30_s11 = sadd.s32 1, %s12305_s30  ;;  %s12309_s9 = sphi %s12365_s9, %s18_s9   ;;  %s12305_s30 = sphi %s12363_s30, %s15196_s30   ;;  %s12301_s29 = sphi %s12361_s29, %s15195_s29   ;;  %s12297_s28 = sphi %s12359_s28, %s15194_s28   ;;  %s12293_s27 = sphi %s12357_s27, %s15193_s27  }
   0x4   : > { %p28_p0 = scmp.ge.s32.totalorder %s27_s10, 2  ;;  %p9755_p1 = scmp.ge.s32.totalorder %s12309_s9, 1 }
   0x5   : > { %p284_p2 = scmp.lt.s32.totalorder %s12309_s9, 5 }
   0x6   : > { %s15198_s10 = smov (%p28_p0, %s27_s10), 0  ;;  %s15200_s11 = smov (!%p28_p0, %s30_s11), %s12305_s30 }
   0x7   : > { %p285_p3 = pnand %p9755_p1, %p284_p2  ;;  %p32_p4 = scmp.ge.s32.totalorder %s15200_s11, 2 }
   0x9   : > { %s15202_s11 = smov (%p32_p4, %s15200_s11), 0  ;;  %288 = sbr.rel (%p285_p3) target bundleno = 2526 (0x9de), region = 52 }
  0x10   : > { %vm517_vm0 = vcmask 1041408   ;;  %v9993_v0 = vld.sshfl [vmem:[%s15121_s2 + $0xc] sm:$0x33 pattern:$0x76325410]  ;;  %v15128_v4 = vmov 0  }
  0x11   : > { %v1755_v1 = vcombine.high %v9993_v0, %v9993_v0  ;;  %v9804_v2 = vld.sshfl [vmem:[%s15120_s1] sm:$0x33 pattern:$0x76325410]  ;;  %v1781_v3 = vsel %vm517_vm0, %v9993_v0, 0  ;;  %556 = vmatprep.mubr.bf16.mxu0 %v15128_v4  ;;  %1818 = vmatprep.mubr.bf16.mxu1 %v15128_v4  ;;  %p326_p5 = scmp.lt.s32.totalorder %s12297_s28, 1 }
  0x12   : > { %v491_v5 = vcombine.high %v9804_v2, %v9804_v2  ;;  %v519_v6 = vsel %vm517_vm0, %v9804_v2, 0  ;;  %v10004_v7 = vld.sshfl [vmem:[%s15121_s2 + $0x10] sm:$0x33 pattern:$0x76325410]  ;;  %vm399_vm1 = vcmask 1042432  }
  0x13   : > { %9994 = vmatprep.subr.msk.bf16.mxu1 %vm517_vm0, %v1755_v1  ;;  %v1941_v8 = vcombine.high %v10004_v7, %v10004_v7  ;;  %s15204_s28 = smov (!%p326_p5, %s12297_s28), 1  ;;  %vm400_vm2 = vcmask 1046532   ;;  %s9763_s18 = smul.u32 224, %s12293_s27  ;;  %v15154_v11 = vmov 0  ;;  %vm858_vm4 = vcmask 1045508  }
  0x14   : > { %9805 = vmatprep.subr.msk.bf16.mxu0 %vm517_vm0, %v491_v5  ;;  %1787 = vmatpush1.bf16.msra.mxu1 %v1781_v3  ;;  %v9889_v9 = vld.sshfl [vmem:[%s15121_s2 + $0x4] sm:$0x33 pattern:$0x76325410]  ;;  %s12117_s21 = smul.u32 1456, %s15204_s28  ;;  %vm12412_vm3 = vmor %vm399_vm1, %vm400_vm2  ;;  %v15157_v19 = vmov 0  ;;  %s333_s26 = scalar_lea.vmem %s15126_s7, %s15204_s28 }
  0x15   : > { %525 = vmatpush1.bf16.msra.mxu0 %v519_v6  ;;  %10005 = vmatprep.subr.msk.bf16.mxu1 %vm517_vm0, %v1941_v8  ;;  %v1055_v10 = vcombine.high %v9889_v9, %v9889_v9  ;;  %v15155_v11 = vsel %vm12412_vm3, 4294967295, %v15154_v11  ;;  %vm12427_vm5 = vmor %vm517_vm0, %vm858_vm4  ;;  %v12439_v28 = vld.sshfl [vmem:[%s15121_s2 + $0x14] sm:$0x33 pattern:$0x76325410]  ;;  %vm492_vm6 = vcmask 31744  }
  0x16   : > { %15156 = vst [vmem:[#allocation2_spill] sm:$0xff] %v15155_v11  ;;  %s330_s24 = scalar_lea.vmem %s15119_s0, %s12117_s21  ;;  %v15158_v19 = vsel %vm12427_vm5, 4294967295, %v15157_v19  ;;  %v1081_v42 = vsel %vm517_vm0, %v9889_v9, 0  ;;  %v1943_v49 = vsel %vm517_vm0, %v10004_v7, 0  ;;  %v2159_v51 = vcombine.high %v12439_v28, %v12439_v28  ;;  %s9757_s20 = sshll.u32 %s12293_s27, 3 }
  0x17   : > { %9890 = vmatprep.subr.msk.bf16.mxu0 %vm517_vm0, %v1055_v10  ;;  %s12420_s25 = scalar_lea.vmem %s330_s24, %s9763_s18  ;;  %15159 = vst [vmem:[#allocation3_spill] sm:$0xff] %v15158_v19  ;;  %vm3818_vm7 = vcmask 1040384   ;;  %vm3819_vm8 = vcmask 1044484   ;;  %p337_p6 = scmp.lt.s32.totalorder %s9757_s20, 15 }
  0x18   : > { %v9764_v12 = vld [vmem:[%s12420_s25 + $0x200] sm:$0xe]  ;;  %v9765_v13 = vld [vmem:[%s12420_s25 + $0x204] sm:$0xf]  ;;  %v9766_v14 = vld [vmem:[%s12420_s25 + $0x208] sm:$0x1] }
  0x19   : > { %v9788_v15 = vrot.slane %v9764_v12, 9  ;;  %v404_v16 = vrot.slane %v9765_v13, 5  ;;  %v407_v17 = vrot.slane %v9766_v14, 5  ;;  %v9952_v18 = vld [vmem:[%s12420_s25 + $0x1fc] sm:$0xc]  ;;  %vm13526_vm9 = vmor %vm3818_vm7, %vm3819_vm8  ;;  %s15206_s20 = smov (!%p337_p6, %s9757_s20), 15 }
  0x1a   : > { %v9953_v20 = vld [vmem:[%s12420_s25 + $0x200] sm:$0xf]  ;;  %v9954_v21 = vld [vmem:[%s12420_s25 + $0x204] sm:$0x3]  ;;  %v9976_v22 = vrot.slane %v9952_v18, 10  ;;  %s9758_s21 = sshll.u32 %s15206_s20, 1 }
  0x1b   : > { %v405_v23 = vsel %vm12412_vm3, %v9788_v15, %v404_v16  ;;  %v406_v24 = vrot.slane %v404_v16, 4  ;;  %v1667_v25 = vrot.slane %v9953_v20, 6  ;;  %v1670_v26 = vrot.slane %v9954_v21, 6  ;;  %v9767_v27 = vld [vmem:[%s12420_s25 + $0x21c] sm:$0xe]  ;;  %s9759_s22 = sshll.u32 %s15204_s28, 5 }
  0x1c   : > { %v9768_v29 = vld [vmem:[%s12420_s25 + $0x220] sm:$0xf]  ;;  %v9769_v30 = vld [vmem:[%s12420_s25 + $0x224] sm:$0x1]  ;;  %v9789_v31 = vrot.slane %v9767_v27, 9  ;;  %s341_s12 = sadd.s32 %s9759_s22, %s9758_s21 }
  0x1d   : > { %v408_v32 = vsel %vm12412_vm3, %v406_v24, %v407_v17  ;;  %v1668_v33 = vsel %vm12427_vm5, %v9976_v22, %v1667_v25  ;;  %v1669_v34 = vrot.slane %v1667_v25, 4  ;;  %v411_v35 = vrot.slane %v9768_v29, 5  ;;  %v9955_v36 = vld [vmem:[%s12420_s25 + $0x218] sm:$0xc]  ;;  %v9956_v37 = vld [vmem:[%s12420_s25 + $0x21c] sm:$0xf] }
  0x1e   : > { %v12449_v38 = vcombine.low %v405_v23, %v408_v32  ;;  %v414_v39 = vrot.slane %v9769_v30, 5  ;;  %v9957_v40 = vld [vmem:[%s12420_s25 + $0x220] sm:$0x3]  ;;  %v1674_v41 = vrot.slane %v9956_v37, 6  ;;  %v9977_v45 = vrot.slane %v9955_v36, 10  ;;  %s9760_s27 = sshll.u32 %s341_s12, 3 }
  0x1f   : > { %v1671_v43 = vsel %vm12427_vm5, %v1669_v34, %v1670_v26  ;;  %v413_v44 = vrot.slane %v411_v35, 4  ;;  %v1677_v46 = vrot.slane %v9957_v40, 6  ;;  %v9771_v47 = vld [vmem:[%s12420_s25 + $0x23c] sm:$0xf]  ;;  %v412_v52 = vsel %vm12412_vm3, %v9789_v31, %v411_v35  ;;  %v9959_v55 = vld [vmem:[%s12420_s25 + $0x238] sm:$0xf]  ;;  %s15043_s15 = scalar_lea.vmem %s15127_s8, %s9760_s27 }
  0x20   : > { %15160 = vst [vmem:[#allocation4_spill] sm:$0xff] %v12449_v38  ;;  %9806 = vmatmul.mubr.msk.bf16.vlgmr.msra.gmra.mrb[0].mxu0 %vm492_vm6, %v12449_v38  ;;  %v9985_v48 = vcombine.low %v1668_v33, %v1671_v43  ;;  %v1676_v50 = vrot.slane %v1674_v41, 4  ;;  %v418_v54 = vrot.slane %v9771_v47, 5  ;;  %v9770_v56 = vld [vmem:[%s12420_s25 + $0x238] sm:$0xe]  ;;  %v1675_v58 = vsel %vm12427_vm5, %v9977_v45, %v1674_v41 }
  0x21   : > { %566 = vmatprep.mubr.bf16.mxu0 %v15128_v4  ;;  %v415_v53 = vsel %vm12412_vm3, %v413_v44, %v414_v39  ;;  %1087 = vmatpush1.bf16.msra.mxu0 %v1081_v42  ;;  %v9772_v57 = vld [vmem:[%s12420_s25 + $0x240] sm:$0x1]  ;;  %v1681_v60 = vrot.slane %v9959_v55, 6  ;;  %v9958_v62 = vld [vmem:[%s12420_s25 + $0x234] sm:$0xc]  ;;  %v9790_v0 = vrot.slane %v9770_v56, 9 }
  0x22   : > { %9995 = vmatmul.mubr.msk.bf16.vlgmr.msra.gmra.mrb[0].mxu1 %vm492_vm6, %v9985_v48  ;;  %v1678_v59 = vsel %vm12427_vm5, %v1676_v50, %v1677_v46  ;;  %v12475_v61 = vcombine.low %v412_v52, %v415_v53  ;;  %v9960_v63 = vld [vmem:[%s12420_s25 + $0x23c] sm:$0x3]  ;;  %v420_v1 = vrot.slane %v418_v54, 4  ;;  %v421_v2 = vrot.slane %v9772_v57, 5  ;;  %v9774_v5 = vld [vmem:[%s12420_s25 + $0x258] sm:$0xf] }
  0x23   : > { %1949 = vmatpush1.bf16.msra.mxu1 %v1943_v49  ;;  %1828 = vmatprep.mubr.bf16.mxu1 %v15128_v4  ;;  %v9986_v3 = vcombine.low %v1675_v58, %v1678_v59  ;;  %v9978_v6 = vrot.slane %v9958_v62, 10  ;;  %v1683_v7 = vrot.slane %v1681_v60, 4  ;;  %v1684_v8 = vrot.slane %v9960_v63, 6  ;;  %v9962_v9 = vld [vmem:[%s12420_s25 + $0x254] sm:$0xf] }
  0x24   : > { %15161 = vst [vmem:[#allocation5_spill] sm:$0xff] %v12475_v61  ;;  %10040 = vmatprep.subr.msk.bf16.mxu1 %vm517_vm0, %v2159_v51  ;;  %v419_v10 = vsel %vm12412_vm3, %v9790_v0, %v418_v54  ;;  %v422_v12 = vsel %vm12412_vm3, %v420_v1, %v421_v2  ;;  %v425_v13 = vrot.slane %v9774_v5, 5  ;;  %v9773_v14 = vld [vmem:[%s12420_s25 + $0x254] sm:$0xe]  ;;  %v9775_v15 = vld [vmem:[%s12420_s25 + $0x25c] sm:$0x1] }
  0x25   : > { %v1682_v16 = vsel %vm12427_vm5, %v9978_v6, %v1681_v60  ;;  %v1685_v17 = vsel %vm12427_vm5, %v1683_v7, %v1684_v8  ;;  %v1688_v18 = vrot.slane %v9962_v9, 6  ;;  %v12497_v20 = vcombine.low %v419_v10, %v422_v12  ;;  %v9961_v21 = vld [vmem:[%s12420_s25 + $0x250] sm:$0xc]  ;;  %v9963_v22 = vld [vmem:[%s12420_s25 + $0x258] sm:$0x3] }
  0x26   : > { %v9791_v23 = vrot.slane %v9773_v14, 9  ;;  %v427_v24 = vrot.slane %v425_v13, 4  ;;  %v428_v25 = vrot.slane %v9775_v15, 5  ;;  %v9987_v26 = vcombine.low %v1682_v16, %v1685_v17  ;;  %v9777_v27 = vld [vmem:[%s12420_s25 + $0x274] sm:$0xf] }
  0x27   : > { %15162 = vst [vmem:[#allocation6_spill] sm:$0xff] %v12497_v20  ;;  %v9979_v29 = vrot.slane %v9961_v21, 10  ;;  %v1690_v30 = vrot.slane %v1688_v18, 4  ;;  %v1691_v31 = vrot.slane %v9963_v22, 6  ;;  %v9965_v32 = vld [vmem:[%s12420_s25 + $0x270] sm:$0xf] }
  0x28   : > { %9807 = vmatmul.mubr.msk.bf16.gmra.mrb[4].mxu0 %vm492_vm6, %v12475_v61  ;;  %v426_v33 = vsel %vm12412_vm3, %v9791_v23, %v425_v13  ;;  %v429_v34 = vsel %vm12412_vm3, %v427_v24, %v428_v25  ;;  %v432_v35 = vrot.slane %v9777_v27, 5  ;;  %v9776_v36 = vld [vmem:[%s12420_s25 + $0x270] sm:$0xe]  ;;  %v9778_v37 = vld [vmem:[%s12420_s25 + $0x278] sm:$0x1]  ;;  %v1695_v41 = vrot.slane %v9965_v32, 6 }
  0x29   : > { %576 = vmatprep.mubr.bf16.mxu0 %v15128_v4  ;;  %v1689_v39 = vsel %vm12427_vm5, %v9979_v29, %v1688_v18  ;;  %v1692_v40 = vsel %vm12427_vm5, %v1690_v30, %v1691_v31  ;;  %v12518_v42 = vcombine.low %v426_v33, %v429_v34  ;;  %v9964_v43 = vld [vmem:[%s12420_s25 + $0x26c] sm:$0xc]  ;;  %v9966_v44 = vld [vmem:[%s12420_s25 + $0x274] sm:$0x3]  ;;  %v9792_v45 = vrot.slane %v9776_v36, 9 }
  0x2a   : > { %9996 = vmatmul.mubr.msk.bf16.gmra.mrb[4].mxu1 %vm492_vm6, %v9986_v3  ;;  %v434_v46 = vrot.slane %v432_v35, 4  ;;  %v435_v47 = vrot.slane %v9778_v37, 5  ;;  %v9988_v48 = vcombine.low %v1689_v39, %v1692_v40  ;;  %v9780_v49 = vld [vmem:[%s12420_s25 + $0x290] sm:$0xf]  ;;  %v9980_v50 = vrot.slane %v9964_v43, 10 }
  0x2b   : > { %1838 = vmatprep.mubr.bf16.mxu1 %v15128_v4  ;;  %15163 = vst [vmem:[#allocation7_spill] sm:$0xff] %v12518_v42  ;;  %v1697_v51 = vrot.slane %v1695_v41, 4  ;;  %v1698_v52 = vrot.slane %v9966_v44, 6  ;;  %v9968_v53 = vld [vmem:[%s12420_s25 + $0x28c] sm:$0xf]  ;;  %v433_v54 = vsel %vm12412_vm3, %v9792_v45, %v432_v35  ;;  %v439_v56 = vrot.slane %v9780_v49, 5 }
  0x2c   : > { %v436_v55 = vsel %vm12412_vm3, %v434_v46, %v435_v47  ;;  %v9779_v57 = vld [vmem:[%s12420_s25 + $0x28c] sm:$0xe]  ;;  %v9781_v58 = vld [vmem:[%s12420_s25 + $0x294] sm:$0x1]  ;;  %v1696_v59 = vsel %vm12427_vm5, %v9980_v50, %v1695_v41  ;;  %v1702_v62 = vrot.slane %v9968_v53, 6 }
  0x2d   : > { %v1699_v60 = vsel %vm12427_vm5, %v1697_v51, %v1698_v52  ;;  %v12539_v63 = vcombine.low %v433_v54, %v436_v55  ;;  %v9967_v0 = vld [vmem:[%s12420_s25 + $0x288] sm:$0xc]  ;;  %v9969_v1 = vld [vmem:[%s12420_s25 + $0x290] sm:$0x3]  ;;  %v9793_v2 = vrot.slane %v9779_v57, 9  ;;  %v441_v3 = vrot.slane %v439_v56, 4 }
  0x2e   : > { %v442_v5 = vrot.slane %v9781_v58, 5  ;;  %v9989_v6 = vcombine.low %v1696_v59, %v1699_v60  ;;  %v9783_v7 = vld [vmem:[%s12420_s25 + $0x2ac] sm:$0xf]  ;;  %v9981_v8 = vrot.slane %v9967_v0, 10  ;;  %v1704_v9 = vrot.slane %v1702_v62, 4 }
  0x2f   : > { %15164 = vst [vmem:[#allocation8_spill] sm:$0xff] %v12539_v63  ;;  %v1705_v10 = vrot.slane %v9969_v1, 6  ;;  %v9971_v12 = vld [vmem:[%s12420_s25 + $0x2a8] sm:$0xf]  ;;  %v440_v13 = vsel %vm12412_vm3, %v9793_v2, %v439_v56  ;;  %v446_v15 = vrot.slane %v9783_v7, 5 }
  0x30   : > { %9808 = vmatmul.mubr.msk.bf16.gmra.mrb[8].mxu0 %vm492_vm6, %v12497_v20  ;;  %v443_v14 = vsel %vm12412_vm3, %v441_v3, %v442_v5  ;;  %v9782_v16 = vld [vmem:[%s12420_s25 + $0x2a8] sm:$0xe]  ;;  %v9784_v17 = vld [vmem:[%s12420_s25 + $0x2b0] sm:$0x1]  ;;  %v1703_v18 = vsel %vm12427_vm5, %v9981_v8, %v1702_v62  ;;  %v1709_v22 = vrot.slane %v9971_v12, 6 }
  0x31   : > { %586 = vmatprep.mubr.bf16.mxu0 %v15128_v4  ;;  %v1706_v21 = vsel %vm12427_vm5, %v1704_v9, %v1705_v10  ;;  %v12563_v23 = vld.sshfl [vmem:[%s15121_s2] sm:$0x33 pattern:$0x76325410]  ;;  %v12565_v24 = vcombine.low %v440_v13, %v443_v14  ;;  %v9970_v25 = vld [vmem:[%s12420_s25 + $0x2a4] sm:$0xc] }
  0x32   : > { %9997 = vmatmul.mubr.msk.bf16.gmra.mrb[8].mxu1 %vm492_vm6, %v9987_v26  ;;  %v9972_v26 = vld [vmem:[%s12420_s25 + $0x2ac] sm:$0x3]  ;;  %v1231_v27 = vcombine.high %v12563_v23, %v12563_v23  ;;  %v9794_v29 = vrot.slane %v9782_v16, 9  ;;  %v448_v30 = vrot.slane %v446_v15, 4  ;;  %v449_v31 = vrot.slane %v9784_v17, 5 }
  0x33   : > { %1848 = vmatprep.mubr.bf16.mxu1 %v15128_v4  ;;  %15165 = vst [vmem:[#allocation9_spill] sm:$0xff] %v12565_v24  ;;  %v9990_v32 = vcombine.low %v1703_v18, %v1706_v21  ;;  %v9786_v33 = vld [vmem:[%s12420_s25 + $0x2c8] sm:$0xf]  ;;  %v9982_v34 = vrot.slane %v9970_v25, 10  ;;  %v1711_v35 = vrot.slane %v1709_v22, 4  ;;  %v1712_v36 = vrot.slane %v9972_v26, 6 }
  0x34   : > { %9908 = vmatprep.subr.msk.bf16.mxu0 %vm517_vm0, %v1231_v27  ;;  %v9974_v37 = vld [vmem:[%s12420_s25 + $0x2c4] sm:$0xf]  ;;  %v447_v39 = vsel %vm12412_vm3, %v9794_v29, %v446_v15  ;;  %v450_v40 = vsel %vm12412_vm3, %v448_v30, %v449_v31  ;;  %v453_v41 = vrot.slane %v9786_v33, 5  ;;  %v9787_v44 = vld [vmem:[%s12420_s25 + $0x2cc] sm:$0x1]  ;;  %v1257_v29 = vsel %vm517_vm0, %v12563_v23, 0 }
  0x35   : > { %v9785_v43 = vld [vmem:[%s12420_s25 + $0x2c4] sm:$0xe]  ;;  %v1710_v45 = vsel %vm12427_vm5, %v9982_v34, %v1709_v22  ;;  %v1713_v46 = vsel %vm12427_vm5, %v1711_v35, %v1712_v36  ;;  %v1716_v47 = vrot.slane %v9974_v37, 6  ;;  %v9973_v49 = vld [vmem:[%s12420_s25 + $0x2c0] sm:$0xc]  ;;  %v456_v53 = vrot.slane %v9787_v44, 5 }
  0x36   : > { %v9975_v50 = vld [vmem:[%s12420_s25 + $0x2c8] sm:$0x3]  ;;  %v9795_v51 = vrot.slane %v9785_v43, 9  ;;  %v455_v52 = vrot.slane %v453_v41, 4  ;;  %v9991_v54 = vcombine.low %v1710_v45, %v1713_v46  ;;  %v9849_v55 = vld [vmem:[%s12420_s25 + $0x15c] sm:$0xf] }
  0x37   : > { %v9983_v56 = vrot.slane %v9973_v49, 10  ;;  %v1718_v57 = vrot.slane %v1716_v47, 4  ;;  %v1719_v58 = vrot.slane %v9975_v50, 6  ;;  %v9848_v62 = vld [vmem:[%s12420_s25 + $0x158] sm:$0xe]  ;;  %v967_v0 = vrot.slane %v9849_v55, 5 }
  0x38   : > { %9809 = vmatmul.mubr.msk.bf16.gmra.mrb[12].mxu0 %vm492_vm6, %v12518_v42  ;;  %v454_v59 = vsel %vm12412_vm3, %v9795_v51, %v453_v41  ;;  %v457_v60 = vsel %vm12412_vm3, %v455_v52, %v456_v53  ;;  %v9850_v1 = vld [vmem:[%s12420_s25 + $0x160] sm:$0x1]  ;;  %v9852_v7 = vld [vmem:[%s12420_s25 + $0x178] sm:$0xf]  ;;  %v9851_v15 = vld [vmem:[%s12420_s25 + $0x174] sm:$0xe] }
  0x39   : > { %596 = vmatprep.mubr.bf16.mxu0 %v15128_v4  ;;  %v1717_v2 = vsel %vm12427_vm5, %v9983_v56, %v1716_v47  ;;  %v1720_v3 = vsel %vm12427_vm5, %v1718_v57, %v1719_v58  ;;  %v12609_v5 = vcombine.low %v454_v59, %v457_v60  ;;  %v969_v8 = vrot.slane %v967_v0, 4  ;;  %v9853_v16 = vld [vmem:[%s12420_s25 + $0x17c] sm:$0x1]  ;;  %v9855_v21 = vld [vmem:[%s12420_s25 + $0x194] sm:$0xf] }
  0x3a   : > { %9998 = vmatmul.mubr.msk.bf16.gmra.mrb[12].mxu1 %vm492_vm6, %v9988_v48  ;;  %v12589_v48 = vcombine.low %v447_v39, %v450_v40  ;;  %v970_v9 = vrot.slane %v9850_v1, 5  ;;  %v9992_v10 = vcombine.low %v1717_v2, %v1720_v3  ;;  %v974_v12 = vrot.slane %v9852_v7, 5  ;;  %v12626_v17 = vld.sshfl [vmem:[%s15121_s2 + $0x8] sm:$0x33 pattern:$0x76325410] }
  0x3b   : > { %1858 = vmatprep.mubr.bf16.mxu1 %v15128_v4  ;;  %15167 = vst [vmem:[#allocation11_spill] sm:$0xff] %v12609_v5  ;;  %v12632_v22 = vld.sshfl [vmem:[%s15121_s2 + $0x18] sm:$0x33 pattern:$0x76325410]  ;;  %v9873_v25 = vrot.slane %v9851_v15, 9  ;;  %v1441_v30 = vcombine.high %v12626_v17, %v12626_v17 }
  0x3c   : > { %15166 = vst [vmem:[#allocation10_spill] sm:$0xff] %v12589_v48  ;;  %v971_v14 = vsel %vm12412_vm3, %v969_v8, %v970_v9  ;;  %v976_v26 = vrot.slane %v974_v12, 4  ;;  %v977_v27 = vrot.slane %v9853_v16, 5  ;;  %v2185_v31 = vsel %vm517_vm0, %v12439_v28, 0  ;;  %v9854_v33 = vld [vmem:[%s12420_s25 + $0x190] sm:$0xe] }
  0x3d   : > { %v2477_v34 = vcombine.high %v12632_v22, %v12632_v22  ;;  %v975_v35 = vsel %vm12412_vm3, %v9873_v25, %v974_v12  ;;  %v9856_v28 = vld [vmem:[%s12420_s25 + $0x198] sm:$0x1]  ;;  %v9858_v36 = vld [vmem:[%s12420_s25 + $0x1b0] sm:$0xf]  ;;  %v9874_v39 = vrot.slane %v9854_v33, 9 }
  0x3e   : > { %v978_v23 = vsel %vm12412_vm3, %v976_v26, %v977_v27  ;;  %v984_v41 = vrot.slane %v9856_v28, 5  ;;  %v988_v43 = vrot.slane %v9858_v36, 5  ;;  %v9857_v44 = vld [vmem:[%s12420_s25 + $0x1ac] sm:$0xe]  ;;  %v9859_v45 = vld [vmem:[%s12420_s25 + $0x1b4] sm:$0x1] }
  0x3f   : > { %v9882_v37 = vcombine.low %v975_v35, %v978_v23  ;;  %v9861_v49 = vld [vmem:[%s12420_s25 + $0x1cc] sm:$0xf]  ;;  %v9875_v51 = vrot.slane %v9857_v44, 9  ;;  %v991_v53 = vrot.slane %v9859_v45, 5  ;;  %v9860_v55 = vld [vmem:[%s12420_s25 + $0x1c8] sm:$0xe] }
  0x40   : > { %9810 = vmatmul.mubr.msk.bf16.gmra.mrb[16].mxu0 %vm492_vm6, %v12539_v63  ;;  %v990_v52 = vrot.slane %v988_v43, 4  ;;  %v9862_v56 = vld [vmem:[%s12420_s25 + $0x1d0] sm:$0x1]  ;;  %v9864_v59 = vld [vmem:[%s12420_s25 + $0x1e8] sm:$0xf] }
  0x41   : > { %606 = vmatprep.mubr.bf16.mxu0 %v15128_v4  ;;  %v989_v57 = vsel %vm12412_vm3, %v9875_v51, %v988_v43  ;;  %v998_v1 = vrot.slane %v9862_v56, 5  ;;  %v1002_v2 = vrot.slane %v9864_v59, 5  ;;  %v9863_v3 = vld [vmem:[%s12420_s25 + $0x1e4] sm:$0xe]  ;;  %v9866_v16 = vld [vmem:[%s12420_s25 + $0x200] sm:$0xe] }
  0x42   : > { %9999 = vmatmul.mubr.msk.bf16.gmra.mrb[16].mxu1 %vm492_vm6, %v9989_v6  ;;  %v9872_v6 = vrot.slane %v9848_v62, 9  ;;  %v992_v58 = vsel %vm12412_vm3, %v990_v52, %v991_v53  ;;  %v9876_v62 = vrot.slane %v9860_v55, 9  ;;  %v9867_v9 = vld [vmem:[%s12420_s25 + $0x204] sm:$0xf]  ;;  %v9877_v12 = vrot.slane %v9863_v3, 9 }
  0x43   : > { %1868 = vmatprep.mubr.bf16.mxu1 %v15128_v4  ;;  %v9884_v60 = vcombine.low %v989_v57, %v992_v58  ;;  %v1009_v15 = vrot.slane %v9867_v9, 5  ;;  %v9870_v26 = vld [vmem:[%s12420_s25 + $0x220] sm:$0xf]  ;;  %v9869_v33 = vld [vmem:[%s12420_s25 + $0x21c] sm:$0xe]  ;;  %v2503_v58 = vsel %vm517_vm0, %v12632_v22, 0 }
  0x44   : > { %v968_v13 = vsel %vm12412_vm3, %v9872_v6, %v967_v0  ;;  %v9865_v6 = vld [vmem:[%s12420_s25 + $0x1ec] sm:$0x1]  ;;  %v9817_v28 = vld [vmem:[%s12420_s25 + $0x158] sm:$0xf]  ;;  %v9816_v43 = vld [vmem:[%s12420_s25 + $0x154] sm:$0xc] }
  0x45   : > { %v9881_v18 = vcombine.low %v968_v13, %v971_v14  ;;  %v1004_v13 = vrot.slane %v1002_v2, 4  ;;  %v1005_v14 = vrot.slane %v9865_v6, 5  ;;  %v9818_v44 = vld [vmem:[%s12420_s25 + $0x15c] sm:$0x3]  ;;  %v9821_v57 = vld [vmem:[%s12420_s25 + $0x178] sm:$0x3] }
  0x46   : > { %v865_v52 = vrot.slane %v9818_v44, 6  ;;  %v872_v3 = vrot.slane %v9821_v57, 6  ;;  %v9824_v9 = vld [vmem:[%s12420_s25 + $0x194] sm:$0x3] }
  0x47   : > { %v1006_v25 = vsel %vm12412_vm3, %v1004_v13, %v1005_v14  ;;  %v12160_v14 = vld [vmem:[%s12420_s25 + $0x220] sm:$0xff]   ;;  %v12163_v57 = vld [vmem:[%s12420_s25 + $0x274] sm:$0xff]  }
  0x48   : > { %9811 = vmatmul.mubr.msk.bf16.gmra.mrb[20].mxu0 %vm492_vm6, %v12565_v24 }
  0x49   : > { %616 = vmatprep.mubr.bf16.mxu0 %v15128_v4 }
  0x4a   : > { %10000 = vmatmul.mubr.msk.bf16.gmra.mrb[20].mxu1 %vm492_vm6, %v9990_v32  ;;  %v981_v32 = vrot.slane %v9855_v21, 5  ;;  %v1003_v21 = vsel %vm12412_vm3, %v9877_v12, %v1002_v2 }
  0x4b   : > { %1878 = vmatprep.mubr.bf16.mxu1 %v15128_v4  ;;  %v9886_v27 = vcombine.low %v1003_v21, %v1006_v25  ;;  %v9825_v25 = vld [vmem:[%s12420_s25 + $0x1a8] sm:$0xc] }
  0x4c   : > { %v983_v40 = vrot.slane %v981_v32, 4  ;;  %v982_v46 = vsel %vm12412_vm3, %v9874_v39, %v981_v32  ;;  %v1016_v32 = vrot.slane %v9870_v26, 5  ;;  %v9827_v26 = vld [vmem:[%s12420_s25 + $0x1b0] sm:$0x3] }
  0x4e   : > { %v985_v47 = vsel %vm12412_vm3, %v983_v40, %v984_v41  ;;  %v1018_v39 = vrot.slane %v1016_v32, 4  ;;  %v862_v41 = vrot.slane %v9817_v28, 6  ;;  %v9828_v28 = vld [vmem:[%s12420_s25 + $0x1c4] sm:$0xc] }
  0x4f   : > { %v9883_v50 = vcombine.low %v982_v46, %v985_v47  ;;  %v9820_v47 = vld [vmem:[%s12420_s25 + $0x174] sm:$0xf] }
  0x50   : > { %9812 = vmatmul.mubr.msk.bf16.gmra.mrb[24].mxu0 %vm492_vm6, %v12589_v48  ;;  %v864_v51 = vrot.slane %v862_v41, 4  ;;  %v869_v53 = vrot.slane %v9820_v47, 6 }
  0x51   : > { %626 = vmatprep.mubr.bf16.mxu0 %v15128_v4 }
  0x52   : > { %10001 = vmatmul.mubr.msk.bf16.gmra.mrb[24].mxu1 %vm492_vm6, %v9991_v54  ;;  %v995_v54 = vrot.slane %v9861_v49, 5  ;;  %v866_v56 = vsel %vm12427_vm5, %v864_v51, %v865_v52  ;;  %v871_v2 = vrot.slane %v869_v53, 4  ;;  %v9831_v51 = vld [vmem:[%s12420_s25 + $0x1e0] sm:$0xc]  ;;  %v9833_v52 = vld [vmem:[%s12420_s25 + $0x1e8] sm:$0x3] }
  0x53   : > { %1888 = vmatprep.mubr.bf16.mxu1 %v15128_v4 }
  0x54   : > { %v997_v0 = vrot.slane %v995_v54, 4  ;;  %v996_v7 = vsel %vm12412_vm3, %v9876_v62, %v995_v54  ;;  %v9819_v54 = vld [vmem:[%s12420_s25 + $0x170] sm:$0xc]  ;;  %v873_v12 = vsel %vm12427_vm5, %v871_v2, %v872_v3  ;;  %v9836_v2 = vld [vmem:[%s12420_s25 + $0x204] sm:$0x3] }
  0x55   : > { %v9841_v59 = vrot.slane %v9819_v54, 10  ;;  %v9845_v54 = vrot.slane %v9831_v51, 10 }
  0x56   : > { %v999_v8 = vsel %vm12412_vm3, %v997_v0, %v998_v1  ;;  %v12159_v0 = vld [vmem:[%s12420_s25 + $0x204] sm:$0xff]   ;;  %v12746_v1 = vld.sshfl [vmem:[%s15121_s2 + $0x1c] sm:$0x33 pattern:$0x76325410] }
  0x57   : > { %v2791_v22 = vcombine.high %v12746_v1, %v12746_v1  ;;  %v2817_v51 = vsel %vm517_vm0, %v12746_v1, 0  ;;  %v12168_v1 = vld [vmem:[%s12420_s25 + $0x178] sm:$0xff]  }
  0x58   : > { %9813 = vmatmul.mubr.msk.bf16.gmra.mrb[28].mxu0 %vm492_vm6, %v12609_v5 }
  0x59   : > { %1118 = vmatprep.mubr.bf16.mxu0 %v15128_v4 }
  0x5a   : > { %10002 = vmatmul.mubr.msk.bf16.gmra.mrb[28].mxu1 %vm492_vm6, %v9992_v10  ;;  %v9885_v10 = vcombine.low %v996_v7, %v999_v8  ;;  %v1467_v7 = vsel %vm517_vm0, %v12626_v17, 0  ;;  %v9822_v8 = vld [vmem:[%s12420_s25 + $0x18c] sm:$0xc] }
  0x5b   : > { %1980 = vmatprep.mubr.bf16.mxu1 %v15128_v4  ;;  %v9826_v17 = vld [vmem:[%s12420_s25 + $0x1ac] sm:$0xf] }
  0x5c   : > { %v883_v21 = vrot.slane %v9826_v17, 6 }
  0x60   : > { %9891 = vmatmul.mubr.msk.bf16.vlgmr.msra.gmra.mrb[32].mxu0 %vm492_vm6, %v9881_v18  ;;  %v9868_v18 = vld [vmem:[%s12420_s25 + $0x208] sm:$0x1] }
  0x61   : > { %1128 = vmatprep.mubr.bf16.mxu0 %v15128_v4  ;;  %1263 = vmatpush1.bf16.msra.mxu0 %v1257_v29  ;;  %v9878_v29 = vrot.slane %v9866_v16, 9  ;;  %v879_v16 = vrot.slane %v9824_v9, 6  ;;  %v12164_v9 = vld [vmem:[%s12420_s25 + $0x290] sm:$0xff]  }
  0x62   : > { %10006 = vmatmul.mubr.msk.bf16.vlgmr.msra.gmra.mrb[0].mxu1 %vm492_vm6, %v12449_v38  ;;  %9943 = vmatprep.subr.msk.bf16.mxu0 %vm517_vm0, %v1441_v30  ;;  %v1011_v30 = vrot.slane %v1009_v15, 4 }
  0x63   : > { %2191 = vmatpush1.bf16.msra.mxu1 %v2185_v31  ;;  %1990 = vmatprep.mubr.bf16.mxu1 %v15128_v4  ;;  %v1012_v31 = vrot.slane %v9868_v18, 5  ;;  %v1010_v35 = vsel %vm12412_vm3, %v9878_v29, %v1009_v15  ;;  %v9842_v15 = vrot.slane %v9822_v8, 10  ;;  %v907_v8 = vrot.slane %v9836_v2, 6  ;;  %v10061_v2 = vld [vmem:[%s12420_s25 + $0x2fc] sm:$0xf] }
  0x64   : > { %10093 = vmatprep.subr.msk.bf16.mxu1 %vm517_vm0, %v2477_v34  ;;  %v9871_v34 = vld [vmem:[%s12420_s25 + $0x224] sm:$0x1] }
  0x65   : > { %v1013_v23 = vsel %vm12412_vm3, %v1011_v30, %v1012_v31  ;;  %v1019_v40 = vrot.slane %v9871_v34, 5  ;;  %v9829_v30 = vld [vmem:[%s12420_s25 + $0x1c8] sm:$0xf]  ;;  %v886_v34 = vrot.slane %v9827_v26, 6 }
  0x66   : > { %v9887_v36 = vcombine.low %v1010_v35, %v1013_v23  ;;  %v885_v35 = vrot.slane %v883_v21, 4  ;;  %v890_v23 = vrot.slane %v9829_v30, 6  ;;  %v10052_v26 = vld [vmem:[%s12420_s25 + $0x2a8] sm:$0xf] }
  0x67   : > { %v1020_v46 = vsel %vm12412_vm3, %v1018_v39, %v1019_v40  ;;  %v9830_v39 = vld [vmem:[%s12420_s25 + $0x1cc] sm:$0x3]  ;;  %v2389_v30 = vrot.slane %v10052_v26, 6 }
  0x68   : > { %9892 = vmatmul.mubr.msk.bf16.gmra.mrb[36].mxu0 %vm492_vm6, %v9882_v37  ;;  %v9879_v37 = vrot.slane %v9869_v33, 9  ;;  %v9843_v33 = vrot.slane %v9825_v25, 10  ;;  %v892_v44 = vrot.slane %v890_v23, 4  ;;  %v12165_v25 = vld [vmem:[%s12420_s25 + $0x2ac] sm:$0xff]  }
  0x69   : > { %1138 = vmatprep.mubr.bf16.mxu0 %v15128_v4 }
  0x6a   : > { %10007 = vmatmul.mubr.msk.bf16.gmra.mrb[4].mxu1 %vm492_vm6, %v12475_v61  ;;  %v1017_v45 = vsel %vm12412_vm3, %v9879_v37, %v1016_v32  ;;  %v12161_v32 = vld [vmem:[%s12420_s25 + $0x23c] sm:$0xff]   ;;  %v887_v37 = vsel %vm12427_vm5, %v885_v35, %v886_v34  ;;  %v12166_v34 = vld [vmem:[%s12420_s25 + $0x2c8] sm:$0xff]  }
  0x6b   : > { %2000 = vmatprep.mubr.bf16.mxu1 %v15128_v4  ;;  %v9888_v49 = vcombine.low %v1017_v45, %v1020_v46  ;;  %v893_v45 = vrot.slane %v9830_v39, 6  ;;  %v9832_v46 = vld [vmem:[%s12420_s25 + $0x1e4] sm:$0xf] }
  0x70   : > { %9893 = vmatmul.mubr.msk.bf16.gmra.mrb[40].mxu0 %vm492_vm6, %v9883_v50  ;;  %v9840_v50 = vrot.slane %v9816_v43, 10  ;;  %v9844_v43 = vrot.slane %v9828_v28, 10 }
  0x71   : > { %1148 = vmatprep.mubr.bf16.mxu0 %v15128_v4 }
  0x72   : > { %10008 = vmatmul.mubr.msk.bf16.gmra.mrb[8].mxu1 %vm492_vm6, %v12497_v20  ;;  %v863_v55 = vsel %vm12427_vm5, %v9840_v50, %v862_v41  ;;  %v12162_v41 = vld [vmem:[%s12420_s25 + $0x258] sm:$0xff]   ;;  %v891_v47 = vsel %vm12427_vm5, %v9844_v43, %v890_v23  ;;  %v897_v50 = vrot.slane %v9832_v46, 6  ;;  %v2391_v23 = vrot.slane %v2389_v30, 4  ;;  %v10054_v43 = vld [vmem:[%s12420_s25 + $0x2c0] sm:$0xc] }
  0x73   : > { %2010 = vmatprep.mubr.bf16.mxu1 %v15128_v4  ;;  %v9899_v62 = vcombine.low %v863_v55, %v866_v56  ;;  %v900_v56 = vrot.slane %v9833_v52, 6  ;;  %v10058_v52 = vld [vmem:[%s12420_s25 + $0x2e0] sm:$0xf] }
  0x74   : > { %v899_v55 = vrot.slane %v897_v50, 4 }
  0x78   : > { %9894 = vmatmul.mubr.msk.bf16.gmra.mrb[44].mxu0 %vm492_vm6, %v9884_v60  ;;  %v9823_v60 = vld [vmem:[%s12420_s25 + $0x190] sm:$0xf] }
  0x79   : > { %1158 = vmatprep.mubr.bf16.mxu0 %v15128_v4  ;;  %v876_v6 = vrot.slane %v9823_v60, 6  ;;  %v901_v60 = vsel %vm12427_vm5, %v899_v55, %v900_v56  ;;  %v2403_v56 = vrot.slane %v10058_v52, 6 }
  0x7a   : > { %10009 = vmatmul.mubr.msk.bf16.gmra.mrb[12].mxu1 %vm492_vm6, %v12518_v42 }
  0x7b   : > { %2020 = vmatprep.mubr.bf16.mxu1 %v15128_v4  ;;  %v878_v18 = vrot.slane %v876_v6, 4 }
  0x7d   : > { %v880_v29 = vsel %vm12427_vm5, %v878_v18, %v879_v16 }
  0x80   : > { %9895 = vmatmul.mubr.msk.bf16.gmra.mrb[48].mxu0 %vm492_vm6, %v9885_v10  ;;  %v870_v10 = vsel %vm12427_vm5, %v9841_v59, %v869_v53  ;;  %v898_v59 = vsel %vm12427_vm5, %v9845_v54, %v897_v50 }
  0x81   : > { %1168 = vmatprep.mubr.bf16.mxu0 %v15128_v4  ;;  %v9900_v13 = vcombine.low %v870_v10, %v873_v12  ;;  %v9904_v3 = vcombine.low %v898_v59, %v901_v60 }
  0x82   : > { %10010 = vmatmul.mubr.msk.bf16.gmra.mrb[16].mxu1 %vm492_vm6, %v12539_v63 }
  0x83   : > { %2030 = vmatprep.mubr.bf16.mxu1 %v15128_v4 }
  0x88   : > { %9896 = vmatmul.mubr.msk.bf16.gmra.mrb[52].mxu0 %vm492_vm6, %v9886_v27  ;;  %v877_v27 = vsel %vm12427_vm5, %v9842_v15, %v876_v6 }
  0x89   : > { %1178 = vmatprep.mubr.bf16.mxu0 %v15128_v4  ;;  %v9901_v31 = vcombine.low %v877_v27, %v880_v29 }
  0x8a   : > { %10011 = vmatmul.mubr.msk.bf16.gmra.mrb[20].mxu1 %vm492_vm6, %v12565_v24 }
  0x8b   : > { %2040 = vmatprep.mubr.bf16.mxu1 %v15128_v4 }
  0x90   : > { %9897 = vmatmul.mubr.msk.bf16.gmra.mrb[56].mxu0 %vm492_vm6, %v9887_v36  ;;  %v884_v36 = vsel %vm12427_vm5, %v9843_v33, %v883_v21  ;;  %v10053_v33 = vld [vmem:[%s12420_s25 + $0x2ac] sm:$0x3] }
  0x91   : > { %1188 = vmatprep.mubr.bf16.mxu0 %v15128_v4  ;;  %v9902_v40 = vcombine.low %v884_v36, %v887_v37  ;;  %v2392_v28 = vrot.slane %v10053_v33, 6  ;;  %v10055_v36 = vld [vmem:[%s12420_s25 + $0x2c4] sm:$0xf] }
  0x92   : > { %10012 = vmatmul.mubr.msk.bf16.gmra.mrb[24].mxu1 %vm492_vm6, %v12589_v48 }
  0x93   : > { %2050 = vmatprep.mubr.bf16.mxu1 %v15128_v4  ;;  %v2393_v39 = vsel %vm12427_vm5, %v2391_v23, %v2392_v28  ;;  %v10065_v23 = vld [vmem:[%s12420_s25 + $0x31c] sm:$0x3] }
  0x98   : > { %9898 = vmatmul.mubr.msk.bf16.gmra.mrb[60].mxu0 %vm492_vm6, %v9888_v49  ;;  %v894_v49 = vsel %vm12427_vm5, %v892_v44, %v893_v45  ;;  %v10056_v44 = vld [vmem:[%s12420_s25 + $0x2c8] sm:$0x3]  ;;  %v12851_v45 = vld.sshfl [vmem:[%s15121_s2 + $0x20] sm:$0x33 pattern:$0x76325410] }
  0x99   : > { %1294 = vmatprep.mubr.bf16.mxu0 %v15128_v4  ;;  %v9903_v53 = vcombine.low %v891_v47, %v894_v49  ;;  %v10076_v47 = vrot.slane %v10054_v43, 10  ;;  %v2399_v50 = vrot.slane %v10056_v44, 6 }
  0x9a   : > { %10013 = vmatmul.mubr.msk.bf16.gmra.mrb[28].mxu1 %vm492_vm6, %v12609_v5 }
  0x9b   : > { %2222 = vmatprep.mubr.bf16.mxu1 %v15128_v4 }
  0xa0   : > { %9909 = vmatmul.mubr.msk.bf16.vlgmr.msra.gmra.mrb[32].mxu0 %vm492_vm6, %v9899_v62 }
  0xa1   : > { %1304 = vmatprep.mubr.bf16.mxu0 %v15128_v4  ;;  %1473 = vmatpush1.bf16.msra.mxu0 %v1467_v7 }
  0xa2   : > { %10041 = vmatmul.mubr.msk.bf16.vlgmr.msra.gmra.mrb[0].mxu1 %vm492_vm6, %v12159_v0  ;;  %v9834_v0 = vld [vmem:[%s12420_s25 + $0x1fc] sm:$0xc] }
  0xa3   : > { %2509 = vmatpush1.bf16.msra.mxu1 %v2503_v58  ;;  %2232 = vmatprep.mubr.bf16.mxu1 %v15128_v4  ;;  %v9835_v58 = vld [vmem:[%s12420_s25 + $0x200] sm:$0xf]  ;;  %v9846_v6 = vrot.slane %v9834_v0, 10 }
  0xa4   : > { %10144 = vmatprep.subr.msk.bf16.mxu1 %vm517_vm0, %v2791_v22  ;;  %v904_v62 = vrot.slane %v9835_v58, 6  ;;  %v9838_v22 = vld [vmem:[%s12420_s25 + $0x21c] sm:$0xf]  ;;  %v10059_v58 = vld [vmem:[%s12420_s25 + $0x2e4] sm:$0x3] }
  0xa5   : > { %v911_v17 = vrot.slane %v9838_v22, 6  ;;  %v2406_v0 = vrot.slane %v10059_v58, 6  ;;  %v12169_v22 = vld [vmem:[%s12420_s25 + $0x194] sm:$0xff]  }
  0xa6   : > { %v906_v7 = vrot.slane %v904_v62, 4  ;;  %v905_v10 = vsel %vm12427_vm5, %v9846_v6, %v904_v62  ;;  %v2405_v62 = vrot.slane %v2403_v56, 4 }
  0xa7   : > { %v913_v18 = vrot.slane %v911_v17, 4 }
  0xa8   : > { %9910 = vmatmul.mubr.msk.bf16.gmra.mrb[36].mxu0 %vm492_vm6, %v9900_v13  ;;  %v908_v12 = vsel %vm12427_vm5, %v906_v7, %v907_v8  ;;  %v9837_v13 = vld [vmem:[%s12420_s25 + $0x218] sm:$0xc]  ;;  %v2407_v6 = vsel %vm12427_vm5, %v2405_v62, %v2406_v0  ;;  %v2410_v8 = vrot.slane %v10061_v2, 6  ;;  %v10066_v62 = vld [vmem:[%s12420_s25 + $0x330] sm:$0xc] }
  0xa9   : > { %1314 = vmatprep.mubr.bf16.mxu0 %v15128_v4  ;;  %v9905_v15 = vcombine.low %v905_v10, %v908_v12  ;;  %v9847_v16 = vrot.slane %v9837_v13, 10  ;;  %v10060_v7 = vld [vmem:[%s12420_s25 + $0x2f8] sm:$0xc]  ;;  %v10062_v10 = vld [vmem:[%s12420_s25 + $0x300] sm:$0x3] }
  0xaa   : > { %10042 = vmatmul.mubr.msk.bf16.gmra.mrb[4].mxu1 %vm492_vm6, %v12160_v14  ;;  %v9839_v14 = vld [vmem:[%s12420_s25 + $0x220] sm:$0x3]  ;;  %v10078_v13 = vrot.slane %v10060_v7, 10  ;;  %v10068_v7 = vld [vmem:[%s12420_s25 + $0x338] sm:$0x3] }
  0xab   : > { %2242 = vmatprep.mubr.bf16.mxu1 %v15128_v4  ;;  %v914_v21 = vrot.slane %v9839_v14, 6  ;;  %v912_v27 = vsel %vm12427_vm5, %v9847_v16, %v911_v17  ;;  %v637_v14 = vld [vmem:[%s15123_s4] ss:$4 sm:$0x3]  ;;  %v2413_v16 = vrot.slane %v10062_v10, 6 }
  0xad   : > { %v915_v29 = vsel %vm12427_vm5, %v913_v18, %v914_v21  ;;  %v681_v21 = vld [vmem:[%s15124_s5] ss:$4 sm:$0x3] }
  0xb0   : > { %9911 = vmatmul.mubr.msk.bf16.gmra.mrb[40].mxu0 %vm492_vm6, %v9901_v31  ;;  %v9906_v31 = vcombine.low %v912_v27, %v915_v29 }
  0xb1   : > { %1324 = vmatprep.mubr.bf16.mxu0 %v15128_v4 }
  0xb2   : > { %10043 = vmatmul.mubr.msk.bf16.gmra.mrb[8].mxu1 %vm492_vm6, %v12161_v32  ;;  %v10051_v32 = vld [vmem:[%s12420_s25 + $0x2a4] sm:$0xc] }
  0xb3   : > { %2252 = vmatprep.mubr.bf16.mxu1 %v15128_v4  ;;  %v10075_v35 = vrot.slane %v10051_v32, 10 }
  0xb5   : > { %v2390_v37 = vsel %vm12427_vm5, %v10075_v35, %v2389_v30  ;;  %v2411_v30 = vsel %vm12427_vm5, %v10078_v13, %v2410_v8  ;;  %v10063_v35 = vld [vmem:[%s12420_s25 + $0x314] sm:$0xc] }
  0xb6   : > { %v10084_v46 = vcombine.low %v2390_v37, %v2393_v39 }
  0xb8   : > { %9912 = vmatmul.mubr.msk.bf16.gmra.mrb[44].mxu0 %vm492_vm6, %v9902_v40  ;;  %v2396_v40 = vrot.slane %v10055_v36, 6 }
  0xb9   : > { %1334 = vmatprep.mubr.bf16.mxu0 %v15128_v4 }
  0xba   : > { %10044 = vmatmul.mubr.msk.bf16.gmra.mrb[12].mxu1 %vm492_vm6, %v12162_v41  ;;  %v12167_v41 = vld [vmem:[%s12420_s25 + $0x15c] sm:$0xff]   ;;  %v2398_v49 = vrot.slane %v2396_v40, 4  ;;  %v2397_v54 = vsel %vm12427_vm5, %v10076_v47, %v2396_v40 }
  0xbb   : > { %2262 = vmatprep.mubr.bf16.mxu1 %v15128_v4 }
  0xbc   : > { %v2400_v55 = vsel %vm12427_vm5, %v2398_v49, %v2399_v50  ;;  %v10079_v49 = vrot.slane %v10063_v35, 10 }
  0xbd   : > { %v10085_v59 = vcombine.low %v2397_v54, %v2400_v55 }
  0xc0   : > { %9913 = vmatmul.mubr.msk.bf16.gmra.mrb[48].mxu0 %vm492_vm6, %v9903_v53  ;;  %v3033_v53 = vcombine.high %v12851_v45, %v12851_v45 }
  0xc1   : > { %1344 = vmatprep.mubr.bf16.mxu0 %v15128_v4 }
  0xc2   : > { %10045 = vmatmul.mubr.msk.bf16.gmra.mrb[16].mxu1 %vm492_vm6, %v12163_v57  ;;  %v10057_v57 = vld [vmem:[%s12420_s25 + $0x2dc] sm:$0xc] }
  0xc3   : > { %2272 = vmatprep.mubr.bf16.mxu1 %v15128_v4  ;;  %v10077_v60 = vrot.slane %v10057_v57, 10 }
  0xc8   : > { %9914 = vmatmul.mubr.msk.bf16.gmra.mrb[52].mxu0 %vm492_vm6, %v9904_v3  ;;  %v2404_v3 = vsel %vm12427_vm5, %v10077_v60, %v2403_v56 }
  0xc9   : > { %1354 = vmatprep.mubr.bf16.mxu0 %v15128_v4  ;;  %v10086_v17 = vcombine.low %v2404_v3, %v2407_v6  ;;  %v12171_v6 = vld [vmem:[%s12420_s25 + $0x1cc] sm:$0xff]  }
  0xca   : > { %10046 = vmatmul.mubr.msk.bf16.gmra.mrb[20].mxu1 %vm492_vm6, %v12164_v9  ;;  %v639_v9 = vlaneseq }
  0xcb   : > { %2282 = vmatprep.mubr.bf16.mxu1 %v15128_v4 }
  0xcc   : > { %v640_v12 = vshrl.u32 %v639_v9, 7 }
  0xce   : > { %v12885_v18 = vsub.s32 0, %v640_v12  ;;  %v12900_v29 = vsub.s32 1, %v640_v12 }
  0xd0   : > { %9915 = vmatmul.mubr.msk.bf16.gmra.mrb[56].mxu0 %vm492_vm6, %v9905_v15  ;;  %v2412_v15 = vrot.slane %v2410_v8, 4  ;;  %15168 = vst [vmem:[#allocation12_spill] sm:$0xff] %v12885_v18  ;;  %v12894_v26 = vrot.slane %v637_v14, %v12885_v18  ;;  %v12898_v27 = vrot.slane %v681_v21, %v12885_v18  ;;  %15169 = vst [vmem:[#allocation13_spill] sm:$0xff] %v12900_v29 }
  0xd1   : > { %1364 = vmatprep.mubr.bf16.mxu0 %v15128_v4  ;;  %v12912_v37 = vrot.slane %v637_v14, %v12900_v29  ;;  %v12915_v39 = vrot.slane %v681_v21, %v12900_v29  ;;  %v10080_v14 = vrot.slane %v10066_v62, 10 }
  0xd2   : > { %10047 = vmatmul.mubr.msk.bf16.gmra.mrb[24].mxu1 %vm492_vm6, %v12165_v25  ;;  %v10064_v25 = vld [vmem:[%s12420_s25 + $0x318] sm:$0xf] }
  0xd3   : > { %2292 = vmatprep.mubr.bf16.mxu1 %v15128_v4  ;;  %v2417_v32 = vrot.slane %v10064_v25, 6 }
  0xd5   : > { %v2419_v50 = vrot.slane %v2417_v32, 4 }
  0xd8   : > { %9916 = vmatmul.mubr.msk.bf16.gmra.mrb[60].mxu0 %vm492_vm6, %v9906_v31  ;;  %v2414_v31 = vsel %vm12427_vm5, %v2412_v15, %v2413_v16 }
  0xd9   : > { %1504 = vmatprep.mubr.bf16.mxu0 %v15128_v4 }
  0xda   : > { %10048 = vmatmul.mubr.msk.bf16.gmra.mrb[28].mxu1 %vm492_vm6, %v12166_v34  ;;  %v12170_v34 = vld [vmem:[%s12420_s25 + $0x1b0] sm:$0xff]  }
  0xdb   : > { %2540 = vmatprep.mubr.bf16.mxu1 %v15128_v4 }
  0xe0   : > { %9944 = vmatmul.mubr.msk.bf16.vlgmr.msra.gmra.mrb[32].mxu0 %vm492_vm6, %v12167_v41  ;;  %v10087_v41 = vcombine.low %v2411_v30, %v2414_v31  ;;  %v2427_v30 = vrot.slane %v10068_v7, 6 }
  0xe1   : > { %1514 = vmatprep.mubr.bf16.mxu0 %v15128_v4 }
  0xe2   : > { %10094 = vmatmul.mubr.msk.bf16.vlgmr.msra.gmra.mrb[0].mxu1 %vm492_vm6, %v10084_v46 }
  0xe3   : > { %2823 = vmatpush1.bf16.msra.mxu1 %v2817_v51  ;;  %2550 = vmatprep.mubr.bf16.mxu1 %v15128_v4  ;;  %v2420_v51 = vrot.slane %v10065_v23, 6 }
  0xe4   : > { %10179 = vmatprep.subr.msk.bf16.mxu1 %vm517_vm0, %v3033_v53  ;;  %v10067_v53 = vld [vmem:[%s12420_s25 + $0x334] sm:$0xf] }
  0xe5   : > { %v2421_v60 = vsel %vm12427_vm5, %v2419_v50, %v2420_v51  ;;  %v2424_v0 = vrot.slane %v10067_v53, 6  ;;  %v10071_v50 = vld [vmem:[%s12420_s25 + $0x354] sm:$0x3] }
  0xe7   : > { %v2426_v25 = vrot.slane %v2424_v0, 4 }
  0xe8   : > { %9945 = vmatmul.mubr.msk.bf16.gmra.mrb[36].mxu0 %vm492_vm6, %v12168_v1 }
  0xe9   : > { %1524 = vmatprep.mubr.bf16.mxu0 %v15128_v4 }
  0xea   : > { %10095 = vmatmul.mubr.msk.bf16.gmra.mrb[4].mxu1 %vm492_vm6, %v10085_v59  ;;  %v2418_v59 = vsel %vm12427_vm5, %v10079_v49, %v2417_v32  ;;  %v12172_v49 = vld [vmem:[%s12420_s25 + $0x1e8] sm:$0xff]  }
  0xeb   : > { %2560 = vmatprep.mubr.bf16.mxu1 %v15128_v4  ;;  %v10088_v13 = vcombine.low %v2418_v59, %v2421_v60 }
  0xf0   : > { %9946 = vmatmul.mubr.msk.bf16.gmra.mrb[40].mxu0 %vm492_vm6, %v12169_v22 }
  0xf1   : > { %1534 = vmatprep.mubr.bf16.mxu0 %v15128_v4 }
  0xf2   : > { %10096 = vmatmul.mubr.msk.bf16.gmra.mrb[8].mxu1 %vm492_vm6, %v10086_v17 }
  0xf3   : > { %2570 = vmatprep.mubr.bf16.mxu1 %v15128_v4  ;;  %v558_v33 = vpop.f32.mrb[0].mxu0 }
  0xf4   : > { %v649_v28 = vmul.f32 %v12894_v26, %v558_v33  ;;  %v560_v36 = vpop.f32.mrb[1].mxu0  ;;  %v10070_v33 = vld [vmem:[%s12420_s25 + $0x350] sm:$0xf] }
  0xf5   : > { %v562_v40 = vpop.f32.mrb[2].mxu0  ;;  %v650_v44 = vmul.f32 %v12912_v37, %v560_v36 }
  0xf6   : > { %v693_v43 = vadd.f32 %v12898_v27, %v649_v28  ;;  %v651_v46 = vmul.f32 %v12894_v26, %v562_v40  ;;  %v564_v47 = vpop.f32.mrb[3].mxu0  ;;  %v2425_v40 = vsel %vm12427_vm5, %v10080_v14, %v2424_v0  ;;  %v2434_v0 = vrot.slane %v10071_v50, 6 }
  0xf7   : > { %v652_v52 = vmul.f32 %v12912_v37, %v564_v47  ;;  %v694_v55 = vadd.f32 %v12915_v39, %v650_v44  ;;  %v2431_v44 = vrot.slane %v10070_v33, 6 }
  0xf8   : > { %9947 = vmatmul.mubr.msk.bf16.gmra.mrb[44].mxu0 %vm492_vm6, %v12170_v34  ;;  %v725_v54 = vmax.f32 %v693_v43, 0.0  ;;  %v695_v56 = vadd.f32 %v12898_v27, %v651_v46  ;;  %v10069_v43 = vld [vmem:[%s12420_s25 + $0x34c] sm:$0xc] }
  0xf9   : > { %1544 = vmatprep.mubr.bf16.mxu0 %v15128_v4  ;;  %v696_v1 = vadd.f32 %v12915_v39, %v652_v52  ;;  %v726_v57 = vmax.f32 %v694_v55, 0.0  ;;  %v2433_v62 = vrot.slane %v2431_v44, 4 }
  0xfa   : > { %10097 = vmatmul.mubr.msk.bf16.gmra.mrb[12].mxu1 %vm492_vm6, %v10087_v41  ;;  %v727_v58 = vmax.f32 %v695_v56, 0.0  ;;  %v2428_v41 = vsel %vm12427_vm5, %v2426_v25, %v2427_v30  ;;  %v12173_v30 = vld [vmem:[%s12420_s25 + $0x204] sm:$0xff]  }
  0xfb   : > { %2580 = vmatprep.mubr.bf16.mxu1 %v15128_v4  ;;  %v728_v2 = vmax.f32 %v696_v1, 0.0  ;;  %v568_v3 = vpop.f32.mrb[4].mxu0  ;;  %v10089_v1 = vcombine.low %v2425_v40, %v2428_v41  ;;  %v2435_v14 = vsel %vm12427_vm5, %v2433_v62, %v2434_v0 }
  0xfc   : > { %v12936_v8 = vpack.c.bf16 %v727_v58, %v725_v54  ;;  %v653_v9 = vmul.f32 %v12894_v26, %v568_v3  ;;  %v570_v22 = vpop.f32.mrb[5].mxu0 }
  0xfd   : > { %v654_v10 = vmul.f32 %v12912_v37, %v570_v22  ;;  %v572_v12 = vpop.f32.mrb[6].mxu0  ;;  %v12940_v17 = vpack.c.bf16 %v728_v2, %v726_v57  ;;  %v10081_v57 = vrot.slane %v10069_v43, 10 }
  0xfe   : > { %v697_v15 = vadd.f32 %v12898_v27, %v653_v9  ;;  %v655_v16 = vmul.f32 %v12894_v26, %v572_v12  ;;  %v574_v21 = vpop.f32.mrb[7].mxu0 }
  0xff   : > { %v698_v31 = vadd.f32 %v12915_v39, %v654_v10  ;;  %v656_v32 = vmul.f32 %v12912_v37, %v574_v21 }
 0x100   : > { %9948 = vmatmul.mubr.msk.bf16.gmra.mrb[48].mxu0 %vm492_vm6, %v12171_v6  ;;  %v729_v34 = vmax.f32 %v697_v15, 0.0  ;;  %v699_v35 = vadd.f32 %v12898_v27, %v655_v16  ;;  %v10073_v6 = vld [vmem:[%s12420_s25 + $0x36c] sm:$0xf]  ;;  %v10072_v15 = vld [vmem:[%s12420_s25 + $0x368] sm:$0xc] }
 0x101   : > { %1554 = vmatprep.mubr.bf16.mxu0 %v15128_v4  ;;  %v730_v23 = vmax.f32 %v698_v31, 0.0  ;;  %v700_v28 = vadd.f32 %v12915_v39, %v656_v32  ;;  %v2438_v16 = vrot.slane %v10073_v6, 6  ;;  %v10074_v31 = vld [vmem:[%s12420_s25 + $0x370] sm:$0x3]  ;;  %v10082_v40 = vrot.slane %v10072_v15, 10 }
 0x102   : > { %10098 = vmatmul.mubr.msk.bf16.gmra.mrb[16].mxu1 %vm492_vm6, %v10088_v13  ;;  %v731_v36 = vmax.f32 %v699_v35, 0.0  ;;  %v2432_v13 = vsel %vm12427_vm5, %v10081_v57, %v2431_v44  ;;  %v10104_v6 = vld [vmem:[%s12420_s25 + $0x2b0] sm:$0x1] }
 0x103   : > { %2590 = vmatprep.mubr.bf16.mxu1 %v15128_v4  ;;  %v732_v46 = vmax.f32 %v700_v28, 0.0  ;;  %v578_v47 = vpop.f32.mrb[8].mxu0 }
 0x104   : > { %v657_v51 = vmul.f32 %v12894_v26, %v578_v47  ;;  %v580_v52 = vpop.f32.mrb[9].mxu0  ;;  %v12961_v53 = vpack.c.bf16 %v731_v36, %v729_v34  ;;  %v10090_v36 = vcombine.low %v2432_v13, %v2435_v14  ;;  %v2441_v47 = vrot.slane %v10074_v31, 6 }
 0x105   : > { %v658_v54 = vmul.f32 %v12912_v37, %v580_v52  ;;  %v582_v55 = vpop.f32.mrb[10].mxu0  ;;  %v12964_v56 = vpack.c.bf16 %v732_v46, %v730_v23  ;;  %v2440_v46 = vrot.slane %v2438_v16, 4  ;;  %v2706_v31 = vrot.slane %v10104_v6, 5 }
 0x106   : > { %v701_v58 = vadd.f32 %v12898_v27, %v657_v51  ;;  %v659_v59 = vmul.f32 %v12894_v26, %v582_v55  ;;  %v584_v60 = vpop.f32.mrb[11].mxu0  ;;  %v10103_v51 = vld [vmem:[%s12420_s25 + $0x2ac] sm:$0xf] }
 0x107   : > { %v702_v2 = vadd.f32 %v12915_v39, %v658_v54  ;;  %v660_v3 = vmul.f32 %v12912_v37, %v584_v60  ;;  %v10102_v60 = vld [vmem:[%s12420_s25 + $0x2a8] sm:$0xe]  ;;  %v2703_v62 = vrot.slane %v10103_v51, 5 }
 0x108   : > { %9949 = vmatmul.mubr.msk.bf16.gmra.mrb[52].mxu0 %vm492_vm6, %v12172_v49  ;;  %v733_v7 = vmax.f32 %v701_v58, 0.0  ;;  %v703_v9 = vadd.f32 %v12898_v27, %v659_v59  ;;  %v2439_v58 = vsel %vm12427_vm5, %v10082_v40, %v2438_v16  ;;  %v2442_v59 = vsel %vm12427_vm5, %v2440_v46, %v2441_v47  ;;  %v10105_v47 = vld [vmem:[%s12420_s25 + $0x2c4] sm:$0xe] }
 0x109   : > { %1564 = vmatprep.mubr.bf16.mxu0 %v15128_v4  ;;  %v734_v22 = vmax.f32 %v702_v2, 0.0  ;;  %v704_v10 = vadd.f32 %v12915_v39, %v660_v3  ;;  %v12174_v3 = vld [vmem:[%s12420_s25 + $0x220] sm:$0xff]   ;;  %v10091_v14 = vcombine.low %v2439_v58, %v2442_v59  ;;  %v10126_v15 = vrot.slane %v10102_v60, 9 }
 0x10a   : > { %10099 = vmatmul.mubr.msk.bf16.gmra.mrb[20].mxu1 %vm492_vm6, %v10089_v1  ;;  %v735_v12 = vmax.f32 %v703_v9, 0.0 }
 0x10b   : > { %2600 = vmatprep.mubr.bf16.mxu1 %v15128_v4  ;;  %v736_v21 = vmax.f32 %v704_v10, 0.0  ;;  %v588_v25 = vpop.f32.mrb[12].mxu0 }
 0x10c   : > { %v661_v32 = vmul.f32 %v12894_v26, %v588_v25  ;;  %v590_v33 = vpop.f32.mrb[13].mxu0  ;;  %v12985_v34 = vpack.c.bf16 %v735_v12, %v733_v7 }
 0x10d   : > { %v662_v35 = vmul.f32 %v12912_v37, %v590_v33  ;;  %v592_v23 = vpop.f32.mrb[14].mxu0  ;;  %v12988_v28 = vpack.c.bf16 %v736_v21, %v734_v22 }
 0x10e   : > { %v705_v41 = vadd.f32 %v12898_v27, %v661_v32  ;;  %v663_v43 = vmul.f32 %v12894_v26, %v592_v23  ;;  %v594_v44 = vpop.f32.mrb[15].mxu0 }
 0x10f   : > { %v706_v49 = vadd.f32 %v12915_v39, %v662_v35  ;;  %v664_v50 = vmul.f32 %v12912_v37, %v594_v44  ;;  %v10106_v35 = vld [vmem:[%s12420_s25 + $0x2c8] sm:$0xf]  ;;  %v2704_v44 = vsel %vm12412_vm3, %v10126_v15, %v2703_v62 }
 0x110   : > { %9950 = vmatmul.mubr.msk.bf16.gmra.mrb[56].mxu0 %vm492_vm6, %v12173_v30  ;;  %v737_v52 = vmax.f32 %v705_v41, 0.0  ;;  %v707_v54 = vadd.f32 %v12898_v27, %v663_v43  ;;  %v2705_v30 = vrot.slane %v2703_v62, 4  ;;  %v10127_v62 = vrot.slane %v10105_v47, 9 }
 0x111   : > { %1574 = vmatprep.mubr.bf16.mxu0 %v15128_v4  ;;  %v738_v55 = vmax.f32 %v706_v49, 0.0  ;;  %v708_v1 = vadd.f32 %v12915_v39, %v664_v50  ;;  %v2710_v49 = vrot.slane %v10106_v35, 5 }
 0x112   : > { %10100 = vmatmul.mubr.msk.bf16.gmra.mrb[24].mxu1 %vm492_vm6, %v10090_v36  ;;  %v739_v57 = vmax.f32 %v707_v54, 0.0  ;;  %v2707_v46 = vsel %vm12412_vm3, %v2705_v30, %v2706_v31 }
 0x113   : > { %2610 = vmatprep.mubr.bf16.mxu1 %v15128_v4  ;;  %v740_v0 = vmax.f32 %v708_v1, 0.0  ;;  %v598_v2 = vpop.f32.mrb[16].mxu0  ;;  %v10135_v60 = vcombine.low %v2704_v44, %v2707_v46  ;;  %v2712_v6 = vrot.slane %v2710_v49, 4  ;;  %v2711_v31 = vsel %vm12412_vm3, %v10127_v62, %v2710_v49  ;;  %v10112_v62 = vld [vmem:[%s12420_s25 + $0x300] sm:$0xf] }
 0x114   : > { %v665_v7 = vmul.f32 %v12894_v26, %v598_v2  ;;  %v600_v9 = vpop.f32.mrb[17].mxu0  ;;  %v13009_v22 = vpack.c.bf16 %v739_v57, %v737_v52  ;;  %v10107_v52 = vld [vmem:[%s12420_s25 + $0x2cc] sm:$0x1] }
 0x115   : > { %v666_v10 = vmul.f32 %v12912_v37, %v600_v9  ;;  %v602_v12 = vpop.f32.mrb[18].mxu0  ;;  %v13012_v13 = vpack.c.bf16 %v740_v0, %v738_v55 }
 0x116   : > { %v709_v16 = vadd.f32 %v12898_v27, %v665_v7  ;;  %v667_v21 = vmul.f32 %v12894_v26, %v602_v12  ;;  %v604_v25 = vpop.f32.mrb[19].mxu0  ;;  %v2713_v7 = vrot.slane %v10107_v52, 5  ;;  %v3059_v12 = vsel %vm517_vm0, %v12851_v45, 0 }
 0x117   : > { %v710_v32 = vadd.f32 %v12915_v39, %v666_v10  ;;  %v668_v33 = vmul.f32 %v12912_v37, %v604_v25 }
 0x118   : > { %9951 = vmatmul.mubr.msk.bf16.gmra.mrb[60].mxu0 %vm492_vm6, %v12174_v3  ;;  %v741_v23 = vmax.f32 %v709_v16, 0.0  ;;  %v711_v36 = vadd.f32 %v12898_v27, %v667_v21  ;;  %v2714_v45 = vsel %vm12412_vm3, %v2712_v6, %v2713_v7 }
 0x119   : > { %v742_v40 = vmax.f32 %v710_v32, 0.0  ;;  %v712_v41 = vadd.f32 %v12915_v39, %v668_v33  ;;  %v10108_v32 = vld [vmem:[%s12420_s25 + $0x2e0] sm:$0xe]  ;;  %v10136_v49 = vcombine.low %v2711_v31, %v2714_v45 }
 0x11a   : > { %10101 = vmatmul.mubr.msk.bf16.gmra.mrb[28].mxu1 %vm492_vm6, %v10091_v14  ;;  %v743_v43 = vmax.f32 %v711_v36, 0.0  ;;  %v10109_v14 = vld [vmem:[%s12420_s25 + $0x2e4] sm:$0xf]  ;;  %v10110_v36 = vld [vmem:[%s12420_s25 + $0x2e8] sm:$0x1] }
 0x11b   : > { %2854 = vmatprep.mubr.bf16.mxu1 %v15128_v4  ;;  %v744_v50 = vmax.f32 %v712_v41, 0.0  ;;  %v608_v51 = vpop.f32.mrb[20].mxu0  ;;  %v2717_v33 = vrot.slane %v10109_v14, 5  ;;  %v2724_v14 = vrot.slane %v10112_v62, 5 }
 0x11c   : > { %v669_v54 = vmul.f32 %v12894_v26, %v608_v51  ;;  %v610_v55 = vpop.f32.mrb[21].mxu0  ;;  %v13031_v1 = vpack.c.bf16 %v743_v43, %v741_v23 }
 0x11d   : > { %v670_v57 = vmul.f32 %v12912_v37, %v610_v55  ;;  %v612_v58 = vpop.f32.mrb[22].mxu0  ;;  %v13034_v59 = vpack.c.bf16 %v744_v50, %v742_v40  ;;  %v10128_v50 = vrot.slane %v10108_v32, 9  ;;  %v2719_v55 = vrot.slane %v2717_v33, 4 }
 0x11e   : > { %v713_v0 = vadd.f32 %v12898_v27, %v669_v54  ;;  %v671_v2 = vmul.f32 %v12894_v26, %v612_v58  ;;  %v614_v3 = vpop.f32.mrb[23].mxu0 }
 0x11f   : > { %v714_v9 = vadd.f32 %v12915_v39, %v670_v57  ;;  %v672_v10 = vmul.f32 %v12912_v37, %v614_v3  ;;  %v2720_v57 = vrot.slane %v10110_v36, 5 }
 0x120   : > { %v745_v15 = vmax.f32 %v713_v0, 0.0  ;;  %v715_v16 = vadd.f32 %v12898_v27, %v671_v2 }
 0x121   : > { %v746_v21 = vmax.f32 %v714_v9, 0.0  ;;  %v716_v25 = vadd.f32 %v12915_v39, %v672_v10  ;;  %v2718_v9 = vsel %vm12412_vm3, %v10128_v50, %v2717_v33  ;;  %v2721_v10 = vsel %vm12412_vm3, %v2719_v55, %v2720_v57 }
 0x122   : > { %10145 = vmatmul.mubr.msk.bf16.vlgmr.msra.gmra.mrb[0].mxu1 %vm492_vm6, %v10135_v60  ;;  %v747_v30 = vmax.f32 %v715_v16, 0.0  ;;  %v10137_v33 = vcombine.low %v2718_v9, %v2721_v10  ;;  %v10118_v10 = vld [vmem:[%s12420_s25 + $0x338] sm:$0xf] }
 0x123   : > { %3065 = vmatpush1.bf16.msra.mxu1 %v3059_v12  ;;  %2864 = vmatprep.mubr.bf16.mxu1 %v15128_v4  ;;  %v748_v35 = vmax.f32 %v716_v25, 0.0  ;;  %v618_v23 = vpop.f32.mrb[24].mxu0  ;;  %v10111_v12 = vld [vmem:[%s12420_s25 + $0x2fc] sm:$0xe] }
 0x124   : > { %v673_v40 = vmul.f32 %v12894_v26, %v618_v23  ;;  %v620_v41 = vpop.f32.mrb[25].mxu0  ;;  %v13054_v43 = vpack.c.bf16 %v747_v30, %v745_v15  ;;  %v10129_v23 = vrot.slane %v10111_v12, 9 }
 0x125   : > { %v674_v44 = vmul.f32 %v12912_v37, %v620_v41  ;;  %v622_v46 = vpop.f32.mrb[26].mxu0  ;;  %v13057_v47 = vpack.c.bf16 %v748_v35, %v746_v21  ;;  %v10113_v21 = vld [vmem:[%s12420_s25 + $0x304] sm:$0x1] }
 0x126   : > { %v717_v51 = vadd.f32 %v12898_v27, %v673_v40  ;;  %v675_v52 = vmul.f32 %v12894_v26, %v622_v46  ;;  %v624_v54 = vpop.f32.mrb[27].mxu0  ;;  %v2727_v46 = vrot.slane %v10113_v21, 5  ;;  %v10119_v21 = vld [vmem:[%s12420_s25 + $0x33c] sm:$0x1] }
 0x127   : > { %v718_v58 = vadd.f32 %v12915_v39, %v674_v44  ;;  %v676_v60 = vmul.f32 %v12912_v37, %v624_v54  ;;  %v2726_v44 = vrot.slane %v2724_v14, 4 }
 0x128   : > { %v749_v0 = vmax.f32 %v717_v51, 0.0  ;;  %v719_v2 = vadd.f32 %v12898_v27, %v675_v52  ;;  %v10115_v51 = vld [vmem:[%s12420_s25 + $0x31c] sm:$0xf] }
 0x129   : > { %v750_v3 = vmax.f32 %v718_v58, 0.0  ;;  %v720_v6 = vadd.f32 %v12915_v39, %v676_v60  ;;  %v2725_v58 = vsel %vm12412_vm3, %v10129_v23, %v2724_v14  ;;  %v2728_v60 = vsel %vm12412_vm3, %v2726_v44, %v2727_v46  ;;  %v10122_v44 = vld [vmem:[%s12420_s25 + $0x358] sm:$0x1] }
 0x12a   : > { %10146 = vmatmul.mubr.msk.bf16.gmra.mrb[4].mxu1 %vm492_vm6, %v10136_v49  ;;  %v751_v7 = vmax.f32 %v719_v2, 0.0 }
 0x12b   : > { %2874 = vmatprep.mubr.bf16.mxu1 %v15128_v4  ;;  %v752_v15 = vmax.f32 %v720_v6, 0.0  ;;  %v628_v16 = vpop.f32.mrb[28].mxu0 }
 0x12c   : > { %v677_v25 = vmul.f32 %v12894_v26, %v628_v16  ;;  %v630_v30 = vpop.f32.mrb[29].mxu0  ;;  %v13075_v31 = vpack.c.bf16 %v751_v7, %v749_v0  ;;  %v10116_v0 = vld [vmem:[%s12420_s25 + $0x320] sm:$0x1]  ;;  %v10117_v16 = vld [vmem:[%s12420_s25 + $0x334] sm:$0xe] }
 0x12d   : > { %v678_v45 = vmul.f32 %v12912_v37, %v630_v30  ;;  %v632_v32 = vpop.f32.mrb[30].mxu0  ;;  %v13078_v35 = vpack.c.bf16 %v752_v15, %v750_v3  ;;  %v10138_v3 = vcombine.low %v2725_v58, %v2728_v60  ;;  %v2734_v9 = vrot.slane %v10116_v0, 5  ;;  %v10125_v58 = vld [vmem:[%s12420_s25 + $0x374] sm:$0x1] }
 0x12e   : > { %15170 = vst [vmem:[#allocation14_spill] sm:$0xff] %v13075_v31  ;;  %v721_v36 = vadd.f32 %v12898_v27, %v677_v25  ;;  %v679_v40 = vmul.f32 %v12894_v26, %v632_v32  ;;  %v634_v41 = vpop.f32.mrb[31].mxu0  ;;  %v2738_v15 = vrot.slane %v10118_v10, 5  ;;  %v10131_v30 = vrot.slane %v10117_v16, 9  ;;  %v12177_v10 = vld [vmem:[%s12420_s25 + $0x2e4] sm:$0xff]  }
 0x12f   : > { %15171 = vst [vmem:[#allocation15_spill] sm:$0xff] %v13078_v35  ;;  %v722_v49 = vadd.f32 %v12915_v39, %v678_v45  ;;  %v680_v50 = vmul.f32 %v12912_v37, %v634_v41  ;;  %v2731_v37 = vrot.slane %v10115_v51, 5  ;;  %v2741_v32 = vrot.slane %v10119_v21, 5  ;;  %v10120_v41 = vld [vmem:[%s12420_s25 + $0x350] sm:$0xe]  ;;  %v12186_v16 = vld [vmem:[%s15122_s3 + $0x88] sm:$0xff]  }
 0x130   : > { %v753_v52 = vmax.f32 %v721_v36, 0.0  ;;  %v723_v54 = vadd.f32 %v12898_v27, %v679_v40  ;;  %v10114_v27 = vld [vmem:[%s12420_s25 + $0x318] sm:$0xe]  ;;  %v2740_v45 = vrot.slane %v2738_v15, 4  ;;  %v2739_v23 = vsel %vm12412_vm3, %v10131_v30, %v2738_v15  ;;  %v12185_v15 = vld [vmem:[%s15122_s3 + $0xc8] sm:$0xff]   ;;  %v12187_v21 = vld [vmem:[%s15122_s3 + $0xd0] sm:$0xff]  }
 0x131   : > { %v754_v55 = vmax.f32 %v722_v49, 0.0  ;;  %v724_v57 = vadd.f32 %v12915_v39, %v680_v50  ;;  %v10130_v6 = vrot.slane %v10114_v27, 9  ;;  %v2733_v7 = vrot.slane %v2731_v37, 4  ;;  %v12178_v30 = vld [vmem:[%s12420_s25 + $0x300] sm:$0xff]  }
 0x132   : > { %10147 = vmatmul.mubr.msk.bf16.gmra.mrb[8].mxu1 %vm492_vm6, %v10137_v33  ;;  %v755_v26 = vmax.f32 %v723_v54, 0.0  ;;  %v10121_v33 = vld [vmem:[%s12420_s25 + $0x354] sm:$0xf]  ;;  %v2742_v36 = vsel %vm12412_vm3, %v2740_v45, %v2741_v32  ;;  %v10132_v49 = vrot.slane %v10120_v41, 9  ;;  %v2748_v51 = vrot.slane %v10122_v44, 5  ;;  %v12189_v45 = vld [vmem:[%s15122_s3 + $0xd8] sm:$0xff]  }
 0x133   : > { %2884 = vmatprep.mubr.bf16.mxu1 %v15128_v4  ;;  %v756_v62 = vmax.f32 %v724_v57, 0.0  ;;  %v2732_v12 = vsel %vm12412_vm3, %v10130_v6, %v2731_v37  ;;  %v2735_v14 = vsel %vm12412_vm3, %v2733_v7, %v2734_v9  ;;  %v2745_v40 = vrot.slane %v10121_v33, 5  ;;  %v12175_v7 = vld [vmem:[%s12420_s25 + $0x2ac] sm:$0xff]   ;;  %v12190_v32 = vld [vmem:[%s15122_s3 + $0x98] sm:$0xff]   ;;  %v12191_v33 = vld [vmem:[%s15122_s3 + $0xe0] sm:$0xff]  }
 0x134   : > { %v13095_v2 = vpack.c.bf16 %v755_v26, %v753_v52  ;;  %v10139_v25 = vcombine.low %v2732_v12, %v2735_v14  ;;  %v10140_v46 = vcombine.low %v2739_v23, %v2742_v36  ;;  %v10124_v52 = vld [vmem:[%s12420_s25 + $0x370] sm:$0xf]  ;;  %v10123_v26 = vld [vmem:[%s12420_s25 + $0x36c] sm:$0xe]  ;;  %v2755_v27 = vrot.slane %v10125_v58, 5  ;;  %v12183_v12 = vld [vmem:[%s15122_s3 + $0xc0] sm:$0xff]  }
 0x135   : > { %v13097_v39 = vpack.c.bf16 %v756_v62, %v754_v55  ;;  %v2747_v50 = vrot.slane %v2745_v40, 4  ;;  %v2746_v54 = vsel %vm12412_vm3, %v10132_v49, %v2745_v40  ;;  %v2752_v57 = vrot.slane %v10124_v52, 5  ;;  %v12176_v9 = vld [vmem:[%s12420_s25 + $0x2c8] sm:$0xff]   ;;  %v12184_v14 = vld [vmem:[%s15122_s3 + $0x80] sm:$0xff]   ;;  %11093 = vmatprep.subr.bf16.mxu0 %v12183_v12  ;;  %v12195_v44 = vld [vmem:[%s15122_s3 + $0xf0] sm:$0xff]  }
 0x136   : > { %15172 = vst [vmem:[#allocation16_spill] sm:$0xff] %v13095_v2  ;;  %v10133_v37 = vrot.slane %v10123_v26, 9  ;;  %11094 = vmatpush3.bf16.msra.mxu0 %v12184_v14  ;;  %v12192_v23 = vld [vmem:[%s15122_s3 + $0xa0] sm:$0xff]   ;;  %v12193_v40 = vld [vmem:[%s15122_s3 + $0xe8] sm:$0xff]   ;;  %v12180_v49 = vld [vmem:[%s12420_s25 + $0x338] sm:$0xff]  }
 0x137   : > { %15173 = vst [vmem:[#allocation17_spill] sm:$0xff] %v13097_v39  ;;  %v2749_v55 = vsel %vm12412_vm3, %v2747_v50, %v2748_v51  ;;  %v2754_v62 = vrot.slane %v2752_v57, 4  ;;  %11095 = vmatprep.subr.bf16.mxu0 %v12185_v15  ;;  %v12179_v36 = vld [vmem:[%s12420_s25 + $0x31c] sm:$0xff]   ;;  %v12194_v41 = vld [vmem:[%s15122_s3 + $0xa8] sm:$0xff]   ;;  %v12181_v50 = vld [vmem:[%s12420_s25 + $0x354] sm:$0xff]  }
 0x138   : > { %v10141_v60 = vcombine.low %v2746_v54, %v2749_v55  ;;  %v2753_v0 = vsel %vm12412_vm3, %v10133_v37, %v2752_v57  ;;  %v12182_v51 = vld [vmem:[%s12420_s25 + $0x370] sm:$0xff]  }
 0x13a   : > { %10148 = vmatmul.mubr.msk.bf16.gmra.mrb[12].mxu1 %vm492_vm6, %v10138_v3  ;;  %v2756_v3 = vsel %vm12412_vm3, %v2754_v62, %v2755_v27  ;;  %11096 = vmatpush3.bf16.msra.mxu0 %v12186_v16  ;;  %v12197_v62 = vld [vmem:[%s15122_s3 + $0xf8] sm:$0xff]  }
 0x13b   : > { %2894 = vmatprep.mubr.bf16.mxu1 %v15128_v4  ;;  %v10142_v6 = vcombine.low %v2753_v0, %v2756_v3  ;;  %11097 = vmatprep.subr.bf16.mxu0 %v12187_v21  ;;  %v12198_v27 = vld [vmem:[%s15122_s3 + $0xb8] sm:$0xff]  }
 0x142   : > { %10149 = vmatmul.mubr.msk.bf16.gmra.mrb[16].mxu1 %vm492_vm6, %v10139_v25  ;;  %v12188_v25 = vld [vmem:[%s15122_s3 + $0x90] sm:$0xff]  }
 0x143   : > { %2904 = vmatprep.mubr.bf16.mxu1 %v15128_v4  ;;  %11098 = vmatpush3.bf16.msra.mxu0 %v12188_v25 }
 0x144   : > { %11099 = vmatprep.subr.bf16.mxu0 %v12189_v45 }
 0x147   : > { %11100 = vmatpush3.bf16.msra.mxu0 %v12190_v32 }
 0x148   : > { %11101 = vmatprep.subr.bf16.mxu0 %v12191_v33 }
 0x14a   : > { %10150 = vmatmul.mubr.msk.bf16.gmra.mrb[20].mxu1 %vm492_vm6, %v10140_v46  ;;  %v12196_v46 = vld [vmem:[%s15122_s3 + $0xb0] sm:$0xff]  }
 0x14b   : > { %2914 = vmatprep.mubr.bf16.mxu1 %v15128_v4  ;;  %11102 = vmatpush3.bf16.msra.mxu0 %v12192_v23 }
 0x14c   : > { %11103 = vmatprep.subr.bf16.mxu0 %v12193_v40 }
 0x14f   : > { %11104 = vmatpush3.bf16.msra.mxu0 %v12194_v41 }
 0x150   : > { %11105 = vmatprep.subr.bf16.mxu0 %v12195_v44 }
 0x152   : > { %10151 = vmatmul.mubr.msk.bf16.gmra.mrb[24].mxu1 %vm492_vm6, %v10141_v60 }
 0x153   : > { %2924 = vmatprep.mubr.bf16.mxu1 %v15128_v4  ;;  %11106 = vmatpush3.bf16.msra.mxu0 %v12196_v46 }
 0x154   : > { %11107 = vmatprep.subr.bf16.mxu0 %v12197_v62  ;;  %v10188_v62 = vld [vmem:[%s15123_s4 + $0x1] ss:$4 sm:$0x3] }
 0x155   : > { %v13270_v19 = vrot.slane %v10188_v62, %v12900_v29 }
 0x157   : > { %11108 = vmatpush3.bf16.msra.mxu0 %v12198_v27  ;;  %v10189_v27 = vld [vmem:[%s15124_s5 + $0x1] ss:$4 sm:$0x3] }
 0x158   : > { %v13273_v48 = vrot.slane %v10189_v27, %v12885_v18  ;;  %v13276_v42 = vrot.slane %v10189_v27, %v12900_v29 }
 0x15a   : > { %10152 = vmatmul.mubr.msk.bf16.gmra.mrb[28].mxu1 %vm492_vm6, %v10142_v6 }
 0x15b   : > { %3096 = vmatprep.mubr.bf16.mxu1 %v15128_v4 }
 0x162   : > { %10180 = vmatmul.mubr.msk.bf16.vlgmr.msra.gmra.mrb[0].mxu1 %vm492_vm6, %v12175_v7 }
 0x163   : > { %3106 = vmatprep.mubr.bf16.mxu1 %v15128_v4 }
 0x16a   : > { %10181 = vmatmul.mubr.msk.bf16.gmra.mrb[4].mxu1 %vm492_vm6, %v12176_v9  ;;  %v12199_v9 = vld [vmem:[%s15122_s3 + $0x40] sm:$0xff]  }
 0x16b   : > { %3116 = vmatprep.mubr.bf16.mxu1 %v15128_v4  ;;  %11157 = vmatprep.subr.bf16.mxu0 %v12199_v9  ;;  %v13267_v9 = vrot.slane %v10188_v62, %v12885_v18 }
 0x172   : > { %10182 = vmatmul.mubr.msk.bf16.gmra.mrb[8].mxu1 %vm492_vm6, %v12177_v10 }
 0x173   : > { %3126 = vmatprep.mubr.bf16.mxu1 %v15128_v4 }
 0x17a   : > { %10183 = vmatmul.mubr.msk.bf16.gmra.mrb[12].mxu1 %vm492_vm6, %v12178_v30 }
 0x17b   : > { %3136 = vmatprep.mubr.bf16.mxu1 %v15128_v4 }
 0x182   : > { %10184 = vmatmul.mubr.msk.bf16.gmra.mrb[16].mxu1 %vm492_vm6, %v12179_v36 }
 0x183   : > { %3146 = vmatprep.mubr.bf16.mxu1 %v15128_v4 }
 0x18a   : > { %10185 = vmatmul.mubr.msk.bf16.gmra.mrb[20].mxu1 %vm492_vm6, %v12180_v49 }
 0x18b   : > { %3156 = vmatprep.mubr.bf16.mxu1 %v15128_v4 }
 0x192   : > { %10186 = vmatmul.mubr.msk.bf16.gmra.mrb[24].mxu1 %vm492_vm6, %v12181_v50 }
 0x193   : > { %3166 = vmatprep.mubr.bf16.mxu1 %v15128_v4 }
 0x19a   : > { %10187 = vmatmul.mubr.msk.bf16.gmra.mrb[28].mxu1 %vm492_vm6, %v12182_v51 }
 0x1b3   : > { %v1506_v52 = vpop.f32.mrb[32].mxu0 }
 0x1b4   : > { %v1508_v54 = vpop.f32.mrb[33].mxu0 }
 0x1b5   : > { %v1510_v55 = vpop.f32.mrb[34].mxu0 }
 0x1b6   : > { %v1512_v57 = vpop.f32.mrb[35].mxu0 }
 0x1bb   : > { %v1516_v26 = vpop.f32.mrb[36].mxu0 }
 0x1bc   : > { %v1518_v58 = vpop.f32.mrb[37].mxu0 }
 0x1bd   : > { %v13199_v60 = vpop.f32.mrb[38].mxu0 }
 0x1be   : > { %v13201_v37 = vpop.f32.mrb[39].mxu0 }
 0x1c3   : > { %v13209_v0 = vpop.f32.mrb[40].mxu0 }
 0x1c4   : > { %v13211_v3 = vpop.f32.mrb[41].mxu0 }
 0x1c5   : > { %v13213_v6 = vpop.f32.mrb[42].mxu0 }
 0x1c6   : > { %v13215_v7 = vpop.f32.mrb[43].mxu0 }
 0x1cb   : > { %v13220_v10 = vpop.f32.mrb[44].mxu0 }
 0x1cc   : > { %v13222_v12 = vpop.f32.mrb[45].mxu0 }
 0x1cd   : > { %v13224_v14 = vpop.f32.mrb[46].mxu0 }
 0x1ce   : > { %v13226_v15 = vpop.f32.mrb[47].mxu0 }
 0x1d3   : > { %v13228_v16 = vpop.f32.mrb[48].mxu0 }
 0x1d4   : > { %v13230_v21 = vpop.f32.mrb[49].mxu0 }
 0x1d5   : > { %v13232_v25 = vpop.f32.mrb[50].mxu0 }
 0x1d6   : > { %v13234_v30 = vpop.f32.mrb[51].mxu0 }
 0x1db   : > { %v13236_v45 = vpop.f32.mrb[52].mxu0 }
 0x1dc   : > { %v13238_v32 = vpop.f32.mrb[53].mxu0 }
 0x1dd   : > { %v13240_v33 = vpop.f32.mrb[54].mxu0 }
 0x1de   : > { %v13242_v23 = vpop.f32.mrb[55].mxu0 }
 0x1e3   : > { %v13244_v36 = vpop.f32.mrb[56].mxu0 }
 0x1e4   : > { %v13246_v40 = vpop.f32.mrb[57].mxu0 }
 0x1e5   : > { %v13248_v41 = vpop.f32.mrb[58].mxu0 }
 0x1e6   : > { %v13250_v44 = vpop.f32.mrb[59].mxu0 }
 0x1eb   : > { %v13252_v46 = vpop.f32.mrb[60].mxu0 }
 0x1ec   : > { %v13254_v49 = vpop.f32.mrb[61].mxu0 }
 0x1ed   : > { %v13256_v50 = vpop.f32.mrb[62].mxu0 }
 0x1ee   : > { %v13258_v51 = vpop.f32.mrb[63].mxu0 }
 0x235   : > { %v3098_v4 = vpop.f32.mrb[0].mxu1 }
 0x236   : > { %v11349_v5 = vadd.f32 %v3098_v4, %v1506_v52  ;;  %v3100_v24 = vpop.f32.mrb[1].mxu1 }
 0x237   : > { %v11350_v63 = vadd.f32 %v3100_v24, %v1508_v54  ;;  %v3102_v20 = vpop.f32.mrb[2].mxu1 }
 0x238   : > { %v3222_v61 = vmul.f32 %v11349_v5, %v13267_v9  ;;  %v11351_v38 = vadd.f32 %v3102_v20, %v1510_v55  ;;  %v3104_v11 = vpop.f32.mrb[3].mxu1 }
 0x239   : > { %v3223_v2 = vmul.f32 %v11350_v63, %v13270_v19  ;;  %v11352_v39 = vadd.f32 %v3104_v11, %v1512_v57 }
 0x23a   : > { %v3267_v62 = vadd.f32 %v13273_v48, %v3222_v61  ;;  %v3224_v4 = vmul.f32 %v11351_v38, %v13267_v9 }
 0x23b   : > { %v3268_v52 = vadd.f32 %v13276_v42, %v3223_v2  ;;  %v3225_v18 = vmul.f32 %v11352_v39, %v13270_v19 }
 0x23c   : > { %v3269_v24 = vadd.f32 %v13273_v48, %v3224_v4  ;;  %v3299_v29 = vmax.f32 %v3267_v62, 0.0 }
 0x23d   : > { %v3270_v54 = vadd.f32 %v13276_v42, %v3225_v18  ;;  %v3108_v27 = vpop.f32.mrb[4].mxu1  ;;  %v3300_v31 = vmax.f32 %v3268_v52, 0.0 }
 0x23e   : > { %v3301_v5 = vmax.f32 %v3269_v24, 0.0  ;;  %v11353_v20 = vadd.f32 %v3108_v27, %v1516_v26  ;;  %v3110_v55 = vpop.f32.mrb[5].mxu1  ;;  %v12200_v26 = vld [vmem:[%s15122_s3] sm:$0xff]   ;;  %v12202_v24 = vld [vmem:[%s15122_s3 + $0x8] sm:$0xff]  }
 0x23f   : > { %v3302_v63 = vmax.f32 %v3270_v54, 0.0  ;;  %v11354_v11 = vadd.f32 %v3110_v55, %v1518_v58  ;;  %v3112_v57 = vpop.f32.mrb[6].mxu1  ;;  %v12203_v55 = vld [vmem:[%s15122_s3 + $0x50] sm:$0xff]  }
 0x240   : > { %v3331_v61 = vpack.c.bf16 %v3301_v5, %v3299_v29  ;;  %v3226_v38 = vmul.f32 %v11353_v20, %v13267_v9  ;;  %v11355_v2 = vadd.f32 %v3112_v57, %v13199_v60  ;;  %v3114_v35 = vpop.f32.mrb[7].mxu1  ;;  %v12201_v29 = vld [vmem:[%s15122_s3 + $0x48] sm:$0xff]  }
 0x241   : > { %v3227_v39 = vmul.f32 %v11354_v11, %v13270_v19  ;;  %v11356_v4 = vadd.f32 %v3114_v35, %v13201_v37  ;;  %v3332_v18 = vpack.c.bf16 %v3302_v63, %v3300_v31 }
 0x242   : > { %v3271_v62 = vadd.f32 %v13273_v48, %v3226_v38  ;;  %v3228_v58 = vmul.f32 %v11355_v2, %v13267_v9 }
 0x243   : > { %v3272_v60 = vadd.f32 %v13276_v42, %v3227_v39  ;;  %v3229_v52 = vmul.f32 %v11356_v4, %v13270_v19  ;;  %3508 = vmatprep.mubr.bf16.mxu0 %v3332_v18 }
 0x244   : > { %v3273_v35 = vadd.f32 %v13273_v48, %v3228_v58  ;;  %3509 = vmatmul.mubr.bf16.vlgmr.msra.gmra.mrb[64].mxu0 %v3331_v61  ;;  %v3303_v54 = vmax.f32 %v3271_v62, 0.0  ;;  %v12204_v62 = vld [vmem:[%s15122_s3 + $0x10] sm:$0xff]  }
 0x245   : > { %v3274_v31 = vadd.f32 %v13276_v42, %v3229_v52  ;;  %11158 = vmatpush3.bf16.msra.mxu0 %v12200_v26  ;;  %v3118_v37 = vpop.f32.mrb[8].mxu1  ;;  %v3304_v63 = vmax.f32 %v3272_v60, 0.0 }
 0x246   : > { %v3305_v27 = vmax.f32 %v3273_v35, 0.0  ;;  %v11357_v5 = vadd.f32 %v3118_v37, %v13209_v0  ;;  %v3120_v20 = vpop.f32.mrb[9].mxu1  ;;  %11159 = vmatprep.subr.bf16.mxu0 %v12201_v29 }
 0x247   : > { %v3306_v11 = vmax.f32 %v3274_v31, 0.0  ;;  %v11358_v57 = vadd.f32 %v3120_v20, %v13211_v3  ;;  %v3122_v61 = vpop.f32.mrb[10].mxu1  ;;  %v12206_v31 = vld [vmem:[%s15122_s3 + $0x18] sm:$0xff]  }
 0x248   : > { %v3230_v38 = vmul.f32 %v11357_v5, %v13267_v9  ;;  %v11359_v2 = vadd.f32 %v3122_v61, %v13213_v6  ;;  %v3124_v39 = vpop.f32.mrb[11].mxu1  ;;  %v3333_v4 = vpack.c.bf16 %v3305_v27, %v3303_v54  ;;  %v12205_v6 = vld [vmem:[%s15122_s3 + $0x58] sm:$0xff]   ;;  %v12207_v5 = vld [vmem:[%s15122_s3 + $0x60] sm:$0xff]  }
 0x249   : > { %v3231_v18 = vmul.f32 %v11358_v57, %v13270_v19  ;;  %v11360_v0 = vadd.f32 %v3124_v39, %v13215_v7  ;;  %v3334_v26 = vpack.c.bf16 %v3306_v11, %v3304_v63  ;;  %11160 = vmatpush3.bf16.msra.mxu0 %v12202_v24 }
 0x24a   : > { %v3275_v58 = vadd.f32 %v13273_v48, %v3230_v38  ;;  %v3232_v3 = vmul.f32 %v11359_v2, %v13267_v9  ;;  %11161 = vmatprep.subr.bf16.mxu0 %v12203_v55 }
 0x24b   : > { %v3276_v29 = vadd.f32 %v13276_v42, %v3231_v18  ;;  %v3233_v60 = vmul.f32 %v11360_v0, %v13270_v19  ;;  %3516 = vmatprep.mubr.bf16.mxu0 %v3334_v26  ;;  %v12208_v18 = vld [vmem:[%s15122_s3 + $0x20] sm:$0xff]  }
 0x24c   : > { %v3277_v7 = vadd.f32 %v13273_v48, %v3232_v3  ;;  %3517 = vmatmul.mubr.bf16.gmra.mrb[68].mxu0 %v3333_v4  ;;  %v3307_v37 = vmax.f32 %v3275_v58, 0.0 }
 0x24d   : > { %v3278_v52 = vadd.f32 %v13276_v42, %v3233_v60  ;;  %v3128_v35 = vpop.f32.mrb[12].mxu1  ;;  %11162 = vmatpush3.bf16.msra.mxu0 %v12204_v62  ;;  %v3308_v20 = vmax.f32 %v3276_v29, 0.0 }
 0x24e   : > { %v3309_v24 = vmax.f32 %v3277_v7, 0.0  ;;  %v11361_v54 = vadd.f32 %v3128_v35, %v13220_v10  ;;  %v3130_v27 = vpop.f32.mrb[13].mxu1  ;;  %11163 = vmatprep.subr.bf16.mxu0 %v12205_v6  ;;  %v12210_v6 = vld [vmem:[%s15122_s3 + $0x28] sm:$0xff]   ;;  %v12211_v35 = vld [vmem:[%s15122_s3 + $0x70] sm:$0xff]  }
 0x24f   : > { %v3310_v55 = vmax.f32 %v3278_v52, 0.0  ;;  %v11362_v63 = vadd.f32 %v3130_v27, %v13222_v12  ;;  %v3132_v11 = vpop.f32.mrb[14].mxu1 }
 0x250   : > { %v3234_v57 = vmul.f32 %v11361_v54, %v13267_v9  ;;  %v11363_v61 = vadd.f32 %v3132_v11, %v13224_v14  ;;  %v3134_v38 = vpop.f32.mrb[15].mxu1  ;;  %v3335_v2 = vpack.c.bf16 %v3309_v24, %v3307_v37  ;;  %v12209_v14 = vld [vmem:[%s15122_s3 + $0x68] sm:$0xff]  }
 0x251   : > { %v3235_v39 = vmul.f32 %v11362_v63, %v13270_v19  ;;  %v11364_v10 = vadd.f32 %v3134_v38, %v13226_v15  ;;  %v3336_v4 = vpack.c.bf16 %v3310_v55, %v3308_v20  ;;  %11164 = vmatpush3.bf16.msra.mxu0 %v12206_v31 }
 0x252   : > { %v3279_v0 = vadd.f32 %v13273_v48, %v3234_v57  ;;  %v3236_v12 = vmul.f32 %v11363_v61, %v13267_v9  ;;  %11165 = vmatprep.subr.bf16.mxu0 %v12207_v5  ;;  %v12212_v57 = vld [vmem:[%s15122_s3 + $0x30] sm:$0xff]  }
 0x253   : > { %v3280_v26 = vadd.f32 %v13276_v42, %v3235_v39  ;;  %v3237_v62 = vmul.f32 %v11364_v10, %v13270_v19  ;;  %3524 = vmatprep.mubr.bf16.mxu0 %v3336_v4 }
 0x254   : > { %v3281_v15 = vadd.f32 %v13273_v48, %v3236_v12  ;;  %3525 = vmatmul.mubr.bf16.gmra.mrb[72].mxu0 %v3335_v2  ;;  %v3311_v29 = vmax.f32 %v3279_v0, 0.0 }
 0x255   : > { %v3282_v58 = vadd.f32 %v13276_v42, %v3237_v62  ;;  %v3138_v3 = vpop.f32.mrb[16].mxu1  ;;  %11166 = vmatpush3.bf16.msra.mxu0 %v12208_v18  ;;  %v3312_v31 = vmax.f32 %v3280_v26, 0.0  ;;  %v12214_v18 = vld [vmem:[%s15122_s3 + $0x38] sm:$0xff]  }
 0x256   : > { %v3313_v60 = vmax.f32 %v3281_v15, 0.0  ;;  %v11365_v7 = vadd.f32 %v3138_v3, %v13228_v16  ;;  %v3140_v52 = vpop.f32.mrb[17].mxu1  ;;  %11167 = vmatprep.subr.bf16.mxu0 %v12209_v14 }
 0x257   : > { %v3314_v37 = vmax.f32 %v3282_v58, 0.0  ;;  %v11366_v24 = vadd.f32 %v3140_v52, %v13230_v21  ;;  %v3142_v54 = vpop.f32.mrb[18].mxu1 }
 0x258   : > { %v3238_v27 = vmul.f32 %v11365_v7, %v13267_v9  ;;  %v11367_v5 = vadd.f32 %v3142_v54, %v13232_v25  ;;  %v3144_v20 = vpop.f32.mrb[19].mxu1  ;;  %v3337_v55 = vpack.c.bf16 %v3313_v60, %v3311_v29  ;;  %v12213_v25 = vld [vmem:[%s15122_s3 + $0x78] sm:$0xff]  }
 0x259   : > { %v3239_v63 = vmul.f32 %v11366_v24, %v13270_v19  ;;  %v11368_v16 = vadd.f32 %v3144_v20, %v13234_v30  ;;  %v3338_v11 = vpack.c.bf16 %v3314_v37, %v3312_v31  ;;  %11168 = vmatpush3.bf16.msra.mxu0 %v12210_v6  ;;  %v13375_v30 = vld.sshfl [vmem:[%s15121_s2 + $0x28] sm:$0x33 pattern:$0x76325410] }
 0x25a   : > { %v3283_v61 = vadd.f32 %v13273_v48, %v3238_v27  ;;  %v3240_v21 = vmul.f32 %v11367_v5, %v13267_v9  ;;  %11169 = vmatprep.subr.bf16.mxu0 %v12211_v35  ;;  %v4017_v62 = vcombine.high %v13375_v30, %v13375_v30 }
 0x25b   : > { %v3284_v38 = vadd.f32 %v13276_v42, %v3239_v63  ;;  %v3241_v2 = vmul.f32 %v11368_v16, %v13270_v19  ;;  %3532 = vmatprep.mubr.bf16.mxu0 %v3338_v11 }
 0x25c   : > { %v3285_v39 = vadd.f32 %v13273_v48, %v3240_v21  ;;  %3533 = vmatmul.mubr.bf16.gmra.mrb[76].mxu0 %v3337_v55  ;;  %v3315_v0 = vmax.f32 %v3283_v61, 0.0 }
 0x25d   : > { %v3286_v10 = vadd.f32 %v13276_v42, %v3241_v2  ;;  %v3148_v4 = vpop.f32.mrb[20].mxu1  ;;  %11170 = vmatpush3.bf16.msra.mxu0 %v12212_v57  ;;  %v3316_v15 = vmax.f32 %v3284_v38, 0.0 }
 0x25e   : > { %v3317_v12 = vmax.f32 %v3285_v39, 0.0  ;;  %v11369_v14 = vadd.f32 %v3148_v4, %v13236_v45  ;;  %v3150_v26 = vpop.f32.mrb[21].mxu1  ;;  %11171 = vmatprep.subr.bf16.mxu0 %v12213_v25 }
 0x25f   : > { %v3318_v58 = vmax.f32 %v3286_v10, 0.0  ;;  %v11370_v3 = vadd.f32 %v3150_v26, %v13238_v32  ;;  %v3152_v6 = vpop.f32.mrb[22].mxu1 }
 0x260   : > { %v3242_v29 = vmul.f32 %v11369_v14, %v13267_v9  ;;  %v11371_v60 = vadd.f32 %v3152_v6, %v13240_v33  ;;  %v3154_v7 = vpop.f32.mrb[23].mxu1  ;;  %v3339_v52 = vpack.c.bf16 %v3317_v12, %v3315_v0 }
 0x261   : > { %v3243_v35 = vmul.f32 %v11370_v3, %v13270_v19  ;;  %v11372_v45 = vadd.f32 %v3154_v7, %v13242_v23  ;;  %v3340_v31 = vpack.c.bf16 %v3318_v58, %v3316_v15  ;;  %11172 = vmatpush3.bf16.msra.mxu0 %v12214_v18 }
 0x262   : > { %v3287_v37 = vadd.f32 %v13273_v48, %v3242_v29  ;;  %v3244_v24 = vmul.f32 %v11371_v60, %v13267_v9  ;;  %10331 = vmatprep.subr.msk.bf16.mxu0 %vm517_vm0, %v4017_v62 }
 0x263   : > { %v3288_v32 = vadd.f32 %v13276_v42, %v3243_v35  ;;  %v3245_v54 = vmul.f32 %v11372_v45, %v13270_v19  ;;  %3540 = vmatprep.mubr.bf16.mxu0 %v3340_v31 }
 0x264   : > { %v3289_v33 = vadd.f32 %v13273_v48, %v3244_v24  ;;  %3541 = vmatmul.mubr.bf16.gmra.mrb[80].mxu0 %v3339_v52  ;;  %v3319_v23 = vmax.f32 %v3287_v37, 0.0 }
 0x265   : > { %v3290_v27 = vadd.f32 %v13276_v42, %v3245_v54  ;;  %v3158_v5 = vpop.f32.mrb[24].mxu1  ;;  %v3320_v16 = vmax.f32 %v3288_v32, 0.0 }
 0x266   : > { %v3321_v20 = vmax.f32 %v3289_v33, 0.0  ;;  %v11373_v55 = vadd.f32 %v3158_v5, %v13244_v36  ;;  %v3160_v63 = vpop.f32.mrb[25].mxu1 }
 0x267   : > { %v3322_v11 = vmax.f32 %v3290_v27, 0.0  ;;  %v11374_v57 = vadd.f32 %v3160_v63, %v13246_v40  ;;  %v3162_v61 = vpop.f32.mrb[26].mxu1 }
 0x268   : > { %v3246_v21 = vmul.f32 %v11373_v55, %v13267_v9  ;;  %v11375_v25 = vadd.f32 %v3162_v61, %v13248_v41  ;;  %v3164_v38 = vpop.f32.mrb[27].mxu1  ;;  %v3341_v2 = vpack.c.bf16 %v3321_v20, %v3319_v23  ;;  %v13457_v61 = vld.sshfl [vmem:[%s15121_s2 + $0x2c] sm:$0x33 pattern:$0x76325410] }
 0x269   : > { %v3247_v39 = vmul.f32 %v11374_v57, %v13270_v19  ;;  %v11376_v10 = vadd.f32 %v3164_v38, %v13250_v44  ;;  %v3342_v4 = vpack.c.bf16 %v3322_v11, %v3320_v16  ;;  %v10292_v11 = vld [vmem:[%s12420_s25 + $0xcc] sm:$0xe]  ;;  %v10294_v57 = vld [vmem:[%s12420_s25 + $0xd4] sm:$0x1] }
 0x26a   : > { %v3291_v18 = vadd.f32 %v13273_v48, %v3246_v21  ;;  %v3248_v36 = vmul.f32 %v11375_v25, %v13267_v9  ;;  %v10314_v25 = vrot.slane %v10292_v11, 9 }
 0x26b   : > { %v3292_v0 = vadd.f32 %v13276_v42, %v3247_v39  ;;  %v3249_v40 = vmul.f32 %v11376_v10, %v13270_v19  ;;  %3548 = vmatprep.mubr.bf16.mxu0 %v3342_v4  ;;  %v10296_v10 = vld [vmem:[%s12420_s25 + $0xec] sm:$0xf]  ;;  %v4475_v4 = vcombine.high %v13457_v61, %v13457_v61 }
 0x26c   : > { %v3293_v12 = vadd.f32 %v13273_v48, %v3248_v36  ;;  %3549 = vmatmul.mubr.bf16.gmra.mrb[84].mxu0 %v3341_v2  ;;  %v3323_v26 = vmax.f32 %v3291_v18, 0.0  ;;  %v3939_v2 = vrot.slane %v10294_v57, 5  ;;  %v10310_v57 = vld [vmem:[%s12420_s25 + $0x174] sm:$0xe] }
 0x26d   : > { %v3294_v41 = vadd.f32 %v13276_v42, %v3249_v40  ;;  %v3168_v14 = vpop.f32.mrb[28].mxu1  ;;  %v3324_v58 = vmax.f32 %v3292_v0, 0.0  ;;  %v3943_v0 = vrot.slane %v10296_v10, 5  ;;  %v10295_v40 = vld [vmem:[%s12420_s25 + $0xe8] sm:$0xe] }
 0x26e   : > { %v3325_v62 = vmax.f32 %v3293_v12, 0.0  ;;  %v11377_v44 = vadd.f32 %v3168_v14, %v13252_v46  ;;  %v3170_v15 = vpop.f32.mrb[29].mxu1  ;;  %v10297_v12 = vld [vmem:[%s12420_s25 + $0xf0] sm:$0x1]  ;;  %v10315_v14 = vrot.slane %v10295_v40, 9 }
 0x26f   : > { %v3326_v3 = vmax.f32 %v3294_v41, 0.0  ;;  %v11378_v6 = vadd.f32 %v3170_v15, %v13254_v49  ;;  %v3172_v29 = vpop.f32.mrb[30].mxu1  ;;  %v10257_v10 = vld [vmem:[%s12420_s25 + $0xac] sm:$0xf]  ;;  %v10258_v40 = vld [vmem:[%s12420_s25 + $0xb0] sm:$0x7] }
 0x270   : > { %v3250_v60 = vmul.f32 %v11377_v44, %v13267_v9  ;;  %v11379_v7 = vadd.f32 %v3172_v29, %v13256_v50  ;;  %v3174_v52 = vpop.f32.mrb[31].mxu1  ;;  %v3343_v35 = vpack.c.bf16 %v3325_v62, %v3323_v26  ;;  %v3945_v26 = vrot.slane %v3943_v0, 4  ;;  %v10299_v44 = vld [vmem:[%s12420_s25 + $0x108] sm:$0xf]  ;;  %v10300_v29 = vld [vmem:[%s12420_s25 + $0x10c] sm:$0x1] }
 0x271   : > { %v3251_v45 = vmul.f32 %v11378_v6, %v13270_v19  ;;  %v11380_v31 = vadd.f32 %v3174_v52, %v13258_v51  ;;  %v3344_v37 = vpack.c.bf16 %v3326_v3, %v3324_v58  ;;  %v3946_v62 = vrot.slane %v10297_v12, 5  ;;  %v10298_v6 = vld [vmem:[%s12420_s25 + $0x104] sm:$0xe] }
 0x272   : > { %v3295_v24 = vadd.f32 %v13273_v48, %v3250_v60  ;;  %v3252_v46 = vmul.f32 %v11379_v7, %v13267_v9  ;;  %v3944_v15 = vsel %vm12412_vm3, %v10315_v14, %v3943_v0  ;;  %v3950_v3 = vrot.slane %v10299_v44, 5  ;;  %v10256_v0 = vld [vmem:[%s12420_s25 + $0xa8] sm:$0x8] }
 0x273   : > { %v3296_v32 = vadd.f32 %v13276_v42, %v3251_v45  ;;  %v3253_v49 = vmul.f32 %v11380_v31, %v13270_v19  ;;  %3556 = vmatprep.mubr.bf16.mxu0 %v3344_v37  ;;  %v10348_v19 = vld.sshfl [vmem:[%s15121_s2 + $0x24] sm:$0x33 pattern:$0x76325410]  ;;  %v3947_v58 = vsel %vm12412_vm3, %v3945_v26, %v3946_v62  ;;  %v10316_v7 = vrot.slane %v10298_v6, 9 }
 0x274   : > { %v3297_v54 = vadd.f32 %v13273_v48, %v3252_v46  ;;  %3557 = vmatmul.mubr.bf16.gmra.mrb[88].mxu0 %v3343_v35  ;;  %v3327_v33 = vmax.f32 %v3295_v24, 0.0  ;;  %v4043_v48 = vsel %vm517_vm0, %v13375_v30, 0  ;;  %v4193_v9 = vcombine.high %v10348_v19, %v10348_v19  ;;  %v10302_v45 = vld [vmem:[%s12420_s25 + $0x124] sm:$0xf]  ;;  %v10301_v46 = vld [vmem:[%s12420_s25 + $0x120] sm:$0xe] }
 0x275   : > { %v3298_v50 = vadd.f32 %v13276_v42, %v3253_v49  ;;  %v3328_v5 = vmax.f32 %v3296_v32, 0.0  ;;  %v15174_v42 = vld [vmem:[#allocation15_spill] sm:$0xff]  ;;  %v4219_v39 = vsel %vm517_vm0, %v10348_v19, 0  ;;  %v10324_v60 = vcombine.low %v3944_v15, %v3947_v58  ;;  %v10306_v19 = vld [vmem:[%s12420_s25 + $0x144] sm:$0x1] }
 0x276   : > { %v3329_v27 = vmax.f32 %v3297_v54, 0.0  ;;  %v3952_v52 = vrot.slane %v3950_v3, 4  ;;  %v3953_v35 = vrot.slane %v10300_v29, 5  ;;  %v3951_v31 = vsel %vm12412_vm3, %v10316_v7, %v3950_v3  ;;  %v10303_v32 = vld [vmem:[%s12420_s25 + $0x128] sm:$0x1] }
 0x277   : > { %v3330_v23 = vmax.f32 %v3298_v50, 0.0  ;;  %v3957_v24 = vrot.slane %v10302_v45, 5  ;;  %v10317_v54 = vrot.slane %v10301_v46, 9  ;;  %v3826_v26 = vrot.slane %v10258_v40, 7  ;;  %v10260_v44 = vld [vmem:[%s12420_s25 + $0xc8] sm:$0xf] }
 0x278   : > { %v3345_v51 = vpack.c.bf16 %v3329_v27, %v3327_v33  ;;  %v3954_v37 = vsel %vm12412_vm3, %v3952_v52, %v3953_v35  ;;  %v3960_v33 = vrot.slane %v10303_v32, 5  ;;  %v10305_v27 = vld [vmem:[%s12420_s25 + $0x140] sm:$0xf]  ;;  %v3830_v3 = vrot.slane %v10260_v44, 7  ;;  %v10259_v6 = vld [vmem:[%s12420_s25 + $0xc4] sm:$0x8] }
 0x279   : > { %v3346_v20 = vpack.c.bf16 %v3330_v23, %v3328_v5  ;;  %v10325_v49 = vcombine.low %v3951_v31, %v3954_v37  ;;  %v3959_v50 = vrot.slane %v3957_v24, 4  ;;  %v3958_v5 = vsel %vm12412_vm3, %v10317_v54, %v3957_v24  ;;  %v10261_v29 = vld [vmem:[%s12420_s25 + $0xcc] sm:$0x7]  ;;  %v10263_v37 = vld [vmem:[%s12420_s25 + $0xe4] sm:$0xf] }
 0x27a   : > { %v10281_v52 = vrot.slane %v10259_v6, 11  ;;  %v3832_v35 = vrot.slane %v3830_v3, 4  ;;  %v3833_v45 = vrot.slane %v10261_v29, 7  ;;  %v4501_v31 = vsel %vm517_vm0, %v13457_v61, 0  ;;  %v10262_v61 = vld [vmem:[%s12420_s25 + $0xe0] sm:$0x8] }
 0x27b   : > { %3564 = vmatprep.mubr.bf16.mxu0 %v3346_v20  ;;  %v3961_v23 = vsel %vm12412_vm3, %v3959_v50, %v3960_v33  ;;  %v10304_v20 = vld [vmem:[%s12420_s25 + $0x13c] sm:$0xe]  ;;  %v10264_v54 = vld [vmem:[%s12420_s25 + $0xe8] sm:$0x7]  ;;  %v10282_v33 = vrot.slane %v10262_v61, 11 }
 0x27c   : > { %3565 = vmatmul.mubr.bf16.gmra.mrb[92].mxu0 %v3345_v51  ;;  %v3964_v51 = vrot.slane %v10305_v27, 5  ;;  %v3831_v46 = vsel %vm13526_vm9, %v10281_v52, %v3830_v3  ;;  %v3834_v32 = vsel %vm13526_vm9, %v3832_v35, %v3833_v45  ;;  %v10275_v3 = vld [vmem:[%s12420_s25 + $0x154] sm:$0xf]  ;;  %v10274_v35 = vld [vmem:[%s12420_s25 + $0x150] sm:$0x8] }
 0x27d   : > { %3701 = vmatprep.mubr.bf16.mxu0 %v12940_v17  ;;  %v15175_v17 = vld [vmem:[#allocation14_spill] sm:$0xff]  ;;  %v10341_v50 = vcombine.low %v3831_v46, %v3834_v32  ;;  %v3865_v52 = vrot.slane %v10275_v3, 7  ;;  %v10276_v45 = vld [vmem:[%s12420_s25 + $0x158] sm:$0x7] }
 0x27e   : > { %v10677_v62 = vld [vmem:[%s15123_s4 + $0x2] ss:$4 sm:$0x3] }
 0x27f   : > { %v3867_v61 = vrot.slane %v3865_v52, 4 }
 0x284   : > { %3702 = vmatmul.mubr.bf16.vlgmr.msra.gmra.mrb[96].mxu0 %v12936_v8  ;;  %v10290_v8 = vld [vmem:[%s12420_s25 + $0xb4] sm:$0xf] }
 0x285   : > { %4049 = vmatpush1.bf16.msra.mxu0 %v4043_v48  ;;  %3709 = vmatprep.mubr.bf16.mxu0 %v12964_v56  ;;  %v3929_v56 = vrot.slane %v10290_v8, 5  ;;  %v10326_v48 = vcombine.low %v3958_v5, %v3961_v23  ;;  %v3967_v8 = vrot.slane %v10306_v19, 5  ;;  %v3840_v5 = vrot.slane %v10264_v54, 7  ;;  %v10266_v23 = vld [vmem:[%s12420_s25 + $0x100] sm:$0xf] }
 0x286   : > { %10349 = vmatprep.subr.msk.bf16.mxu0 %vm517_vm0, %v4193_v9  ;;  %v10318_v9 = vrot.slane %v10304_v20, 9  ;;  %v3844_v19 = vrot.slane %v10266_v23, 7  ;;  %v3868_v54 = vrot.slane %v10276_v45, 7 }
 0x288   : > { %v3869_v23 = vsel %vm13526_vm9, %v3867_v61, %v3868_v54 }
 0x28c   : > { %3710 = vmatmul.mubr.bf16.gmra.mrb[100].mxu0 %v12961_v53  ;;  %v15176_v53 = vld [vmem:[#allocation17_spill] sm:$0xff] }
 0x28d   : > { %3717 = vmatprep.mubr.bf16.mxu0 %v12988_v28  ;;  %v10291_v28 = vld [vmem:[%s12420_s25 + $0xb8] sm:$0x1] }
 0x294   : > { %3718 = vmatmul.mubr.bf16.gmra.mrb[104].mxu0 %v12985_v34  ;;  %v10289_v34 = vld [vmem:[%s12420_s25 + $0xb0] sm:$0xe] }
 0x295   : > { %3725 = vmatprep.mubr.bf16.mxu0 %v13012_v13  ;;  %v3931_v13 = vrot.slane %v3929_v56, 4 }
 0x29c   : > { %3726 = vmatmul.mubr.bf16.gmra.mrb[108].mxu0 %v13009_v22  ;;  %v10313_v22 = vrot.slane %v10289_v34, 9 }
 0x29d   : > { %3733 = vmatprep.mubr.bf16.mxu0 %v13034_v59  ;;  %v10293_v59 = vld [vmem:[%s12420_s25 + $0xd0] sm:$0xf] }
 0x29e   : > { %v3930_v55 = vsel %vm12412_vm3, %v10313_v22, %v3929_v56  ;;  %v3936_v16 = vrot.slane %v10293_v59, 5  ;;  %v10309_v22 = vld [vmem:[%s12420_s25 + $0x160] sm:$0x1] }
 0x2a0   : > { %v3938_v38 = vrot.slane %v3936_v16, 4  ;;  %v3937_v18 = vsel %vm12412_vm3, %v10314_v25, %v3936_v16 }
 0x2a2   : > { %v3940_v36 = vsel %vm12412_vm3, %v3938_v38, %v3939_v2  ;;  %v10320_v38 = vrot.slane %v10310_v57, 9 }
 0x2a3   : > { %v10323_v41 = vcombine.low %v3937_v18, %v3940_v36  ;;  %v3823_v36 = vrot.slane %v10257_v10, 7 }
 0x2a4   : > { %3734 = vmatmul.mubr.bf16.gmra.mrb[112].mxu0 %v13031_v1  ;;  %v3932_v1 = vrot.slane %v10291_v28, 5  ;;  %v10307_v28 = vld [vmem:[%s12420_s25 + $0x158] sm:$0xe] }
 0x2a5   : > { %3741 = vmatprep.mubr.bf16.mxu0 %v13057_v47  ;;  %v15177_v47 = vld [vmem:[#allocation16_spill] sm:$0xff]  ;;  %v3825_v14 = vrot.slane %v3823_v36, 4 }
 0x2a6   : > { %v3933_v63 = vsel %vm12412_vm3, %v3931_v13, %v3932_v1  ;;  %v10319_v1 = vrot.slane %v10307_v28, 9 }
 0x2a7   : > { %v10322_v21 = vcombine.low %v3930_v55, %v3933_v63  ;;  %v10311_v55 = vld [vmem:[%s12420_s25 + $0x178] sm:$0xf]  ;;  %v3827_v58 = vsel %vm13526_vm9, %v3825_v14, %v3826_v26 }
 0x2a8   : > { %v3978_v11 = vrot.slane %v10311_v55, 5 }
 0x2aa   : > { %v3980_v2 = vrot.slane %v3978_v11, 4 }
 0x2ac   : > { %3742 = vmatmul.mubr.bf16.gmra.mrb[116].mxu0 %v13054_v43  ;;  %v15178_v43 = vmov 0  }
 0x2ad   : > { %3749 = vmatprep.mubr.bf16.mxu0 %v15174_v42  ;;  %v3966_v42 = vrot.slane %v3964_v51, 4 }
 0x2af   : > { %v3968_v56 = vsel %vm12412_vm3, %v3966_v42, %v3967_v8 }
 0x2b4   : > { %3750 = vmatmul.mubr.bf16.gmra.mrb[120].mxu0 %v15175_v17  ;;  %v10308_v17 = vld [vmem:[%s12420_s25 + $0x15c] sm:$0xf] }
 0x2b5   : > { %3757 = vmatprep.mubr.bf16.mxu0 %v15176_v53  ;;  %v3965_v53 = vsel %vm12412_vm3, %v10318_v9, %v3964_v51  ;;  %v3971_v34 = vrot.slane %v10308_v17, 5  ;;  %v10267_v9 = vld [vmem:[%s12420_s25 + $0x104] sm:$0x7]  ;;  %v3846_v17 = vrot.slane %v3844_v19, 4 }
 0x2b6   : > { %v10327_v13 = vcombine.low %v3965_v53, %v3968_v56  ;;  %v3847_v53 = vrot.slane %v10267_v9, 7  ;;  %v10269_v56 = vld [vmem:[%s12420_s25 + $0x11c] sm:$0xf] }
 0x2b7   : > { %v3973_v59 = vrot.slane %v3971_v34, 4  ;;  %v3972_v63 = vsel %vm12412_vm3, %v10319_v1, %v3971_v34  ;;  %v10270_v1 = vld [vmem:[%s12420_s25 + $0x120] sm:$0x7] }
 0x2b8   : > { %v3848_v28 = vsel %vm13526_vm9, %v3846_v17, %v3847_v53 }
 0x2bc   : > { %3758 = vmatmul.mubr.bf16.gmra.mrb[124].mxu0 %v15177_v47  ;;  %v3974_v47 = vrot.slane %v10309_v22, 5  ;;  %v3851_v22 = vrot.slane %v10269_v56, 7 }
 0x2bd   : > { %4080 = vmatprep.mubr.bf16.mxu0 %v15178_v43 }
 0x2be   : > { %v3975_v16 = vsel %vm12412_vm3, %v3973_v59, %v3974_v47  ;;  %v3853_v57 = vrot.slane %v3851_v22, 4 }
 0x2bf   : > { %v10328_v25 = vcombine.low %v3972_v63, %v3975_v16 }
 0x2c4   : > { %10332 = vmatmul.mubr.msk.bf16.vlgmr.msra.gmra.mrb[128].mxu0 %vm492_vm6, %v10322_v21  ;;  %v10312_v21 = vld [vmem:[%s12420_s25 + $0x17c] sm:$0x1] }
 0x2c5   : > { %4225 = vmatpush1.bf16.msra.mxu0 %v4219_v39  ;;  %4090 = vmatprep.mubr.bf16.mxu0 %v15178_v43  ;;  %v3981_v39 = vrot.slane %v10312_v21, 5  ;;  %v3854_v21 = vrot.slane %v10270_v1, 7 }
 0x2c6   : > { %10400 = vmatprep.subr.msk.bf16.mxu0 %vm517_vm0, %v4475_v4  ;;  %v3979_v4 = vsel %vm12412_vm3, %v10320_v38, %v3978_v11  ;;  %v10272_v38 = vld [vmem:[%s12420_s25 + $0x138] sm:$0xf] }
 0x2c7   : > { %v3982_v18 = vsel %vm12412_vm3, %v3980_v2, %v3981_v39  ;;  %v3855_v10 = vsel %vm13526_vm9, %v3853_v57, %v3854_v21 }
 0x2c8   : > { %v10329_v12 = vcombine.low %v3979_v4, %v3982_v18  ;;  %v3858_v4 = vrot.slane %v10272_v38, 7  ;;  %v10271_v18 = vld [vmem:[%s12420_s25 + $0x134] sm:$0x8] }
 0x2c9   : > { %v10285_v26 = vrot.slane %v10271_v18, 11 }
 0x2ca   : > { %v3860_v44 = vrot.slane %v3858_v4, 4 }
 0x2cb   : > { %v3859_v29 = vsel %vm13526_vm9, %v10285_v26, %v3858_v4  ;;  %v10361_v26 = vld [vmem:[%s12420_s25 + $0xd0] sm:$0x8] }
 0x2cc   : > { %10333 = vmatmul.mubr.msk.bf16.gmra.mrb[132].mxu0 %vm492_vm6, %v10323_v41  ;;  %v10280_v41 = vrot.slane %v10256_v0, 11 }
 0x2cd   : > { %4100 = vmatprep.mubr.bf16.mxu0 %v15178_v43 }
 0x2ce   : > { %v3824_v15 = vsel %vm13526_vm9, %v10280_v41, %v3823_v36  ;;  %v10273_v36 = vld [vmem:[%s12420_s25 + $0x13c] sm:$0x7] }
 0x2cf   : > { %v10340_v7 = vcombine.low %v3824_v15, %v3827_v58  ;;  %v3861_v15 = vrot.slane %v10273_v36, 7  ;;  %v10362_v36 = vld [vmem:[%s12420_s25 + $0xd4] sm:$0xf] }
 0x2d4   : > { %10334 = vmatmul.mubr.msk.bf16.gmra.mrb[136].mxu0 %vm492_vm6, %v10324_v60  ;;  %v13542_v60 = vld.sshfl [vmem:[%s15121_s2 + $0x30] sm:$0x33 pattern:$0x76325410] }
 0x2d5   : > { %4110 = vmatprep.mubr.bf16.mxu0 %v15178_v43  ;;  %v4789_v24 = vcombine.high %v13542_v60, %v13542_v60 }
 0x2dc   : > { %10335 = vmatmul.mubr.msk.bf16.gmra.mrb[140].mxu0 %vm492_vm6, %v10325_v49  ;;  %v3837_v49 = vrot.slane %v10263_v37, 7 }
 0x2dd   : > { %4120 = vmatprep.mubr.bf16.mxu0 %v15178_v43 }
 0x2de   : > { %v3839_v27 = vrot.slane %v3837_v49, 4  ;;  %v3838_v51 = vsel %vm13526_vm9, %v10282_v33, %v3837_v49  ;;  %v10286_v49 = vrot.slane %v10274_v35, 11  ;;  %v10278_v33 = vld [vmem:[%s12420_s25 + $0x170] sm:$0xf]  ;;  %v10383_v35 = vrot.slane %v10361_v26, 11 }
 0x2df   : > { %v10370_v26 = vld [vmem:[%s12420_s25 + $0x124] sm:$0x8] }
 0x2e0   : > { %v3841_v20 = vsel %vm13526_vm9, %v3839_v27, %v3840_v5  ;;  %v3866_v5 = vsel %vm13526_vm9, %v10286_v49, %v3865_v52 }
 0x2e1   : > { %v10342_v42 = vcombine.low %v3838_v51, %v3841_v20  ;;  %v3872_v51 = vrot.slane %v10278_v33, 7  ;;  %v10277_v20 = vld [vmem:[%s12420_s25 + $0x16c] sm:$0x8] }
 0x2e2   : > { %v10287_v53 = vrot.slane %v10277_v20, 11 }
 0x2e3   : > { %v3874_v56 = vrot.slane %v3872_v51, 4 }
 0x2e4   : > { %10336 = vmatmul.mubr.msk.bf16.gmra.mrb[144].mxu0 %vm492_vm6, %v10326_v48  ;;  %v10265_v48 = vld [vmem:[%s12420_s25 + $0xfc] sm:$0x8]  ;;  %v3873_v1 = vsel %vm13526_vm9, %v10287_v53, %v3872_v51 }
 0x2e5   : > { %4130 = vmatprep.mubr.bf16.mxu0 %v15178_v43  ;;  %v10283_v8 = vrot.slane %v10265_v48, 11 }
 0x2e7   : > { %v3845_v34 = vsel %vm13526_vm9, %v10283_v8, %v3844_v19  ;;  %v10279_v19 = vld [vmem:[%s12420_s25 + $0x174] sm:$0x7] }
 0x2e8   : > { %v10343_v55 = vcombine.low %v3845_v34, %v3848_v28  ;;  %v3875_v34 = vrot.slane %v10279_v19, 7 }
 0x2ec   : > { %10337 = vmatmul.mubr.msk.bf16.gmra.mrb[148].mxu0 %vm492_vm6, %v10327_v13  ;;  %v10268_v13 = vld [vmem:[%s12420_s25 + $0x118] sm:$0x8] }
 0x2ed   : > { %4140 = vmatprep.mubr.bf16.mxu0 %v15178_v43  ;;  %v10284_v11 = vrot.slane %v10268_v13, 11 }
 0x2ef   : > { %v3852_v39 = vsel %vm13526_vm9, %v10284_v11, %v3851_v22  ;;  %v10359_v22 = vld [vmem:[%s12420_s25 + $0xb8] sm:$0xf] }
 0x2f4   : > { %10338 = vmatmul.mubr.msk.bf16.gmra.mrb[152].mxu0 %vm492_vm6, %v10328_v25 }
 0x2f5   : > { %4150 = vmatprep.mubr.bf16.mxu0 %v15178_v43 }
 0x2fc   : > { %10339 = vmatmul.mubr.msk.bf16.gmra.mrb[156].mxu0 %vm492_vm6, %v10329_v12  ;;  %v10344_v12 = vcombine.low %v3852_v39, %v3855_v10 }
 0x2fd   : > { %4256 = vmatprep.mubr.bf16.mxu0 %v15178_v43 }
 0x304   : > { %10350 = vmatmul.mubr.msk.bf16.vlgmr.msra.gmra.mrb[128].mxu0 %vm492_vm6, %v10340_v7  ;;  %v3862_v7 = vsel %vm13526_vm9, %v3860_v44, %v3861_v15  ;;  %v10363_v44 = vld [vmem:[%s12420_s25 + $0xd8] sm:$0x7] }
 0x305   : > { %4507 = vmatpush1.bf16.msra.mxu0 %v4501_v31  ;;  %4266 = vmatprep.mubr.bf16.mxu0 %v15178_v43 }
 0x306   : > { %10451 = vmatprep.subr.msk.bf16.mxu0 %vm517_vm0, %v4789_v24  ;;  %v10345_v24 = vcombine.low %v3859_v29, %v3862_v7 }
 0x30c   : > { %10351 = vmatmul.mubr.msk.bf16.gmra.mrb[132].mxu0 %vm492_vm6, %v10341_v50 }
 0x30d   : > { %4276 = vmatprep.mubr.bf16.mxu0 %v15178_v43 }
 0x314   : > { %10352 = vmatmul.mubr.msk.bf16.gmra.mrb[136].mxu0 %vm492_vm6, %v10342_v42  ;;  %v10346_v42 = vcombine.low %v3866_v5, %v3869_v23  ;;  %v10366_v5 = vld [vmem:[%s12420_s25 + $0xf4] sm:$0x7] }
 0x315   : > { %4286 = vmatprep.mubr.bf16.mxu0 %v15178_v43 }
 0x317   : > { %v11109_v59 = vpop.f32.mrb[64].mxu0 }
 0x318   : > { %v11110_v47 = vpop.f32.mrb[65].mxu0 }
 0x319   : > { %v13576_v63 = vadd.f32 %v11110_v47, %v11109_v59  ;;  %v11112_v16 = vpop.f32.mrb[66].mxu0  ;;  %v3876_v59 = vsel %vm13526_vm9, %v3874_v56, %v3875_v34  ;;  %v4387_v47 = vrot.slane %v10359_v22, 7  ;;  %v10368_v56 = vld [vmem:[%s12420_s25 + $0x10c] sm:$0xf] }
 0x31a   : > { %v11113_v25 = vpop.f32.mrb[67].mxu0  ;;  %v10347_v21 = vcombine.low %v3873_v1, %v3876_v59  ;;  %v4408_v1 = vrot.slane %v10368_v56, 7  ;;  %v10367_v59 = vld [vmem:[%s12420_s25 + $0x108] sm:$0x8] }
 0x31b   : > { %v13579_v2 = vadd.f32 %v11113_v25, %v11112_v16  ;;  %v10360_v16 = vld [vmem:[%s12420_s25 + $0xbc] sm:$0x7]  ;;  %v4389_v10 = vrot.slane %v4387_v47, 4 }
 0x31c   : > { %10353 = vmatmul.mubr.msk.bf16.gmra.mrb[140].mxu0 %vm492_vm6, %v10343_v55  ;;  %v10358_v55 = vld [vmem:[%s12420_s25 + $0xb4] sm:$0x8]  ;;  %v4390_v4 = vrot.slane %v10360_v16, 7 }
 0x31d   : > { %4296 = vmatprep.mubr.bf16.mxu0 %v15178_v43  ;;  %v10382_v39 = vrot.slane %v10358_v55, 11 }
 0x31f   : > { %v11115_v0 = vpop.f32.mrb[68].mxu0 }
 0x320   : > { %v11116_v40 = vpop.f32.mrb[69].mxu0 }
 0x321   : > { %v13589_v41 = vadd.f32 %v11116_v40, %v11115_v0  ;;  %v11118_v14 = vpop.f32.mrb[70].mxu0  ;;  %v4388_v40 = vsel %vm13526_vm9, %v10382_v39, %v4387_v47  ;;  %v10369_v47 = vld [vmem:[%s12420_s25 + $0x110] sm:$0x7]  ;;  %v4410_v39 = vrot.slane %v4408_v1, 4 }
 0x322   : > { %v11119_v58 = vpop.f32.mrb[71].mxu0 }
 0x323   : > { %v13592_v6 = vadd.f32 %v11119_v58, %v11118_v14  ;;  %v4394_v14 = vrot.slane %v10362_v36, 7  ;;  %v13644_v58 = vld.sshfl [vmem:[%s15121_s2 + $0x34] sm:$0x33 pattern:$0x76325410] }
 0x324   : > { %10354 = vmatmul.mubr.msk.bf16.gmra.mrb[144].mxu0 %vm492_vm6, %v10344_v12  ;;  %v4391_v12 = vsel %vm13526_vm9, %v4389_v10, %v4390_v4  ;;  %v4975_v49 = vcombine.high %v13644_v58, %v13644_v58  ;;  %v4411_v10 = vrot.slane %v10369_v47, 7 }
 0x325   : > { %4306 = vmatprep.mubr.bf16.mxu0 %v15178_v43  ;;  %v10391_v29 = vcombine.low %v4388_v40, %v4391_v12  ;;  %v4396_v45 = vrot.slane %v4394_v14, 4  ;;  %v4395_v54 = vsel %vm13526_vm9, %v10383_v35, %v4394_v14 }
 0x326   : > { %v4412_v12 = vsel %vm13526_vm9, %v4410_v39, %v4411_v10 }
 0x327   : > { %v11121_v31 = vpop.f32.mrb[72].mxu0 }
 0x328   : > { %v11122_v37 = vpop.f32.mrb[73].mxu0 }
 0x329   : > { %v13602_v46 = vadd.f32 %v11122_v37, %v11121_v31  ;;  %v11124_v32 = vpop.f32.mrb[74].mxu0  ;;  %v4397_v31 = vrot.slane %v10363_v44, 7  ;;  %v10372_v44 = vld [vmem:[%s12420_s25 + $0x12c] sm:$0x7] }
 0x32a   : > { %v11125_v50 = vpop.f32.mrb[75].mxu0 }
 0x32b   : > { %v13605_v27 = vadd.f32 %v11125_v50, %v11124_v32  ;;  %v10365_v32 = vld [vmem:[%s12420_s25 + $0xf0] sm:$0xf]  ;;  %v4398_v50 = vsel %vm13526_vm9, %v4396_v45, %v4397_v31  ;;  %v10386_v45 = vrot.slane %v10370_v26, 11 }
 0x32c   : > { %10355 = vmatmul.mubr.msk.bf16.gmra.mrb[148].mxu0 %vm492_vm6, %v10345_v24  ;;  %v4815_v24 = vsel %vm517_vm0, %v13542_v60, 0  ;;  %v4401_v33 = vrot.slane %v10365_v32, 7  ;;  %v10364_v60 = vld [vmem:[%s12420_s25 + $0xec] sm:$0x8]  ;;  %v10392_v20 = vcombine.low %v4395_v54, %v4398_v50  ;;  %v10374_v32 = vld [vmem:[%s12420_s25 + $0x144] sm:$0xf] }
 0x32d   : > { %4316 = vmatprep.mubr.bf16.mxu0 %v15178_v43 }
 0x32f   : > { %v11127_v48 = vpop.f32.mrb[76].mxu0 }
 0x330   : > { %v11128_v9 = vpop.f32.mrb[77].mxu0 }
 0x331   : > { %v13615_v8 = vadd.f32 %v11128_v9, %v11127_v48  ;;  %v11130_v17 = vpop.f32.mrb[78].mxu0  ;;  %v10384_v9 = vrot.slane %v10364_v60, 11 }
 0x332   : > { %v11131_v28 = vpop.f32.mrb[79].mxu0 }
 0x333   : > { %v13618_v13 = vadd.f32 %v11131_v28, %v11130_v17  ;;  %v4404_v17 = vrot.slane %v10366_v5, 7  ;;  %v4402_v28 = vsel %vm13526_vm9, %v10384_v9, %v4401_v33  ;;  %v4422_v5 = vrot.slane %v10374_v32, 7 }
 0x334   : > { %10356 = vmatmul.mubr.msk.bf16.gmra.mrb[152].mxu0 %vm492_vm6, %v10346_v42  ;;  %v4403_v42 = vrot.slane %v4401_v33, 4 }
 0x335   : > { %4326 = vmatprep.mubr.bf16.mxu0 %v15178_v43 }
 0x336   : > { %v4405_v22 = vsel %vm13526_vm9, %v4403_v42, %v4404_v17  ;;  %v4424_v17 = vrot.slane %v4422_v5, 4 }
 0x337   : > { %v11133_v11 = vpop.f32.mrb[80].mxu0 }
 0x338   : > { %v11134_v57 = vpop.f32.mrb[81].mxu0 }
 0x339   : > { %v13628_v25 = vadd.f32 %v11134_v57, %v11133_v11  ;;  %v11136_v38 = vpop.f32.mrb[82].mxu0  ;;  %v10393_v11 = vcombine.low %v4402_v28, %v4405_v22  ;;  %v10377_v28 = vld [vmem:[%s12420_s25 + $0x160] sm:$0xf] }
 0x33a   : > { %v11137_v18 = vpop.f32.mrb[83].mxu0 }
 0x33b   : > { %v13631_v0 = vadd.f32 %v11137_v18, %v11136_v38  ;;  %v10385_v38 = vrot.slane %v10367_v59, 11  ;;  %v10371_v18 = vld [vmem:[%s12420_s25 + $0x128] sm:$0xf] }
 0x33c   : > { %10357 = vmatmul.mubr.msk.bf16.gmra.mrb[156].mxu0 %vm492_vm6, %v10347_v21  ;;  %v4415_v14 = vrot.slane %v10371_v18, 7 }
 0x33d   : > { %4538 = vmatprep.mubr.bf16.mxu0 %v15178_v43  ;;  %v4409_v40 = vsel %vm13526_vm9, %v10385_v38, %v4408_v1 }
 0x33e   : > { %v4417_v31 = vrot.slane %v4415_v14, 4  ;;  %v4416_v33 = vsel %vm13526_vm9, %v10386_v45, %v4415_v14  ;;  %v10380_v14 = vld [vmem:[%s12420_s25 + $0x17c] sm:$0xf]  ;;  %v10381_v45 = vld [vmem:[%s12420_s25 + $0x180] sm:$0x7] }
 0x33f   : > { %v11139_v15 = vpop.f32.mrb[84].mxu0 }
 0x340   : > { %v11140_v3 = vpop.f32.mrb[85].mxu0 }
 0x341   : > { %v13646_v7 = vadd.f32 %v11140_v3, %v11139_v15  ;;  %v11142_v52 = vpop.f32.mrb[86].mxu0 }
 0x342   : > { %v11143_v37 = vpop.f32.mrb[87].mxu0 }
 0x343   : > { %v13653_v61 = vadd.f32 %v11143_v37, %v11142_v52  ;;  %v4418_v37 = vrot.slane %v10372_v44, 7 }
 0x344   : > { %10401 = vmatmul.mubr.msk.bf16.vlgmr.msra.gmra.mrb[128].mxu0 %vm492_vm6, %v10391_v29  ;;  %v10394_v29 = vcombine.low %v4409_v40, %v4412_v12 }
 0x345   : > { %4821 = vmatpush1.bf16.msra.mxu0 %v4815_v24  ;;  %4548 = vmatprep.mubr.bf16.mxu0 %v15178_v43  ;;  %v4419_v60 = vsel %vm13526_vm9, %v4417_v31, %v4418_v37 }
 0x346   : > { %10462 = vmatprep.subr.msk.bf16.mxu0 %vm517_vm0, %v4975_v49 }
 0x347   : > { %v11145_v23 = vpop.f32.mrb[88].mxu0 }
 0x348   : > { %v11146_v51 = vpop.f32.mrb[89].mxu0 }
 0x349   : > { %v13664_v19 = vadd.f32 %v11146_v51, %v11145_v23  ;;  %v11148_v48 = vpop.f32.mrb[90].mxu0  ;;  %v10373_v23 = vld [vmem:[%s12420_s25 + $0x140] sm:$0x8]  ;;  %v10375_v51 = vld [vmem:[%s12420_s25 + $0x148] sm:$0x7] }
 0x34a   : > { %v11149_v53 = vpop.f32.mrb[91].mxu0  ;;  %v10387_v42 = vrot.slane %v10373_v23, 11 }
 0x34b   : > { %v13667_v34 = vadd.f32 %v11149_v53, %v11148_v48  ;;  %v10395_v48 = vcombine.low %v4416_v33, %v4419_v60  ;;  %v4425_v53 = vrot.slane %v10375_v51, 7  ;;  %v4439_v33 = vrot.slane %v10381_v45, 7  ;;  %v10416_v45 = vld [vmem:[%s12420_s25 + $0x234] sm:$0xf] }
 0x34c   : > { %10402 = vmatmul.mubr.msk.bf16.gmra.mrb[132].mxu0 %vm492_vm6, %v10392_v20  ;;  %v4423_v47 = vsel %vm13526_vm9, %v10387_v42, %v4422_v5  ;;  %v10410_v5 = vld [vmem:[%s12420_s25 + $0x1fc] sm:$0xf]  ;;  %v10411_v42 = vld [vmem:[%s12420_s25 + $0x200] sm:$0x7] }
 0x34d   : > { %4558 = vmatprep.mubr.bf16.mxu0 %v15178_v43 }
 0x34f   : > { %v11151_v55 = vpop.f32.mrb[92].mxu0 }
 0x350   : > { %v11152_v16 = vpop.f32.mrb[93].mxu0 }
 0x351   : > { %v13677_v57 = vadd.f32 %v11152_v16, %v11151_v55  ;;  %v11154_v21 = vpop.f32.mrb[94].mxu0  ;;  %v4426_v55 = vsel %vm13526_vm9, %v4424_v17, %v4425_v53  ;;  %v4429_v16 = vrot.slane %v10377_v28, 7 }
 0x352   : > { %v11155_v4 = vpop.f32.mrb[95].mxu0  ;;  %v10396_v39 = vcombine.low %v4423_v47, %v4426_v55  ;;  %v4704_v47 = vrot.slane %v10411_v42, 7  ;;  %v10419_v42 = vld [vmem:[%s12420_s25 + $0x250] sm:$0xf] }
 0x353   : > { %v13680_v36 = vadd.f32 %v11155_v4, %v11154_v21  ;;  %v10378_v21 = vld [vmem:[%s12420_s25 + $0x164] sm:$0x7]  ;;  %v4431_v18 = vrot.slane %v4429_v16, 4 }
 0x354   : > { %10403 = vmatmul.mubr.msk.bf16.gmra.mrb[136].mxu0 %vm492_vm6, %v10393_v11  ;;  %v10376_v11 = vld [vmem:[%s12420_s25 + $0x15c] sm:$0x8]  ;;  %v4432_v40 = vrot.slane %v10378_v21, 7 }
 0x355   : > { %4568 = vmatprep.mubr.bf16.mxu0 %v15178_v43  ;;  %v10388_v4 = vrot.slane %v10376_v11, 11 }
 0x357   : > { %v11173_v15 = vpop.f32.mrb[96].mxu0 }
 0x358   : > { %v11174_v3 = vpop.f32.mrb[97].mxu0 }
 0x359   : > { %v11175_v52 = vadd.f32 %v11174_v3, %v11173_v15  ;;  %v11176_v35 = vpop.f32.mrb[98].mxu0  ;;  %v4430_v3 = vsel %vm13526_vm9, %v10388_v4, %v4429_v16  ;;  %v10413_v16 = vld [vmem:[%s12420_s25 + $0x218] sm:$0xf]  ;;  %v10414_v4 = vld [vmem:[%s12420_s25 + $0x21c] sm:$0x7] }
 0x35a   : > { %v11177_v24 = vpop.f32.mrb[99].mxu0 }
 0x35b   : > { %v13692_v49 = vadd.f32 %v11175_v52, %v13576_v63  ;;  %v11178_v54 = vadd.f32 %v11177_v24, %v11176_v35  ;;  %v4436_v52 = vrot.slane %v10380_v14, 7  ;;  %v10379_v35 = vld [vmem:[%s12420_s25 + $0x178] sm:$0x8] }
 0x35c   : > { %10404 = vmatmul.mubr.msk.bf16.gmra.mrb[140].mxu0 %vm492_vm6, %v10394_v29  ;;  %v4433_v29 = vsel %vm13526_vm9, %v4431_v18, %v4432_v40  ;;  %v10389_v32 = vrot.slane %v10379_v35, 11  ;;  %v13768_v18 = vld.sshfl [vmem:[%s15121_s2 + $0x38] sm:$0x33 pattern:$0x76325410]  ;;  %v4977_v35 = vsel %vm517_vm0, %v13644_v58, 0 }
 0x35d   : > { %v13696_v50 = vadd.f32 %v11178_v54, %v13579_v2  ;;  %4578 = vmatprep.mubr.bf16.mxu0 %v15178_v43  ;;  %v10397_v37 = vcombine.low %v4430_v3, %v4433_v29  ;;  %v4438_v54 = vrot.slane %v4436_v52, 4  ;;  %v4711_v29 = vrot.slane %v10414_v4, 7  ;;  %v10422_v4 = vld [vmem:[%s12420_s25 + $0x26c] sm:$0xf] }
 0x35f   : > { %v11179_v63 = vpop.f32.mrb[100].mxu0 }
 0x360   : > { %v11180_v20 = vpop.f32.mrb[101].mxu0 }
 0x361   : > { %v11181_v9 = vadd.f32 %v11180_v20, %v11179_v63  ;;  %v11182_v2 = vpop.f32.mrb[102].mxu0  ;;  %v4437_v20 = vsel %vm13526_vm9, %v10389_v32, %v4436_v52  ;;  %v4715_v32 = vrot.slane %v10416_v45, 7 }
 0x362   : > { %v11183_v56 = vpop.f32.mrb[103].mxu0 }
 0x363   : > { %v13707_v22 = vadd.f32 %v11181_v9, %v13589_v41  ;;  %v11184_v1 = vadd.f32 %v11183_v56, %v11182_v2  ;;  %v4701_v9 = vrot.slane %v10410_v5, 7  ;;  %v10409_v2 = vld [vmem:[%s12420_s25 + $0x1f8] sm:$0x8] }
 0x364   : > { %10405 = vmatmul.mubr.msk.bf16.gmra.mrb[144].mxu0 %vm492_vm6, %v10395_v48  ;;  %v4440_v48 = vsel %vm13526_vm9, %v4438_v54, %v4439_v33  ;;  %v10433_v28 = vrot.slane %v10409_v2, 11  ;;  %v10415_v54 = vld [vmem:[%s12420_s25 + $0x230] sm:$0x8] }
 0x365   : > { %v13711_v59 = vadd.f32 %v11184_v1, %v13592_v6  ;;  %4588 = vmatprep.mubr.bf16.mxu0 %v15178_v43  ;;  %v10398_v53 = vcombine.low %v4437_v20, %v4440_v48  ;;  %v4703_v1 = vrot.slane %v4701_v9, 4  ;;  %v10435_v20 = vrot.slane %v10415_v54, 11 }
 0x366   : > { %v4717_v48 = vrot.slane %v4715_v32, 4 }
 0x367   : > { %v11185_v41 = vpop.f32.mrb[104].mxu0 }
 0x368   : > { %v11186_v38 = vpop.f32.mrb[105].mxu0 }
 0x369   : > { %v11187_v10 = vadd.f32 %v11186_v38, %v11185_v41  ;;  %v11188_v6 = vpop.f32.mrb[106].mxu0  ;;  %v4702_v38 = vsel %vm13526_vm9, %v10433_v28, %v4701_v9  ;;  %v4722_v28 = vrot.slane %v10419_v42, 7 }
 0x36a   : > { %v11189_v12 = vpop.f32.mrb[107].mxu0 }
 0x36b   : > { %v13722_v26 = vadd.f32 %v11187_v10, %v13602_v46  ;;  %v11190_v44 = vadd.f32 %v11189_v12, %v11188_v6  ;;  %v4708_v10 = vrot.slane %v10413_v16, 7  ;;  %v10412_v6 = vld [vmem:[%s12420_s25 + $0x214] sm:$0x8] }
 0x36c   : > { %10406 = vmatmul.mubr.msk.bf16.gmra.mrb[148].mxu0 %vm492_vm6, %v10396_v39  ;;  %v4705_v39 = vsel %vm13526_vm9, %v4703_v1, %v4704_v47  ;;  %v10418_v1 = vld [vmem:[%s12420_s25 + $0x24c] sm:$0x8]  ;;  %v10420_v47 = vld [vmem:[%s12420_s25 + $0x254] sm:$0x7] }
 0x36d   : > { %v13726_v15 = vadd.f32 %v11190_v44, %v13605_v27  ;;  %4598 = vmatprep.mubr.bf16.mxu0 %v15178_v43  ;;  %v10442_v40 = vcombine.low %v4702_v38, %v4705_v39  ;;  %v10434_v44 = vrot.slane %v10412_v6, 11  ;;  %v4710_v3 = vrot.slane %v4708_v10, 4 }
 0x36e   : > { %v10436_v38 = vrot.slane %v10418_v1, 11  ;;  %v4724_v39 = vrot.slane %v4722_v28, 4 }
 0x36f   : > { %v11191_v46 = vpop.f32.mrb[108].mxu0  ;;  %v4709_v58 = vsel %vm13526_vm9, %v10434_v44, %v4708_v10  ;;  %v4725_v10 = vrot.slane %v10420_v47, 7  ;;  %v4729_v44 = vrot.slane %v10422_v4, 7 }
 0x370   : > { %v11192_v31 = vpop.f32.mrb[109].mxu0  ;;  %v10565_v4 = vld.sshfl [vmem:[%s15121_s2 + $0x3c] sm:$0x33 pattern:$0x76325410] }
 0x371   : > { %v11193_v24 = vadd.f32 %v11192_v31, %v11191_v46  ;;  %v11194_v27 = vpop.f32.mrb[110].mxu0  ;;  %v5265_v46 = vcombine.high %v13768_v18, %v13768_v18 }
 0x372   : > { %v11195_v60 = vpop.f32.mrb[111].mxu0 }
 0x373   : > { %v13737_v23 = vadd.f32 %v11193_v24, %v13615_v8  ;;  %v11196_v51 = vadd.f32 %v11195_v60, %v11194_v27  ;;  %v4712_v27 = vsel %vm13526_vm9, %v4710_v3, %v4711_v29  ;;  %v10421_v3 = vld [vmem:[%s12420_s25 + $0x268] sm:$0x8] }
 0x374   : > { %10407 = vmatmul.mubr.msk.bf16.gmra.mrb[152].mxu0 %vm492_vm6, %v10397_v37  ;;  %v10443_v5 = vcombine.low %v4709_v58, %v4712_v27  ;;  %v10424_v27 = vld [vmem:[%s12420_s25 + $0x284] sm:$0x8] }
 0x375   : > { %v13741_v63 = vadd.f32 %v11196_v51, %v13618_v13  ;;  %4608 = vmatprep.mubr.bf16.mxu0 %v15178_v43 }
 0x377   : > { %v11197_v8 = vpop.f32.mrb[112].mxu0 }
 0x378   : > { %v11198_v17 = vpop.f32.mrb[113].mxu0 }
 0x379   : > { %v11199_v56 = vadd.f32 %v11198_v17, %v11197_v8  ;;  %v11200_v13 = vpop.f32.mrb[114].mxu0 }
 0x37a   : > { %v11201_v55 = vpop.f32.mrb[115].mxu0 }
 0x37b   : > { %v13752_v11 = vadd.f32 %v11199_v56, %v13628_v25  ;;  %v11202_v21 = vadd.f32 %v11201_v55, %v11200_v13  ;;  %v4716_v56 = vsel %vm13526_vm9, %v10435_v20, %v4715_v32  ;;  %v10426_v32 = vld [vmem:[%s12420_s25 + $0x28c] sm:$0x7] }
 0x37c   : > { %10408 = vmatmul.mubr.msk.bf16.gmra.mrb[156].mxu0 %vm492_vm6, %v10398_v53 }
 0x37d   : > { %v13756_v41 = vadd.f32 %v11202_v21, %v13631_v0  ;;  %4852 = vmatprep.mubr.bf16.mxu0 %v15178_v43 }
 0x37f   : > { %v11203_v25 = vpop.f32.mrb[116].mxu0 }
 0x380   : > { %v11204_v0 = vpop.f32.mrb[117].mxu0 }
 0x381   : > { %v11205_v12 = vadd.f32 %v11204_v0, %v11203_v25  ;;  %v11206_v14 = vpop.f32.mrb[118].mxu0 }
 0x382   : > { %v11207_v52 = vpop.f32.mrb[119].mxu0 }
 0x383   : > { %v13776_v31 = vadd.f32 %v11205_v12, %v13646_v7  ;;  %v11208_v37 = vadd.f32 %v11207_v52, %v11206_v14  ;;  %v10417_v7 = vld [vmem:[%s12420_s25 + $0x238] sm:$0x7]  ;;  %v4723_v12 = vsel %vm13526_vm9, %v10436_v38, %v4722_v28  ;;  %v4726_v14 = vsel %vm13526_vm9, %v4724_v39, %v4725_v10 }
 0x384   : > { %10452 = vmatmul.mubr.msk.bf16.vlgmr.msra.gmra.mrb[128].mxu0 %vm492_vm6, %v10442_v40  ;;  %v4718_v9 = vrot.slane %v10417_v7, 7  ;;  %v10445_v29 = vcombine.low %v4723_v12, %v4726_v14  ;;  %v10437_v52 = vrot.slane %v10421_v3, 11  ;;  %v10438_v7 = vrot.slane %v10424_v27, 11  ;;  %v15182_v14 = vld [vmem:[#allocation4_spill] sm:$0xff]  ;;  %v15184_v3 = vld [vmem:[#allocation6_spill] sm:$0xff] }
 0x385   : > { %v13780_v24 = vadd.f32 %v11208_v37, %v13653_v61  ;;  %4983 = vmatpush1.bf16.msra.mxu0 %v4977_v35  ;;  %4862 = vmatprep.mubr.bf16.mxu0 %v15178_v43  ;;  %v4731_v35 = vrot.slane %v4729_v44, 4  ;;  %v5583_v12 = vcombine.high %v10565_v4, %v10565_v4 }
 0x386   : > { %10513 = vmatprep.subr.msk.bf16.mxu0 %vm517_vm0, %v5265_v46  ;;  %v4719_v13 = vsel %vm13526_vm9, %v4717_v48, %v4718_v9  ;;  %v4730_v46 = vsel %vm13526_vm9, %v10437_v52, %v4729_v44  ;;  %v10427_v48 = vld [vmem:[%s12420_s25 + $0x2a0] sm:$0x8]  ;;  %v10429_v9 = vld [vmem:[%s12420_s25 + $0x2a8] sm:$0x7]  ;;  %v15183_v44 = vld [vmem:[#allocation5_spill] sm:$0xff] }
 0x387   : > { %v11209_v33 = vpop.f32.mrb[120].mxu0  ;;  %v10444_v16 = vcombine.low %v4716_v56, %v4719_v13  ;;  %v10439_v42 = vrot.slane %v10427_v48, 11  ;;  %v4746_v56 = vrot.slane %v10429_v9, 7  ;;  %v10431_v13 = vld [vmem:[%s12420_s25 + $0x2c0] sm:$0xf] }
 0x388   : > { %v11210_v60 = vpop.f32.mrb[121].mxu0  ;;  %v4750_v47 = vrot.slane %v10431_v13, 7  ;;  %v10472_v52 = vld [vmem:[%s12420_s25 + $0x208] sm:$0xf] }
 0x389   : > { %v11211_v61 = vadd.f32 %v11210_v60, %v11209_v33  ;;  %v11212_v51 = vpop.f32.mrb[122].mxu0  ;;  %v4739_v60 = vrot.slane %v10426_v32, 7  ;;  %v10475_v32 = vld [vmem:[%s12420_s25 + $0x224] sm:$0xf] }
 0x38a   : > { %v11213_v2 = vpop.f32.mrb[123].mxu0 }
 0x38b   : > { %v13792_v8 = vadd.f32 %v11211_v61, %v13664_v19  ;;  %v11214_v17 = vadd.f32 %v11213_v2, %v11212_v51 }
 0x38c   : > { %10453 = vmatmul.mubr.msk.bf16.gmra.mrb[132].mxu0 %vm492_vm6, %v10443_v5  ;;  %v10428_v5 = vld [vmem:[%s12420_s25 + $0x2a4] sm:$0xf] }
 0x38d   : > { %v13796_v53 = vadd.f32 %v11214_v17, %v13667_v34  ;;  %4872 = vmatprep.mubr.bf16.mxu0 %v15178_v43  ;;  %v4743_v20 = vrot.slane %v10428_v5, 7  ;;  %v10474_v5 = vld [vmem:[%s12420_s25 + $0x220] sm:$0x8] }
 0x38e   : > { %v10496_v48 = vrot.slane %v10474_v5, 11 }
 0x38f   : > { %v11215_v19 = vpop.f32.mrb[124].mxu0  ;;  %v4745_v17 = vrot.slane %v4743_v20, 4  ;;  %v4744_v28 = vsel %vm13526_vm9, %v10439_v42, %v4743_v20  ;;  %v5609_v42 = vsel %vm517_vm0, %v10565_v4, 0  ;;  %v10480_v4 = vld [vmem:[%s12420_s25 + $0x258] sm:$0x8] }
 0x390   : > { %v11216_v55 = vpop.f32.mrb[125].mxu0 }
 0x391   : > { %v11217_v21 = vadd.f32 %v11216_v55, %v11215_v19  ;;  %v11218_v34 = vpop.f32.mrb[126].mxu0  ;;  %v4747_v1 = vsel %vm13526_vm9, %v4745_v17, %v4746_v56  ;;  %v10430_v19 = vld [vmem:[%s12420_s25 + $0x2bc] sm:$0x8]  ;;  %v10432_v55 = vld [vmem:[%s12420_s25 + $0x2c4] sm:$0x7] }
 0x392   : > { %v11219_v6 = vpop.f32.mrb[127].mxu0  ;;  %v4753_v38 = vrot.slane %v10432_v55, 7  ;;  %v10478_v17 = vld [vmem:[%s12420_s25 + $0x240] sm:$0xf] }
 0x393   : > { %v13807_v25 = vadd.f32 %v11217_v21, %v13677_v57  ;;  %v11220_v0 = vadd.f32 %v11219_v6, %v11218_v34  ;;  %v10423_v57 = vld [vmem:[%s12420_s25 + $0x270] sm:$0x7]  ;;  %v10440_v21 = vrot.slane %v10430_v19, 11  ;;  %v4752_v34 = vrot.slane %v4750_v47, 4  ;;  %v10479_v19 = vld [vmem:[%s12420_s25 + $0x244] sm:$0x7] }
 0x394   : > { %10454 = vmatmul.mubr.msk.bf16.gmra.mrb[136].mxu0 %vm492_vm6, %v10444_v16  ;;  %v4732_v45 = vrot.slane %v10423_v57, 7  ;;  %v10448_v16 = vcombine.low %v4744_v28, %v4747_v1  ;;  %v15186_v57 = vld [vmem:[#allocation8_spill] sm:$0xff]  ;;  %v5191_v1 = vrot.slane %v10478_v17, 7  ;;  %v10488_v17 = vld [vmem:[%s12420_s25 + $0x298] sm:$0x7] }
 0x395   : > { %v13811_v40 = vadd.f32 %v11220_v0, %v13680_v36  ;;  %4882 = vmatprep.mubr.bf16.mxu0 %v15178_v43  ;;  %v10425_v36 = vld [vmem:[%s12420_s25 + $0x288] sm:$0xf]  ;;  %v4751_v39 = vsel %vm13526_vm9, %v10440_v21, %v4750_v47  ;;  %v4754_v10 = vsel %vm13526_vm9, %v4752_v34, %v4753_v38  ;;  %v5291_v0 = vsel %vm517_vm0, %v13768_v18, 0  ;;  %v10477_v47 = vld [vmem:[%s12420_s25 + $0x23c] sm:$0x8] }
 0x396   : > { %v4733_v37 = vsel %vm13526_vm9, %v4731_v35, %v4732_v45  ;;  %v4736_v58 = vrot.slane %v10425_v36, 7  ;;  %v10449_v6 = vcombine.low %v4751_v39, %v4754_v10  ;;  %v15185_v18 = vld [vmem:[#allocation7_spill] sm:$0xff]  ;;  %v15188_v35 = vld [vmem:[#allocation10_spill] sm:$0xff]  ;;  %v5177_v45 = vrot.slane %v10472_v52, 7  ;;  %v10481_v38 = vld [vmem:[%s12420_s25 + $0x25c] sm:$0xf] }
 0x397   : > { %v10446_v54 = vcombine.low %v4730_v46, %v4733_v37  ;;  %v10471_v36 = vld [vmem:[%s12420_s25 + $0x204] sm:$0x8]  ;;  %v10473_v46 = vld [vmem:[%s12420_s25 + $0x20c] sm:$0x7]  ;;  %v5193_v21 = vrot.slane %v5191_v1, 4  ;;  %v5194_v34 = vrot.slane %v10479_v19, 7 }
 0x398   : > { %v4738_v33 = vrot.slane %v4736_v58, 4  ;;  %v4737_v61 = vsel %vm13526_vm9, %v10438_v7, %v4736_v58  ;;  %v10495_v37 = vrot.slane %v10471_v36, 11  ;;  %v5179_v58 = vrot.slane %v5177_v45, 4 }
 0x399   : > { %v5180_v27 = vrot.slane %v10473_v46, 7  ;;  %v5195_v10 = vsel %vm13526_vm9, %v5193_v21, %v5194_v34  ;;  %v10498_v52 = vrot.slane %v10480_v4, 11  ;;  %v10484_v46 = vld [vmem:[%s12420_s25 + $0x278] sm:$0xf]  ;;  %v10489_v21 = vld [vmem:[%s12420_s25 + $0x2ac] sm:$0x8] }
 0x39a   : > { %v4740_v51 = vsel %vm13526_vm9, %v4738_v33, %v4739_v60  ;;  %v5178_v7 = vsel %vm13526_vm9, %v10495_v37, %v5177_v45  ;;  %v5184_v60 = vrot.slane %v10475_v32, 7  ;;  %v10483_v32 = vld [vmem:[%s12420_s25 + $0x274] sm:$0x8]  ;;  %v10491_v34 = vld [vmem:[%s12420_s25 + $0x2b4] sm:$0x7] }
 0x39b   : > { %v10447_v2 = vcombine.low %v4737_v61, %v4740_v51  ;;  %v5181_v33 = vsel %vm13526_vm9, %v5179_v58, %v5180_v27  ;;  %v10476_v61 = vld [vmem:[%s12420_s25 + $0x228] sm:$0x7]  ;;  %v13898_v51 = vld.sshfl [vmem:[%s15121_s2 + $0x40] sm:$0x33 pattern:$0x76325410] }
 0x39c   : > { %10455 = vmatmul.mubr.msk.bf16.gmra.mrb[140].mxu0 %vm492_vm6, %v10445_v29  ;;  %v15187_v29 = vld [vmem:[#allocation9_spill] sm:$0xff]  ;;  %v10504_v20 = vcombine.low %v5178_v7, %v5181_v33  ;;  %v5186_v9 = vrot.slane %v5184_v60, 4  ;;  %v5897_v56 = vcombine.high %v13898_v51, %v13898_v51  ;;  %v5185_v13 = vsel %vm13526_vm9, %v10496_v48, %v5184_v60  ;;  %v10493_v4 = vld [vmem:[%s12420_s25 + $0x2cc] sm:$0xf] }
 0x39d   : > { %4892 = vmatprep.mubr.bf16.mxu0 %v15178_v43  ;;  %v5205_v27 = vrot.slane %v10484_v46, 7  ;;  %v10485_v7 = vld [vmem:[%s12420_s25 + $0x27c] sm:$0x7]  ;;  %v10499_v60 = vrot.slane %v10483_v32, 11  ;;  %v10525_v32 = vld [vmem:[%s12420_s25 + $0x34c] sm:$0xf] }
 0x39f   : > { %v5207_v5 = vrot.slane %v5205_v27, 4  ;;  %v5206_v48 = vsel %vm13526_vm9, %v10499_v60, %v5205_v27  ;;  %v5495_v60 = vrot.slane %v10525_v32, 7  ;;  %v10533_v32 = vld [vmem:[%s12420_s25 + $0x39c] sm:$0x8] }
 0x3a4   : > { %10456 = vmatmul.mubr.msk.bf16.gmra.mrb[144].mxu0 %vm492_vm6, %v10446_v54  ;;  %v15189_v54 = vld [vmem:[#allocation11_spill] sm:$0xff] }
 0x3a5   : > { %4902 = vmatprep.mubr.bf16.mxu0 %v15178_v43 }
 0x3ac   : > { %10457 = vmatmul.mubr.msk.bf16.gmra.mrb[148].mxu0 %vm492_vm6, %v10447_v2  ;;  %v5187_v2 = vrot.slane %v10476_v61, 7  ;;  %v5208_v61 = vrot.slane %v10485_v7, 7 }
 0x3ad   : > { %4912 = vmatprep.mubr.bf16.mxu0 %v15178_v43 }
 0x3ae   : > { %v5188_v28 = vsel %vm13526_vm9, %v5186_v9, %v5187_v2  ;;  %v5209_v9 = vsel %vm13526_vm9, %v5207_v5, %v5208_v61  ;;  %v10524_v5 = vld [vmem:[%s12420_s25 + $0x348] sm:$0x8]  ;;  %v10526_v61 = vld [vmem:[%s12420_s25 + $0x350] sm:$0x7] }
 0x3af   : > { %v10505_v55 = vcombine.low %v5185_v13, %v5188_v28 }
 0x3b4   : > { %10458 = vmatmul.mubr.msk.bf16.gmra.mrb[152].mxu0 %vm492_vm6, %v10448_v16  ;;  %v10497_v16 = vrot.slane %v10477_v47, 11  ;;  %v10490_v47 = vld [vmem:[%s12420_s25 + $0x2b0] sm:$0xf] }
 0x3b5   : > { %4922 = vmatprep.mubr.bf16.mxu0 %v15178_v43 }
 0x3b6   : > { %v5192_v39 = vsel %vm13526_vm9, %v10497_v16, %v5191_v1  ;;  %v5215_v1 = vrot.slane %v10488_v17, 7  ;;  %v5219_v16 = vrot.slane %v10490_v47, 7  ;;  %v13979_v47 = vld.sshfl [vmem:[%s15121_s2 + $0x44] sm:$0x33 pattern:$0x76325410] }
 0x3bc   : > { %10459 = vmatmul.mubr.msk.bf16.gmra.mrb[156].mxu0 %vm492_vm6, %v10449_v6  ;;  %v5198_v6 = vrot.slane %v10481_v38, 7 }
 0x3bd   : > { %5014 = vmatprep.mubr.bf16.mxu0 %v15178_v43 }
 0x3be   : > { %v5200_v45 = vrot.slane %v5198_v6, 4  ;;  %v5199_v37 = vsel %vm13526_vm9, %v10498_v52, %v5198_v6  ;;  %v5222_v6 = vrot.slane %v10491_v34, 7  ;;  %v5226_v52 = vrot.slane %v10493_v4, 7 }
 0x3bf   : > { %v5923_v34 = vsel %vm517_vm0, %v13898_v51, 0  ;;  %v10530_v51 = vld [vmem:[%s12420_s25 + $0x380] sm:$0x8] }
 0x3c4   : > { %10463 = vmatmul.mubr.msk.bf16.vlgmr.msra.gmra.mrb[128].mxu0 %vm492_vm6, %v15182_v14 }
 0x3c5   : > { %5297 = vmatpush1.bf16.msra.mxu0 %v5291_v0  ;;  %5024 = vmatprep.mubr.bf16.mxu0 %v15178_v43  ;;  %v10482_v0 = vld [vmem:[%s12420_s25 + $0x260] sm:$0x7] }
 0x3c6   : > { %10566 = vmatprep.subr.msk.bf16.mxu0 %vm517_vm0, %v5583_v12  ;;  %v10506_v12 = vcombine.low %v5192_v39, %v5195_v10  ;;  %v5201_v36 = vrot.slane %v10482_v0, 7  ;;  %v10501_v39 = vrot.slane %v10489_v21, 11  ;;  %v5221_v10 = vrot.slane %v5219_v16, 4 }
 0x3c8   : > { %v5202_v58 = vsel %vm13526_vm9, %v5200_v45, %v5201_v36  ;;  %v5220_v0 = vsel %vm13526_vm9, %v10501_v39, %v5219_v16  ;;  %v10492_v45 = vld [vmem:[%s12420_s25 + $0x2c8] sm:$0x8]  ;;  %v10494_v36 = vld [vmem:[%s12420_s25 + $0x2d0] sm:$0x7]  ;;  %v6211_v39 = vcombine.high %v13979_v47, %v13979_v47 }
 0x3c9   : > { %v10507_v33 = vcombine.low %v5199_v37, %v5202_v58  ;;  %v10502_v37 = vrot.slane %v10492_v45, 11  ;;  %v5228_v58 = vrot.slane %v5226_v52, 4  ;;  %v5229_v27 = vrot.slane %v10494_v36, 7 }
 0x3cb   : > { %v5227_v7 = vsel %vm13526_vm9, %v10502_v37, %v5226_v52  ;;  %v10550_v52 = vrot.slane %v10530_v51, 11  ;;  %v10543_v51 = vld [vmem:[%s12420_s25 + $0x3f4] sm:$0xf] }
 0x3cc   : > { %10464 = vmatmul.mubr.msk.bf16.gmra.mrb[132].mxu0 %vm492_vm6, %v15183_v44 }
 0x3cd   : > { %5034 = vmatprep.mubr.bf16.mxu0 %v15178_v43 }
 0x3d4   : > { %10465 = vmatmul.mubr.msk.bf16.gmra.mrb[136].mxu0 %vm492_vm6, %v15184_v3 }
 0x3d5   : > { %5044 = vmatprep.mubr.bf16.mxu0 %v15178_v43 }
 0x3dc   : > { %10466 = vmatmul.mubr.msk.bf16.gmra.mrb[140].mxu0 %vm492_vm6, %v15185_v18 }
 0x3dd   : > { %5054 = vmatprep.mubr.bf16.mxu0 %v15178_v43 }
 0x3e4   : > { %10467 = vmatmul.mubr.msk.bf16.gmra.mrb[144].mxu0 %vm492_vm6, %v15186_v57 }
 0x3e5   : > { %5064 = vmatprep.mubr.bf16.mxu0 %v15178_v43 }
 0x3ec   : > { %10468 = vmatmul.mubr.msk.bf16.gmra.mrb[148].mxu0 %vm492_vm6, %v15187_v29 }
 0x3ed   : > { %5074 = vmatprep.mubr.bf16.mxu0 %v15178_v43 }
 0x3f4   : > { %10469 = vmatmul.mubr.msk.bf16.gmra.mrb[152].mxu0 %vm492_vm6, %v15188_v35 }
 0x3f5   : > { %5084 = vmatprep.mubr.bf16.mxu0 %v15178_v43 }
 0x3fc   : > { %10470 = vmatmul.mubr.msk.bf16.gmra.mrb[156].mxu0 %vm492_vm6, %v15189_v54 }
 0x3fd   : > { %5328 = vmatprep.mubr.bf16.mxu0 %v15178_v43 }
 0x404   : > { %10514 = vmatmul.mubr.msk.bf16.vlgmr.msra.gmra.mrb[128].mxu0 %vm492_vm6, %v10504_v20  ;;  %v10487_v20 = vld [vmem:[%s12420_s25 + $0x294] sm:$0xf] }
 0x405   : > { %5615 = vmatpush1.bf16.msra.mxu0 %v5609_v42  ;;  %5338 = vmatprep.mubr.bf16.mxu0 %v15178_v43  ;;  %v5212_v2 = vrot.slane %v10487_v20, 7  ;;  %v10486_v42 = vld [vmem:[%s12420_s25 + $0x290] sm:$0x8] }
 0x406   : > { %10617 = vmatprep.subr.msk.bf16.mxu0 %vm517_vm0, %v5897_v56  ;;  %v10508_v56 = vcombine.low %v5206_v48, %v5209_v9  ;;  %v10500_v13 = vrot.slane %v10486_v42, 11  ;;  %v10548_v48 = vrot.slane %v10524_v5, 11  ;;  %v5497_v9 = vrot.slane %v5495_v60, 4  ;;  %v10528_v42 = vld [vmem:[%s12420_s25 + $0x368] sm:$0xf] }
 0x407   : > { %v5214_v28 = vrot.slane %v5212_v2, 4 }
 0x408   : > { %v5213_v19 = vsel %vm13526_vm9, %v10500_v13, %v5212_v2  ;;  %v5498_v2 = vrot.slane %v10526_v61, 7  ;;  %v5496_v17 = vsel %vm13526_vm9, %v10548_v48, %v5495_v60  ;;  %v5502_v13 = vrot.slane %v10528_v42, 7  ;;  %v10536_v42 = vld [vmem:[%s12420_s25 + $0x3b8] sm:$0x8] }
 0x409   : > { %v10551_v60 = vrot.slane %v10533_v32, 11  ;;  %v10546_v32 = vld [vmem:[%s12420_s25 + $0x410] sm:$0xf] }
 0x40a   : > { %v5504_v16 = vrot.slane %v5502_v13, 4 }
 0x40c   : > { %10515 = vmatmul.mubr.msk.bf16.gmra.mrb[132].mxu0 %vm492_vm6, %v10505_v55  ;;  %v5216_v55 = vsel %vm13526_vm9, %v5214_v28, %v5215_v1  ;;  %v10527_v28 = vld [vmem:[%s12420_s25 + $0x364] sm:$0x8]  ;;  %v10529_v1 = vld [vmem:[%s12420_s25 + $0x36c] sm:$0x7] }
 0x40d   : > { %5348 = vmatprep.mubr.bf16.mxu0 %v15178_v43  ;;  %v10509_v38 = vcombine.low %v5213_v19, %v5216_v55  ;;  %v10549_v55 = vrot.slane %v10527_v28, 11  ;;  %v5505_v21 = vrot.slane %v10529_v1, 7 }
 0x414   : > { %10516 = vmatmul.mubr.msk.bf16.gmra.mrb[136].mxu0 %vm492_vm6, %v10506_v12  ;;  %v5223_v12 = vsel %vm13526_vm9, %v5221_v10, %v5222_v6  ;;  %v5503_v10 = vsel %vm13526_vm9, %v10549_v55, %v5502_v13  ;;  %v5506_v6 = vsel %vm13526_vm9, %v5504_v16, %v5505_v21  ;;  %v10552_v13 = vrot.slane %v10536_v42, 11  ;;  %v10576_v42 = vld [vmem:[%s12420_s25 + $0x354] sm:$0xf] }
 0x415   : > { %5358 = vmatprep.mubr.bf16.mxu0 %v15178_v43  ;;  %v10510_v46 = vcombine.low %v5220_v0, %v5223_v12  ;;  %v10532_v0 = vld [vmem:[%s12420_s25 + $0x388] sm:$0x7]  ;;  %v10558_v12 = vcombine.low %v5503_v10, %v5506_v6 }
 0x416   : > { %v5512_v36 = vrot.slane %v10532_v0, 7 }
 0x41c   : > { %10517 = vmatmul.mubr.msk.bf16.gmra.mrb[140].mxu0 %vm492_vm6, %v10507_v33  ;;  %v5230_v33 = vsel %vm13526_vm9, %v5228_v58, %v5229_v27 }
 0x41d   : > { %5368 = vmatprep.mubr.bf16.mxu0 %v15178_v43  ;;  %v10511_v20 = vcombine.low %v5227_v7, %v5230_v33  ;;  %v10535_v7 = vld [vmem:[%s12420_s25 + $0x3a4] sm:$0x7] }
 0x41e   : > { %v5519_v61 = vrot.slane %v10535_v7, 7 }
 0x424   : > { %10518 = vmatmul.mubr.msk.bf16.gmra.mrb[144].mxu0 %vm492_vm6, %v10508_v56  ;;  %v5499_v56 = vsel %vm13526_vm9, %v5497_v9, %v5498_v2 }
 0x425   : > { %5378 = vmatprep.mubr.bf16.mxu0 %v15178_v43  ;;  %v10557_v19 = vcombine.low %v5496_v17, %v5499_v56  ;;  %v10538_v17 = vld [vmem:[%s12420_s25 + $0x3c0] sm:$0x7] }
 0x426   : > { %v5526_v1 = vrot.slane %v10538_v17, 7 }
 0x42c   : > { %10519 = vmatmul.mubr.msk.bf16.gmra.mrb[148].mxu0 %vm492_vm6, %v10509_v38  ;;  %v10531_v38 = vld [vmem:[%s12420_s25 + $0x384] sm:$0xf] }
 0x42d   : > { %5388 = vmatprep.mubr.bf16.mxu0 %v15178_v43  ;;  %v5509_v4 = vrot.slane %v10531_v38, 7  ;;  %v10541_v38 = vld [vmem:[%s12420_s25 + $0x3dc] sm:$0x7] }
 0x42f   : > { %v5511_v45 = vrot.slane %v5509_v4, 4  ;;  %v5510_v37 = vsel %vm13526_vm9, %v10550_v52, %v5509_v4  ;;  %v5533_v4 = vrot.slane %v10541_v38, 7  ;;  %v5537_v52 = vrot.slane %v10543_v51, 7  ;;  %v12215_v38 = vld [vmem:[%s15122_s3 + $0x140] sm:$0xff]  }
 0x430   : > { %11221 = vmatprep.subr.bf16.mxu1 %v12215_v38  ;;  %v12226_v38 = vld [vmem:[%s15122_s3 + $0x128] sm:$0xff]  }
 0x431   : > { %v5513_v58 = vsel %vm13526_vm9, %v5511_v45, %v5512_v36  ;;  %v10542_v45 = vld [vmem:[%s12420_s25 + $0x3f0] sm:$0x8]  ;;  %v10544_v36 = vld [vmem:[%s12420_s25 + $0x3f8] sm:$0x7] }
 0x432   : > { %v10559_v33 = vcombine.low %v5510_v37, %v5513_v58  ;;  %v10554_v37 = vrot.slane %v10542_v45, 11  ;;  %v5539_v58 = vrot.slane %v5537_v52, 4 }
 0x434   : > { %10520 = vmatmul.mubr.msk.bf16.gmra.mrb[152].mxu0 %vm492_vm6, %v10510_v46  ;;  %v10534_v46 = vld [vmem:[%s12420_s25 + $0x3a0] sm:$0xf]  ;;  %v5538_v7 = vsel %vm13526_vm9, %v10554_v37, %v5537_v52  ;;  %v12218_v52 = vld [vmem:[%s15122_s3 + $0x108] sm:$0xff]  }
 0x435   : > { %5398 = vmatprep.mubr.bf16.mxu0 %v15178_v43  ;;  %v5516_v27 = vrot.slane %v10534_v46, 7 }
 0x437   : > { %v5518_v5 = vrot.slane %v5516_v27, 4  ;;  %v5517_v48 = vsel %vm13526_vm9, %v10551_v60, %v5516_v27  ;;  %v5540_v27 = vrot.slane %v10544_v36, 7  ;;  %v5544_v60 = vrot.slane %v10546_v32, 7  ;;  %v12219_v36 = vld [vmem:[%s15122_s3 + $0x150] sm:$0xff]   ;;  %v10582_v32 = vld [vmem:[%s12420_s25 + $0x38c] sm:$0xf] }
 0x439   : > { %v5520_v9 = vsel %vm13526_vm9, %v5518_v5, %v5519_v61  ;;  %v10545_v5 = vld [vmem:[%s12420_s25 + $0x40c] sm:$0x8]  ;;  %v10547_v61 = vld [vmem:[%s12420_s25 + $0x414] sm:$0x7] }
 0x43a   : > { %v10560_v56 = vcombine.low %v5517_v48, %v5520_v9  ;;  %v10555_v48 = vrot.slane %v10545_v5, 11  ;;  %v5546_v9 = vrot.slane %v5544_v60, 4  ;;  %v5823_v5 = vrot.slane %v10582_v32, 5 }
 0x43c   : > { %10521 = vmatmul.mubr.msk.bf16.gmra.mrb[156].mxu0 %vm492_vm6, %v10511_v20  ;;  %v10537_v20 = vld [vmem:[%s12420_s25 + $0x3bc] sm:$0xf]  ;;  %v5545_v17 = vsel %vm13526_vm9, %v10555_v48, %v5544_v60 }
 0x43d   : > { %5646 = vmatprep.mubr.bf16.mxu0 %v15178_v43  ;;  %v5523_v2 = vrot.slane %v10537_v20, 7  ;;  %v12222_v48 = vld [vmem:[%s15122_s3 + $0x118] sm:$0xff]  }
 0x43f   : > { %v5525_v28 = vrot.slane %v5523_v2, 4  ;;  %v5524_v55 = vsel %vm13526_vm9, %v10552_v13, %v5523_v2  ;;  %v5547_v2 = vrot.slane %v10547_v61, 7  ;;  %v5809_v13 = vrot.slane %v10576_v42, 5  ;;  %v10581_v61 = vld [vmem:[%s12420_s25 + $0x388] sm:$0xe] }
 0x440   : > { %v10601_v42 = vrot.slane %v10581_v61, 9  ;;  %v10590_v61 = vld [vmem:[%s12420_s25 + $0x3dc] sm:$0xe] }
 0x441   : > { %v5527_v16 = vsel %vm13526_vm9, %v5525_v28, %v5526_v1  ;;  %v10575_v28 = vld [vmem:[%s12420_s25 + $0x350] sm:$0xe]  ;;  %v10577_v1 = vld [vmem:[%s12420_s25 + $0x358] sm:$0x1] }
 0x444   : > { %10567 = vmatmul.mubr.msk.bf16.vlgmr.msra.gmra.mrb[128].mxu0 %vm492_vm6, %v10557_v19  ;;  %v10540_v19 = vld [vmem:[%s12420_s25 + $0x3d8] sm:$0xf] }
 0x445   : > { %5929 = vmatpush1.bf16.msra.mxu0 %v5923_v34  ;;  %5656 = vmatprep.mubr.bf16.mxu0 %v15178_v43  ;;  %v5530_v21 = vrot.slane %v10540_v19, 7  ;;  %v10539_v34 = vld [vmem:[%s12420_s25 + $0x3d4] sm:$0x8] }
 0x446   : > { %10668 = vmatprep.subr.msk.bf16.mxu0 %vm517_vm0, %v6211_v39  ;;  %v10561_v39 = vcombine.low %v5524_v55, %v5527_v16  ;;  %v10553_v10 = vrot.slane %v10539_v34, 11  ;;  %v10599_v55 = vrot.slane %v10575_v28, 9  ;;  %v5811_v16 = vrot.slane %v5809_v13, 4  ;;  %v10579_v34 = vld [vmem:[%s12420_s25 + $0x370] sm:$0xf]  ;;  %v12224_v28 = vld [vmem:[%s15122_s3 + $0x120] sm:$0xff]  }
 0x447   : > { %v5532_v6 = vrot.slane %v5530_v21, 4  ;;  %v5816_v51 = vrot.slane %v10579_v34, 5  ;;  %v10586_v34 = vld [vmem:[%s12420_s25 + $0x3ac] sm:$0x1] }
 0x448   : > { %v5531_v0 = vsel %vm13526_vm9, %v10553_v10, %v5530_v21  ;;  %v5812_v21 = vrot.slane %v10577_v1, 5  ;;  %v12217_v10 = vld [vmem:[%s15122_s3 + $0x148] sm:$0xff]  }
 0x449   : > { %v5818_v37 = vrot.slane %v5816_v51, 4  ;;  %v12225_v1 = vld [vmem:[%s15122_s3 + $0x168] sm:$0xff]  }
 0x44c   : > { %10568 = vmatmul.mubr.msk.bf16.gmra.mrb[132].mxu0 %vm492_vm6, %v10558_v12  ;;  %v5534_v12 = vsel %vm13526_vm9, %v5532_v6, %v5533_v4  ;;  %v5810_v6 = vsel %vm12412_vm3, %v10599_v55, %v5809_v13  ;;  %v5813_v4 = vsel %vm12412_vm3, %v5811_v16, %v5812_v21  ;;  %v10585_v13 = vld [vmem:[%s12420_s25 + $0x3a8] sm:$0xf]  ;;  %v10584_v21 = vld [vmem:[%s12420_s25 + $0x3a4] sm:$0xe] }
 0x44d   : > { %5666 = vmatprep.mubr.bf16.mxu0 %v15178_v43  ;;  %v10562_v46 = vcombine.low %v5531_v0, %v5534_v12  ;;  %v10578_v0 = vld [vmem:[%s12420_s25 + $0x36c] sm:$0xe]  ;;  %v10580_v12 = vld [vmem:[%s12420_s25 + $0x374] sm:$0x1]  ;;  %v10608_v45 = vcombine.low %v5810_v6, %v5813_v4  ;;  %v5830_v16 = vrot.slane %v10585_v13, 5  ;;  %v10602_v6 = vrot.slane %v10584_v21, 9 }
 0x44f   : > { %v5832_v4 = vrot.slane %v5830_v16, 4 }
 0x454   : > { %10569 = vmatmul.mubr.msk.bf16.gmra.mrb[136].mxu0 %vm492_vm6, %v10559_v33  ;;  %v5541_v33 = vsel %vm13526_vm9, %v5539_v58, %v5540_v27  ;;  %v5819_v58 = vrot.slane %v10580_v12, 5  ;;  %v6237_v27 = vsel %vm517_vm0, %v13979_v47, 0  ;;  %v12228_v12 = vld [vmem:[%s15122_s3 + $0x130] sm:$0xff]  }
 0x455   : > { %5676 = vmatprep.mubr.bf16.mxu0 %v15178_v43  ;;  %v10563_v20 = vcombine.low %v5538_v7, %v5541_v33  ;;  %v12220_v7 = vld [vmem:[%s15122_s3 + $0x110] sm:$0xff]   ;;  %v12221_v33 = vld [vmem:[%s15122_s3 + $0x158] sm:$0xff]  }
 0x456   : > { %v5820_v60 = vsel %vm12412_vm3, %v5818_v37, %v5819_v58  ;;  %v10589_v37 = vld [vmem:[%s12420_s25 + $0x3c8] sm:$0x1] }
 0x45c   : > { %10570 = vmatmul.mubr.msk.bf16.gmra.mrb[140].mxu0 %vm492_vm6, %v10560_v56  ;;  %v5548_v56 = vsel %vm13526_vm9, %v5546_v9, %v5547_v2  ;;  %v12223_v2 = vld [vmem:[%s15122_s3 + $0x160] sm:$0xff]  }
 0x45d   : > { %5686 = vmatprep.mubr.bf16.mxu0 %v15178_v43  ;;  %v10564_v19 = vcombine.low %v5545_v17, %v5548_v56  ;;  %v5825_v17 = vrot.slane %v5823_v5, 4 }
 0x464   : > { %10571 = vmatmul.mubr.msk.bf16.gmra.mrb[144].mxu0 %vm492_vm6, %v10561_v39  ;;  %v12216_v39 = vld [vmem:[%s15122_s3 + $0x100] sm:$0xff]  }
 0x465   : > { %5696 = vmatprep.mubr.bf16.mxu0 %v15178_v43  ;;  %11222 = vmatpush3.bf16.msra.mxu1 %v12216_v39 }
 0x466   : > { %11223 = vmatprep.subr.bf16.mxu1 %v12217_v10  ;;  %v12227_v10 = vld [vmem:[%s15122_s3 + $0x170] sm:$0xff]  }
 0x469   : > { %11224 = vmatpush3.bf16.msra.mxu1 %v12218_v52  ;;  %v5831_v52 = vsel %vm12412_vm3, %v10602_v6, %v5830_v16 }
 0x46a   : > { %11225 = vmatprep.subr.bf16.mxu1 %v12219_v36 }
 0x46c   : > { %10572 = vmatmul.mubr.msk.bf16.gmra.mrb[148].mxu0 %vm492_vm6, %v10562_v46  ;;  %v10600_v46 = vrot.slane %v10578_v0, 9  ;;  %v10588_v0 = vld [vmem:[%s12420_s25 + $0x3c4] sm:$0xf] }
 0x46d   : > { %5706 = vmatprep.mubr.bf16.mxu0 %v15178_v43  ;;  %11226 = vmatpush3.bf16.msra.mxu1 %v12220_v7  ;;  %v5837_v36 = vrot.slane %v10588_v0, 5  ;;  %v5840_v7 = vrot.slane %v10589_v37, 5 }
 0x46e   : > { %v5817_v47 = vsel %vm12412_vm3, %v10600_v46, %v5816_v51  ;;  %11227 = vmatprep.subr.bf16.mxu1 %v12221_v33  ;;  %v5833_v51 = vrot.slane %v10586_v34, 5  ;;  %v10587_v46 = vld [vmem:[%s12420_s25 + $0x3c0] sm:$0xe] }
 0x46f   : > { %v10609_v9 = vcombine.low %v5817_v47, %v5820_v60  ;;  %v5839_v32 = vrot.slane %v5837_v36, 4  ;;  %v10591_v33 = vld [vmem:[%s12420_s25 + $0x3e0] sm:$0xf] }
 0x471   : > { %11228 = vmatpush3.bf16.msra.mxu1 %v12222_v48  ;;  %v5841_v60 = vsel %vm12412_vm3, %v5839_v32, %v5840_v7  ;;  %v10628_v32 = vld [vmem:[%s12420_s25 + $0x35c] sm:$0x7] }
 0x472   : > { %11229 = vmatprep.subr.bf16.mxu1 %v12223_v2 }
 0x474   : > { %10573 = vmatmul.mubr.msk.bf16.gmra.mrb[152].mxu0 %vm492_vm6, %v10563_v20  ;;  %v10583_v20 = vld [vmem:[%s12420_s25 + $0x390] sm:$0x1] }
 0x475   : > { %5716 = vmatprep.mubr.bf16.mxu0 %v15178_v43  ;;  %v5826_v56 = vrot.slane %v10583_v20, 5  ;;  %11230 = vmatpush3.bf16.msra.mxu1 %v12224_v28  ;;  %v10592_v20 = vld [vmem:[%s12420_s25 + $0x3e4] sm:$0x1] }
 0x476   : > { %11231 = vmatprep.subr.bf16.mxu1 %v12225_v1  ;;  %v10593_v1 = vld [vmem:[%s12420_s25 + $0x3f8] sm:$0xe] }
 0x477   : > { %v5827_v55 = vsel %vm12412_vm3, %v5825_v17, %v5826_v56  ;;  %v10594_v17 = vld [vmem:[%s12420_s25 + $0x3fc] sm:$0xf]  ;;  %v10605_v16 = vrot.slane %v10593_v1, 9 }
 0x478   : > { %v5851_v28 = vrot.slane %v10594_v17, 5 }
 0x479   : > { %11232 = vmatpush3.bf16.msra.mxu1 %v12226_v38  ;;  %v10597_v38 = vld [vmem:[%s12420_s25 + $0x418] sm:$0xf] }
 0x47a   : > { %11233 = vmatprep.subr.bf16.mxu1 %v12227_v10  ;;  %v5853_v21 = vrot.slane %v5851_v28, 4  ;;  %v5858_v6 = vrot.slane %v10597_v38, 5 }
 0x47c   : > { %10574 = vmatmul.mubr.msk.bf16.gmra.mrb[156].mxu0 %vm492_vm6, %v10564_v19  ;;  %v5824_v19 = vsel %vm12412_vm3, %v10601_v42, %v5823_v5  ;;  %v5844_v5 = vrot.slane %v10591_v33, 5  ;;  %v5847_v42 = vrot.slane %v10592_v20, 5 }
 0x47d   : > { %5960 = vmatprep.mubr.bf16.mxu0 %v15178_v43  ;;  %v10610_v39 = vcombine.low %v5824_v19, %v5827_v55  ;;  %11234 = vmatpush3.bf16.msra.mxu1 %v12228_v12  ;;  %v10595_v19 = vld [vmem:[%s12420_s25 + $0x400] sm:$0x1] }
 0x47e   : > { %v5846_v2 = vrot.slane %v5844_v5, 4  ;;  %v5854_v34 = vrot.slane %v10595_v19, 5 }
 0x480   : > { %v5848_v13 = vsel %vm12412_vm3, %v5846_v2, %v5847_v42  ;;  %v5855_v10 = vsel %vm12412_vm3, %v5853_v21, %v5854_v34  ;;  %v10631_v2 = vld [vmem:[%s12420_s25 + $0x378] sm:$0x7]  ;;  %v10634_v21 = vld [vmem:[%s12420_s25 + $0x394] sm:$0x7] }
 0x484   : > { %10618 = vmatmul.mubr.msk.bf16.vlgmr.msra.gmra.mrb[128].mxu0 %vm492_vm6, %v10608_v45  ;;  %v5834_v45 = vsel %vm12412_vm3, %v5832_v4, %v5833_v51  ;;  %v10596_v4 = vld [vmem:[%s12420_s25 + $0x414] sm:$0xe]  ;;  %v10598_v51 = vld [vmem:[%s12420_s25 + $0x41c] sm:$0x1] }
 0x485   : > { %6243 = vmatpush1.bf16.msra.mxu0 %v6237_v27  ;;  %5970 = vmatprep.mubr.bf16.mxu0 %v15178_v43  ;;  %v10611_v58 = vcombine.low %v5831_v52, %v5834_v45  ;;  %v10603_v27 = vrot.slane %v10587_v46, 9  ;;  %v10606_v12 = vrot.slane %v10596_v4, 9  ;;  %v5860_v52 = vrot.slane %v5858_v6, 4 }
 0x486   : > { %v5861_v45 = vrot.slane %v10598_v51, 5 }
 0x487   : > { %v5838_v47 = vsel %vm12412_vm3, %v10603_v27, %v5837_v36  ;;  %v10627_v36 = vld [vmem:[%s12420_s25 + $0x358] sm:$0xf]  ;;  %v5859_v46 = vsel %vm12412_vm3, %v10606_v12, %v5858_v6  ;;  %v10626_v27 = vld [vmem:[%s12420_s25 + $0x354] sm:$0x8]  ;;  %v10636_v6 = vld [vmem:[%s12420_s25 + $0x3ac] sm:$0xf] }
 0x488   : > { %v10612_v48 = vcombine.low %v5838_v47, %v5841_v60  ;;  %v5862_v37 = vsel %vm12412_vm3, %v5860_v52, %v5861_v45  ;;  %v10650_v33 = vrot.slane %v10626_v27, 11  ;;  %v6126_v60 = vrot.slane %v10628_v32, 7  ;;  %v10635_v12 = vld [vmem:[%s12420_s25 + $0x3a8] sm:$0x8]  ;;  %v10637_v52 = vld [vmem:[%s12420_s25 + $0x3b0] sm:$0x7] }
 0x489   : > { %v10615_v7 = vcombine.low %v5859_v46, %v5862_v37  ;;  %v6147_v37 = vrot.slane %v10637_v52, 7 }
 0x48c   : > { %10619 = vmatmul.mubr.msk.bf16.gmra.mrb[132].mxu0 %vm492_vm6, %v10609_v9  ;;  %v10604_v9 = vrot.slane %v10590_v61, 9 }
 0x48d   : > { %5980 = vmatprep.mubr.bf16.mxu0 %v15178_v43 }
 0x48e   : > { %v5845_v56 = vsel %vm12412_vm3, %v10604_v9, %v5844_v5  ;;  %v10630_v5 = vld [vmem:[%s12420_s25 + $0x374] sm:$0xf]  ;;  %v10629_v9 = vld [vmem:[%s12420_s25 + $0x370] sm:$0x8] }
 0x48f   : > { %v10613_v55 = vcombine.low %v5845_v56, %v5848_v13  ;;  %v10651_v17 = vrot.slane %v10629_v9, 11  ;;  %v6133_v13 = vrot.slane %v10631_v2, 7 }
 0x494   : > { %10620 = vmatmul.mubr.msk.bf16.gmra.mrb[136].mxu0 %vm492_vm6, %v10610_v39  ;;  %v5852_v39 = vsel %vm12412_vm3, %v10605_v16, %v5851_v28  ;;  %v10633_v28 = vld [vmem:[%s12420_s25 + $0x390] sm:$0xf]  ;;  %v10632_v16 = vld [vmem:[%s12420_s25 + $0x38c] sm:$0x8] }
 0x495   : > { %5990 = vmatprep.mubr.bf16.mxu0 %v15178_v43  ;;  %v10614_v0 = vcombine.low %v5852_v39, %v5855_v10  ;;  %v10652_v38 = vrot.slane %v10632_v16, 11  ;;  %v6140_v10 = vrot.slane %v10634_v21, 7 }
 0x49c   : > { %10621 = vmatmul.mubr.msk.bf16.gmra.mrb[140].mxu0 %vm492_vm6, %v10611_v58  ;;  %v6123_v58 = vrot.slane %v10627_v36, 7  ;;  %v10653_v36 = vrot.slane %v10635_v12, 11 }
 0x49d   : > { %6000 = vmatprep.mubr.bf16.mxu0 %v15178_v43 }
 0x49e   : > { %v6125_v47 = vrot.slane %v6123_v58, 4  ;;  %v6124_v61 = vsel %vm13526_vm9, %v10650_v33, %v6123_v58  ;;  %v10639_v58 = vld [vmem:[%s12420_s25 + $0x3c8] sm:$0xf]  ;;  %v10638_v33 = vld [vmem:[%s12420_s25 + $0x3c4] sm:$0x8] }
 0x4a0   : > { %v6127_v20 = vsel %vm13526_vm9, %v6125_v47, %v6126_v60  ;;  %v10640_v47 = vld [vmem:[%s12420_s25 + $0x3cc] sm:$0x7] }
 0x4a1   : > { %v10659_v42 = vcombine.low %v6124_v61, %v6127_v20  ;;  %v6154_v20 = vrot.slane %v10640_v47, 7 }
 0x4a4   : > { %10622 = vmatmul.mubr.msk.bf16.gmra.mrb[144].mxu0 %vm492_vm6, %v10612_v48  ;;  %v6130_v48 = vrot.slane %v10630_v5, 7  ;;  %v10654_v5 = vrot.slane %v10638_v33, 11 }
 0x4a5   : > { %6010 = vmatprep.mubr.bf16.mxu0 %v15178_v43 }
 0x4a6   : > { %v6132_v56 = vrot.slane %v6130_v48, 4  ;;  %v6131_v1 = vsel %vm13526_vm9, %v10651_v17, %v6130_v48  ;;  %v10642_v48 = vld [vmem:[%s12420_s25 + $0x3e4] sm:$0xf]  ;;  %v10641_v17 = vld [vmem:[%s12420_s25 + $0x3e0] sm:$0x8] }
 0x4a8   : > { %v6134_v19 = vsel %vm13526_vm9, %v6132_v56, %v6133_v13  ;;  %v10643_v56 = vld [vmem:[%s12420_s25 + $0x3e8] sm:$0x7] }
 0x4a9   : > { %v10660_v34 = vcombine.low %v6131_v1, %v6134_v19  ;;  %v6161_v19 = vrot.slane %v10643_v56, 7 }
 0x4ac   : > { %10623 = vmatmul.mubr.msk.bf16.gmra.mrb[148].mxu0 %vm492_vm6, %v10613_v55  ;;  %v6137_v55 = vrot.slane %v10633_v28, 7  ;;  %v10655_v28 = vrot.slane %v10641_v17, 11 }
 0x4ad   : > { %6020 = vmatprep.mubr.bf16.mxu0 %v15178_v43 }
 0x4ae   : > { %v6139_v39 = vrot.slane %v6137_v55, 4  ;;  %v6138_v4 = vsel %vm13526_vm9, %v10652_v38, %v6137_v55  ;;  %v10645_v55 = vld [vmem:[%s12420_s25 + $0x400] sm:$0xf]  ;;  %v10644_v38 = vld [vmem:[%s12420_s25 + $0x3fc] sm:$0x8] }
 0x4b0   : > { %v6141_v51 = vsel %vm13526_vm9, %v6139_v39, %v6140_v10  ;;  %v10646_v39 = vld [vmem:[%s12420_s25 + $0x404] sm:$0x7] }
 0x4b1   : > { %v10661_v45 = vcombine.low %v6138_v4, %v6141_v51  ;;  %v6168_v51 = vrot.slane %v10646_v39, 7 }
 0x4b4   : > { %10624 = vmatmul.mubr.msk.bf16.gmra.mrb[152].mxu0 %vm492_vm6, %v10614_v0  ;;  %v6144_v0 = vrot.slane %v10636_v6, 7  ;;  %v10656_v6 = vrot.slane %v10644_v38, 11 }
 0x4b5   : > { %6030 = vmatprep.mubr.bf16.mxu0 %v15178_v43 }
 0x4b6   : > { %v6146_v46 = vrot.slane %v6144_v0, 4  ;;  %v6145_v27 = vsel %vm13526_vm9, %v10653_v36, %v6144_v0  ;;  %v10648_v0 = vld [vmem:[%s12420_s25 + $0x41c] sm:$0xf]  ;;  %v10647_v36 = vld [vmem:[%s12420_s25 + $0x418] sm:$0x8] }
 0x4b8   : > { %v6148_v32 = vsel %vm13526_vm9, %v6146_v46, %v6147_v37  ;;  %v10649_v46 = vld [vmem:[%s12420_s25 + $0x420] sm:$0x7] }
 0x4b9   : > { %v10662_v60 = vcombine.low %v6145_v27, %v6148_v32  ;;  %v6175_v32 = vrot.slane %v10649_v46, 7 }
 0x4bc   : > { %10625 = vmatmul.mubr.msk.bf16.gmra.mrb[156].mxu0 %vm492_vm6, %v10615_v7  ;;  %v6151_v7 = vrot.slane %v10639_v58, 7  ;;  %v10657_v58 = vrot.slane %v10647_v36, 11 }
 0x4bd   : > { %6274 = vmatprep.mubr.bf16.mxu0 %v15178_v43 }
 0x4be   : > { %v6153_v61 = vrot.slane %v6151_v7, 4  ;;  %v6152_v9 = vsel %vm13526_vm9, %v10654_v5, %v6151_v7  ;;  %v12230_v5 = vld [vmem:[%s15122_s3 + $0x138] sm:$0xff]  }
 0x4c0   : > { %v6155_v2 = vsel %vm13526_vm9, %v6153_v61, %v6154_v20  ;;  %v10747_v61 = vld.sshfl [vmem:[%s15121_s2 + $0x4c] sm:$0x33 pattern:$0x76325410] }
 0x4c1   : > { %v10663_v13 = vcombine.low %v6152_v9, %v6155_v2  ;;  %v6926_v20 = vcombine.high %v10747_v61, %v10747_v61  ;;  %v15190_v9 = vld [vmem:[#allocation12_spill] sm:$0xff] }
 0x4c2   : > { %v14252_v2 = vrot.slane %v10677_v62, %v15190_v9 }
 0x4c4   : > { %10669 = vmatmul.mubr.msk.bf16.vlgmr.msra.gmra.mrb[128].mxu0 %vm492_vm6, %v10659_v42  ;;  %v6158_v42 = vrot.slane %v10642_v48, 7  ;;  %v10678_v48 = vld [vmem:[%s15124_s5 + $0x2] ss:$4 sm:$0x3] }
 0x4c5   : > { %6284 = vmatprep.mubr.bf16.mxu0 %v15178_v43  ;;  %v14258_v56 = vrot.slane %v10678_v48, %v15190_v9 }
 0x4c6   : > { %v6160_v1 = vrot.slane %v6158_v42, 4  ;;  %v6159_v16 = vsel %vm13526_vm9, %v10655_v28, %v6158_v42  ;;  %v15191_v42 = vld [vmem:[#allocation13_spill] sm:$0xff] }
 0x4c7   : > { %v14255_v17 = vrot.slane %v10677_v62, %v15191_v42  ;;  %v14261_v28 = vrot.slane %v10678_v48, %v15191_v42 }
 0x4c8   : > { %v6162_v21 = vsel %vm13526_vm9, %v6160_v1, %v6161_v19 }
 0x4c9   : > { %v10664_v10 = vcombine.low %v6159_v16, %v6162_v21 }
 0x4cc   : > { %10670 = vmatmul.mubr.msk.bf16.gmra.mrb[132].mxu0 %vm492_vm6, %v10660_v34  ;;  %v6165_v34 = vrot.slane %v10645_v55, 7 }
 0x4cd   : > { %6294 = vmatprep.mubr.bf16.mxu0 %v15178_v43 }
 0x4ce   : > { %v6167_v4 = vrot.slane %v6165_v34, 4  ;;  %v6166_v12 = vsel %vm13526_vm9, %v10656_v6, %v6165_v34 }
 0x4d0   : > { %v6169_v52 = vsel %vm13526_vm9, %v6167_v4, %v6168_v51 }
 0x4d1   : > { %v10665_v37 = vcombine.low %v6166_v12, %v6169_v52  ;;  %v14274_v12 = vld.sshfl [vmem:[%s15121_s2 + $0x48] sm:$0x33 pattern:$0x76325410] }
 0x4d4   : > { %10671 = vmatmul.mubr.msk.bf16.gmra.mrb[136].mxu0 %vm492_vm6, %v10661_v45  ;;  %v6172_v45 = vrot.slane %v10648_v0, 7 }
 0x4d5   : > { %6304 = vmatprep.mubr.bf16.mxu0 %v15178_v43 }
 0x4d6   : > { %v6174_v27 = vrot.slane %v6172_v45, 4  ;;  %v6173_v7 = vsel %vm13526_vm9, %v10657_v58, %v6172_v45 }
 0x4d8   : > { %v6176_v33 = vsel %vm13526_vm9, %v6174_v27, %v6175_v32 }
 0x4d9   : > { %v10666_v47 = vcombine.low %v6173_v7, %v6176_v33 }
 0x4dc   : > { %10672 = vmatmul.mubr.msk.bf16.gmra.mrb[140].mxu0 %vm492_vm6, %v10662_v60  ;;  %v12229_v60 = vld [vmem:[%s15122_s3 + $0x178] sm:$0xff]  }
 0x4dd   : > { %6314 = vmatprep.mubr.bf16.mxu0 %v15178_v43  ;;  %11235 = vmatprep.subr.bf16.mxu1 %v12229_v60 }
 0x4de   : > { %11236 = vmatpush3.bf16.msra.mxu1 %v12230_v5  ;;  %v6952_v5 = vsel %vm517_vm0, %v10747_v61, 0 }
 0x4df   : > { %10748 = vmatprep.subr.msk.bf16.mxu1 %vm517_vm0, %v6926_v20  ;;  %v7118_v20 = vcombine.high %v14274_v12, %v14274_v12 }
 0x4e4   : > { %10673 = vmatmul.mubr.msk.bf16.gmra.mrb[144].mxu0 %vm492_vm6, %v10663_v13 }
 0x4e5   : > { %6324 = vmatprep.mubr.bf16.mxu0 %v15178_v43 }
 0x4ec   : > { %10674 = vmatmul.mubr.msk.bf16.gmra.mrb[148].mxu0 %vm492_vm6, %v10664_v10 }
 0x4ed   : > { %6334 = vmatprep.mubr.bf16.mxu0 %v15178_v43 }
 0x4f4   : > { %10675 = vmatmul.mubr.msk.bf16.gmra.mrb[152].mxu0 %vm492_vm6, %v10665_v37 }
 0x4f5   : > { %6344 = vmatprep.mubr.bf16.mxu0 %v15178_v43 }
 0x4fc   : > { %10676 = vmatmul.mubr.msk.bf16.gmra.mrb[156].mxu0 %vm492_vm6, %v10666_v47 }
 0x597   : > { %v6276_v13 = vpop.f32.mrb[128].mxu0 }
 0x598   : > { %v6400_v1 = vmul.f32 %v14252_v2, %v6276_v13  ;;  %v6278_v19 = vpop.f32.mrb[129].mxu0 }
 0x599   : > { %v6401_v55 = vmul.f32 %v14255_v17, %v6278_v19  ;;  %v6280_v16 = vpop.f32.mrb[130].mxu0 }
 0x59a   : > { %v6445_v21 = vadd.f32 %v14258_v56, %v6400_v1  ;;  %v6402_v34 = vmul.f32 %v14252_v2, %v6280_v16  ;;  %v6282_v38 = vpop.f32.mrb[131].mxu0 }
 0x59b   : > { %v6446_v39 = vadd.f32 %v14261_v28, %v6401_v55  ;;  %v6403_v10 = vmul.f32 %v14255_v17, %v6282_v38 }
 0x59c   : > { %v6447_v6 = vadd.f32 %v14258_v56, %v6402_v34  ;;  %v6477_v51 = vmax.f32 %v6445_v21, 0.0 }
 0x59d   : > { %v6448_v4 = vadd.f32 %v14261_v28, %v6403_v10  ;;  %v6478_v52 = vmax.f32 %v6446_v39, 0.0 }
 0x59e   : > { %v6479_v0 = vmax.f32 %v6447_v6, 0.0 }
 0x59f   : > { %v6480_v45 = vmax.f32 %v6448_v4, 0.0  ;;  %v6286_v36 = vpop.f32.mrb[132].mxu0 }
 0x5a0   : > { %v6509_v46 = vpack.c.bf16 %v6479_v0, %v6477_v51  ;;  %v6404_v37 = vmul.f32 %v14252_v2, %v6286_v36  ;;  %v6288_v58 = vpop.f32.mrb[133].mxu0 }
 0x5a1   : > { %v6405_v27 = vmul.f32 %v14255_v17, %v6288_v58  ;;  %v6290_v32 = vpop.f32.mrb[134].mxu0  ;;  %v6510_v7 = vpack.c.bf16 %v6480_v45, %v6478_v52 }
 0x5a2   : > { %v6449_v33 = vadd.f32 %v14258_v56, %v6404_v37  ;;  %v6406_v47 = vmul.f32 %v14252_v2, %v6290_v32  ;;  %v6292_v60 = vpop.f32.mrb[135].mxu0 }
 0x5a3   : > { %v6450_v62 = vadd.f32 %v14261_v28, %v6405_v27  ;;  %v6407_v48 = vmul.f32 %v14255_v17, %v6292_v60  ;;  %6686 = vmatprep.mubr.bf16.mxu1 %v6510_v7 }
 0x5a4   : > { %v6451_v13 = vadd.f32 %v14258_v56, %v6406_v47  ;;  %6687 = vmatmul.mubr.bf16.vlgmr.msra.gmra.mrb[32].mxu1 %v6509_v46  ;;  %v6481_v19 = vmax.f32 %v6449_v33, 0.0 }
 0x5a5   : > { %v6452_v1 = vadd.f32 %v14261_v28, %v6407_v48  ;;  %6958 = vmatpush1.bf16.msra.mxu1 %v6952_v5  ;;  %v6482_v16 = vmax.f32 %v6450_v62, 0.0 }
 0x5a6   : > { %v6483_v55 = vmax.f32 %v6451_v13, 0.0  ;;  %10766 = vmatprep.subr.msk.bf16.mxu1 %vm517_vm0, %v7118_v20 }
 0x5a7   : > { %v6484_v61 = vmax.f32 %v6452_v1, 0.0  ;;  %v6296_v21 = vpop.f32.mrb[136].mxu0 }
 0x5a8   : > { %v6408_v34 = vmul.f32 %v14252_v2, %v6296_v21  ;;  %v6298_v38 = vpop.f32.mrb[137].mxu0  ;;  %v6511_v39 = vpack.c.bf16 %v6483_v55, %v6481_v19 }
 0x5a9   : > { %v6409_v10 = vmul.f32 %v14255_v17, %v6298_v38  ;;  %v6300_v6 = vpop.f32.mrb[138].mxu0  ;;  %v6512_v4 = vpack.c.bf16 %v6484_v61, %v6482_v16 }
 0x5aa   : > { %v6453_v51 = vadd.f32 %v14258_v56, %v6408_v34  ;;  %v6410_v0 = vmul.f32 %v14252_v2, %v6300_v6  ;;  %v6302_v52 = vpop.f32.mrb[139].mxu0 }
 0x5ab   : > { %v6454_v45 = vadd.f32 %v14261_v28, %v6409_v10  ;;  %v6411_v36 = vmul.f32 %v14255_v17, %v6302_v52  ;;  %6694 = vmatprep.mubr.bf16.mxu1 %v6512_v4 }
 0x5ac   : > { %v6455_v46 = vadd.f32 %v14258_v56, %v6410_v0  ;;  %6695 = vmatmul.mubr.bf16.gmra.mrb[36].mxu1 %v6511_v39  ;;  %v6485_v58 = vmax.f32 %v6453_v51, 0.0 }
 0x5ad   : > { %v6456_v37 = vadd.f32 %v14261_v28, %v6411_v36  ;;  %v6486_v32 = vmax.f32 %v6454_v45, 0.0 }
 0x5ae   : > { %v6487_v27 = vmax.f32 %v6455_v46, 0.0 }
 0x5af   : > { %v6488_v7 = vmax.f32 %v6456_v37, 0.0  ;;  %v6306_v33 = vpop.f32.mrb[140].mxu0 }
 0x5b0   : > { %v6412_v47 = vmul.f32 %v14252_v2, %v6306_v33  ;;  %v6308_v60 = vpop.f32.mrb[141].mxu0  ;;  %v6513_v5 = vpack.c.bf16 %v6487_v27, %v6485_v58 }
 0x5b1   : > { %v6413_v20 = vmul.f32 %v14255_v17, %v6308_v60  ;;  %v6310_v62 = vpop.f32.mrb[142].mxu0  ;;  %v6514_v48 = vpack.c.bf16 %v6488_v7, %v6486_v32 }
 0x5b2   : > { %v6457_v13 = vadd.f32 %v14258_v56, %v6412_v47  ;;  %v6414_v1 = vmul.f32 %v14252_v2, %v6310_v62  ;;  %v6312_v19 = vpop.f32.mrb[143].mxu0 }
 0x5b3   : > { %v6458_v55 = vadd.f32 %v14261_v28, %v6413_v20  ;;  %v6415_v16 = vmul.f32 %v14255_v17, %v6312_v19  ;;  %6702 = vmatprep.mubr.bf16.mxu1 %v6514_v48 }
 0x5b4   : > { %v6459_v61 = vadd.f32 %v14258_v56, %v6414_v1  ;;  %6703 = vmatmul.mubr.bf16.gmra.mrb[40].mxu1 %v6513_v5  ;;  %v6489_v34 = vmax.f32 %v6457_v13, 0.0 }
 0x5b5   : > { %v6460_v21 = vadd.f32 %v14261_v28, %v6415_v16  ;;  %v6490_v39 = vmax.f32 %v6458_v55, 0.0 }
 0x5b6   : > { %v6491_v38 = vmax.f32 %v6459_v61, 0.0 }
 0x5b7   : > { %v6492_v10 = vmax.f32 %v6460_v21, 0.0  ;;  %v6316_v6 = vpop.f32.mrb[144].mxu0 }
 0x5b8   : > { %v6416_v4 = vmul.f32 %v14252_v2, %v6316_v6  ;;  %v6318_v51 = vpop.f32.mrb[145].mxu0  ;;  %v6515_v0 = vpack.c.bf16 %v6491_v38, %v6489_v34 }
 0x5b9   : > { %v6417_v52 = vmul.f32 %v14255_v17, %v6318_v51  ;;  %v6320_v45 = vpop.f32.mrb[146].mxu0  ;;  %v6516_v36 = vpack.c.bf16 %v6492_v10, %v6490_v39 }
 0x5ba   : > { %v6461_v46 = vadd.f32 %v14258_v56, %v6416_v4  ;;  %v6418_v37 = vmul.f32 %v14252_v2, %v6320_v45  ;;  %v6322_v58 = vpop.f32.mrb[147].mxu0 }
 0x5bb   : > { %v6462_v27 = vadd.f32 %v14261_v28, %v6417_v52  ;;  %v6419_v32 = vmul.f32 %v14255_v17, %v6322_v58  ;;  %6710 = vmatprep.mubr.bf16.mxu1 %v6516_v36 }
 0x5bc   : > { %v6463_v7 = vadd.f32 %v14258_v56, %v6418_v37  ;;  %6711 = vmatmul.mubr.bf16.gmra.mrb[44].mxu1 %v6515_v0  ;;  %v6493_v47 = vmax.f32 %v6461_v46, 0.0 }
 0x5bd   : > { %v6464_v33 = vadd.f32 %v14261_v28, %v6419_v32  ;;  %v6494_v5 = vmax.f32 %v6462_v27, 0.0 }
 0x5be   : > { %v6495_v60 = vmax.f32 %v6463_v7, 0.0 }
 0x5bf   : > { %v6496_v20 = vmax.f32 %v6464_v33, 0.0  ;;  %v6326_v62 = vpop.f32.mrb[148].mxu0 }
 0x5c0   : > { %v6420_v48 = vmul.f32 %v14252_v2, %v6326_v62  ;;  %v6328_v13 = vpop.f32.mrb[149].mxu0  ;;  %v6517_v1 = vpack.c.bf16 %v6495_v60, %v6493_v47 }
 0x5c1   : > { %v6421_v19 = vmul.f32 %v14255_v17, %v6328_v13  ;;  %v6330_v55 = vpop.f32.mrb[150].mxu0  ;;  %v6518_v16 = vpack.c.bf16 %v6496_v20, %v6494_v5 }
 0x5c2   : > { %v6465_v61 = vadd.f32 %v14258_v56, %v6420_v48  ;;  %v6422_v21 = vmul.f32 %v14252_v2, %v6330_v55  ;;  %v6332_v34 = vpop.f32.mrb[151].mxu0 }
 0x5c3   : > { %v6466_v38 = vadd.f32 %v14261_v28, %v6421_v19  ;;  %v6423_v39 = vmul.f32 %v14255_v17, %v6332_v34  ;;  %6718 = vmatprep.mubr.bf16.mxu1 %v6518_v16 }
 0x5c4   : > { %v6467_v10 = vadd.f32 %v14258_v56, %v6422_v21  ;;  %6719 = vmatmul.mubr.bf16.gmra.mrb[48].mxu1 %v6517_v1  ;;  %v6497_v4 = vmax.f32 %v6465_v61, 0.0 }
 0x5c5   : > { %v6468_v6 = vadd.f32 %v14261_v28, %v6423_v39  ;;  %v6498_v0 = vmax.f32 %v6466_v38, 0.0 }
 0x5c6   : > { %v6499_v51 = vmax.f32 %v6467_v10, 0.0 }
 0x5c7   : > { %v6500_v52 = vmax.f32 %v6468_v6, 0.0  ;;  %v6336_v45 = vpop.f32.mrb[152].mxu0 }
 0x5c8   : > { %v6424_v36 = vmul.f32 %v14252_v2, %v6336_v45  ;;  %v6338_v46 = vpop.f32.mrb[153].mxu0  ;;  %v6519_v37 = vpack.c.bf16 %v6499_v51, %v6497_v4  ;;  %v6789_v51 = vld [vmem:[%s12420_s25 + $0xc] sm:$0xf] }
 0x5c9   : > { %v6425_v58 = vmul.f32 %v14255_v17, %v6338_v46  ;;  %v6340_v27 = vpop.f32.mrb[154].mxu0  ;;  %v6520_v32 = vpack.c.bf16 %v6500_v52, %v6498_v0  ;;  %v6838_v46 = vrot.slane %v6789_v51, 5 }
 0x5ca   : > { %v6469_v7 = vadd.f32 %v14258_v56, %v6424_v36  ;;  %v6426_v33 = vmul.f32 %v14252_v2, %v6340_v27  ;;  %v6342_v47 = vpop.f32.mrb[155].mxu0  ;;  %v6788_v27 = vld [vmem:[%s12420_s25 + $0x8] sm:$0xe] }
 0x5cb   : > { %v6470_v60 = vadd.f32 %v14261_v28, %v6425_v58  ;;  %v6427_v5 = vmul.f32 %v14255_v17, %v6342_v47  ;;  %6726 = vmatprep.mubr.bf16.mxu1 %v6520_v32  ;;  %v6790_v32 = vld [vmem:[%s12420_s25 + $0x10] sm:$0x1] }
 0x5cc   : > { %v6471_v20 = vadd.f32 %v14258_v56, %v6426_v33  ;;  %6727 = vmatmul.mubr.bf16.gmra.mrb[52].mxu1 %v6519_v37  ;;  %v6501_v48 = vmax.f32 %v6469_v7, 0.0 }
 0x5cd   : > { %v6472_v62 = vadd.f32 %v14261_v28, %v6427_v5  ;;  %v6502_v1 = vmax.f32 %v6470_v60, 0.0  ;;  %v10730_v60 = vrot.slane %v6788_v27, 9  ;;  %v6841_v5 = vrot.slane %v6790_v32, 5  ;;  %v6797_v27 = vld [vmem:[%s12420_s25 + $0x5c] sm:$0xe] }
 0x5ce   : > { %v6503_v13 = vmax.f32 %v6471_v20, 0.0  ;;  %v6792_v20 = vld [vmem:[%s12420_s25 + $0x28] sm:$0xf]  ;;  %v6799_v32 = vld [vmem:[%s12420_s25 + $0x64] sm:$0x1] }
 0x5cf   : > { %v6504_v19 = vmax.f32 %v6472_v62, 0.0  ;;  %v6346_v55 = vpop.f32.mrb[156].mxu0  ;;  %v6845_v62 = vrot.slane %v6792_v20, 5 }
 0x5d0   : > { %v6428_v16 = vmul.f32 %v14252_v2, %v6346_v55  ;;  %v6348_v61 = vpop.f32.mrb[157].mxu0  ;;  %v6521_v21 = vpack.c.bf16 %v6503_v13, %v6501_v48  ;;  %v6791_v48 = vld [vmem:[%s12420_s25 + $0x24] sm:$0xe]  ;;  %v6793_v13 = vld [vmem:[%s12420_s25 + $0x2c] sm:$0x1] }
 0x5d1   : > { %v6429_v34 = vmul.f32 %v14255_v17, %v6348_v61  ;;  %v6350_v38 = vpop.f32.mrb[158].mxu0  ;;  %v6522_v39 = vpack.c.bf16 %v6504_v19, %v6502_v1  ;;  %v14350_v1 = vld.sshfl [vmem:[%s15121_s2 + $0x50] sm:$0x33 pattern:$0x76325410]  ;;  %v10731_v55 = vrot.slane %v6791_v48, 9 }
 0x5d2   : > { %v6473_v10 = vadd.f32 %v14258_v56, %v6428_v16  ;;  %v6430_v6 = vmul.f32 %v14252_v2, %v6350_v38  ;;  %v6352_v4 = vpop.f32.mrb[159].mxu0  ;;  %v6847_v16 = vrot.slane %v6845_v62, 4  ;;  %v6848_v61 = vrot.slane %v6793_v13, 5 }
 0x5d3   : > { %v6474_v0 = vadd.f32 %v14261_v28, %v6429_v34  ;;  %v6431_v52 = vmul.f32 %v14255_v17, %v6352_v4  ;;  %6734 = vmatprep.mubr.bf16.mxu1 %v6522_v39  ;;  %v6840_v17 = vrot.slane %v6838_v46, 4  ;;  %v6795_v34 = vld [vmem:[%s12420_s25 + $0x44] sm:$0xf]  ;;  %v7400_v38 = vcombine.high %v14350_v1, %v14350_v1  ;;  %v6796_v4 = vld [vmem:[%s12420_s25 + $0x48] sm:$0x1] }
 0x5d4   : > { %v6475_v45 = vadd.f32 %v14258_v56, %v6430_v6  ;;  %6735 = vmatmul.mubr.bf16.gmra.mrb[56].mxu1 %v6521_v21  ;;  %v6505_v37 = vmax.f32 %v6473_v10, 0.0  ;;  %v6839_v56 = vsel %vm12412_vm3, %v10730_v60, %v6838_v46  ;;  %v7144_v21 = vsel %vm517_vm0, %v14274_v12, 0  ;;  %v6794_v12 = vld [vmem:[%s12420_s25 + $0x40] sm:$0xe]  ;;  %v6801_v60 = vld [vmem:[%s12420_s25 + $0x7c] sm:$0xf] }
 0x5d5   : > { %v6476_v36 = vadd.f32 %v14261_v28, %v6431_v52  ;;  %v6506_v2 = vmax.f32 %v6474_v0, 0.0  ;;  %v6842_v28 = vsel %vm12412_vm3, %v6840_v17, %v6841_v5  ;;  %v6846_v39 = vsel %vm12412_vm3, %v10731_v55, %v6845_v62  ;;  %v6804_v55 = vld [vmem:[%s12420_s25 + $0x98] sm:$0xf] }
 0x5d6   : > { %v6507_v58 = vmax.f32 %v6475_v45, 0.0  ;;  %v10739_v19 = vcombine.low %v6839_v56, %v6842_v28  ;;  %v6849_v10 = vsel %vm12412_vm3, %v6847_v16, %v6848_v61  ;;  %v6852_v6 = vrot.slane %v6795_v34, 5  ;;  %v6800_v56 = vld [vmem:[%s12420_s25 + $0x78] sm:$0xe]  ;;  %v6802_v28 = vld [vmem:[%s12420_s25 + $0x80] sm:$0x1] }
 0x5d7   : > { %v6508_v7 = vmax.f32 %v6476_v36, 0.0  ;;  %v10740_v51 = vcombine.low %v6846_v39, %v6849_v10  ;;  %v10732_v0 = vrot.slane %v6794_v12, 9  ;;  %v6855_v45 = vrot.slane %v6796_v4, 5  ;;  %v6798_v36 = vld [vmem:[%s12420_s25 + $0x60] sm:$0xf] }
 0x5d8   : > { %v6523_v33 = vpack.c.bf16 %v6507_v58, %v6505_v37  ;;  %v6854_v52 = vrot.slane %v6852_v6, 4  ;;  %v6859_v58 = vrot.slane %v6798_v36, 5  ;;  %v6866_v20 = vrot.slane %v6801_v60, 5  ;;  %v6803_v34 = vld [vmem:[%s12420_s25 + $0x94] sm:$0xe] }
 0x5d9   : > { %v6524_v47 = vpack.c.bf16 %v6508_v7, %v6506_v2  ;;  %v6853_v46 = vsel %vm12412_vm3, %v10732_v0, %v6852_v6  ;;  %v10733_v7 = vrot.slane %v6797_v27, 9  ;;  %v10734_v48 = vrot.slane %v6800_v56, 9  ;;  %v6807_v4 = vld [vmem:[%s12420_s25 + $0xb4] sm:$0xf]  ;;  %v6808_v36 = vld [vmem:[%s12420_s25 + $0xb8] sm:$0x1] }
 0x5da   : > { %v6856_v37 = vsel %vm12412_vm3, %v6854_v52, %v6855_v45  ;;  %v6868_v13 = vrot.slane %v6866_v20, 4  ;;  %v10735_v10 = vrot.slane %v6803_v34, 9  ;;  %v6880_v52 = vrot.slane %v6807_v4, 5  ;;  %v6806_v45 = vld [vmem:[%s12420_s25 + $0xb0] sm:$0xe] }
 0x5db   : > { %6742 = vmatprep.mubr.bf16.mxu1 %v6524_v47  ;;  %v10741_v2 = vcombine.low %v6853_v46, %v6856_v37  ;;  %v6862_v47 = vrot.slane %v6799_v32, 5  ;;  %v6860_v17 = vsel %vm12412_vm3, %v10733_v7, %v6859_v58  ;;  %v6867_v16 = vsel %vm12412_vm3, %v10734_v48, %v6866_v20  ;;  %v6810_v32 = vld [vmem:[%s12420_s25 + $0xd0] sm:$0xf]  ;;  %v6811_v60 = vld [vmem:[%s12420_s25 + $0xd4] sm:$0x1] }
 0x5dc   : > { %6743 = vmatmul.mubr.bf16.gmra.mrb[60].mxu1 %v6523_v33  ;;  %v6861_v33 = vrot.slane %v6859_v58, 4  ;;  %v10736_v37 = vrot.slane %v6806_v45, 9  ;;  %v6882_v58 = vrot.slane %v6880_v52, 4  ;;  %v6883_v27 = vrot.slane %v6808_v36, 5  ;;  %v12235_v34 = vld [vmem:[%s12420_s25 + $0x70] sm:$0xff]  }
 0x5dd   : > { %6989 = vmatprep.mubr.bf16.mxu1 %v15178_v43  ;;  %v6890_v56 = vrot.slane %v6811_v60, 5  ;;  %v7264_v4 = vld [vmem:[%s12420_s25 + $0x18] sm:$0x3]  ;;  %v7266_v36 = vld [vmem:[%s12420_s25 + $0x30] sm:$0xf] }
 0x5de   : > { %v6863_v5 = vsel %vm12412_vm3, %v6861_v33, %v6862_v47  ;;  %v6884_v7 = vsel %vm12412_vm3, %v6882_v58, %v6883_v27  ;;  %v6887_v33 = vrot.slane %v6810_v32, 5  ;;  %v6809_v47 = vld [vmem:[%s12420_s25 + $0xcc] sm:$0xe]  ;;  %v7315_v45 = vrot.slane %v7264_v4, 6 }
 0x5df   : > { %v10742_v62 = vcombine.low %v6860_v17, %v6863_v5  ;;  %v10737_v5 = vrot.slane %v6809_v47, 9  ;;  %v7319_v27 = vrot.slane %v7266_v36, 6  ;;  %v7265_v32 = vld [vmem:[%s12420_s25 + $0x2c] sm:$0xc] }
 0x5e0   : > { %v6889_v20 = vrot.slane %v6887_v33, 4  ;;  %v10776_v47 = vrot.slane %v7265_v32, 10 }
 0x5e1   : > { %v7321_v60 = vrot.slane %v7319_v27, 4 }
 0x5e4   : > { %10749 = vmatmul.mubr.msk.bf16.vlgmr.msra.gmra.mrb[64].mxu1 %vm492_vm6, %v10739_v19  ;;  %v6869_v19 = vrot.slane %v6802_v28, 5  ;;  %v6888_v28 = vsel %vm12412_vm3, %v10737_v5, %v6887_v33 }
 0x5e5   : > { %7150 = vmatpush1.bf16.msra.mxu1 %v7144_v21  ;;  %6999 = vmatprep.mubr.bf16.mxu1 %v15178_v43  ;;  %v6873_v21 = vrot.slane %v6804_v55, 5  ;;  %v7426_v55 = vsel %vm517_vm0, %v14350_v1, 0  ;;  %v12234_v1 = vld [vmem:[%s12420_s25 + $0x54] sm:$0xff]  }
 0x5e6   : > { %10793 = vmatprep.subr.msk.bf16.mxu1 %vm517_vm0, %v7400_v38  ;;  %v6870_v61 = vsel %vm12412_vm3, %v6868_v13, %v6869_v19  ;;  %v6805_v38 = vld [vmem:[%s12420_s25 + $0x9c] sm:$0x1]  ;;  %v10827_v13 = vld.sshfl [vmem:[%s15121_s2 + $0x54] sm:$0x33 pattern:$0x76325410] }
 0x5e7   : > { %v10743_v39 = vcombine.low %v6867_v16, %v6870_v61  ;;  %v6875_v6 = vrot.slane %v6873_v21, 4  ;;  %v6876_v12 = vrot.slane %v6805_v38, 5  ;;  %v12231_v19 = vld [vmem:[%s12420_s25] sm:$0xff]   ;;  %v7642_v16 = vcombine.high %v10827_v13, %v10827_v13  ;;  %v12236_v38 = vld [vmem:[%s12420_s25 + $0x8c] sm:$0xff]  }
 0x5e8   : > { %v12232_v61 = vld [vmem:[%s12420_s25 + $0x1c] sm:$0xff]   ;;  %v7668_v5 = vsel %vm517_vm0, %v10827_v13, 0  ;;  %v7268_v13 = vld [vmem:[%s12420_s25 + $0x48] sm:$0xc] }
 0x5e9   : > { %v6877_v0 = vsel %vm12412_vm3, %v6875_v6, %v6876_v12  ;;  %v7262_v12 = vld [vmem:[%s12420_s25 + $0x10] sm:$0xc] }
 0x5ec   : > { %10750 = vmatmul.mubr.msk.bf16.gmra.mrb[68].mxu1 %vm492_vm6, %v10740_v51  ;;  %v6874_v51 = vsel %vm12412_vm3, %v10735_v10, %v6873_v21  ;;  %v12233_v21 = vld [vmem:[%s12420_s25 + $0x38] sm:$0xff]   ;;  %v7263_v10 = vld [vmem:[%s12420_s25 + $0x14] sm:$0xf] }
 0x5ed   : > { %7009 = vmatprep.mubr.bf16.mxu1 %v15178_v43  ;;  %v10744_v46 = vcombine.low %v6874_v51, %v6877_v0  ;;  %v7312_v6 = vrot.slane %v7263_v10, 6  ;;  %v12238_v51 = vld [vmem:[%s12420_s25 + $0xc4] sm:$0xff]   ;;  %v10775_v0 = vrot.slane %v7262_v12, 10 }
 0x5ee   : > { %v7271_v10 = vld [vmem:[%s12420_s25 + $0x64] sm:$0xc] }
 0x5ef   : > { %v10778_v4 = vrot.slane %v7271_v10, 10 }
 0x5f4   : > { %10751 = vmatmul.mubr.msk.bf16.gmra.mrb[72].mxu1 %vm492_vm6, %v10741_v2  ;;  %v6881_v2 = vsel %vm12412_vm3, %v10736_v37, %v6880_v52  ;;  %v7314_v52 = vrot.slane %v7312_v6, 4  ;;  %v7313_v37 = vsel %vm12427_vm5, %v10775_v0, %v7312_v6  ;;  %v7273_v6 = vld [vmem:[%s12420_s25 + $0x6c] sm:$0x3] }
 0x5f5   : > { %7019 = vmatprep.mubr.bf16.mxu1 %v15178_v43  ;;  %v10745_v17 = vcombine.low %v6881_v2, %v6884_v7  ;;  %v7267_v2 = vld [vmem:[%s12420_s25 + $0x34] sm:$0x3]  ;;  %v14462_v7 = vld.sshfl [vmem:[%s15121_s2 + $0x58] sm:$0x33 pattern:$0x76325410] }
 0x5f6   : > { %v7316_v58 = vsel %vm12427_vm5, %v7314_v52, %v7315_v45  ;;  %v7336_v0 = vrot.slane %v7273_v6, 6  ;;  %v7275_v52 = vld [vmem:[%s12420_s25 + $0x84] sm:$0xf] }
 0x5f7   : > { %v10784_v33 = vcombine.low %v7313_v37, %v7316_v58  ;;  %v7340_v37 = vrot.slane %v7275_v52, 6  ;;  %v7274_v58 = vld [vmem:[%s12420_s25 + $0x80] sm:$0xc] }
 0x5fc   : > { %10752 = vmatmul.mubr.msk.bf16.gmra.mrb[76].mxu1 %vm492_vm6, %v10742_v62  ;;  %v6891_v62 = vsel %vm12412_vm3, %v6889_v20, %v6890_v56  ;;  %v7269_v20 = vld [vmem:[%s12420_s25 + $0x4c] sm:$0xf]  ;;  %v7828_v56 = vcombine.high %v14462_v7, %v14462_v7 }
 0x5fd   : > { %7029 = vmatprep.mubr.bf16.mxu1 %v15178_v43  ;;  %v10746_v48 = vcombine.low %v6888_v28, %v6891_v62  ;;  %v7320_v28 = vsel %vm12427_vm5, %v10776_v47, %v7319_v27  ;;  %v7276_v27 = vld [vmem:[%s12420_s25 + $0x88] sm:$0x3] }
 0x604   : > { %10753 = vmatmul.mubr.msk.bf16.gmra.mrb[80].mxu1 %vm492_vm6, %v10743_v39  ;;  %v12237_v39 = vld [vmem:[%s12420_s25 + $0xa8] sm:$0xff]  }
 0x605   : > { %7039 = vmatprep.mubr.bf16.mxu1 %v15178_v43 }
 0x60c   : > { %10754 = vmatmul.mubr.msk.bf16.gmra.mrb[84].mxu1 %vm492_vm6, %v10744_v46  ;;  %v11039_v46 = vld [vmem:[%s15124_s5 + $0x3] ss:$4 sm:$0x3] }
 0x60d   : > { %7049 = vmatprep.mubr.bf16.mxu1 %v15178_v43 }
 0x614   : > { %10755 = vmatmul.mubr.msk.bf16.gmra.mrb[88].mxu1 %vm492_vm6, %v10745_v17  ;;  %v7322_v17 = vrot.slane %v7267_v2, 6 }
 0x615   : > { %7059 = vmatprep.mubr.bf16.mxu1 %v15178_v43 }
 0x616   : > { %v7323_v62 = vsel %vm12427_vm5, %v7321_v60, %v7322_v17  ;;  %v10779_v17 = vrot.slane %v7274_v58, 10  ;;  %v7280_v58 = vld [vmem:[%s12420_s25 + $0xb8] sm:$0xc] }
 0x61c   : > { %10756 = vmatmul.mubr.msk.bf16.gmra.mrb[92].mxu1 %vm492_vm6, %v10746_v48  ;;  %v7326_v48 = vrot.slane %v7269_v20, 6  ;;  %v7343_v20 = vrot.slane %v7276_v27, 6  ;;  %v7282_v27 = vld [vmem:[%s12420_s25 + $0xc0] sm:$0x3] }
 0x61d   : > { %7181 = vmatprep.mubr.bf16.mxu1 %v15178_v43 }
 0x624   : > { %10767 = vmatmul.mubr.msk.bf16.vlgmr.msra.gmra.mrb[64].mxu1 %vm492_vm6, %v12231_v19  ;;  %v7270_v19 = vld [vmem:[%s12420_s25 + $0x50] sm:$0x3] }
 0x625   : > { %7432 = vmatpush1.bf16.msra.mxu1 %v7426_v55  ;;  %7191 = vmatprep.mubr.bf16.mxu1 %v15178_v43  ;;  %v10785_v55 = vcombine.low %v7320_v28, %v7323_v62  ;;  %v7278_v28 = vld [vmem:[%s12420_s25 + $0xa0] sm:$0xf] }
 0x626   : > { %10828 = vmatprep.subr.msk.bf16.mxu1 %vm517_vm0, %v7642_v16  ;;  %v10777_v16 = vrot.slane %v7268_v13, 10 }
 0x62c   : > { %10768 = vmatmul.mubr.msk.bf16.gmra.mrb[68].mxu1 %vm492_vm6, %v12232_v61  ;;  %v7328_v61 = vrot.slane %v7326_v48, 4 }
 0x62d   : > { %7201 = vmatprep.mubr.bf16.mxu1 %v15178_v43 }
 0x634   : > { %10769 = vmatmul.mubr.msk.bf16.gmra.mrb[72].mxu1 %vm492_vm6, %v12233_v21  ;;  %v7329_v21 = vrot.slane %v7270_v19, 6  ;;  %v7341_v19 = vsel %vm12427_vm5, %v10779_v17, %v7340_v37  ;;  %v7357_v17 = vrot.slane %v7282_v27, 6 }
 0x635   : > { %7211 = vmatprep.mubr.bf16.mxu1 %v15178_v43 }
 0x63c   : > { %10770 = vmatmul.mubr.msk.bf16.gmra.mrb[76].mxu1 %vm492_vm6, %v12234_v1  ;;  %v7272_v1 = vld [vmem:[%s12420_s25 + $0x68] sm:$0xf] }
 0x63d   : > { %7221 = vmatprep.mubr.bf16.mxu1 %v15178_v43 }
 0x644   : > { %10771 = vmatmul.mubr.msk.bf16.gmra.mrb[80].mxu1 %vm492_vm6, %v12235_v34  ;;  %v7327_v34 = vsel %vm12427_vm5, %v10777_v16, %v7326_v48  ;;  %v7347_v16 = vrot.slane %v7278_v28, 6 }
 0x645   : > { %7231 = vmatprep.mubr.bf16.mxu1 %v15178_v43 }
 0x646   : > { %v7349_v10 = vrot.slane %v7347_v16, 4 }
 0x64c   : > { %10772 = vmatmul.mubr.msk.bf16.gmra.mrb[84].mxu1 %vm492_vm6, %v12236_v38  ;;  %v7330_v38 = vsel %vm12427_vm5, %v7328_v61, %v7329_v21  ;;  %v7277_v61 = vld [vmem:[%s12420_s25 + $0x9c] sm:$0xc]  ;;  %v7279_v21 = vld [vmem:[%s12420_s25 + $0xa4] sm:$0x3] }
 0x64d   : > { %7241 = vmatprep.mubr.bf16.mxu1 %v15178_v43  ;;  %v10786_v12 = vcombine.low %v7327_v34, %v7330_v38  ;;  %v7350_v6 = vrot.slane %v7279_v21, 6  ;;  %v7285_v21 = vld [vmem:[%s12420_s25 + $0xdc] sm:$0x3] }
 0x654   : > { %10773 = vmatmul.mubr.msk.bf16.gmra.mrb[88].mxu1 %vm492_vm6, %v12237_v39  ;;  %v7333_v39 = vrot.slane %v7272_v1, 6 }
 0x655   : > { %7251 = vmatprep.mubr.bf16.mxu1 %v15178_v43 }
 0x656   : > { %v7334_v45 = vsel %vm12427_vm5, %v10778_v4, %v7333_v39  ;;  %v7281_v4 = vld [vmem:[%s12420_s25 + $0xbc] sm:$0xf] }
 0x65c   : > { %10774 = vmatmul.mubr.msk.bf16.gmra.mrb[92].mxu1 %vm492_vm6, %v12238_v51  ;;  %v7335_v51 = vrot.slane %v7333_v39, 4  ;;  %v10780_v39 = vrot.slane %v7277_v61, 10  ;;  %v7283_v61 = vld [vmem:[%s12420_s25 + $0xd4] sm:$0xc] }
 0x65d   : > { %7463 = vmatprep.mubr.bf16.mxu1 %v15178_v43 }
 0x65e   : > { %v7337_v36 = vsel %vm12427_vm5, %v7335_v51, %v7336_v0 }
 0x664   : > { %10794 = vmatmul.mubr.msk.bf16.vlgmr.msra.gmra.mrb[64].mxu1 %vm492_vm6, %v10784_v33  ;;  %v10787_v33 = vcombine.low %v7334_v45, %v7337_v36  ;;  %v7348_v45 = vsel %vm12427_vm5, %v10780_v39, %v7347_v16  ;;  %v7351_v36 = vsel %vm12427_vm5, %v7349_v10, %v7350_v6 }
 0x665   : > { %7674 = vmatpush1.bf16.msra.mxu1 %v7668_v5  ;;  %7473 = vmatprep.mubr.bf16.mxu1 %v15178_v43  ;;  %v7342_v5 = vrot.slane %v7340_v37, 4  ;;  %v7354_v37 = vrot.slane %v7281_v4, 6 }
 0x666   : > { %10839 = vmatprep.subr.msk.bf16.mxu1 %vm517_vm0, %v7828_v56 }
 0x66c   : > { %10795 = vmatmul.mubr.msk.bf16.gmra.mrb[68].mxu1 %vm492_vm6, %v10785_v55  ;;  %v7344_v55 = vsel %vm12427_vm5, %v7342_v5, %v7343_v20  ;;  %v7284_v20 = vld [vmem:[%s12420_s25 + $0xd8] sm:$0xf] }
 0x66d   : > { %7483 = vmatprep.mubr.bf16.mxu1 %v15178_v43  ;;  %v10788_v34 = vcombine.low %v7341_v19, %v7344_v55  ;;  %v7361_v16 = vrot.slane %v7284_v20, 6  ;;  %v7830_v20 = vsel %vm517_vm0, %v14462_v7, 0 }
 0x66f   : > { %v7363_v39 = vrot.slane %v7361_v16, 4 }
 0x674   : > { %10796 = vmatmul.mubr.msk.bf16.gmra.mrb[72].mxu1 %vm492_vm6, %v10786_v12 }
 0x675   : > { %7493 = vmatprep.mubr.bf16.mxu1 %v15178_v43 }
 0x677   : > { %v11237_v32 = vpop.f32.mrb[32].mxu1 }
 0x678   : > { %v11238_v2 = vpop.f32.mrb[33].mxu1 }
 0x679   : > { %v11239_v47 = vadd.f32 %v11238_v2, %v11237_v32  ;;  %v11240_v60 = vpop.f32.mrb[34].mxu1  ;;  %v10789_v2 = vcombine.low %v7348_v45, %v7351_v36 }
 0x67a   : > { %v11241_v56 = vpop.f32.mrb[35].mxu1 }
 0x67b   : > { %v14497_v62 = vadd.f32 %v11239_v47, %v13692_v49  ;;  %v11242_v48 = vadd.f32 %v11241_v56, %v11240_v60  ;;  %v10781_v47 = vrot.slane %v7280_v58, 10  ;;  %v7356_v60 = vrot.slane %v7354_v37, 4 }
 0x67c   : > { %10797 = vmatmul.mubr.msk.bf16.gmra.mrb[76].mxu1 %vm492_vm6, %v10787_v33 }
 0x67d   : > { %v14501_v13 = vadd.f32 %v11242_v48, %v13696_v50  ;;  %7503 = vmatprep.mubr.bf16.mxu1 %v15178_v43  ;;  %v7355_v19 = vsel %vm12427_vm5, %v10781_v47, %v7354_v37  ;;  %v7358_v55 = vsel %vm12427_vm5, %v7356_v60, %v7357_v17  ;;  %v12239_v60 = vld [vmem:[%s12420_s25 + $0x1f8] sm:$0xff]  }
 0x67f   : > { %v11243_v49 = vpop.f32.mrb[36].mxu1 }
 0x680   : > { %v11244_v1 = vpop.f32.mrb[37].mxu1 }
 0x681   : > { %v11245_v38 = vadd.f32 %v11244_v1, %v11243_v49  ;;  %v11246_v50 = vpop.f32.mrb[38].mxu1  ;;  %v10790_v1 = vcombine.low %v7355_v19, %v7358_v55 }
 0x682   : > { %v11247_v12 = vpop.f32.mrb[39].mxu1 }
 0x683   : > { %v14512_v51 = vadd.f32 %v11245_v38, %v13707_v22  ;;  %v11248_v0 = vadd.f32 %v11247_v12, %v11246_v50  ;;  %v10782_v50 = vrot.slane %v7283_v61, 10 }
 0x684   : > { %10798 = vmatmul.mubr.msk.bf16.gmra.mrb[80].mxu1 %vm492_vm6, %v10788_v34 }
 0x685   : > { %v14516_v52 = vadd.f32 %v11248_v0, %v13711_v59  ;;  %7513 = vmatprep.mubr.bf16.mxu1 %v15178_v43  ;;  %v7362_v0 = vsel %vm12427_vm5, %v10782_v50, %v7361_v16  ;;  %v12241_v50 = vld [vmem:[%s12420_s25 + $0x230] sm:$0xff]  }
 0x687   : > { %v11249_v22 = vpop.f32.mrb[40].mxu1 }
 0x688   : > { %v11250_v32 = vpop.f32.mrb[41].mxu1 }
 0x689   : > { %v11251_v33 = vadd.f32 %v11250_v32, %v11249_v22  ;;  %v11252_v59 = vpop.f32.mrb[42].mxu1 }
 0x68a   : > { %v11253_v5 = vpop.f32.mrb[43].mxu1 }
 0x68b   : > { %v14527_v56 = vadd.f32 %v11251_v33, %v13722_v26  ;;  %v11254_v28 = vadd.f32 %v11253_v5, %v11252_v59  ;;  %v10889_v59 = vld.sshfl [vmem:[%s15121_s2 + $0x5c] sm:$0x33 pattern:$0x76325410] }
 0x68c   : > { %10799 = vmatmul.mubr.msk.bf16.gmra.mrb[84].mxu1 %vm492_vm6, %v10789_v2 }
 0x68d   : > { %v14531_v48 = vadd.f32 %v11254_v28, %v13726_v15  ;;  %7523 = vmatprep.mubr.bf16.mxu1 %v15178_v43  ;;  %v7364_v15 = vrot.slane %v7285_v21, 6  ;;  %v8118_v28 = vcombine.high %v10889_v59, %v10889_v59  ;;  %v12240_v21 = vld [vmem:[%s12420_s25 + $0x214] sm:$0xff]  }
 0x68f   : > { %v11255_v49 = vpop.f32.mrb[44].mxu1  ;;  %v7365_v45 = vsel %vm12427_vm5, %v7363_v39, %v7364_v15 }
 0x690   : > { %v11256_v26 = vpop.f32.mrb[45].mxu1  ;;  %v10791_v58 = vcombine.low %v7362_v0, %v7365_v45  ;;  %v12242_v0 = vld [vmem:[%s12420_s25 + $0x24c] sm:$0xff]  }
 0x691   : > { %v11257_v34 = vadd.f32 %v11256_v26, %v11255_v49  ;;  %v11258_v38 = vpop.f32.mrb[46].mxu1  ;;  %v12243_v45 = vld [vmem:[%s12420_s25 + $0x268] sm:$0xff]  }
 0x692   : > { %v11259_v10 = vpop.f32.mrb[47].mxu1 }
 0x693   : > { %v14541_v6 = vadd.f32 %v11257_v34, %v13737_v23  ;;  %v11260_v12 = vadd.f32 %v11259_v10, %v11258_v38 }
 0x694   : > { %10800 = vmatmul.mubr.msk.bf16.gmra.mrb[88].mxu1 %vm492_vm6, %v10790_v1 }
 0x695   : > { %v14545_v4 = vadd.f32 %v11260_v12, %v13741_v63  ;;  %7533 = vmatprep.mubr.bf16.mxu1 %v15178_v43 }
 0x697   : > { %v11261_v36 = vpop.f32.mrb[48].mxu1 }
 0x698   : > { %v11262_v37 = vpop.f32.mrb[49].mxu1 }
 0x699   : > { %v11263_v23 = vadd.f32 %v11262_v37, %v11261_v36  ;;  %v11264_v27 = vpop.f32.mrb[50].mxu1  ;;  %v12245_v36 = vld [vmem:[%s12420_s25 + $0x2a0] sm:$0xff]  }
 0x69a   : > { %v11265_v22 = vpop.f32.mrb[51].mxu1  ;;  %v10926_v37 = vld.sshfl [vmem:[%s15121_s2 + $0x60] sm:$0x33 pattern:$0x76325410] }
 0x69b   : > { %v14553_v32 = vadd.f32 %v11263_v23, %v13752_v11  ;;  %v11266_v63 = vadd.f32 %v11265_v22, %v11264_v27  ;;  %v8364_v23 = vcombine.high %v10926_v37, %v10926_v37 }
 0x69c   : > { %10801 = vmatmul.mubr.msk.bf16.gmra.mrb[92].mxu1 %vm492_vm6, %v10791_v58  ;;  %v8144_v58 = vsel %vm517_vm0, %v10889_v59, 0  ;;  %v10851_v59 = vld [vmem:[%s12420_s25 + $0x224] sm:$0xc] }
 0x69d   : > { %v14557_v2 = vadd.f32 %v11266_v63, %v13756_v41  ;;  %7705 = vmatprep.mubr.bf16.mxu1 %v15178_v43  ;;  %v10852_v63 = vld [vmem:[%s12420_s25 + $0x228] sm:$0xf] }
 0x69f   : > { %v11267_v33 = vpop.f32.mrb[52].mxu1 }
 0x6a0   : > { %v11268_v47 = vpop.f32.mrb[53].mxu1 }
 0x6a1   : > { %v11269_v17 = vadd.f32 %v11268_v47, %v11267_v33  ;;  %v11270_v5 = vpop.f32.mrb[54].mxu1  ;;  %v8037_v33 = vrot.slane %v10852_v63, 6  ;;  %v10853_v47 = vld [vmem:[%s12420_s25 + $0x22c] sm:$0x3]  ;;  %v10864_v63 = vld [vmem:[%s12420_s25 + $0x298] sm:$0xf] }
 0x6a2   : > { %v11271_v11 = vpop.f32.mrb[55].mxu1 }
 0x6a3   : > { %v14567_v41 = vadd.f32 %v11269_v17, %v13776_v31  ;;  %v11272_v19 = vadd.f32 %v11271_v11, %v11270_v5  ;;  %v8039_v5 = vrot.slane %v8037_v33, 4  ;;  %v8040_v11 = vrot.slane %v10853_v47, 6  ;;  %v10865_v47 = vld [vmem:[%s12420_s25 + $0x29c] sm:$0x3] }
 0x6a4   : > { %10829 = vmatmul.mubr.msk.bf16.vlgmr.msra.gmra.mrb[64].mxu1 %vm492_vm6, %v12239_v60  ;;  %v14650_v60 = vld.sshfl [vmem:[%s15121_s2 + $0x64] sm:$0x33 pattern:$0x76325410] }
 0x6a5   : > { %v14571_v55 = vadd.f32 %v11272_v19, %v13780_v24  ;;  %7836 = vmatpush1.bf16.msra.mxu1 %v7830_v20  ;;  %7715 = vmatprep.mubr.bf16.mxu1 %v15178_v43  ;;  %v8390_v20 = vsel %vm517_vm0, %v10926_v37, 0  ;;  %v8678_v19 = vcombine.high %v14650_v60, %v14650_v60  ;;  %v10861_v37 = vld [vmem:[%s12420_s25 + $0x27c] sm:$0xf] }
 0x6a6   : > { %10890 = vmatprep.subr.msk.bf16.mxu1 %vm517_vm0, %v8118_v28  ;;  %v10855_v28 = vld [vmem:[%s12420_s25 + $0x244] sm:$0xf] }
 0x6a7   : > { %v11273_v16 = vpop.f32.mrb[56].mxu1 }
 0x6a8   : > { %v11274_v61 = vpop.f32.mrb[57].mxu1 }
 0x6a9   : > { %v11275_v7 = vadd.f32 %v11274_v61, %v11273_v16  ;;  %v11276_v49 = vpop.f32.mrb[58].mxu1  ;;  %v8041_v61 = vsel %vm12427_vm5, %v8039_v5, %v8040_v11  ;;  %v8068_v11 = vrot.slane %v10865_v47, 6 }
 0x6aa   : > { %v11277_v26 = vpop.f32.mrb[59].mxu1 }
 0x6ab   : > { %v14577_v31 = vadd.f32 %v11275_v7, %v13792_v8  ;;  %v11278_v1 = vadd.f32 %v11277_v26, %v11276_v49  ;;  %v10854_v7 = vld [vmem:[%s12420_s25 + $0x240] sm:$0xc]  ;;  %v10856_v49 = vld [vmem:[%s12420_s25 + $0x248] sm:$0x3] }
 0x6ac   : > { %10830 = vmatmul.mubr.msk.bf16.gmra.mrb[68].mxu1 %vm492_vm6, %v12240_v21  ;;  %v8044_v21 = vrot.slane %v10855_v28, 6 }
 0x6ad   : > { %v14581_v24 = vadd.f32 %v11278_v1, %v13796_v53  ;;  %7725 = vmatprep.mubr.bf16.mxu1 %v15178_v43  ;;  %v10874_v1 = vrot.slane %v10854_v7, 10 }
 0x6af   : > { %v11279_v34 = vpop.f32.mrb[60].mxu1 }
 0x6b0   : > { %v11280_v38 = vpop.f32.mrb[61].mxu1 }
 0x6b1   : > { %v11281_v39 = vadd.f32 %v11280_v38, %v11279_v34  ;;  %v11282_v15 = vpop.f32.mrb[62].mxu1  ;;  %v8046_v34 = vrot.slane %v8044_v21, 4  ;;  %v8047_v38 = vrot.slane %v10856_v49, 6 }
 0x6b2   : > { %v11283_v10 = vpop.f32.mrb[63].mxu1 }
 0x6b3   : > { %v14586_v8 = vadd.f32 %v11281_v39, %v13807_v25  ;;  %v11284_v12 = vadd.f32 %v11283_v10, %v11282_v15  ;;  %v12244_v25 = vld [vmem:[%s12420_s25 + $0x284] sm:$0xff]   ;;  %v8045_v39 = vsel %vm12427_vm5, %v10874_v1, %v8044_v21  ;;  %v8048_v15 = vsel %vm12427_vm5, %v8046_v34, %v8047_v38  ;;  %v10868_v21 = vld [vmem:[%s12420_s25 + $0x2b8] sm:$0x3]  ;;  %v10870_v34 = vld [vmem:[%s12420_s25 + $0x2d0] sm:$0xf] }
 0x6b4   : > { %10831 = vmatmul.mubr.msk.bf16.gmra.mrb[72].mxu1 %vm492_vm6, %v12241_v50  ;;  %v10858_v50 = vld [vmem:[%s12420_s25 + $0x260] sm:$0xf]  ;;  %v8075_v1 = vrot.slane %v10868_v21, 6  ;;  %v10939_v21 = vld [vmem:[%s12420_s25 + $0x414] sm:$0xe] }
 0x6b5   : > { %v14590_v53 = vadd.f32 %v11284_v12, %v13811_v40  ;;  %7735 = vmatprep.mubr.bf16.mxu1 %v15178_v43  ;;  %v12246_v40 = vld [vmem:[%s12420_s25 + $0x2bc] sm:$0xff]   ;;  %v8051_v10 = vrot.slane %v10858_v50, 6 }
 0x6b6   : > { %v10857_v12 = vld [vmem:[%s12420_s25 + $0x25c] sm:$0xc] }
 0x6bc   : > { %10832 = vmatmul.mubr.msk.bf16.gmra.mrb[76].mxu1 %vm492_vm6, %v12242_v0  ;;  %v10859_v0 = vld [vmem:[%s12420_s25 + $0x264] sm:$0x3] }
 0x6bd   : > { %7745 = vmatprep.mubr.bf16.mxu1 %v15178_v43 }
 0x6c4   : > { %10833 = vmatmul.mubr.msk.bf16.gmra.mrb[80].mxu1 %vm492_vm6, %v12243_v45  ;;  %v10883_v45 = vcombine.low %v8045_v39, %v8048_v15  ;;  %v8079_v39 = vrot.slane %v10870_v34, 6  ;;  %v10869_v15 = vld [vmem:[%s12420_s25 + $0x2cc] sm:$0xc]  ;;  %v10961_v34 = vrot.slane %v10939_v21, 9  ;;  %v10950_v21 = vld [vmem:[%s12420_s25 + $0x470] sm:$0x1] }
 0x6c5   : > { %7755 = vmatprep.mubr.bf16.mxu1 %v15178_v43 }
 0x6cc   : > { %10834 = vmatmul.mubr.msk.bf16.gmra.mrb[84].mxu1 %vm492_vm6, %v12244_v25  ;;  %v10875_v25 = vrot.slane %v10857_v12, 10 }
 0x6cd   : > { %7765 = vmatprep.mubr.bf16.mxu1 %v15178_v43 }
 0x6d4   : > { %10835 = vmatmul.mubr.msk.bf16.gmra.mrb[88].mxu1 %vm492_vm6, %v12245_v36  ;;  %v8053_v36 = vrot.slane %v8051_v10, 4 }
 0x6d5   : > { %7775 = vmatprep.mubr.bf16.mxu1 %v15178_v43 }
 0x6dc   : > { %10836 = vmatmul.mubr.msk.bf16.gmra.mrb[92].mxu1 %vm492_vm6, %v12246_v40  ;;  %v8054_v40 = vrot.slane %v10859_v0, 6  ;;  %v10879_v0 = vrot.slane %v10869_v15, 10  ;;  %v10943_v15 = vld [vmem:[%s12420_s25 + $0x434] sm:$0xf] }
 0x6dd   : > { %7867 = vmatprep.mubr.bf16.mxu1 %v15178_v43 }
 0x6e4   : > { %10840 = vmatmul.mubr.msk.bf16.vlgmr.msra.gmra.mrb[64].mxu1 %vm492_vm6, %v15182_v14  ;;  %v10849_v14 = vld [vmem:[%s12420_s25 + $0x20c] sm:$0xf] }
 0x6e5   : > { %8150 = vmatpush1.bf16.msra.mxu1 %v8144_v58  ;;  %7877 = vmatprep.mubr.bf16.mxu1 %v15178_v43  ;;  %v8052_v58 = vsel %vm12427_vm5, %v10875_v25, %v8051_v10  ;;  %v10871_v10 = vld [vmem:[%s12420_s25 + $0x2d4] sm:$0x3] }
 0x6e6   : > { %10927 = vmatprep.subr.msk.bf16.mxu1 %vm517_vm0, %v8364_v23  ;;  %v8055_v23 = vsel %vm12427_vm5, %v8053_v36, %v8054_v40  ;;  %v8082_v25 = vrot.slane %v10871_v10, 6  ;;  %v8080_v36 = vsel %vm12427_vm5, %v10879_v0, %v8079_v39  ;;  %v12260_v10 = vld [vmem:[%s15122_s3 + $0x190] sm:$0xff]  }
 0x6ec   : > { %10841 = vmatmul.mubr.msk.bf16.gmra.mrb[68].mxu1 %vm492_vm6, %v15183_v44  ;;  %v8030_v44 = vrot.slane %v10849_v14, 6  ;;  %v8058_v14 = vrot.slane %v10861_v37, 6 }
 0x6ed   : > { %7887 = vmatprep.mubr.bf16.mxu1 %v15178_v43 }
 0x6f4   : > { %10842 = vmatmul.mubr.msk.bf16.gmra.mrb[72].mxu1 %vm492_vm6, %v15184_v3  ;;  %v10848_v3 = vld [vmem:[%s12420_s25 + $0x208] sm:$0xc] }
 0x6f5   : > { %7897 = vmatprep.mubr.bf16.mxu1 %v15178_v43  ;;  %v10872_v27 = vrot.slane %v10848_v3, 10  ;;  %v10862_v3 = vld [vmem:[%s12420_s25 + $0x280] sm:$0x3] }
 0x6fc   : > { %10843 = vmatmul.mubr.msk.bf16.gmra.mrb[76].mxu1 %vm492_vm6, %v15185_v18  ;;  %v10850_v18 = vld [vmem:[%s12420_s25 + $0x210] sm:$0x3] }
 0x6fd   : > { %7907 = vmatprep.mubr.bf16.mxu1 %v15178_v43  ;;  %v8033_v22 = vrot.slane %v10850_v18, 6  ;;  %v10884_v18 = vcombine.low %v8052_v58, %v8055_v23  ;;  %v11028_v58 = vld.sshfl [vmem:[%s15121_s2 + $0x68] sm:$0x33 pattern:$0x76325410]  ;;  %v12247_v23 = vld [vmem:[%s12420_s25 + $0x3f0] sm:$0xff]  }
 0x704   : > { %10844 = vmatmul.mubr.msk.bf16.gmra.mrb[80].mxu1 %vm492_vm6, %v15186_v57  ;;  %v8032_v57 = vrot.slane %v8030_v44, 4 }
 0x705   : > { %7917 = vmatprep.mubr.bf16.mxu1 %v15178_v43 }
 0x70c   : > { %10845 = vmatmul.mubr.msk.bf16.gmra.mrb[84].mxu1 %vm492_vm6, %v15187_v29  ;;  %v8031_v29 = vsel %vm12427_vm5, %v10872_v27, %v8030_v44  ;;  %v10860_v44 = vld [vmem:[%s12420_s25 + $0x278] sm:$0xc] }
 0x70d   : > { %7927 = vmatprep.mubr.bf16.mxu1 %v15178_v43  ;;  %v10876_v27 = vrot.slane %v10860_v44, 10  ;;  %v8992_v44 = vcombine.high %v11028_v58, %v11028_v58 }
 0x714   : > { %10846 = vmatmul.mubr.msk.bf16.gmra.mrb[88].mxu1 %vm492_vm6, %v15188_v35  ;;  %v8034_v35 = vsel %vm12427_vm5, %v8032_v57, %v8033_v22  ;;  %v8060_v57 = vrot.slane %v8058_v14, 4  ;;  %v8061_v22 = vrot.slane %v10862_v3, 6  ;;  %v12248_v3 = vld [vmem:[%s12420_s25 + $0x40c] sm:$0xff]  }
 0x715   : > { %7937 = vmatprep.mubr.bf16.mxu1 %v15178_v43  ;;  %v10881_v17 = vcombine.low %v8031_v29, %v8034_v35  ;;  %v8059_v29 = vsel %vm12427_vm5, %v10876_v27, %v8058_v14  ;;  %v8704_v14 = vsel %vm517_vm0, %v14650_v60, 0  ;;  %v12250_v60 = vld [vmem:[%s12420_s25 + $0x444] sm:$0xff]  }
 0x716   : > { %v8062_v35 = vsel %vm12427_vm5, %v8060_v57, %v8061_v22  ;;  %v12251_v27 = vld [vmem:[%s12420_s25 + $0x460] sm:$0xff]   ;;  %v12253_v22 = vld [vmem:[%s12420_s25 + $0x498] sm:$0xff]  }
 0x717   : > { %v12252_v57 = vld [vmem:[%s12420_s25 + $0x47c] sm:$0xff]  }
 0x71c   : > { %10847 = vmatmul.mubr.msk.bf16.gmra.mrb[92].mxu1 %vm492_vm6, %v15189_v54  ;;  %v10873_v54 = vrot.slane %v10851_v59, 10  ;;  %v10863_v59 = vld [vmem:[%s12420_s25 + $0x294] sm:$0xc] }
 0x71d   : > { %8181 = vmatprep.mubr.bf16.mxu1 %v15178_v43 }
 0x71e   : > { %v8038_v16 = vsel %vm12427_vm5, %v10873_v54, %v8037_v33  ;;  %v8065_v33 = vrot.slane %v10864_v63, 6  ;;  %v10877_v54 = vrot.slane %v10863_v59, 10  ;;  %v10937_v63 = vld [vmem:[%s12420_s25 + $0x3fc] sm:$0xf]  ;;  %v12254_v59 = vld [vmem:[%s12420_s25 + $0x4b4] sm:$0xff]  }
 0x71f   : > { %v10882_v26 = vcombine.low %v8038_v16, %v8041_v61  ;;  %v10866_v61 = vld [vmem:[%s12420_s25 + $0x2b0] sm:$0xc] }
 0x720   : > { %v8067_v5 = vrot.slane %v8065_v33, 4  ;;  %v8066_v28 = vsel %vm12427_vm5, %v10877_v54, %v8065_v33  ;;  %v10878_v49 = vrot.slane %v10866_v61, 10  ;;  %v10938_v33 = vld [vmem:[%s12420_s25 + $0x400] sm:$0x1] }
 0x721   : > { %v8593_v54 = vrot.slane %v10938_v33, 5  ;;  %v12266_v33 = vld [vmem:[%s15122_s3 + $0x1a8] sm:$0xff]  }
 0x724   : > { %10891 = vmatmul.mubr.msk.bf16.vlgmr.msra.gmra.mrb[64].mxu1 %vm492_vm6, %v10881_v17  ;;  %v10885_v17 = vcombine.low %v8059_v29, %v8062_v35  ;;  %v8590_v29 = vrot.slane %v10937_v63, 5  ;;  %v10936_v35 = vld [vmem:[%s12420_s25 + $0x3f8] sm:$0xe] }
 0x725   : > { %8396 = vmatpush1.bf16.msra.mxu1 %v8390_v20  ;;  %8191 = vmatprep.mubr.bf16.mxu1 %v15178_v43  ;;  %v10867_v20 = vld [vmem:[%s12420_s25 + $0x2b4] sm:$0xf]  ;;  %v10960_v47 = vrot.slane %v10936_v35, 9 }
 0x726   : > { %10978 = vmatprep.subr.msk.bf16.mxu1 %vm517_vm0, %v8678_v19  ;;  %v8069_v19 = vsel %vm12427_vm5, %v8067_v5, %v8068_v11  ;;  %v8072_v16 = vrot.slane %v10867_v20, 6  ;;  %v10940_v5 = vld [vmem:[%s12420_s25 + $0x418] sm:$0xf]  ;;  %v12255_v11 = vld [vmem:[%s15122_s3 + $0x1c0] sm:$0xff]   ;;  %v10947_v35 = vld [vmem:[%s12420_s25 + $0x454] sm:$0x1] }
 0x727   : > { %v10886_v7 = vcombine.low %v8066_v28, %v8069_v19  ;;  %v12256_v20 = vld [vmem:[%s15122_s3 + $0x180] sm:$0xff]   ;;  %v12257_v28 = vld [vmem:[%s15122_s3 + $0x1c8] sm:$0xff]   ;;  %v8591_v19 = vsel %vm12412_vm3, %v10960_v47, %v8590_v29  ;;  %v8597_v61 = vrot.slane %v10940_v5, 5  ;;  %11285 = vmatprep.subr.bf16.mxu0 %v12255_v11  ;;  %v12267_v47 = vld [vmem:[%s15122_s3 + $0x1f0] sm:$0xff]   ;;  %v8614_v5 = vrot.slane %v10947_v35, 5 }
 0x728   : > { %v8073_v38 = vsel %vm12427_vm5, %v10878_v49, %v8072_v16  ;;  %11286 = vmatpush3.bf16.msra.mxu0 %v12256_v20  ;;  %v12258_v49 = vld [vmem:[%s15122_s3 + $0x188] sm:$0xff]   ;;  %v12268_v20 = vld [vmem:[%s15122_s3 + $0x1b0] sm:$0xff]   ;;  %v10959_v35 = vld [vmem:[%s12420_s25 + $0x4c4] sm:$0x1] }
 0x729   : > { %11287 = vmatprep.subr.bf16.mxu0 %v12257_v28  ;;  %v8598_v0 = vsel %vm12412_vm3, %v10961_v34, %v8597_v61  ;;  %v10949_v11 = vld [vmem:[%s12420_s25 + $0x46c] sm:$0xf]  ;;  %v10952_v34 = vld [vmem:[%s12420_s25 + $0x488] sm:$0xf] }
 0x72c   : > { %10892 = vmatmul.mubr.msk.bf16.gmra.mrb[68].mxu1 %vm492_vm6, %v10882_v26  ;;  %v8074_v26 = vrot.slane %v8072_v16, 4  ;;  %11288 = vmatpush3.bf16.msra.mxu0 %v12258_v49 }
 0x72d   : > { %8201 = vmatprep.mubr.bf16.mxu1 %v15178_v43 }
 0x72e   : > { %v8076_v50 = vsel %vm12427_vm5, %v8074_v26, %v8075_v1  ;;  %v12259_v1 = vld [vmem:[%s15122_s3 + $0x1d0] sm:$0xff]  }
 0x72f   : > { %v10887_v12 = vcombine.low %v8073_v38, %v8076_v50  ;;  %v8599_v38 = vrot.slane %v8597_v61, 4  ;;  %11289 = vmatprep.subr.bf16.mxu0 %v12259_v1  ;;  %v10948_v61 = vld [vmem:[%s12420_s25 + $0x468] sm:$0xe]  ;;  %v8621_v1 = vrot.slane %v10950_v21, 5 }
 0x730   : > { %11290 = vmatpush3.bf16.msra.mxu0 %v12260_v10  ;;  %v10964_v49 = vrot.slane %v10948_v61, 9  ;;  %v10953_v10 = vld [vmem:[%s12420_s25 + $0x48c] sm:$0x1] }
 0x734   : > { %10893 = vmatmul.mubr.msk.bf16.gmra.mrb[72].mxu1 %vm492_vm6, %v10883_v45  ;;  %v8081_v45 = vrot.slane %v8079_v39, 4  ;;  %v9018_v39 = vsel %vm517_vm0, %v11028_v58, 0 }
 0x735   : > { %8211 = vmatprep.mubr.bf16.mxu1 %v15178_v43 }
 0x736   : > { %v8083_v40 = vsel %vm12427_vm5, %v8081_v45, %v8082_v25  ;;  %v8604_v25 = vrot.slane %v10943_v15, 5  ;;  %v10951_v15 = vld [vmem:[%s12420_s25 + $0x484] sm:$0xe] }
 0x737   : > { %v10888_v37 = vcombine.low %v8080_v36, %v8083_v40  ;;  %v10942_v36 = vld [vmem:[%s12420_s25 + $0x430] sm:$0xe]  ;;  %v10944_v40 = vld [vmem:[%s12420_s25 + $0x438] sm:$0x1] }
 0x73c   : > { %10894 = vmatmul.mubr.msk.bf16.gmra.mrb[76].mxu1 %vm492_vm6, %v10884_v18  ;;  %v12249_v18 = vld [vmem:[%s12420_s25 + $0x428] sm:$0xff]  }
 0x73d   : > { %8221 = vmatprep.mubr.bf16.mxu1 %v15178_v43 }
 0x744   : > { %10895 = vmatmul.mubr.msk.bf16.gmra.mrb[80].mxu1 %vm492_vm6, %v10885_v17  ;;  %v8592_v17 = vrot.slane %v8590_v29, 4  ;;  %v10945_v29 = vld [vmem:[%s12420_s25 + $0x44c] sm:$0xe] }
 0x745   : > { %8231 = vmatprep.mubr.bf16.mxu1 %v15178_v43 }
 0x746   : > { %v8594_v16 = vsel %vm12412_vm3, %v8592_v17, %v8593_v54  ;;  %v10963_v17 = vrot.slane %v10945_v29, 9  ;;  %v10957_v29 = vld [vmem:[%s12420_s25 + $0x4bc] sm:$0xe] }
 0x747   : > { %v10969_v26 = vcombine.low %v8591_v19, %v8594_v16  ;;  %v8618_v16 = vrot.slane %v10949_v11, 5 }
 0x74c   : > { %10896 = vmatmul.mubr.msk.bf16.gmra.mrb[84].mxu1 %vm492_vm6, %v10886_v7  ;;  %v10941_v7 = vld [vmem:[%s12420_s25 + $0x41c] sm:$0x1] }
 0x74d   : > { %8241 = vmatprep.mubr.bf16.mxu1 %v15178_v43  ;;  %v8600_v50 = vrot.slane %v10941_v7, 5 }
 0x74f   : > { %v8601_v45 = vsel %vm12412_vm3, %v8599_v38, %v8600_v50  ;;  %v8619_v38 = vsel %vm12412_vm3, %v10964_v49, %v8618_v16  ;;  %v10991_v49 = vld [vmem:[%s12420_s25 + $0x420] sm:$0xf] }
 0x750   : > { %v10970_v58 = vcombine.low %v8598_v0, %v8601_v45  ;;  %v10965_v0 = vrot.slane %v10951_v15, 9 }
 0x754   : > { %10897 = vmatmul.mubr.msk.bf16.gmra.mrb[88].mxu1 %vm492_vm6, %v10887_v12  ;;  %v12261_v12 = vld [vmem:[%s15122_s3 + $0x1d8] sm:$0xff]  }
 0x755   : > { %8251 = vmatprep.mubr.bf16.mxu1 %v15178_v43  ;;  %11291 = vmatprep.subr.bf16.mxu0 %v12261_v12 }
 0x75c   : > { %10898 = vmatmul.mubr.msk.bf16.gmra.mrb[92].mxu1 %vm492_vm6, %v10888_v37  ;;  %v12262_v37 = vld [vmem:[%s15122_s3 + $0x198] sm:$0xff]  }
 0x75d   : > { %8427 = vmatprep.mubr.bf16.mxu1 %v15178_v43  ;;  %11292 = vmatpush3.bf16.msra.mxu0 %v12262_v37 }
 0x764   : > { %10928 = vmatmul.mubr.msk.bf16.vlgmr.msra.gmra.mrb[64].mxu1 %vm492_vm6, %v12247_v23  ;;  %v12263_v23 = vld [vmem:[%s15122_s3 + $0x1e0] sm:$0xff]  }
 0x765   : > { %8710 = vmatpush1.bf16.msra.mxu1 %v8704_v14  ;;  %8437 = vmatprep.mubr.bf16.mxu1 %v15178_v43  ;;  %v10962_v14 = vrot.slane %v10942_v36, 9  ;;  %v10955_v36 = vld [vmem:[%s12420_s25 + $0x4a4] sm:$0xf] }
 0x766   : > { %11029 = vmatprep.subr.msk.bf16.mxu1 %vm517_vm0, %v8992_v44  ;;  %v8606_v44 = vrot.slane %v8604_v25, 4  ;;  %11293 = vmatprep.subr.bf16.mxu0 %v12263_v23  ;;  %v10954_v23 = vld [vmem:[%s12420_s25 + $0x4a0] sm:$0xe] }
 0x76c   : > { %10929 = vmatmul.mubr.msk.bf16.gmra.mrb[68].mxu1 %vm492_vm6, %v12248_v3  ;;  %v8607_v3 = vrot.slane %v10944_v40, 5 }
 0x76d   : > { %8447 = vmatprep.mubr.bf16.mxu1 %v15178_v43 }
 0x774   : > { %10930 = vmatmul.mubr.msk.bf16.gmra.mrb[72].mxu1 %vm492_vm6, %v12249_v18  ;;  %v10946_v18 = vld [vmem:[%s12420_s25 + $0x450] sm:$0xf] }
 0x775   : > { %8457 = vmatprep.mubr.bf16.mxu1 %v15178_v43  ;;  %v8611_v63 = vrot.slane %v10946_v18, 5 }
 0x777   : > { %v8613_v54 = vrot.slane %v8611_v63, 4  ;;  %v8612_v28 = vsel %vm12412_vm3, %v10963_v17, %v8611_v63  ;;  %v8642_v17 = vrot.slane %v10959_v35, 5 }
 0x779   : > { %v8615_v19 = vsel %vm12412_vm3, %v8613_v54, %v8614_v5  ;;  %v10988_v54 = vld [vmem:[%s12420_s25 + $0x404] sm:$0xf] }
 0x77a   : > { %v10972_v7 = vcombine.low %v8612_v28, %v8615_v19  ;;  %v10987_v28 = vld [vmem:[%s12420_s25 + $0x400] sm:$0xc]  ;;  %v10989_v19 = vld [vmem:[%s12420_s25 + $0x408] sm:$0x3] }
 0x77b   : > { %v11011_v61 = vrot.slane %v10987_v28, 10 }
 0x77c   : > { %10931 = vmatmul.mubr.msk.bf16.gmra.mrb[76].mxu1 %vm492_vm6, %v12250_v60  ;;  %v12264_v60 = vld [vmem:[%s15122_s3 + $0x1a0] sm:$0xff]  }
 0x77d   : > { %8467 = vmatprep.mubr.bf16.mxu1 %v15178_v43  ;;  %11294 = vmatpush3.bf16.msra.mxu0 %v12264_v60 }
 0x784   : > { %10932 = vmatmul.mubr.msk.bf16.gmra.mrb[80].mxu1 %vm492_vm6, %v12251_v27  ;;  %v12265_v27 = vld [vmem:[%s15122_s3 + $0x1e8] sm:$0xff]  }
 0x785   : > { %8477 = vmatprep.mubr.bf16.mxu1 %v15178_v43  ;;  %11295 = vmatprep.subr.bf16.mxu0 %v12265_v27  ;;  %v10958_v27 = vld [vmem:[%s12420_s25 + $0x4c0] sm:$0xf] }
 0x786   : > { %11296 = vmatpush3.bf16.msra.mxu0 %v12266_v33  ;;  %v8639_v63 = vrot.slane %v10958_v27, 5  ;;  %v10996_v27 = vld [vmem:[%s12420_s25 + $0x454] sm:$0xc] }
 0x787   : > { %11297 = vmatprep.subr.bf16.mxu0 %v12267_v47 }
 0x788   : > { %v8641_v47 = vrot.slane %v8639_v63, 4 }
 0x78a   : > { %11298 = vmatpush3.bf16.msra.mxu0 %v12268_v20  ;;  %v8643_v11 = vsel %vm12412_vm3, %v8641_v47, %v8642_v17  ;;  %v8904_v20 = vrot.slane %v10988_v54, 6  ;;  %v10999_v54 = vld [vmem:[%s12420_s25 + $0x470] sm:$0xc] }
 0x78c   : > { %10933 = vmatmul.mubr.msk.bf16.gmra.mrb[84].mxu1 %vm492_vm6, %v12252_v57  ;;  %v8605_v57 = vsel %vm12412_vm3, %v10962_v14, %v8604_v25  ;;  %v8628_v25 = vrot.slane %v10953_v10, 5  ;;  %v10956_v14 = vld [vmem:[%s12420_s25 + $0x4a8] sm:$0x1]  ;;  %v8906_v21 = vrot.slane %v8904_v20, 4 }
 0x78d   : > { %8487 = vmatprep.mubr.bf16.mxu1 %v15178_v43  ;;  %v8635_v60 = vrot.slane %v10956_v14, 5 }
 0x794   : > { %10934 = vmatmul.mubr.msk.bf16.gmra.mrb[88].mxu1 %vm492_vm6, %v12253_v22  ;;  %v8608_v22 = vsel %vm12412_vm3, %v8606_v44, %v8607_v3  ;;  %v10966_v3 = vrot.slane %v10954_v23, 9 }
 0x795   : > { %8497 = vmatprep.mubr.bf16.mxu1 %v15178_v43 }
 0x79c   : > { %10935 = vmatmul.mubr.msk.bf16.gmra.mrb[92].mxu1 %vm492_vm6, %v12254_v59  ;;  %v10971_v59 = vcombine.low %v8605_v57, %v8608_v22 }
 0x79d   : > { %8741 = vmatprep.mubr.bf16.mxu1 %v15178_v43 }
 0x7a4   : > { %10979 = vmatmul.mubr.msk.bf16.vlgmr.msra.gmra.mrb[64].mxu1 %vm492_vm6, %v10969_v26  ;;  %v8620_v26 = vrot.slane %v8618_v16, 4 }
 0x7a5   : > { %9024 = vmatpush1.bf16.msra.mxu1 %v9018_v39  ;;  %8751 = vmatprep.mubr.bf16.mxu1 %v15178_v43  ;;  %v8625_v39 = vrot.slane %v10952_v34, 5  ;;  %v10990_v34 = vld [vmem:[%s12420_s25 + $0x41c] sm:$0xc] }
 0x7a6   : > { %v8622_v50 = vsel %vm12412_vm3, %v8620_v26, %v8621_v1  ;;  %v8905_v26 = vsel %vm12427_vm5, %v11011_v61, %v8904_v20  ;;  %v8911_v1 = vrot.slane %v10991_v49, 6  ;;  %v11015_v20 = vrot.slane %v10999_v54, 10  ;;  %v11002_v49 = vld [vmem:[%s12420_s25 + $0x48c] sm:$0xc] }
 0x7a7   : > { %v10973_v12 = vcombine.low %v8619_v38, %v8622_v50  ;;  %v8627_v45 = vrot.slane %v8625_v39, 4  ;;  %v8626_v40 = vsel %vm12412_vm3, %v10965_v0, %v8625_v39  ;;  %v10992_v38 = vld [vmem:[%s12420_s25 + $0x424] sm:$0x3]  ;;  %v11012_v39 = vrot.slane %v10990_v34, 10 }
 0x7a8   : > { %v8913_v15 = vrot.slane %v8911_v1, 4  ;;  %v8914_v10 = vrot.slane %v10992_v38, 6 }
 0x7a9   : > { %v8629_v37 = vsel %vm12412_vm3, %v8627_v45, %v8628_v25  ;;  %v8912_v0 = vsel %vm12427_vm5, %v11012_v39, %v8911_v1  ;;  %v11016_v1 = vrot.slane %v11002_v49, 10 }
 0x7aa   : > { %v10974_v44 = vcombine.low %v8626_v40, %v8629_v37  ;;  %v8915_v45 = vsel %vm12427_vm5, %v8913_v15, %v8914_v10  ;;  %v10995_v40 = vld [vmem:[%s12420_s25 + $0x440] sm:$0x3] }
 0x7ab   : > { %v11021_v37 = vcombine.low %v8912_v0, %v8915_v45  ;;  %v8921_v14 = vrot.slane %v10995_v40, 6  ;;  %v11007_v0 = vld [vmem:[%s12420_s25 + $0x4b0] sm:$0x3] }
 0x7ac   : > { %10980 = vmatmul.mubr.msk.bf16.gmra.mrb[68].mxu1 %vm492_vm6, %v10970_v58  ;;  %v8632_v58 = vrot.slane %v10955_v36, 5  ;;  %v10993_v36 = vld [vmem:[%s12420_s25 + $0x438] sm:$0xc]  ;;  %v8949_v40 = vrot.slane %v11007_v0, 6 }
 0x7ad   : > { %8761 = vmatprep.mubr.bf16.mxu1 %v15178_v43 }
 0x7ae   : > { %v8634_v18 = vrot.slane %v8632_v58, 4  ;;  %v8633_v57 = vsel %vm12412_vm3, %v10966_v3, %v8632_v58  ;;  %v11013_v58 = vrot.slane %v10993_v36, 10 }
 0x7b0   : > { %v8636_v22 = vsel %vm12412_vm3, %v8634_v18, %v8635_v60 }
 0x7b1   : > { %v10975_v33 = vcombine.low %v8633_v57, %v8636_v22  ;;  %v10998_v57 = vld [vmem:[%s12420_s25 + $0x45c] sm:$0x3] }
 0x7b2   : > { %v8928_v35 = vrot.slane %v10998_v57, 6 }
 0x7b4   : > { %10981 = vmatmul.mubr.msk.bf16.gmra.mrb[72].mxu1 %vm492_vm6, %v10971_v59  ;;  %v10967_v59 = vrot.slane %v10957_v29, 9 }
 0x7b5   : > { %8771 = vmatprep.mubr.bf16.mxu1 %v15178_v43 }
 0x7b6   : > { %v8640_v5 = vsel %vm12412_vm3, %v10967_v59, %v8639_v63  ;;  %v11014_v63 = vrot.slane %v10996_v27, 10 }
 0x7b7   : > { %v10976_v16 = vcombine.low %v8640_v5, %v8643_v11  ;;  %v11001_v5 = vld [vmem:[%s12420_s25 + $0x478] sm:$0x3] }
 0x7bc   : > { %10982 = vmatmul.mubr.msk.bf16.gmra.mrb[76].mxu1 %vm492_vm6, %v10972_v7  ;;  %v8907_v7 = vrot.slane %v10989_v19, 6  ;;  %v8935_v19 = vrot.slane %v11001_v5, 6  ;;  %v14956_v5 = vrot.slane %v11039_v46, %v15191_v42 }
 0x7bd   : > { %8781 = vmatprep.mubr.bf16.mxu1 %v15178_v43 }
 0x7be   : > { %v8908_v30 = vsel %vm12427_vm5, %v8906_v21, %v8907_v7 }
 0x7bf   : > { %v11020_v50 = vcombine.low %v8905_v26, %v8908_v30  ;;  %v11004_v26 = vld [vmem:[%s12420_s25 + $0x494] sm:$0x3] }
 0x7c0   : > { %v8942_v38 = vrot.slane %v11004_v26, 6 }
 0x7c4   : > { %10983 = vmatmul.mubr.msk.bf16.gmra.mrb[80].mxu1 %vm492_vm6, %v10973_v12  ;;  %v10994_v12 = vld [vmem:[%s12420_s25 + $0x43c] sm:$0xf] }
 0x7c5   : > { %8791 = vmatprep.mubr.bf16.mxu1 %v15178_v43  ;;  %v8918_v25 = vrot.slane %v10994_v12, 6  ;;  %v11005_v12 = vld [vmem:[%s12420_s25 + $0x4a8] sm:$0xc] }
 0x7c7   : > { %v8920_v23 = vrot.slane %v8918_v25, 4  ;;  %v8919_v3 = vsel %vm12427_vm5, %v11013_v58, %v8918_v25  ;;  %v11017_v25 = vrot.slane %v11005_v12, 10 }
 0x7c9   : > { %v8922_v18 = vsel %vm12427_vm5, %v8920_v23, %v8921_v14 }
 0x7ca   : > { %v11022_v22 = vcombine.low %v8919_v3, %v8922_v18  ;;  %v11010_v3 = vld [vmem:[%s12420_s25 + $0x4cc] sm:$0x3] }
 0x7cb   : > { %v8956_v57 = vrot.slane %v11010_v3, 6 }
 0x7cc   : > { %10984 = vmatmul.mubr.msk.bf16.gmra.mrb[84].mxu1 %vm492_vm6, %v10974_v44  ;;  %v10997_v44 = vld [vmem:[%s12420_s25 + $0x458] sm:$0xf] }
 0x7cd   : > { %8801 = vmatprep.mubr.bf16.mxu1 %v15178_v43  ;;  %v8925_v60 = vrot.slane %v10997_v44, 6  ;;  %v11008_v44 = vld [vmem:[%s12420_s25 + $0x4c4] sm:$0xc] }
 0x7cf   : > { %v8927_v29 = vrot.slane %v8925_v60, 4  ;;  %v8926_v59 = vsel %vm12427_vm5, %v11014_v63, %v8925_v60  ;;  %v11018_v60 = vrot.slane %v11008_v44, 10 }
 0x7d1   : > { %v8929_v47 = vsel %vm12427_vm5, %v8927_v29, %v8928_v35  ;;  %v12269_v35 = vld [vmem:[%s15122_s3 + $0x1f8] sm:$0xff]  }
 0x7d2   : > { %v11023_v11 = vcombine.low %v8926_v59, %v8929_v47  ;;  %11299 = vmatprep.subr.bf16.mxu0 %v12269_v35 }
 0x7d4   : > { %10985 = vmatmul.mubr.msk.bf16.gmra.mrb[88].mxu1 %vm492_vm6, %v10975_v33  ;;  %v11000_v33 = vld [vmem:[%s12420_s25 + $0x474] sm:$0xf] }
 0x7d5   : > { %8811 = vmatprep.mubr.bf16.mxu1 %v15178_v43  ;;  %v8932_v17 = vrot.slane %v11000_v33, 6  ;;  %v12270_v33 = vld [vmem:[%s15122_s3 + $0x1b8] sm:$0xff]  }
 0x7d6   : > { %11300 = vmatpush3.bf16.msra.mxu0 %v12270_v33 }
 0x7d7   : > { %v8934_v28 = vrot.slane %v8932_v17, 4  ;;  %v8933_v61 = vsel %vm12427_vm5, %v11015_v20, %v8932_v17  ;;  %v14953_v17 = vrot.slane %v11039_v46, %v15190_v9 }
 0x7d9   : > { %v8936_v21 = vsel %vm12427_vm5, %v8934_v28, %v8935_v19 }
 0x7da   : > { %v11024_v30 = vcombine.low %v8933_v61, %v8936_v21 }
 0x7dc   : > { %10986 = vmatmul.mubr.msk.bf16.gmra.mrb[92].mxu1 %vm492_vm6, %v10976_v16  ;;  %v11003_v16 = vld [vmem:[%s12420_s25 + $0x490] sm:$0xf] }
 0x7dd   : > { %9055 = vmatprep.mubr.bf16.mxu1 %v15178_v43  ;;  %v8939_v7 = vrot.slane %v11003_v16, 6 }
 0x7df   : > { %v8941_v34 = vrot.slane %v8939_v7, 4  ;;  %v8940_v39 = vsel %vm12427_vm5, %v11016_v1, %v8939_v7 }
 0x7e1   : > { %v8943_v15 = vsel %vm12427_vm5, %v8941_v34, %v8942_v38 }
 0x7e2   : > { %v11025_v45 = vcombine.low %v8940_v39, %v8943_v15 }
 0x7e4   : > { %11030 = vmatmul.mubr.msk.bf16.vlgmr.msra.gmra.mrb[64].mxu1 %vm492_vm6, %v11020_v50  ;;  %v11006_v50 = vld [vmem:[%s12420_s25 + $0x4ac] sm:$0xf] }
 0x7e5   : > { %9065 = vmatprep.mubr.bf16.mxu1 %v15178_v43  ;;  %v8946_v10 = vrot.slane %v11006_v50, 6 }
 0x7e7   : > { %v8948_v36 = vrot.slane %v8946_v10, 4  ;;  %v8947_v58 = vsel %vm12427_vm5, %v11017_v25, %v8946_v10 }
 0x7e9   : > { %v8950_v23 = vsel %vm12427_vm5, %v8948_v36, %v8949_v40 }
 0x7ea   : > { %v11026_v18 = vcombine.low %v8947_v58, %v8950_v23 }
 0x7ec   : > { %11031 = vmatmul.mubr.msk.bf16.gmra.mrb[68].mxu1 %vm492_vm6, %v11021_v37  ;;  %v11009_v37 = vld [vmem:[%s12420_s25 + $0x4c8] sm:$0xf] }
 0x7ed   : > { %9075 = vmatprep.mubr.bf16.mxu1 %v15178_v43  ;;  %v8953_v14 = vrot.slane %v11009_v37, 6 }
 0x7ef   : > { %v8955_v27 = vrot.slane %v8953_v14, 4 }
 0x7f1   : > { %v8957_v63 = vsel %vm12427_vm5, %v8955_v27, %v8956_v57 }
 0x7f4   : > { %11032 = vmatmul.mubr.msk.bf16.gmra.mrb[72].mxu1 %vm492_vm6, %v11022_v22  ;;  %v8954_v22 = vsel %vm12427_vm5, %v11018_v60, %v8953_v14 }
 0x7f5   : > { %9085 = vmatprep.mubr.bf16.mxu1 %v15178_v43  ;;  %v11027_v29 = vcombine.low %v8954_v22, %v8957_v63 }
 0x7fc   : > { %11033 = vmatmul.mubr.msk.bf16.gmra.mrb[76].mxu1 %vm492_vm6, %v11023_v11 }
 0x7fd   : > { %9095 = vmatprep.mubr.bf16.mxu1 %v15178_v43 }
 0x804   : > { %11034 = vmatmul.mubr.msk.bf16.gmra.mrb[80].mxu1 %vm492_vm6, %v11024_v30 }
 0x805   : > { %9105 = vmatprep.mubr.bf16.mxu1 %v15178_v43 }
 0x80c   : > { %11035 = vmatmul.mubr.msk.bf16.gmra.mrb[84].mxu1 %vm492_vm6, %v11025_v45 }
 0x80d   : > { %9115 = vmatprep.mubr.bf16.mxu1 %v15178_v43 }
 0x814   : > { %11036 = vmatmul.mubr.msk.bf16.gmra.mrb[88].mxu1 %vm492_vm6, %v11026_v18 }
 0x815   : > { %9125 = vmatprep.mubr.bf16.mxu1 %v15178_v43  ;;  %v11038_v43 = vld [vmem:[%s15123_s4 + $0x3] ss:$4 sm:$0x3] }
 0x816   : > { %v14947_v59 = vrot.slane %v11038_v43, %v15190_v9  ;;  %v14950_v47 = vrot.slane %v11038_v43, %v15191_v42 }
 0x81c   : > { %11037 = vmatmul.mubr.msk.bf16.gmra.mrb[92].mxu1 %vm492_vm6, %v11027_v29 }
 0x8b7   : > { %v9057_v54 = vpop.f32.mrb[64].mxu1 }
 0x8b8   : > { %v9181_v11 = vmul.f32 %v14947_v59, %v9057_v54  ;;  %v9059_v20 = vpop.f32.mrb[65].mxu1 }
 0x8b9   : > { %v9182_v28 = vmul.f32 %v14950_v47, %v9059_v20  ;;  %v9061_v19 = vpop.f32.mrb[66].mxu1 }
 0x8ba   : > { %v9226_v16 = vadd.f32 %v14953_v17, %v9181_v11  ;;  %v9183_v61 = vmul.f32 %v14947_v59, %v9061_v19  ;;  %v9063_v21 = vpop.f32.mrb[67].mxu1 }
 0x8bb   : > { %v9227_v7 = vadd.f32 %v14956_v5, %v9182_v28  ;;  %v9184_v9 = vmul.f32 %v14950_v47, %v9063_v21 }
 0x8bc   : > { %v9228_v49 = vadd.f32 %v14953_v17, %v9183_v61  ;;  %v9258_v26 = vmax.f32 %v9226_v16, 0.0 }
 0x8bd   : > { %v9229_v42 = vadd.f32 %v14956_v5, %v9184_v9  ;;  %v9259_v1 = vmax.f32 %v9227_v7, 0.0 }
 0x8be   : > { %v9260_v30 = vmax.f32 %v9228_v49, 0.0 }
 0x8bf   : > { %v9261_v34 = vmax.f32 %v9229_v42, 0.0  ;;  %v9067_v38 = vpop.f32.mrb[68].mxu1 }
 0x8c0   : > { %v9290_v50 = vpack.c.bf16 %v9260_v30, %v9258_v26  ;;  %v9185_v39 = vmul.f32 %v14947_v59, %v9067_v38  ;;  %v9069_v15 = vpop.f32.mrb[69].mxu1 }
 0x8c1   : > { %v9186_v10 = vmul.f32 %v14950_v47, %v9069_v15  ;;  %v9071_v12 = vpop.f32.mrb[70].mxu1  ;;  %v9291_v0 = vpack.c.bf16 %v9261_v34, %v9259_v1 }
 0x8c2   : > { %v9230_v45 = vadd.f32 %v14953_v17, %v9185_v39  ;;  %v9187_v25 = vmul.f32 %v14947_v59, %v9071_v12  ;;  %v9073_v36 = vpop.f32.mrb[71].mxu1 }
 0x8c3   : > { %v9231_v40 = vadd.f32 %v14956_v5, %v9186_v10  ;;  %v9188_v37 = vmul.f32 %v14950_v47, %v9073_v36  ;;  %9467 = vmatprep.mubr.bf16.mxu0 %v9291_v0 }
 0x8c4   : > { %v9232_v58 = vadd.f32 %v14953_v17, %v9187_v25  ;;  %9468 = vmatmul.mubr.bf16.vlgmr.msra.gmra.mrb[160].mxu0 %v9290_v50  ;;  %v9262_v14 = vmax.f32 %v9230_v45, 0.0 }
 0x8c5   : > { %v9233_v23 = vadd.f32 %v14956_v5, %v9188_v37  ;;  %v9263_v3 = vmax.f32 %v9231_v40, 0.0 }
 0x8c6   : > { %v9264_v44 = vmax.f32 %v9232_v58, 0.0 }
 0x8c7   : > { %v9265_v18 = vmax.f32 %v9233_v23, 0.0  ;;  %v9077_v60 = vpop.f32.mrb[72].mxu1 }
 0x8c8   : > { %v9189_v27 = vmul.f32 %v14947_v59, %v9077_v60  ;;  %v9079_v57 = vpop.f32.mrb[73].mxu1  ;;  %v9292_v22 = vpack.c.bf16 %v9264_v44, %v9262_v14 }
 0x8c9   : > { %v9190_v63 = vmul.f32 %v14950_v47, %v9079_v57  ;;  %v9081_v29 = vpop.f32.mrb[74].mxu1  ;;  %v9293_v35 = vpack.c.bf16 %v9265_v18, %v9263_v3 }
 0x8ca   : > { %v9234_v33 = vadd.f32 %v14953_v17, %v9189_v27  ;;  %v9191_v43 = vmul.f32 %v14947_v59, %v9081_v29  ;;  %v9083_v46 = vpop.f32.mrb[75].mxu1 }
 0x8cb   : > { %v9235_v54 = vadd.f32 %v14956_v5, %v9190_v63  ;;  %v9192_v11 = vmul.f32 %v14950_v47, %v9083_v46  ;;  %9475 = vmatprep.mubr.bf16.mxu0 %v9293_v35 }
 0x8cc   : > { %v9236_v20 = vadd.f32 %v14953_v17, %v9191_v43  ;;  %9476 = vmatmul.mubr.bf16.gmra.mrb[164].mxu0 %v9292_v22  ;;  %v9266_v19 = vmax.f32 %v9234_v33, 0.0 }
 0x8cd   : > { %v9237_v28 = vadd.f32 %v14956_v5, %v9192_v11  ;;  %v9267_v61 = vmax.f32 %v9235_v54, 0.0 }
 0x8ce   : > { %v9268_v16 = vmax.f32 %v9236_v20, 0.0 }
 0x8cf   : > { %v9269_v21 = vmax.f32 %v9237_v28, 0.0  ;;  %v9087_v7 = vpop.f32.mrb[76].mxu1 }
 0x8d0   : > { %v9193_v9 = vmul.f32 %v14947_v59, %v9087_v7  ;;  %v9089_v49 = vpop.f32.mrb[77].mxu1  ;;  %v9294_v42 = vpack.c.bf16 %v9268_v16, %v9266_v19 }
 0x8d1   : > { %v9194_v26 = vmul.f32 %v14950_v47, %v9089_v49  ;;  %v9091_v30 = vpop.f32.mrb[78].mxu1  ;;  %v9295_v1 = vpack.c.bf16 %v9269_v21, %v9267_v61 }
 0x8d2   : > { %v9238_v34 = vadd.f32 %v14953_v17, %v9193_v9  ;;  %v9195_v38 = vmul.f32 %v14947_v59, %v9091_v30  ;;  %v9093_v50 = vpop.f32.mrb[79].mxu1 }
 0x8d3   : > { %v9239_v39 = vadd.f32 %v14956_v5, %v9194_v26  ;;  %v9196_v15 = vmul.f32 %v14950_v47, %v9093_v50  ;;  %9483 = vmatprep.mubr.bf16.mxu0 %v9295_v1 }
 0x8d4   : > { %v9240_v10 = vadd.f32 %v14953_v17, %v9195_v38  ;;  %9484 = vmatmul.mubr.bf16.gmra.mrb[168].mxu0 %v9294_v42  ;;  %v9270_v0 = vmax.f32 %v9238_v34, 0.0 }
 0x8d5   : > { %v9241_v12 = vadd.f32 %v14956_v5, %v9196_v15  ;;  %v9271_v25 = vmax.f32 %v9239_v39, 0.0 }
 0x8d6   : > { %v9272_v45 = vmax.f32 %v9240_v10, 0.0 }
 0x8d7   : > { %v9273_v36 = vmax.f32 %v9241_v12, 0.0  ;;  %v9097_v40 = vpop.f32.mrb[80].mxu1 }
 0x8d8   : > { %v9197_v37 = vmul.f32 %v14947_v59, %v9097_v40  ;;  %v9099_v58 = vpop.f32.mrb[81].mxu1  ;;  %v9296_v23 = vpack.c.bf16 %v9272_v45, %v9270_v0 }
 0x8d9   : > { %v9198_v14 = vmul.f32 %v14950_v47, %v9099_v58  ;;  %v9101_v44 = vpop.f32.mrb[82].mxu1  ;;  %v9297_v3 = vpack.c.bf16 %v9273_v36, %v9271_v25 }
 0x8da   : > { %v9242_v18 = vadd.f32 %v14953_v17, %v9197_v37  ;;  %v9199_v60 = vmul.f32 %v14947_v59, %v9101_v44  ;;  %v9103_v27 = vpop.f32.mrb[83].mxu1 }
 0x8db   : > { %v9243_v57 = vadd.f32 %v14956_v5, %v9198_v14  ;;  %v9200_v22 = vmul.f32 %v14950_v47, %v9103_v27  ;;  %9491 = vmatprep.mubr.bf16.mxu0 %v9297_v3 }
 0x8dc   : > { %v9244_v63 = vadd.f32 %v14953_v17, %v9199_v60  ;;  %9492 = vmatmul.mubr.bf16.gmra.mrb[172].mxu0 %v9296_v23  ;;  %v9274_v35 = vmax.f32 %v9242_v18, 0.0 }
 0x8dd   : > { %v9245_v29 = vadd.f32 %v14956_v5, %v9200_v22  ;;  %v9275_v43 = vmax.f32 %v9243_v57, 0.0 }
 0x8de   : > { %v9276_v33 = vmax.f32 %v9244_v63, 0.0 }
 0x8df   : > { %v9277_v46 = vmax.f32 %v9245_v29, 0.0  ;;  %v9107_v54 = vpop.f32.mrb[84].mxu1 }
 0x8e0   : > { %v9201_v11 = vmul.f32 %v14947_v59, %v9107_v54  ;;  %v9109_v20 = vpop.f32.mrb[85].mxu1  ;;  %v9298_v28 = vpack.c.bf16 %v9276_v33, %v9274_v35 }
 0x8e1   : > { %v9202_v19 = vmul.f32 %v14950_v47, %v9109_v20  ;;  %v9111_v16 = vpop.f32.mrb[86].mxu1  ;;  %v9299_v61 = vpack.c.bf16 %v9277_v46, %v9275_v43 }
 0x8e2   : > { %v9246_v21 = vadd.f32 %v14953_v17, %v9201_v11  ;;  %v9203_v7 = vmul.f32 %v14947_v59, %v9111_v16  ;;  %v9113_v9 = vpop.f32.mrb[87].mxu1 }
 0x8e3   : > { %v9247_v49 = vadd.f32 %v14956_v5, %v9202_v19  ;;  %v9204_v42 = vmul.f32 %v14950_v47, %v9113_v9  ;;  %9499 = vmatprep.mubr.bf16.mxu0 %v9299_v61 }
 0x8e4   : > { %v9248_v26 = vadd.f32 %v14953_v17, %v9203_v7  ;;  %9500 = vmatmul.mubr.bf16.gmra.mrb[176].mxu0 %v9298_v28  ;;  %v9278_v1 = vmax.f32 %v9246_v21, 0.0 }
 0x8e5   : > { %v9249_v30 = vadd.f32 %v14956_v5, %v9204_v42  ;;  %v9279_v38 = vmax.f32 %v9247_v49, 0.0 }
 0x8e6   : > { %v9280_v34 = vmax.f32 %v9248_v26, 0.0  ;;  %v15031_v26 = vld [vmem:[%s15125_s6] ss:$0 sm:$0xff] }
 0x8e7   : > { %v9281_v50 = vmax.f32 %v9249_v30, 0.0  ;;  %v9117_v39 = vpop.f32.mrb[88].mxu1 }
 0x8e8   : > { %v9205_v15 = vmul.f32 %v14947_v59, %v9117_v39  ;;  %v9119_v10 = vpop.f32.mrb[89].mxu1  ;;  %v9300_v12 = vpack.c.bf16 %v9280_v34, %v9278_v1 }
 0x8e9   : > { %v9206_v0 = vmul.f32 %v14950_v47, %v9119_v10  ;;  %v9121_v45 = vpop.f32.mrb[90].mxu1  ;;  %v9301_v25 = vpack.c.bf16 %v9281_v50, %v9279_v38  ;;  %v15034_v38 = vld [vmem:[%s333_s26] ss:$0 sm:$0xff] }
 0x8ea   : > { %v9250_v36 = vadd.f32 %v14953_v17, %v9205_v15  ;;  %v9207_v40 = vmul.f32 %v14947_v59, %v9121_v45  ;;  %v9123_v37 = vpop.f32.mrb[91].mxu1 }
 0x8eb   : > { %v9251_v58 = vadd.f32 %v14956_v5, %v9206_v0  ;;  %v9208_v23 = vmul.f32 %v14950_v47, %v9123_v37  ;;  %9507 = vmatprep.mubr.bf16.mxu0 %v9301_v25 }
 0x8ec   : > { %v9252_v14 = vadd.f32 %v14953_v17, %v9207_v40  ;;  %9508 = vmatmul.mubr.bf16.gmra.mrb[180].mxu0 %v9300_v12  ;;  %v9282_v3 = vmax.f32 %v9250_v36, 0.0 }
 0x8ed   : > { %v9253_v44 = vadd.f32 %v14956_v5, %v9208_v23  ;;  %v9283_v60 = vmax.f32 %v9251_v58, 0.0 }
 0x8ee   : > { %v9284_v18 = vmax.f32 %v9252_v14, 0.0 }
 0x8ef   : > { %v9285_v27 = vmax.f32 %v9253_v44, 0.0  ;;  %v9127_v57 = vpop.f32.mrb[92].mxu1 }
 0x8f0   : > { %v9209_v22 = vmul.f32 %v14947_v59, %v9127_v57  ;;  %v9129_v63 = vpop.f32.mrb[93].mxu1  ;;  %v9302_v29 = vpack.c.bf16 %v9284_v18, %v9282_v3 }
 0x8f1   : > { %v9210_v35 = vmul.f32 %v14950_v47, %v9129_v63  ;;  %v9131_v33 = vpop.f32.mrb[94].mxu1  ;;  %v9303_v43 = vpack.c.bf16 %v9285_v27, %v9283_v60 }
 0x8f2   : > { %v9254_v46 = vadd.f32 %v14953_v17, %v9209_v22  ;;  %v9211_v54 = vmul.f32 %v14947_v59, %v9131_v33  ;;  %v9133_v11 = vpop.f32.mrb[95].mxu1 }
 0x8f3   : > { %v9255_v20 = vadd.f32 %v14956_v5, %v9210_v35  ;;  %v9212_v28 = vmul.f32 %v14950_v47, %v9133_v11  ;;  %9515 = vmatprep.mubr.bf16.mxu0 %v9303_v43 }
 0x8f4   : > { %v9256_v19 = vadd.f32 %v14953_v17, %v9211_v54  ;;  %9516 = vmatmul.mubr.bf16.gmra.mrb[184].mxu0 %v9302_v29  ;;  %v9286_v61 = vmax.f32 %v9254_v46, 0.0 }
 0x8f5   : > { %v9257_v16 = vadd.f32 %v14956_v5, %v9212_v28  ;;  %v9287_v7 = vmax.f32 %v9255_v20, 0.0 }
 0x8f6   : > { %v9288_v21 = vmax.f32 %v9256_v19, 0.0 }
 0x8f7   : > { %v9289_v9 = vmax.f32 %v9257_v16, 0.0 }
 0x8f8   : > { %v9304_v49 = vpack.c.bf16 %v9288_v21, %v9286_v61 }
 0x8f9   : > { %v9305_v59 = vpack.c.bf16 %v9289_v9, %v9287_v7 }
 0x8fb   : > { %9523 = vmatprep.mubr.bf16.mxu0 %v9305_v59 }
 0x8fc   : > { %9524 = vmatmul.mubr.bf16.gmra.mrb[188].mxu0 %v9304_v49 }
 0x997   : > { %v11301_v47 = vpop.f32.mrb[160].mxu0 }
 0x998   : > { %v11302_v17 = vpop.f32.mrb[161].mxu0 }
 0x999   : > { %v11303_v5 = vadd.f32 %v11302_v17, %v11301_v47  ;;  %v11304_v42 = vpop.f32.mrb[162].mxu0 }
 0x99a   : > { %v11305_v30 = vpop.f32.mrb[163].mxu0 }
 0x99b   : > { %v9532_v1 = vadd.f32 %v11303_v5, %v14497_v62  ;;  %v11306_v34 = vadd.f32 %v11305_v30, %v11304_v42 }
 0x99d   : > { %v9555_v50 = vmul.f32 %v15031_v26, %v9532_v1  ;;  %v9533_v39 = vadd.f32 %v11306_v34, %v14501_v13 }
 0x99f   : > { %v9578_v15 = vadd.f32 %v15034_v38, %v9555_v50  ;;  %v9556_v10 = vmul.f32 %v15031_v26, %v9533_v39  ;;  %v11307_v12 = vpop.f32.mrb[164].mxu0 }
 0x9a0   : > { %v11308_v62 = vpop.f32.mrb[165].mxu0 }
 0x9a1   : > { %v9594_v0 = vmax.f32 %v9578_v15, 0.0  ;;  %v9579_v45 = vadd.f32 %v15034_v38, %v9556_v10  ;;  %v11309_v25 = vadd.f32 %v11308_v62, %v11307_v12  ;;  %v11310_v36 = vpop.f32.mrb[166].mxu0 }
 0x9a2   : > { %v11311_v40 = vpop.f32.mrb[167].mxu0 }
 0x9a3   : > { %9610 = vst [vmem:[%s15043_s15] sm:$0xff] %v9594_v0  ;;  %v9595_v13 = vmax.f32 %v9579_v45, 0.0  ;;  %v9534_v37 = vadd.f32 %v11309_v25, %v14512_v51  ;;  %v11312_v58 = vadd.f32 %v11311_v40, %v11310_v36 }
 0x9a5   : > { %9611 = vst [vmem:[%s15043_s15 + $0x8] sm:$0xff] %v9595_v13  ;;  %v9557_v23 = vmul.f32 %v15031_v26, %v9534_v37  ;;  %v9535_v14 = vadd.f32 %v11312_v58, %v14516_v52 }
 0x9a7   : > { %v9580_v44 = vadd.f32 %v15034_v38, %v9557_v23  ;;  %v9558_v3 = vmul.f32 %v15031_v26, %v9535_v14  ;;  %v11313_v18 = vpop.f32.mrb[168].mxu0 }
 0x9a8   : > { %v11314_v60 = vpop.f32.mrb[169].mxu0 }
 0x9a9   : > { %v9596_v27 = vmax.f32 %v9580_v44, 0.0  ;;  %v9581_v57 = vadd.f32 %v15034_v38, %v9558_v3  ;;  %v11315_v22 = vadd.f32 %v11314_v60, %v11313_v18  ;;  %v11316_v63 = vpop.f32.mrb[170].mxu0 }
 0x9aa   : > { %v11317_v29 = vpop.f32.mrb[171].mxu0 }
 0x9ab   : > { %9612 = vst [vmem:[%s15043_s15 + $0x10] sm:$0xff] %v9596_v27  ;;  %v9597_v51 = vmax.f32 %v9581_v57, 0.0  ;;  %v9536_v35 = vadd.f32 %v11315_v22, %v14527_v56  ;;  %v11318_v33 = vadd.f32 %v11317_v29, %v11316_v63 }
 0x9ad   : > { %9613 = vst [vmem:[%s15043_s15 + $0x18] sm:$0xff] %v9597_v51  ;;  %v9559_v52 = vmul.f32 %v15031_v26, %v9536_v35  ;;  %v9537_v43 = vadd.f32 %v11318_v33, %v14531_v48 }
 0x9af   : > { %v9582_v46 = vadd.f32 %v15034_v38, %v9559_v52  ;;  %v9560_v54 = vmul.f32 %v15031_v26, %v9537_v43  ;;  %v11319_v11 = vpop.f32.mrb[172].mxu0 }
 0x9b0   : > { %v11320_v20 = vpop.f32.mrb[173].mxu0 }
 0x9b1   : > { %v9598_v28 = vmax.f32 %v9582_v46, 0.0  ;;  %v9583_v19 = vadd.f32 %v15034_v38, %v9560_v54  ;;  %v11321_v16 = vadd.f32 %v11320_v20, %v11319_v11  ;;  %v11322_v61 = vpop.f32.mrb[174].mxu0 }
 0x9b2   : > { %v11323_v21 = vpop.f32.mrb[175].mxu0 }
 0x9b3   : > { %9614 = vst [vmem:[%s15043_s15 + $0x20] sm:$0xff] %v9598_v28  ;;  %v9599_v56 = vmax.f32 %v9583_v19, 0.0  ;;  %v9538_v7 = vadd.f32 %v11321_v16, %v14541_v6  ;;  %v11324_v9 = vadd.f32 %v11323_v21, %v11322_v61 }
 0x9b5   : > { %9615 = vst [vmem:[%s15043_s15 + $0x28] sm:$0xff] %v9599_v56  ;;  %v9561_v48 = vmul.f32 %v15031_v26, %v9538_v7  ;;  %v9539_v49 = vadd.f32 %v11324_v9, %v14545_v4 }
 0x9b7   : > { %v9584_v59 = vadd.f32 %v15034_v38, %v9561_v48  ;;  %v9562_v47 = vmul.f32 %v15031_v26, %v9539_v49  ;;  %v11325_v17 = vpop.f32.mrb[176].mxu0 }
 0x9b8   : > { %v11326_v5 = vpop.f32.mrb[177].mxu0 }
 0x9b9   : > { %v9600_v42 = vmax.f32 %v9584_v59, 0.0  ;;  %v9585_v30 = vadd.f32 %v15034_v38, %v9562_v47  ;;  %v11327_v1 = vadd.f32 %v11326_v5, %v11325_v17  ;;  %v11328_v34 = vpop.f32.mrb[178].mxu0 }
 0x9ba   : > { %v11329_v50 = vpop.f32.mrb[179].mxu0 }
 0x9bb   : > { %9616 = vst [vmem:[%s15043_s15 + $0x30] sm:$0xff] %v9600_v42  ;;  %v9601_v6 = vmax.f32 %v9585_v30, 0.0  ;;  %v9540_v39 = vadd.f32 %v11327_v1, %v14553_v32  ;;  %v11330_v15 = vadd.f32 %v11329_v50, %v11328_v34 }
 0x9bd   : > { %9617 = vst [vmem:[%s15043_s15 + $0x38] sm:$0xff] %v9601_v6  ;;  %v9563_v4 = vmul.f32 %v15031_v26, %v9540_v39  ;;  %v9541_v10 = vadd.f32 %v11330_v15, %v14557_v2 }
 0x9bf   : > { %v9586_v12 = vadd.f32 %v15034_v38, %v9563_v4  ;;  %v9564_v62 = vmul.f32 %v15031_v26, %v9541_v10  ;;  %v11331_v0 = vpop.f32.mrb[180].mxu0 }
 0x9c0   : > { %v11332_v45 = vpop.f32.mrb[181].mxu0 }
 0x9c1   : > { %v9602_v25 = vmax.f32 %v9586_v12, 0.0  ;;  %v9587_v36 = vadd.f32 %v15034_v38, %v9564_v62  ;;  %v11333_v40 = vadd.f32 %v11332_v45, %v11331_v0  ;;  %v11334_v13 = vpop.f32.mrb[182].mxu0 }
 0x9c2   : > { %v11335_v37 = vpop.f32.mrb[183].mxu0 }
 0x9c3   : > { %9618 = vst [vmem:[%s15043_s15 + $0x40] sm:$0xff] %v9602_v25  ;;  %v9603_v32 = vmax.f32 %v9587_v36, 0.0  ;;  %v9542_v58 = vadd.f32 %v11333_v40, %v14567_v41  ;;  %v11336_v23 = vadd.f32 %v11335_v37, %v11334_v13 }
 0x9c5   : > { %9619 = vst [vmem:[%s15043_s15 + $0x48] sm:$0xff] %v9603_v32  ;;  %v9565_v2 = vmul.f32 %v15031_v26, %v9542_v58  ;;  %v9543_v14 = vadd.f32 %v11336_v23, %v14571_v55 }
 0x9c7   : > { %v9588_v44 = vadd.f32 %v15034_v38, %v9565_v2  ;;  %v9566_v3 = vmul.f32 %v15031_v26, %v9543_v14  ;;  %v11337_v18 = vpop.f32.mrb[184].mxu0 }
 0x9c8   : > { %v11338_v60 = vpop.f32.mrb[185].mxu0 }
 0x9c9   : > { %v9604_v27 = vmax.f32 %v9588_v44, 0.0  ;;  %v9589_v57 = vadd.f32 %v15034_v38, %v9566_v3  ;;  %v11339_v22 = vadd.f32 %v11338_v60, %v11337_v18  ;;  %v11340_v63 = vpop.f32.mrb[186].mxu0 }
 0x9ca   : > { %v11341_v29 = vpop.f32.mrb[187].mxu0 }
 0x9cb   : > { %9620 = vst [vmem:[%s15043_s15 + $0x50] sm:$0xff] %v9604_v27  ;;  %v9605_v41 = vmax.f32 %v9589_v57, 0.0  ;;  %v9544_v51 = vadd.f32 %v11339_v22, %v14577_v31  ;;  %v11342_v35 = vadd.f32 %v11341_v29, %v11340_v63 }
 0x9cd   : > { %9621 = vst [vmem:[%s15043_s15 + $0x58] sm:$0xff] %v9605_v41  ;;  %v9567_v55 = vmul.f32 %v15031_v26, %v9544_v51  ;;  %v9545_v33 = vadd.f32 %v11342_v35, %v14581_v24 }
 0x9cf   : > { %v9590_v52 = vadd.f32 %v15034_v38, %v9567_v55  ;;  %v9568_v43 = vmul.f32 %v15031_v26, %v9545_v33  ;;  %v11343_v46 = vpop.f32.mrb[188].mxu0 }
 0x9d0   : > { %v11344_v54 = vpop.f32.mrb[189].mxu0 }
 0x9d1   : > { %v9606_v11 = vmax.f32 %v9590_v52, 0.0  ;;  %v9591_v20 = vadd.f32 %v15034_v38, %v9568_v43  ;;  %v11345_v28 = vadd.f32 %v11344_v54, %v11343_v46  ;;  %v11346_v31 = vpop.f32.mrb[190].mxu0 }
 0x9d2   : > { %v11347_v19 = vpop.f32.mrb[191].mxu0 }
 0x9d3   : > { %9622 = vst [vmem:[%s15043_s15 + $0x60] sm:$0xff] %v9606_v11  ;;  %v9607_v16 = vmax.f32 %v9591_v20, 0.0  ;;  %v9546_v61 = vadd.f32 %v11345_v28, %v14586_v8  ;;  %v11348_v21 = vadd.f32 %v11347_v19, %v11346_v31 }
 0x9d5   : > { %9623 = vst [vmem:[%s15043_s15 + $0x68] sm:$0xff] %v9607_v16  ;;  %v9569_v24 = vmul.f32 %v15031_v26, %v9546_v61  ;;  %v9547_v56 = vadd.f32 %v11348_v21, %v14590_v53 }
 0x9d7   : > { %v9592_v7 = vadd.f32 %v15034_v38, %v9569_v24  ;;  %v9570_v9 = vmul.f32 %v15031_v26, %v9547_v56 }
 0x9d9   : > { %v9608_v48 = vmax.f32 %v9592_v7, 0.0  ;;  %v9593_v49 = vadd.f32 %v15034_v38, %v9570_v9 }
 0x9db   : > { %9624 = vst [vmem:[%s15043_s15 + $0x70] sm:$0xff] %v9608_v48  ;;  %v9609_v59 = vmax.f32 %v9593_v49, 0.0 }
 0x9dd   : > { %9625 = vst [vmem:[%s15043_s15 + $0x78] sm:$0xff] %v9609_v59 }
 0x9de PF: > { %s18_s9 = sadd.s32 1, %s12309_s9   ;;  %s15193_s27 = smov %s12301_s29 }
 0x9df   : > { %p15_p7 = scmp.ge.s32.totalorder %s18_s9, 6   ;;  %s15194_s28 = smov %s12305_s30 }
 0x9e0   : > { %s15195_s29 = smov %s15198_s10  ;;  %s15196_s30 = smov %s15202_s11 }
 0x9e1   :  { %17 = sbr.rel (!%p15_p7) target bundleno = 3 (0x3), region = 127 }

</bundles_post_ra>
